<compile_context>
chip_gen: v5e
topology: v5e:2x2
jax: 0.10.0
libtpu: 0.0.40
codegen_flags: <defaults>
</compile_context>

<pallas_src>
import functools

import numpy as np
import jax
import jax.numpy as jnp
from jax.experimental import pallas as pl
from jax.experimental.pallas import tpu as pltpu

K_SIZE = 5
PAD = 1
STRIDE = 4
DIL = 1
EPS = 1e-5
F32 = jnp.float32

C1 = 6    # conv1 out channels
C2 = 16   # conv2 out channels


def _conv_out(s):
    return (s + 2 * PAD - DIL * (K_SIZE - 1) - 1) // STRIDE + 1


def _tconv_out(s):
    return (s - 1) * STRIDE - 2 * PAD + DIL * (K_SIZE - 1) + 1


# --------------------------------------------------------------------------
# Constant 0/1 selection patterns (numpy, built at trace time).
# Conventions: activations live as 2-D matrices A[(c, w), (n, h)]
#   rows  = channel-major (c, width-index)
#   lanes = batch-major   (n, height-index)
# --------------------------------------------------------------------------
def _gather_w_np(out_sz, in_sz):
    """g[kw, ow, w] = 1 iff w == ow*stride + kw*dil - pad and 0 <= w < in_sz."""
    g = np.zeros((K_SIZE, out_sz, in_sz), np.float32)
    for kw in range(K_SIZE):
        for ow in range(out_sz):
            w = ow * STRIDE + kw * DIL - PAD
            if 0 <= w < in_sz:
                g[kw, ow, w] = 1.0
    return g


def _gather_h_np(out_sz, in_sz, n):
    """s[kh, n*in+h, n*out+oh] = 1 iff h == oh*stride + kh*dil - pad."""
    s = np.zeros((K_SIZE, n * in_sz, n * out_sz), np.float32)
    for kh in range(K_SIZE):
        for b in range(n):
            for oh in range(out_sz):
                h = oh * STRIDE + kh * DIL - PAD
                if 0 <= h < in_sz:
                    s[kh, b * in_sz + h, b * out_sz + oh] = 1.0
    return s


def _scatter_w_np(in_sz, out_sz):
    """g[kw, ow, j] = 1 iff j == ow*stride + kw*dil - pad and 0 <= j < out_sz."""
    g = np.zeros((K_SIZE, in_sz, out_sz), np.float32)
    for kw in range(K_SIZE):
        for ow in range(in_sz):
            j = ow * STRIDE + kw * DIL - PAD
            if 0 <= j < out_sz:
                g[kw, ow, j] = 1.0
    return g


def _scatter_h_np(in_sz, out_sz, n):
    """t[kh, n*in+oh, n*out+i] = 1 iff i == oh*stride + kh*dil - pad."""
    t = np.zeros((K_SIZE, n * in_sz, n * out_sz), np.float32)
    for kh in range(K_SIZE):
        for b in range(n):
            for oh in range(in_sz):
                i = oh * STRIDE + kh * DIL - PAD
                if 0 <= i < out_sz:
                    t[kh, b * in_sz + oh, b * out_sz + i] = 1.0
    return t


# --------------------------------------------------------------------------
# The single fused Pallas kernel
# --------------------------------------------------------------------------
def _fused_forward_kernel(x0_ref, b1m_ref, s1m_ref, c1b_ref,
                          b2m_ref, s2m_ref, c2b_ref,
                          csum_ref, cexp_ref, g1_ref, be1_ref,
                          w1s_ref, sel1_ref, l1b_ref,
                          w2s_ref, l2b_ref, cc_ref, g2_ref, be2_ref,
                          d1m_ref, t1m_ref, t1b_ref,
                          d2m_ref, t2m_ref, t2b_ref,
                          out_ref, *, taps, noh, eps, inv_bn):
    dot = lambda a, b: jnp.dot(a, b, preferred_element_type=jnp.float32)

    x0 = x0_ref[...]                                      # (W0, N*H0)

    # ---- Conv2d(1, 6) + ReLU  ->  h1[(co,ow), (n,oh)] ----
    h1 = dot(b1m_ref[0], dot(x0, s1m_ref[0]))
    for i in range(1, taps):
        h1 = h1 + dot(b1m_ref[i], dot(x0, s1m_ref[i]))
    h1 = jnp.maximum(h1 + c1b_ref[...], 0.0)

    # ---- Conv2d(6, 16) + bias  ->  y2[(co,ow), (n,oh)] ----
    y2 = dot(b2m_ref[0], dot(h1, s2m_ref[0]))
    for i in range(1, taps):
        y2 = y2 + dot(b2m_ref[i], dot(h1, s2m_ref[i]))
    y2 = y2 + c2b_ref[...]

    # ---- BatchNorm2d(16) (batch stats, one pass) + ReLU ----
    csum = csum_ref[...]
    cexp = cexp_ref[...]
    m1 = dot(csum, jnp.sum(y2, axis=1, keepdims=True)) * inv_bn        # E[y]
    m2 = dot(csum, jnp.sum(y2 * y2, axis=1, keepdims=True)) * inv_bn   # E[y^2]
    inv_std = jax.lax.rsqrt(m2 - m1 * m1 + eps)
    scale = g1_ref[...] * inv_std
    shift = be1_ref[...] - m1 * scale
    h2 = jnp.maximum(y2 * dot(cexp, scale) + dot(cexp, shift), 0.0)

    # ---- Flatten + Linear(16*s2*s2 -> E) + ReLU  ->  enc (E, N) ----
    enc = dot(dot(w1s_ref[0], h2), sel1_ref[0])
    for i in range(1, noh):
        enc = enc + dot(dot(w1s_ref[i], h2), sel1_ref[i])
    enc = jnp.maximum(enc + l1b_ref[...], 0.0)

    # ---- Linear(E -> 16*s2*s2) + ReLU + Unflatten  ->  x3[(ci,ow), (n,oh)] ----
    x3 = dot(jnp.maximum(dot(w2s_ref[0], enc) + l2b_ref[0], 0.0), cc_ref[0])
    for i in range(1, noh):
        x3 = x3 + dot(jnp.maximum(dot(w2s_ref[i], enc) + l2b_ref[i], 0.0),
                      cc_ref[i])

    # ---- BatchNorm2d(16) (batch stats, one pass) ----
    n1 = dot(csum, jnp.sum(x3, axis=1, keepdims=True)) * inv_bn
    n2 = dot(csum, jnp.sum(x3 * x3, axis=1, keepdims=True)) * inv_bn
    inv_std2 = jax.lax.rsqrt(n2 - n1 * n1 + eps)
    scale2 = g2_ref[...] * inv_std2
    shift2 = be2_ref[...] - n1 * scale2
    x3 = x3 * dot(cexp, scale2) + dot(cexp, shift2)

    # ---- ConvTranspose2d(16, 6) + ReLU  ->  y3[(co,j), (n,i)] ----
    y3 = dot(dot(d1m_ref[0], x3), t1m_ref[0])
    for i in range(1, taps):
        y3 = y3 + dot(dot(d1m_ref[i], x3), t1m_ref[i])
    y3 = jnp.maximum(y3 + t1b_ref[...], 0.0)

    # ---- ConvTranspose2d(6, 1) + ReLU  ->  (W_out, N*H_out) ----
    y4 = dot(dot(d2m_ref[0], y3), t2m_ref[0])
    for i in range(1, taps):
        y4 = y4 + dot(dot(d2m_ref[i], y3), t2m_ref[i])
    out_ref[...] = jnp.maximum(y4 + t2b_ref[...], 0.0)


# --------------------------------------------------------------------------
# Weight folding (params only; hoistable / cacheable for repeated inference)
# --------------------------------------------------------------------------
def _fold_params(params, n, s0):
    s1 = _conv_out(s0)     # 19
    s2 = _conv_out(s1)     # 5
    s3 = _tconv_out(s2)    # 19
    s4 = _tconv_out(s3)    # 75
    enc = params["lin1_w"].shape[0]

    asf = lambda a: jnp.asarray(a, F32)

    # encoder Conv2d(1 -> 6)
    b1m = jnp.einsum("oikl,lpw->kopiw", asf(params["conv1_w"]),
                     _gather_w_np(s1, s0)).reshape(K_SIZE, C1 * s1, 1 * s0)
    s1m = jnp.asarray(_gather_h_np(s1, s0, n))
    c1b = jnp.repeat(asf(params["conv1_b"]), s1)[:, None]

    # encoder Conv2d(6 -> 16)
    b2m = jnp.einsum("oikl,lpw->kopiw", asf(params["conv2_w"]),
                     _gather_w_np(s2, s1)).reshape(K_SIZE, C2 * s2, C1 * s1)
    s2m = jnp.asarray(_gather_h_np(s2, s1, n))
    c2b = jnp.repeat(asf(params["conv2_b"]), s2)[:, None]

    # per-channel sum / expand indicators for both BatchNorms (rows = (c, w))
    csum = jnp.asarray(np.kron(np.eye(C2, dtype=np.float32),
                               np.ones((1, s2), np.float32)))
    cexp = csum.T
    g1 = asf(params["bn1_g"])[:, None]
    be1 = asf(params["bn1_b"])[:, None]
    g2 = asf(params["bn2_g"])[:, None]
    be2 = asf(params["bn2_b"])[:, None]

    # encoder Linear(16*s2*s2 -> enc), split per flatten-row oh
    w1s = asf(params["lin1_w"]).reshape(enc, C2, s2, s2).transpose(
        2, 0, 1, 3).reshape(s2, enc, C2 * s2)
    sel1 = np.zeros((s2, n * s2, n), np.float32)
    for oh in range(s2):
        for b in range(n):
            sel1[oh, b * s2 + oh, b] = 1.0
    sel1 = jnp.asarray(sel1)
    l1b = asf(params["lin1_b"])[:, None]

    # decoder Linear(enc -> 16*s2*s2), rows regrouped to (ci, ow) per oh
    w2s = asf(params["lin2_w"]).reshape(C2, s2, s2, enc).transpose(
        1, 0, 2, 3).reshape(s2, C2 * s2, enc)
    l2b = asf(params["lin2_b"]).reshape(C2, s2, s2).transpose(
        1, 0, 2).reshape(s2, C2 * s2, 1)
    cc = np.zeros((s2, n, n * s2), np.float32)
    for oh in range(s2):
        for b in range(n):
            cc[oh, b, b * s2 + oh] = 1.0
    cc = jnp.asarray(cc)

    # decoder ConvTranspose2d(16 -> 6)   (scatter + output crop folded in)
    d1m = jnp.einsum("iokl,lpj->kojip", asf(params["tconv1_w"]),
                     _scatter_w_np(s2, s3)).reshape(K_SIZE, C1 * s3, C2 * s2)
    t1m = jnp.asarray(_scatter_h_np(s2, s3, n))
    t1b = jnp.repeat(asf(params["tconv1_b"]), s3)[:, None]

    # decoder ConvTranspose2d(6 -> 1)
    d2m = jnp.einsum("iokl,lpj->kojip", asf(params["tconv2_w"]),
                     _scatter_w_np(s3, s4)).reshape(K_SIZE, 1 * s4, C1 * s3)
    t2m = jnp.asarray(_scatter_h_np(s3, s4, n))
    t2b = jnp.repeat(asf(params["tconv2_b"]), s4)[:, None]

    ops = [b1m, s1m, c1b, b2m, s2m, c2b, csum, cexp, g1, be1,
           w1s, sel1, l1b, w2s, l2b, cc, g2, be2,
           d1m, t1m, t1b, d2m, t2m, t2b]
    meta = dict(s1=s1, s2=s2, s3=s3, s4=s4)
    return ops, meta


def _zero_index_map(i, *, nd):
    return (0,) * nd


# --------------------------------------------------------------------------
# Forward
# --------------------------------------------------------------------------
def autoencoder_forward(params, x):
    n, c, hh, ww = x.shape
    assert c == 1 and hh == ww

    ops, meta = _fold_params(params, n, hh)
    s2, s4 = meta["s2"], meta["s4"]

    # input layout: (W, N*H)   with rows = w, lanes = (n, h)
    x0 = x.reshape(n, hh, ww).transpose(2, 0, 1).reshape(ww, n * hh).astype(F32)

    operands = [x0] + ops
    in_specs = [pl.BlockSpec(o.shape,
                             functools.partial(_zero_index_map, nd=o.ndim))
                for o in operands]

    out = pl.pallas_call(
        functools.partial(_fused_forward_kernel,
                          taps=K_SIZE, noh=s2, eps=EPS,
                          inv_bn=1.0 / float(n * s2 * s2)),
        out_shape=jax.ShapeDtypeStruct((s4, n * s4), F32),
        grid=(1,),
        in_specs=in_specs,
        out_specs=pl.BlockSpec((s4, n * s4), lambda i: (0, 0)),
        compiler_params=pltpu.CompilerParams(
            dimension_semantics=("arbitrary",)),
    )(*operands)

    # (W_out, N*H_out) -> (N, 1, H_out, W_out)
    return out.reshape(s4, n, s4).transpose(1, 2, 0)[:, None, :, :]


# --------------------------------------------------------------------------
# Parameters (torch-style init, same as the previously accepted version)
# --------------------------------------------------------------------------
def init_params(key, encoding_size, out_spatial):
    feat = C2 * out_spatial * out_spatial
    ks = jax.random.split(key, 12)

    def u(k, shape, fan_in):
        bound = 1.0 / (fan_in ** 0.5)
        return jax.random.uniform(k, shape, F32, -bound, bound)

    return {
        "conv1_w": u(ks[0], (C1, 1, K_SIZE, K_SIZE), 1 * K_SIZE * K_SIZE),
        "conv1_b": u(ks[1], (C1,), 1 * K_SIZE * K_SIZE),
        "conv2_w": u(ks[2], (C2, C1, K_SIZE, K_SIZE), C1 * K_SIZE * K_SIZE),
        "conv2_b": u(ks[3], (C2,), C1 * K_SIZE * K_SIZE),
        "bn1_g": jnp.ones((C2,), F32),
        "bn1_b": jnp.zeros((C2,), F32),
        "lin1_w": u(ks[4], (encoding_size, feat), feat),      # torch (out, in)
        "lin1_b": u(ks[5], (encoding_size,), feat),
        "lin2_w": u(ks[6], (feat, encoding_size), encoding_size),
        "lin2_b": u(ks[7], (feat,), encoding_size),
        "bn2_g": jnp.ones((C2,), F32),
        "bn2_b": jnp.zeros((C2,), F32),
        "tconv1_w": u(ks[8], (C2, C1, K_SIZE, K_SIZE), C1 * K_SIZE * K_SIZE),
        "tconv1_b": u(ks[9], (C1,), C1 * K_SIZE * K_SIZE),
        "tconv2_w": u(ks[10], (C1, 1, K_SIZE, K_SIZE), 1 * K_SIZE * K_SIZE),
        "tconv2_b": u(ks[11], (1,), 1 * K_SIZE * K_SIZE),
    }


if __name__ == "__main__":
    batch, spatial, encoding_size = 2, 76, 32
    # true encoder output spatial size for a 76x76 input (two k5/p1/s4 convs)
    s1 = _conv_out(spatial)   # 19
    s2 = _conv_out(s1)        # 5
    s_out = _tconv_out(_tconv_out(s2))  # 75

    key = jax.random.PRNGKey(0)
    kp, kx = jax.random.split(key)
    params = init_params(kp, encoding_size, s2)
    x = jax.random.normal(kx, (batch, 1, spatial, spatial), F32)

    fwd = jax.jit(autoencoder_forward)
    y = fwd(params, x)
    jax.block_until_ready(y)

    assert y.shape == (batch, 1, s_out, s_out), y.shape
    assert y.dtype == jnp.float32
    assert bool(jnp.all(jnp.isfinite(y)))
    print("KERNEL_OK")
</pallas_src>

<mosaic_0001>
module attributes {stable_mosaic.version = 11 : i64} {
  func.func @_fused_forward_kernel(%arg0: i32, %arg1: memref<76x152xf32, #tpu.memory_space<vmem>>, %arg2: memref<5x114x76xf32, #tpu.memory_space<vmem>>, %arg3: memref<5x152x38xf32, #tpu.memory_space<vmem>>, %arg4: memref<114x1xf32, #tpu.memory_space<vmem>>, %arg5: memref<5x80x114xf32, #tpu.memory_space<vmem>>, %arg6: memref<5x38x10xf32, #tpu.memory_space<vmem>>, %arg7: memref<80x1xf32, #tpu.memory_space<vmem>>, %arg8: memref<16x80xf32, #tpu.memory_space<vmem>>, %arg9: memref<80x16xf32, #tpu.memory_space<vmem>>, %arg10: memref<16x1xf32, #tpu.memory_space<vmem>>, %arg11: memref<16x1xf32, #tpu.memory_space<vmem>>, %arg12: memref<5x32x80xf32, #tpu.memory_space<vmem>>, %arg13: memref<5x10x2xf32, #tpu.memory_space<vmem>>, %arg14: memref<32x1xf32, #tpu.memory_space<vmem>>, %arg15: memref<5x80x32xf32, #tpu.memory_space<vmem>>, %arg16: memref<5x80x1xf32, #tpu.memory_space<vmem>>, %arg17: memref<5x2x10xf32, #tpu.memory_space<vmem>>, %arg18: memref<16x1xf32, #tpu.memory_space<vmem>>, %arg19: memref<16x1xf32, #tpu.memory_space<vmem>>, %arg20: memref<5x114x80xf32, #tpu.memory_space<vmem>>, %arg21: memref<5x10x38xf32, #tpu.memory_space<vmem>>, %arg22: memref<114x1xf32, #tpu.memory_space<vmem>>, %arg23: memref<5x75x114xf32, #tpu.memory_space<vmem>>, %arg24: memref<5x38x150xf32, #tpu.memory_space<vmem>>, %arg25: memref<75x1xf32, #tpu.memory_space<vmem>>, %arg26: memref<75x150xf32, #tpu.memory_space<vmem>>) attributes {dimension_semantics = [#tpu.dimension_semantics<arbitrary>], iteration_bounds = array<i64: 1>, scalar_prefetch = 0 : i64, scratch_operands = 0 : i64, tpu.core_type = #tpu.core_type<tc>, window_params = [{pipeline_mode = #tpu.pipeline_mode<synchronous>, transform_indices = @transform_0, window_bounds = array<i64: 76, 152>}, {pipeline_mode = #tpu.pipeline_mode<synchronous>, transform_indices = @transform_1, window_bounds = array<i64: 5, 114, 76>}, {pipeline_mode = #tpu.pipeline_mode<synchronous>, transform_indices = @transform_2, window_bounds = array<i64: 5, 152, 38>}, {pipeline_mode = #tpu.pipeline_mode<synchronous>, transform_indices = @transform_3, window_bounds = array<i64: 114, 1>}, {pipeline_mode = #tpu.pipeline_mode<synchronous>, transform_indices = @transform_4, window_bounds = array<i64: 5, 80, 114>}, {pipeline_mode = #tpu.pipeline_mode<synchronous>, transform_indices = @transform_5, window_bounds = array<i64: 5, 38, 10>}, {pipeline_mode = #tpu.pipeline_mode<synchronous>, transform_indices = @transform_6, window_bounds = array<i64: 80, 1>}, {pipeline_mode = #tpu.pipeline_mode<synchronous>, transform_indices = @transform_7, window_bounds = array<i64: 16, 80>}, {pipeline_mode = #tpu.pipeline_mode<synchronous>, transform_indices = @transform_8, window_bounds = array<i64: 80, 16>}, {pipeline_mode = #tpu.pipeline_mode<synchronous>, transform_indices = @transform_9, window_bounds = array<i64: 16, 1>}, {pipeline_mode = #tpu.pipeline_mode<synchronous>, transform_indices = @transform_10, window_bounds = array<i64: 16, 1>}, {pipeline_mode = #tpu.pipeline_mode<synchronous>, transform_indices = @transform_11, window_bounds = array<i64: 5, 32, 80>}, {pipeline_mode = #tpu.pipeline_mode<synchronous>, transform_indices = @transform_12, window_bounds = array<i64: 5, 10, 2>}, {pipeline_mode = #tpu.pipeline_mode<synchronous>, transform_indices = @transform_13, window_bounds = array<i64: 32, 1>}, {pipeline_mode = #tpu.pipeline_mode<synchronous>, transform_indices = @transform_14, window_bounds = array<i64: 5, 80, 32>}, {pipeline_mode = #tpu.pipeline_mode<synchronous>, transform_indices = @transform_15, window_bounds = array<i64: 5, 80, 1>}, {pipeline_mode = #tpu.pipeline_mode<synchronous>, transform_indices = @transform_16, window_bounds = array<i64: 5, 2, 10>}, {pipeline_mode = #tpu.pipeline_mode<synchronous>, transform_indices = @transform_17, window_bounds = array<i64: 16, 1>}, {pipeline_mode = #tpu.pipeline_mode<synchronous>, transform_indices = @transform_18, window_bounds = array<i64: 16, 1>}, {pipeline_mode = #tpu.pipeline_mode<synchronous>, transform_indices = @transform_19, window_bounds = array<i64: 5, 114, 80>}, {pipeline_mode = #tpu.pipeline_mode<synchronous>, transform_indices = @transform_20, window_bounds = array<i64: 5, 10, 38>}, {pipeline_mode = #tpu.pipeline_mode<synchronous>, transform_indices = @transform_21, window_bounds = array<i64: 114, 1>}, {pipeline_mode = #tpu.pipeline_mode<synchronous>, transform_indices = @transform_22, window_bounds = array<i64: 5, 75, 114>}, {pipeline_mode = #tpu.pipeline_mode<synchronous>, transform_indices = @transform_23, window_bounds = array<i64: 5, 38, 150>}, {pipeline_mode = #tpu.pipeline_mode<synchronous>, transform_indices = @transform_24, window_bounds = array<i64: 75, 1>}, {pipeline_mode = #tpu.pipeline_mode<synchronous>, transform_indices = @transform_25, window_bounds = array<i64: 75, 150>}]} {
    %c0 = arith.constant 0 : index
    %c0_0 = arith.constant 0 : index
    %0 = vector.load %arg1[%c0, %c0_0] : memref<76x152xf32, #tpu.memory_space<vmem>>, vector<76x152xf32>
    %c0_1 = arith.constant 0 : index
    %c0_2 = arith.constant 0 : index
    %c0_3 = arith.constant 0 : index
    %1 = vector.load %arg2[%c0_1, %c0_2, %c0_3] : memref<5x114x76xf32, #tpu.memory_space<vmem>>, vector<1x114x76xf32>
    %2 = vector.shape_cast %1 : vector<1x114x76xf32> to vector<114x76xf32>
    %c0_4 = arith.constant 0 : index
    %c0_5 = arith.constant 0 : index
    %c0_6 = arith.constant 0 : index
    %3 = vector.load %arg3[%c0_4, %c0_5, %c0_6] : memref<5x152x38xf32, #tpu.memory_space<vmem>>, vector<1x152x38xf32>
    %4 = vector.shape_cast %3 : vector<1x152x38xf32> to vector<152x38xf32>
    %cst = arith.constant dense<0.000000e+00> : vector<76x38xf32>
    %5 = tpu.matmul %0, %4, %cst {dimension_numbers = #tpu.dot_dimension_numbers<[1], [0], [0], [1], [0, 0, 1, 1], [], []>} : vector<76x152xf32>, vector<152x38xf32>, vector<76x38xf32> -> vector<76x38xf32>
    %cst_7 = arith.constant dense<0.000000e+00> : vector<114x38xf32>
    %6 = tpu.matmul %2, %5, %cst_7 {dimension_numbers = #tpu.dot_dimension_numbers<[1], [0], [0], [1], [0, 0, 1, 1], [], []>} : vector<114x76xf32>, vector<76x38xf32>, vector<114x38xf32> -> vector<114x38xf32>
    %c1 = arith.constant 1 : index
    %c0_8 = arith.constant 0 : index
    %c0_9 = arith.constant 0 : index
    %7 = vector.load %arg2[%c1, %c0_8, %c0_9] : memref<5x114x76xf32, #tpu.memory_space<vmem>>, vector<1x114x76xf32>
    %8 = vector.shape_cast %7 : vector<1x114x76xf32> to vector<114x76xf32>
    %c1_10 = arith.constant 1 : index
    %c0_11 = arith.constant 0 : index
    %c0_12 = arith.constant 0 : index
    %9 = vector.load %arg3[%c1_10, %c0_11, %c0_12] : memref<5x152x38xf32, #tpu.memory_space<vmem>>, vector<1x152x38xf32>
    %10 = vector.shape_cast %9 : vector<1x152x38xf32> to vector<152x38xf32>
    %cst_13 = arith.constant dense<0.000000e+00> : vector<76x38xf32>
    %11 = tpu.matmul %0, %10, %cst_13 {dimension_numbers = #tpu.dot_dimension_numbers<[1], [0], [0], [1], [0, 0, 1, 1], [], []>} : vector<76x152xf32>, vector<152x38xf32>, vector<76x38xf32> -> vector<76x38xf32>
    %cst_14 = arith.constant dense<0.000000e+00> : vector<114x38xf32>
    %12 = tpu.matmul %8, %11, %cst_14 {dimension_numbers = #tpu.dot_dimension_numbers<[1], [0], [0], [1], [0, 0, 1, 1], [], []>} : vector<114x76xf32>, vector<76x38xf32>, vector<114x38xf32> -> vector<114x38xf32>
    %13 = arith.addf %6, %12 : vector<114x38xf32>
    %c2 = arith.constant 2 : index
    %c0_15 = arith.constant 0 : index
    %c0_16 = arith.constant 0 : index
    %14 = vector.load %arg2[%c2, %c0_15, %c0_16] : memref<5x114x76xf32, #tpu.memory_space<vmem>>, vector<1x114x76xf32>
    %15 = vector.shape_cast %14 : vector<1x114x76xf32> to vector<114x76xf32>
    %c2_17 = arith.constant 2 : index
    %c0_18 = arith.constant 0 : index
    %c0_19 = arith.constant 0 : index
    %16 = vector.load %arg3[%c2_17, %c0_18, %c0_19] : memref<5x152x38xf32, #tpu.memory_space<vmem>>, vector<1x152x38xf32>
    %17 = vector.shape_cast %16 : vector<1x152x38xf32> to vector<152x38xf32>
    %cst_20 = arith.constant dense<0.000000e+00> : vector<76x38xf32>
    %18 = tpu.matmul %0, %17, %cst_20 {dimension_numbers = #tpu.dot_dimension_numbers<[1], [0], [0], [1], [0, 0, 1, 1], [], []>} : vector<76x152xf32>, vector<152x38xf32>, vector<76x38xf32> -> vector<76x38xf32>
    %cst_21 = arith.constant dense<0.000000e+00> : vector<114x38xf32>
    %19 = tpu.matmul %15, %18, %cst_21 {dimension_numbers = #tpu.dot_dimension_numbers<[1], [0], [0], [1], [0, 0, 1, 1], [], []>} : vector<114x76xf32>, vector<76x38xf32>, vector<114x38xf32> -> vector<114x38xf32>
    %20 = arith.addf %13, %19 : vector<114x38xf32>
    %c3 = arith.constant 3 : index
    %c0_22 = arith.constant 0 : index
    %c0_23 = arith.constant 0 : index
    %21 = vector.load %arg2[%c3, %c0_22, %c0_23] : memref<5x114x76xf32, #tpu.memory_space<vmem>>, vector<1x114x76xf32>
    %22 = vector.shape_cast %21 : vector<1x114x76xf32> to vector<114x76xf32>
    %c3_24 = arith.constant 3 : index
    %c0_25 = arith.constant 0 : index
    %c0_26 = arith.constant 0 : index
    %23 = vector.load %arg3[%c3_24, %c0_25, %c0_26] : memref<5x152x38xf32, #tpu.memory_space<vmem>>, vector<1x152x38xf32>
    %24 = vector.shape_cast %23 : vector<1x152x38xf32> to vector<152x38xf32>
    %cst_27 = arith.constant dense<0.000000e+00> : vector<76x38xf32>
    %25 = tpu.matmul %0, %24, %cst_27 {dimension_numbers = #tpu.dot_dimension_numbers<[1], [0], [0], [1], [0, 0, 1, 1], [], []>} : vector<76x152xf32>, vector<152x38xf32>, vector<76x38xf32> -> vector<76x38xf32>
    %cst_28 = arith.constant dense<0.000000e+00> : vector<114x38xf32>
    %26 = tpu.matmul %22, %25, %cst_28 {dimension_numbers = #tpu.dot_dimension_numbers<[1], [0], [0], [1], [0, 0, 1, 1], [], []>} : vector<114x76xf32>, vector<76x38xf32>, vector<114x38xf32> -> vector<114x38xf32>
    %27 = arith.addf %20, %26 : vector<114x38xf32>
    %c4 = arith.constant 4 : index
    %c0_29 = arith.constant 0 : index
    %c0_30 = arith.constant 0 : index
    %28 = vector.load %arg2[%c4, %c0_29, %c0_30] : memref<5x114x76xf32, #tpu.memory_space<vmem>>, vector<1x114x76xf32>
    %29 = vector.shape_cast %28 : vector<1x114x76xf32> to vector<114x76xf32>
    %c4_31 = arith.constant 4 : index
    %c0_32 = arith.constant 0 : index
    %c0_33 = arith.constant 0 : index
    %30 = vector.load %arg3[%c4_31, %c0_32, %c0_33] : memref<5x152x38xf32, #tpu.memory_space<vmem>>, vector<1x152x38xf32>
    %31 = vector.shape_cast %30 : vector<1x152x38xf32> to vector<152x38xf32>
    %cst_34 = arith.constant dense<0.000000e+00> : vector<76x38xf32>
    %32 = tpu.matmul %0, %31, %cst_34 {dimension_numbers = #tpu.dot_dimension_numbers<[1], [0], [0], [1], [0, 0, 1, 1], [], []>} : vector<76x152xf32>, vector<152x38xf32>, vector<76x38xf32> -> vector<76x38xf32>
    %cst_35 = arith.constant dense<0.000000e+00> : vector<114x38xf32>
    %33 = tpu.matmul %29, %32, %cst_35 {dimension_numbers = #tpu.dot_dimension_numbers<[1], [0], [0], [1], [0, 0, 1, 1], [], []>} : vector<114x76xf32>, vector<76x38xf32>, vector<114x38xf32> -> vector<114x38xf32>
    %34 = arith.addf %27, %33 : vector<114x38xf32>
    %c0_36 = arith.constant 0 : index
    %c0_37 = arith.constant 0 : index
    %35 = vector.load %arg4[%c0_36, %c0_37] : memref<114x1xf32, #tpu.memory_space<vmem>>, vector<114x1xf32>
    %36 = vector.broadcast %35 : vector<114x1xf32> to vector<114x38xf32>
    %37 = arith.addf %34, %36 : vector<114x38xf32>
    %cst_38 = arith.constant 0.000000e+00 : f32
    %38 = vector.broadcast %cst_38 : f32 to vector<114x38xf32>
    %39 = arith.maximumf %37, %38 : vector<114x38xf32>
    %c0_39 = arith.constant 0 : index
    %c0_40 = arith.constant 0 : index
    %c0_41 = arith.constant 0 : index
    %40 = vector.load %arg5[%c0_39, %c0_40, %c0_41] : memref<5x80x114xf32, #tpu.memory_space<vmem>>, vector<1x80x114xf32>
    %41 = vector.shape_cast %40 : vector<1x80x114xf32> to vector<80x114xf32>
    %c0_42 = arith.constant 0 : index
    %c0_43 = arith.constant 0 : index
    %c0_44 = arith.constant 0 : index
    %42 = vector.load %arg6[%c0_42, %c0_43, %c0_44] : memref<5x38x10xf32, #tpu.memory_space<vmem>>, vector<1x38x10xf32>
    %43 = vector.shape_cast %42 : vector<1x38x10xf32> to vector<38x10xf32>
    %cst_45 = arith.constant dense<0.000000e+00> : vector<114x10xf32>
    %44 = tpu.matmul %39, %43, %cst_45 {dimension_numbers = #tpu.dot_dimension_numbers<[1], [0], [0], [1], [0, 0, 1, 1], [], []>} : vector<114x38xf32>, vector<38x10xf32>, vector<114x10xf32> -> vector<114x10xf32>
    %cst_46 = arith.constant dense<0.000000e+00> : vector<80x10xf32>
    %45 = tpu.matmul %41, %44, %cst_46 {dimension_numbers = #tpu.dot_dimension_numbers<[1], [0], [0], [1], [0, 0, 1, 1], [], []>} : vector<80x114xf32>, vector<114x10xf32>, vector<80x10xf32> -> vector<80x10xf32>
    %c1_47 = arith.constant 1 : index
    %c0_48 = arith.constant 0 : index
    %c0_49 = arith.constant 0 : index
    %46 = vector.load %arg5[%c1_47, %c0_48, %c0_49] : memref<5x80x114xf32, #tpu.memory_space<vmem>>, vector<1x80x114xf32>
    %47 = vector.shape_cast %46 : vector<1x80x114xf32> to vector<80x114xf32>
    %c1_50 = arith.constant 1 : index
    %c0_51 = arith.constant 0 : index
    %c0_52 = arith.constant 0 : index
    %48 = vector.load %arg6[%c1_50, %c0_51, %c0_52] : memref<5x38x10xf32, #tpu.memory_space<vmem>>, vector<1x38x10xf32>
    %49 = vector.shape_cast %48 : vector<1x38x10xf32> to vector<38x10xf32>
    %cst_53 = arith.constant dense<0.000000e+00> : vector<114x10xf32>
    %50 = tpu.matmul %39, %49, %cst_53 {dimension_numbers = #tpu.dot_dimension_numbers<[1], [0], [0], [1], [0, 0, 1, 1], [], []>} : vector<114x38xf32>, vector<38x10xf32>, vector<114x10xf32> -> vector<114x10xf32>
    %cst_54 = arith.constant dense<0.000000e+00> : vector<80x10xf32>
    %51 = tpu.matmul %47, %50, %cst_54 {dimension_numbers = #tpu.dot_dimension_numbers<[1], [0], [0], [1], [0, 0, 1, 1], [], []>} : vector<80x114xf32>, vector<114x10xf32>, vector<80x10xf32> -> vector<80x10xf32>
    %52 = arith.addf %45, %51 : vector<80x10xf32>
    %c2_55 = arith.constant 2 : index
    %c0_56 = arith.constant 0 : index
    %c0_57 = arith.constant 0 : index
    %53 = vector.load %arg5[%c2_55, %c0_56, %c0_57] : memref<5x80x114xf32, #tpu.memory_space<vmem>>, vector<1x80x114xf32>
    %54 = vector.shape_cast %53 : vector<1x80x114xf32> to vector<80x114xf32>
    %c2_58 = arith.constant 2 : index
    %c0_59 = arith.constant 0 : index
    %c0_60 = arith.constant 0 : index
    %55 = vector.load %arg6[%c2_58, %c0_59, %c0_60] : memref<5x38x10xf32, #tpu.memory_space<vmem>>, vector<1x38x10xf32>
    %56 = vector.shape_cast %55 : vector<1x38x10xf32> to vector<38x10xf32>
    %cst_61 = arith.constant dense<0.000000e+00> : vector<114x10xf32>
    %57 = tpu.matmul %39, %56, %cst_61 {dimension_numbers = #tpu.dot_dimension_numbers<[1], [0], [0], [1], [0, 0, 1, 1], [], []>} : vector<114x38xf32>, vector<38x10xf32>, vector<114x10xf32> -> vector<114x10xf32>
    %cst_62 = arith.constant dense<0.000000e+00> : vector<80x10xf32>
    %58 = tpu.matmul %54, %57, %cst_62 {dimension_numbers = #tpu.dot_dimension_numbers<[1], [0], [0], [1], [0, 0, 1, 1], [], []>} : vector<80x114xf32>, vector<114x10xf32>, vector<80x10xf32> -> vector<80x10xf32>
    %59 = arith.addf %52, %58 : vector<80x10xf32>
    %c3_63 = arith.constant 3 : index
    %c0_64 = arith.constant 0 : index
    %c0_65 = arith.constant 0 : index
    %60 = vector.load %arg5[%c3_63, %c0_64, %c0_65] : memref<5x80x114xf32, #tpu.memory_space<vmem>>, vector<1x80x114xf32>
    %61 = vector.shape_cast %60 : vector<1x80x114xf32> to vector<80x114xf32>
    %c3_66 = arith.constant 3 : index
    %c0_67 = arith.constant 0 : index
    %c0_68 = arith.constant 0 : index
    %62 = vector.load %arg6[%c3_66, %c0_67, %c0_68] : memref<5x38x10xf32, #tpu.memory_space<vmem>>, vector<1x38x10xf32>
    %63 = vector.shape_cast %62 : vector<1x38x10xf32> to vector<38x10xf32>
    %cst_69 = arith.constant dense<0.000000e+00> : vector<114x10xf32>
    %64 = tpu.matmul %39, %63, %cst_69 {dimension_numbers = #tpu.dot_dimension_numbers<[1], [0], [0], [1], [0, 0, 1, 1], [], []>} : vector<114x38xf32>, vector<38x10xf32>, vector<114x10xf32> -> vector<114x10xf32>
    %cst_70 = arith.constant dense<0.000000e+00> : vector<80x10xf32>
    %65 = tpu.matmul %61, %64, %cst_70 {dimension_numbers = #tpu.dot_dimension_numbers<[1], [0], [0], [1], [0, 0, 1, 1], [], []>} : vector<80x114xf32>, vector<114x10xf32>, vector<80x10xf32> -> vector<80x10xf32>
    %66 = arith.addf %59, %65 : vector<80x10xf32>
    %c4_71 = arith.constant 4 : index
    %c0_72 = arith.constant 0 : index
    %c0_73 = arith.constant 0 : index
    %67 = vector.load %arg5[%c4_71, %c0_72, %c0_73] : memref<5x80x114xf32, #tpu.memory_space<vmem>>, vector<1x80x114xf32>
    %68 = vector.shape_cast %67 : vector<1x80x114xf32> to vector<80x114xf32>
    %c4_74 = arith.constant 4 : index
    %c0_75 = arith.constant 0 : index
    %c0_76 = arith.constant 0 : index
    %69 = vector.load %arg6[%c4_74, %c0_75, %c0_76] : memref<5x38x10xf32, #tpu.memory_space<vmem>>, vector<1x38x10xf32>
    %70 = vector.shape_cast %69 : vector<1x38x10xf32> to vector<38x10xf32>
    %cst_77 = arith.constant dense<0.000000e+00> : vector<114x10xf32>
    %71 = tpu.matmul %39, %70, %cst_77 {dimension_numbers = #tpu.dot_dimension_numbers<[1], [0], [0], [1], [0, 0, 1, 1], [], []>} : vector<114x38xf32>, vector<38x10xf32>, vector<114x10xf32> -> vector<114x10xf32>
    %cst_78 = arith.constant dense<0.000000e+00> : vector<80x10xf32>
    %72 = tpu.matmul %68, %71, %cst_78 {dimension_numbers = #tpu.dot_dimension_numbers<[1], [0], [0], [1], [0, 0, 1, 1], [], []>} : vector<80x114xf32>, vector<114x10xf32>, vector<80x10xf32> -> vector<80x10xf32>
    %73 = arith.addf %66, %72 : vector<80x10xf32>
    %c0_79 = arith.constant 0 : index
    %c0_80 = arith.constant 0 : index
    %74 = vector.load %arg7[%c0_79, %c0_80] : memref<80x1xf32, #tpu.memory_space<vmem>>, vector<80x1xf32>
    %75 = vector.broadcast %74 : vector<80x1xf32> to vector<80x10xf32>
    %76 = arith.addf %73, %75 : vector<80x10xf32>
    %c0_81 = arith.constant 0 : index
    %c0_82 = arith.constant 0 : index
    %77 = vector.load %arg8[%c0_81, %c0_82] : memref<16x80xf32, #tpu.memory_space<vmem>>, vector<16x80xf32>
    %c0_83 = arith.constant 0 : index
    %c0_84 = arith.constant 0 : index
    %78 = vector.load %arg9[%c0_83, %c0_84] : memref<80x16xf32, #tpu.memory_space<vmem>>, vector<80x16xf32>
    %cst_85 = arith.constant dense<0.000000e+00> : vector<80xf32>
    %79 = vector.multi_reduction <add>, %76, %cst_85 [1] : vector<80x10xf32> to vector<80xf32>
    %80 = vector.shape_cast %79 : vector<80xf32> to vector<80x1xf32>
    %cst_86 = arith.constant dense<0.000000e+00> : vector<16x1xf32>
    %81 = tpu.matmul %77, %80, %cst_86 {dimension_numbers = #tpu.dot_dimension_numbers<[1], [0], [0], [1], [0, 0, 1, 1], [], []>} : vector<16x80xf32>, vector<80x1xf32>, vector<16x1xf32> -> vector<16x1xf32>
    %cst_87 = arith.constant 2.000000e-02 : f32
    %82 = vector.broadcast %cst_87 : f32 to vector<16x1xf32>
    %83 = arith.mulf %81, %82 : vector<16x1xf32>
    %84 = arith.mulf %76, %76 : vector<80x10xf32>
    %cst_88 = arith.constant dense<0.000000e+00> : vector<80xf32>
    %85 = vector.multi_reduction <add>, %84, %cst_88 [1] : vector<80x10xf32> to vector<80xf32>
    %86 = vector.shape_cast %85 : vector<80xf32> to vector<80x1xf32>
    %cst_89 = arith.constant dense<0.000000e+00> : vector<16x1xf32>
    %87 = tpu.matmul %77, %86, %cst_89 {dimension_numbers = #tpu.dot_dimension_numbers<[1], [0], [0], [1], [0, 0, 1, 1], [], []>} : vector<16x80xf32>, vector<80x1xf32>, vector<16x1xf32> -> vector<16x1xf32>
    %cst_90 = arith.constant 2.000000e-02 : f32
    %88 = vector.broadcast %cst_90 : f32 to vector<16x1xf32>
    %89 = arith.mulf %87, %88 : vector<16x1xf32>
    %90 = arith.mulf %83, %83 : vector<16x1xf32>
    %91 = arith.subf %89, %90 : vector<16x1xf32>
    %cst_91 = arith.constant 9.99999974E-6 : f32
    %92 = vector.broadcast %cst_91 : f32 to vector<16x1xf32>
    %93 = arith.addf %91, %92 : vector<16x1xf32>
    %94 = math.rsqrt %93 : vector<16x1xf32>
    %c0_92 = arith.constant 0 : index
    %c0_93 = arith.constant 0 : index
    %95 = vector.load %arg10[%c0_92, %c0_93] : memref<16x1xf32, #tpu.memory_space<vmem>>, vector<16x1xf32>
    %96 = arith.mulf %95, %94 : vector<16x1xf32>
    %c0_94 = arith.constant 0 : index
    %c0_95 = arith.constant 0 : index
    %97 = vector.load %arg11[%c0_94, %c0_95] : memref<16x1xf32, #tpu.memory_space<vmem>>, vector<16x1xf32>
    %98 = arith.mulf %83, %96 : vector<16x1xf32>
    %99 = arith.subf %97, %98 : vector<16x1xf32>
    %cst_96 = arith.constant dense<0.000000e+00> : vector<80x1xf32>
    %100 = tpu.matmul %78, %96, %cst_96 {dimension_numbers = #tpu.dot_dimension_numbers<[1], [0], [0], [1], [0, 0, 1, 1], [], []>} : vector<80x16xf32>, vector<16x1xf32>, vector<80x1xf32> -> vector<80x1xf32>
    %101 = vector.broadcast %100 : vector<80x1xf32> to vector<80x10xf32>
    %102 = arith.mulf %76, %101 : vector<80x10xf32>
    %cst_97 = arith.constant dense<0.000000e+00> : vector<80x1xf32>
    %103 = tpu.matmul %78, %99, %cst_97 {dimension_numbers = #tpu.dot_dimension_numbers<[1], [0], [0], [1], [0, 0, 1, 1], [], []>} : vector<80x16xf32>, vector<16x1xf32>, vector<80x1xf32> -> vector<80x1xf32>
    %104 = vector.broadcast %103 : vector<80x1xf32> to vector<80x10xf32>
    %105 = arith.addf %102, %104 : vector<80x10xf32>
    %cst_98 = arith.constant 0.000000e+00 : f32
    %106 = vector.broadcast %cst_98 : f32 to vector<80x10xf32>
    %107 = arith.maximumf %105, %106 : vector<80x10xf32>
    %c0_99 = arith.constant 0 : index
    %c0_100 = arith.constant 0 : index
    %c0_101 = arith.constant 0 : index
    %108 = vector.load %arg12[%c0_99, %c0_100, %c0_101] : memref<5x32x80xf32, #tpu.memory_space<vmem>>, vector<1x32x80xf32>
    %109 = vector.shape_cast %108 : vector<1x32x80xf32> to vector<32x80xf32>
    %cst_102 = arith.constant dense<0.000000e+00> : vector<32x10xf32>
    %110 = tpu.matmul %109, %107, %cst_102 {dimension_numbers = #tpu.dot_dimension_numbers<[1], [0], [0], [1], [0, 0, 1, 1], [], []>} : vector<32x80xf32>, vector<80x10xf32>, vector<32x10xf32> -> vector<32x10xf32>
    %c0_103 = arith.constant 0 : index
    %c0_104 = arith.constant 0 : index
    %c0_105 = arith.constant 0 : index
    %111 = vector.load %arg13[%c0_103, %c0_104, %c0_105] : memref<5x10x2xf32, #tpu.memory_space<vmem>>, vector<1x10x2xf32>
    %112 = vector.shape_cast %111 : vector<1x10x2xf32> to vector<10x2xf32>
    %cst_106 = arith.constant dense<0.000000e+00> : vector<32x2xf32>
    %113 = tpu.matmul %110, %112, %cst_106 {dimension_numbers = #tpu.dot_dimension_numbers<[1], [0], [0], [1], [0, 0, 1, 1], [], []>} : vector<32x10xf32>, vector<10x2xf32>, vector<32x2xf32> -> vector<32x2xf32>
    %c1_107 = arith.constant 1 : index
    %c0_108 = arith.constant 0 : index
    %c0_109 = arith.constant 0 : index
    %114 = vector.load %arg12[%c1_107, %c0_108, %c0_109] : memref<5x32x80xf32, #tpu.memory_space<vmem>>, vector<1x32x80xf32>
    %115 = vector.shape_cast %114 : vector<1x32x80xf32> to vector<32x80xf32>
    %cst_110 = arith.constant dense<0.000000e+00> : vector<32x10xf32>
    %116 = tpu.matmul %115, %107, %cst_110 {dimension_numbers = #tpu.dot_dimension_numbers<[1], [0], [0], [1], [0, 0, 1, 1], [], []>} : vector<32x80xf32>, vector<80x10xf32>, vector<32x10xf32> -> vector<32x10xf32>
    %c1_111 = arith.constant 1 : index
    %c0_112 = arith.constant 0 : index
    %c0_113 = arith.constant 0 : index
    %117 = vector.load %arg13[%c1_111, %c0_112, %c0_113] : memref<5x10x2xf32, #tpu.memory_space<vmem>>, vector<1x10x2xf32>
    %118 = vector.shape_cast %117 : vector<1x10x2xf32> to vector<10x2xf32>
    %cst_114 = arith.constant dense<0.000000e+00> : vector<32x2xf32>
    %119 = tpu.matmul %116, %118, %cst_114 {dimension_numbers = #tpu.dot_dimension_numbers<[1], [0], [0], [1], [0, 0, 1, 1], [], []>} : vector<32x10xf32>, vector<10x2xf32>, vector<32x2xf32> -> vector<32x2xf32>
    %120 = arith.addf %113, %119 : vector<32x2xf32>
    %c2_115 = arith.constant 2 : index
    %c0_116 = arith.constant 0 : index
    %c0_117 = arith.constant 0 : index
    %121 = vector.load %arg12[%c2_115, %c0_116, %c0_117] : memref<5x32x80xf32, #tpu.memory_space<vmem>>, vector<1x32x80xf32>
    %122 = vector.shape_cast %121 : vector<1x32x80xf32> to vector<32x80xf32>
    %cst_118 = arith.constant dense<0.000000e+00> : vector<32x10xf32>
    %123 = tpu.matmul %122, %107, %cst_118 {dimension_numbers = #tpu.dot_dimension_numbers<[1], [0], [0], [1], [0, 0, 1, 1], [], []>} : vector<32x80xf32>, vector<80x10xf32>, vector<32x10xf32> -> vector<32x10xf32>
    %c2_119 = arith.constant 2 : index
    %c0_120 = arith.constant 0 : index
    %c0_121 = arith.constant 0 : index
    %124 = vector.load %arg13[%c2_119, %c0_120, %c0_121] : memref<5x10x2xf32, #tpu.memory_space<vmem>>, vector<1x10x2xf32>
    %125 = vector.shape_cast %124 : vector<1x10x2xf32> to vector<10x2xf32>
    %cst_122 = arith.constant dense<0.000000e+00> : vector<32x2xf32>
    %126 = tpu.matmul %123, %125, %cst_122 {dimension_numbers = #tpu.dot_dimension_numbers<[1], [0], [0], [1], [0, 0, 1, 1], [], []>} : vector<32x10xf32>, vector<10x2xf32>, vector<32x2xf32> -> vector<32x2xf32>
    %127 = arith.addf %120, %126 : vector<32x2xf32>
    %c3_123 = arith.constant 3 : index
    %c0_124 = arith.constant 0 : index
    %c0_125 = arith.constant 0 : index
    %128 = vector.load %arg12[%c3_123, %c0_124, %c0_125] : memref<5x32x80xf32, #tpu.memory_space<vmem>>, vector<1x32x80xf32>
    %129 = vector.shape_cast %128 : vector<1x32x80xf32> to vector<32x80xf32>
    %cst_126 = arith.constant dense<0.000000e+00> : vector<32x10xf32>
    %130 = tpu.matmul %129, %107, %cst_126 {dimension_numbers = #tpu.dot_dimension_numbers<[1], [0], [0], [1], [0, 0, 1, 1], [], []>} : vector<32x80xf32>, vector<80x10xf32>, vector<32x10xf32> -> vector<32x10xf32>
    %c3_127 = arith.constant 3 : index
    %c0_128 = arith.constant 0 : index
    %c0_129 = arith.constant 0 : index
    %131 = vector.load %arg13[%c3_127, %c0_128, %c0_129] : memref<5x10x2xf32, #tpu.memory_space<vmem>>, vector<1x10x2xf32>
    %132 = vector.shape_cast %131 : vector<1x10x2xf32> to vector<10x2xf32>
    %cst_130 = arith.constant dense<0.000000e+00> : vector<32x2xf32>
    %133 = tpu.matmul %130, %132, %cst_130 {dimension_numbers = #tpu.dot_dimension_numbers<[1], [0], [0], [1], [0, 0, 1, 1], [], []>} : vector<32x10xf32>, vector<10x2xf32>, vector<32x2xf32> -> vector<32x2xf32>
    %134 = arith.addf %127, %133 : vector<32x2xf32>
    %c4_131 = arith.constant 4 : index
    %c0_132 = arith.constant 0 : index
    %c0_133 = arith.constant 0 : index
    %135 = vector.load %arg12[%c4_131, %c0_132, %c0_133] : memref<5x32x80xf32, #tpu.memory_space<vmem>>, vector<1x32x80xf32>
    %136 = vector.shape_cast %135 : vector<1x32x80xf32> to vector<32x80xf32>
    %cst_134 = arith.constant dense<0.000000e+00> : vector<32x10xf32>
    %137 = tpu.matmul %136, %107, %cst_134 {dimension_numbers = #tpu.dot_dimension_numbers<[1], [0], [0], [1], [0, 0, 1, 1], [], []>} : vector<32x80xf32>, vector<80x10xf32>, vector<32x10xf32> -> vector<32x10xf32>
    %c4_135 = arith.constant 4 : index
    %c0_136 = arith.constant 0 : index
    %c0_137 = arith.constant 0 : index
    %138 = vector.load %arg13[%c4_135, %c0_136, %c0_137] : memref<5x10x2xf32, #tpu.memory_space<vmem>>, vector<1x10x2xf32>
    %139 = vector.shape_cast %138 : vector<1x10x2xf32> to vector<10x2xf32>
    %cst_138 = arith.constant dense<0.000000e+00> : vector<32x2xf32>
    %140 = tpu.matmul %137, %139, %cst_138 {dimension_numbers = #tpu.dot_dimension_numbers<[1], [0], [0], [1], [0, 0, 1, 1], [], []>} : vector<32x10xf32>, vector<10x2xf32>, vector<32x2xf32> -> vector<32x2xf32>
    %141 = arith.addf %134, %140 : vector<32x2xf32>
    %c0_139 = arith.constant 0 : index
    %c0_140 = arith.constant 0 : index
    %142 = vector.load %arg14[%c0_139, %c0_140] : memref<32x1xf32, #tpu.memory_space<vmem>>, vector<32x1xf32>
    %143 = vector.broadcast %142 : vector<32x1xf32> to vector<32x2xf32>
    %144 = arith.addf %141, %143 : vector<32x2xf32>
    %cst_141 = arith.constant 0.000000e+00 : f32
    %145 = vector.broadcast %cst_141 : f32 to vector<32x2xf32>
    %146 = arith.maximumf %144, %145 : vector<32x2xf32>
    %c0_142 = arith.constant 0 : index
    %c0_143 = arith.constant 0 : index
    %c0_144 = arith.constant 0 : index
    %147 = vector.load %arg15[%c0_142, %c0_143, %c0_144] : memref<5x80x32xf32, #tpu.memory_space<vmem>>, vector<1x80x32xf32>
    %148 = vector.shape_cast %147 : vector<1x80x32xf32> to vector<80x32xf32>
    %cst_145 = arith.constant dense<0.000000e+00> : vector<80x2xf32>
    %149 = tpu.matmul %148, %146, %cst_145 {dimension_numbers = #tpu.dot_dimension_numbers<[1], [0], [0], [1], [0, 0, 1, 1], [], []>} : vector<80x32xf32>, vector<32x2xf32>, vector<80x2xf32> -> vector<80x2xf32>
    %c0_146 = arith.constant 0 : index
    %c0_147 = arith.constant 0 : index
    %c0_148 = arith.constant 0 : index
    %150 = vector.load %arg16[%c0_146, %c0_147, %c0_148] : memref<5x80x1xf32, #tpu.memory_space<vmem>>, vector<1x80x1xf32>
    %151 = vector.shape_cast %150 : vector<1x80x1xf32> to vector<80x1xf32>
    %152 = vector.broadcast %151 : vector<80x1xf32> to vector<80x2xf32>
    %153 = arith.addf %149, %152 : vector<80x2xf32>
    %cst_149 = arith.constant 0.000000e+00 : f32
    %154 = vector.broadcast %cst_149 : f32 to vector<80x2xf32>
    %155 = arith.maximumf %153, %154 : vector<80x2xf32>
    %c0_150 = arith.constant 0 : index
    %c0_151 = arith.constant 0 : index
    %c0_152 = arith.constant 0 : index
    %156 = vector.load %arg17[%c0_150, %c0_151, %c0_152] : memref<5x2x10xf32, #tpu.memory_space<vmem>>, vector<1x2x10xf32>
    %157 = vector.shape_cast %156 : vector<1x2x10xf32> to vector<2x10xf32>
    %cst_153 = arith.constant dense<0.000000e+00> : vector<80x10xf32>
    %158 = tpu.matmul %155, %157, %cst_153 {dimension_numbers = #tpu.dot_dimension_numbers<[1], [0], [0], [1], [0, 0, 1, 1], [], []>} : vector<80x2xf32>, vector<2x10xf32>, vector<80x10xf32> -> vector<80x10xf32>
    %c1_154 = arith.constant 1 : index
    %c0_155 = arith.constant 0 : index
    %c0_156 = arith.constant 0 : index
    %159 = vector.load %arg15[%c1_154, %c0_155, %c0_156] : memref<5x80x32xf32, #tpu.memory_space<vmem>>, vector<1x80x32xf32>
    %160 = vector.shape_cast %159 : vector<1x80x32xf32> to vector<80x32xf32>
    %cst_157 = arith.constant dense<0.000000e+00> : vector<80x2xf32>
    %161 = tpu.matmul %160, %146, %cst_157 {dimension_numbers = #tpu.dot_dimension_numbers<[1], [0], [0], [1], [0, 0, 1, 1], [], []>} : vector<80x32xf32>, vector<32x2xf32>, vector<80x2xf32> -> vector<80x2xf32>
    %c1_158 = arith.constant 1 : index
    %c0_159 = arith.constant 0 : index
    %c0_160 = arith.constant 0 : index
    %162 = vector.load %arg16[%c1_158, %c0_159, %c0_160] : memref<5x80x1xf32, #tpu.memory_space<vmem>>, vector<1x80x1xf32>
    %163 = vector.shape_cast %162 : vector<1x80x1xf32> to vector<80x1xf32>
    %164 = vector.broadcast %163 : vector<80x1xf32> to vector<80x2xf32>
    %165 = arith.addf %161, %164 : vector<80x2xf32>
    %cst_161 = arith.constant 0.000000e+00 : f32
    %166 = vector.broadcast %cst_161 : f32 to vector<80x2xf32>
    %167 = arith.maximumf %165, %166 : vector<80x2xf32>
    %c1_162 = arith.constant 1 : index
    %c0_163 = arith.constant 0 : index
    %c0_164 = arith.constant 0 : index
    %168 = vector.load %arg17[%c1_162, %c0_163, %c0_164] : memref<5x2x10xf32, #tpu.memory_space<vmem>>, vector<1x2x10xf32>
    %169 = vector.shape_cast %168 : vector<1x2x10xf32> to vector<2x10xf32>
    %cst_165 = arith.constant dense<0.000000e+00> : vector<80x10xf32>
    %170 = tpu.matmul %167, %169, %cst_165 {dimension_numbers = #tpu.dot_dimension_numbers<[1], [0], [0], [1], [0, 0, 1, 1], [], []>} : vector<80x2xf32>, vector<2x10xf32>, vector<80x10xf32> -> vector<80x10xf32>
    %171 = arith.addf %158, %170 : vector<80x10xf32>
    %c2_166 = arith.constant 2 : index
    %c0_167 = arith.constant 0 : index
    %c0_168 = arith.constant 0 : index
    %172 = vector.load %arg15[%c2_166, %c0_167, %c0_168] : memref<5x80x32xf32, #tpu.memory_space<vmem>>, vector<1x80x32xf32>
    %173 = vector.shape_cast %172 : vector<1x80x32xf32> to vector<80x32xf32>
    %cst_169 = arith.constant dense<0.000000e+00> : vector<80x2xf32>
    %174 = tpu.matmul %173, %146, %cst_169 {dimension_numbers = #tpu.dot_dimension_numbers<[1], [0], [0], [1], [0, 0, 1, 1], [], []>} : vector<80x32xf32>, vector<32x2xf32>, vector<80x2xf32> -> vector<80x2xf32>
    %c2_170 = arith.constant 2 : index
    %c0_171 = arith.constant 0 : index
    %c0_172 = arith.constant 0 : index
    %175 = vector.load %arg16[%c2_170, %c0_171, %c0_172] : memref<5x80x1xf32, #tpu.memory_space<vmem>>, vector<1x80x1xf32>
    %176 = vector.shape_cast %175 : vector<1x80x1xf32> to vector<80x1xf32>
    %177 = vector.broadcast %176 : vector<80x1xf32> to vector<80x2xf32>
    %178 = arith.addf %174, %177 : vector<80x2xf32>
    %cst_173 = arith.constant 0.000000e+00 : f32
    %179 = vector.broadcast %cst_173 : f32 to vector<80x2xf32>
    %180 = arith.maximumf %178, %179 : vector<80x2xf32>
    %c2_174 = arith.constant 2 : index
    %c0_175 = arith.constant 0 : index
    %c0_176 = arith.constant 0 : index
    %181 = vector.load %arg17[%c2_174, %c0_175, %c0_176] : memref<5x2x10xf32, #tpu.memory_space<vmem>>, vector<1x2x10xf32>
    %182 = vector.shape_cast %181 : vector<1x2x10xf32> to vector<2x10xf32>
    %cst_177 = arith.constant dense<0.000000e+00> : vector<80x10xf32>
    %183 = tpu.matmul %180, %182, %cst_177 {dimension_numbers = #tpu.dot_dimension_numbers<[1], [0], [0], [1], [0, 0, 1, 1], [], []>} : vector<80x2xf32>, vector<2x10xf32>, vector<80x10xf32> -> vector<80x10xf32>
    %184 = arith.addf %171, %183 : vector<80x10xf32>
    %c3_178 = arith.constant 3 : index
    %c0_179 = arith.constant 0 : index
    %c0_180 = arith.constant 0 : index
    %185 = vector.load %arg15[%c3_178, %c0_179, %c0_180] : memref<5x80x32xf32, #tpu.memory_space<vmem>>, vector<1x80x32xf32>
    %186 = vector.shape_cast %185 : vector<1x80x32xf32> to vector<80x32xf32>
    %cst_181 = arith.constant dense<0.000000e+00> : vector<80x2xf32>
    %187 = tpu.matmul %186, %146, %cst_181 {dimension_numbers = #tpu.dot_dimension_numbers<[1], [0], [0], [1], [0, 0, 1, 1], [], []>} : vector<80x32xf32>, vector<32x2xf32>, vector<80x2xf32> -> vector<80x2xf32>
    %c3_182 = arith.constant 3 : index
    %c0_183 = arith.constant 0 : index
    %c0_184 = arith.constant 0 : index
    %188 = vector.load %arg16[%c3_182, %c0_183, %c0_184] : memref<5x80x1xf32, #tpu.memory_space<vmem>>, vector<1x80x1xf32>
    %189 = vector.shape_cast %188 : vector<1x80x1xf32> to vector<80x1xf32>
    %190 = vector.broadcast %189 : vector<80x1xf32> to vector<80x2xf32>
    %191 = arith.addf %187, %190 : vector<80x2xf32>
    %cst_185 = arith.constant 0.000000e+00 : f32
    %192 = vector.broadcast %cst_185 : f32 to vector<80x2xf32>
    %193 = arith.maximumf %191, %192 : vector<80x2xf32>
    %c3_186 = arith.constant 3 : index
    %c0_187 = arith.constant 0 : index
    %c0_188 = arith.constant 0 : index
    %194 = vector.load %arg17[%c3_186, %c0_187, %c0_188] : memref<5x2x10xf32, #tpu.memory_space<vmem>>, vector<1x2x10xf32>
    %195 = vector.shape_cast %194 : vector<1x2x10xf32> to vector<2x10xf32>
    %cst_189 = arith.constant dense<0.000000e+00> : vector<80x10xf32>
    %196 = tpu.matmul %193, %195, %cst_189 {dimension_numbers = #tpu.dot_dimension_numbers<[1], [0], [0], [1], [0, 0, 1, 1], [], []>} : vector<80x2xf32>, vector<2x10xf32>, vector<80x10xf32> -> vector<80x10xf32>
    %197 = arith.addf %184, %196 : vector<80x10xf32>
    %c4_190 = arith.constant 4 : index
    %c0_191 = arith.constant 0 : index
    %c0_192 = arith.constant 0 : index
    %198 = vector.load %arg15[%c4_190, %c0_191, %c0_192] : memref<5x80x32xf32, #tpu.memory_space<vmem>>, vector<1x80x32xf32>
    %199 = vector.shape_cast %198 : vector<1x80x32xf32> to vector<80x32xf32>
    %cst_193 = arith.constant dense<0.000000e+00> : vector<80x2xf32>
    %200 = tpu.matmul %199, %146, %cst_193 {dimension_numbers = #tpu.dot_dimension_numbers<[1], [0], [0], [1], [0, 0, 1, 1], [], []>} : vector<80x32xf32>, vector<32x2xf32>, vector<80x2xf32> -> vector<80x2xf32>
    %c4_194 = arith.constant 4 : index
    %c0_195 = arith.constant 0 : index
    %c0_196 = arith.constant 0 : index
    %201 = vector.load %arg16[%c4_194, %c0_195, %c0_196] : memref<5x80x1xf32, #tpu.memory_space<vmem>>, vector<1x80x1xf32>
    %202 = vector.shape_cast %201 : vector<1x80x1xf32> to vector<80x1xf32>
    %203 = vector.broadcast %202 : vector<80x1xf32> to vector<80x2xf32>
    %204 = arith.addf %200, %203 : vector<80x2xf32>
    %cst_197 = arith.constant 0.000000e+00 : f32
    %205 = vector.broadcast %cst_197 : f32 to vector<80x2xf32>
    %206 = arith.maximumf %204, %205 : vector<80x2xf32>
    %c4_198 = arith.constant 4 : index
    %c0_199 = arith.constant 0 : index
    %c0_200 = arith.constant 0 : index
    %207 = vector.load %arg17[%c4_198, %c0_199, %c0_200] : memref<5x2x10xf32, #tpu.memory_space<vmem>>, vector<1x2x10xf32>
    %208 = vector.shape_cast %207 : vector<1x2x10xf32> to vector<2x10xf32>
    %cst_201 = arith.constant dense<0.000000e+00> : vector<80x10xf32>
    %209 = tpu.matmul %206, %208, %cst_201 {dimension_numbers = #tpu.dot_dimension_numbers<[1], [0], [0], [1], [0, 0, 1, 1], [], []>} : vector<80x2xf32>, vector<2x10xf32>, vector<80x10xf32> -> vector<80x10xf32>
    %210 = arith.addf %197, %209 : vector<80x10xf32>
    %cst_202 = arith.constant dense<0.000000e+00> : vector<80xf32>
    %211 = vector.multi_reduction <add>, %210, %cst_202 [1] : vector<80x10xf32> to vector<80xf32>
    %212 = vector.shape_cast %211 : vector<80xf32> to vector<80x1xf32>
    %cst_203 = arith.constant dense<0.000000e+00> : vector<16x1xf32>
    %213 = tpu.matmul %77, %212, %cst_203 {dimension_numbers = #tpu.dot_dimension_numbers<[1], [0], [0], [1], [0, 0, 1, 1], [], []>} : vector<16x80xf32>, vector<80x1xf32>, vector<16x1xf32> -> vector<16x1xf32>
    %cst_204 = arith.constant 2.000000e-02 : f32
    %214 = vector.broadcast %cst_204 : f32 to vector<16x1xf32>
    %215 = arith.mulf %213, %214 : vector<16x1xf32>
    %216 = arith.mulf %210, %210 : vector<80x10xf32>
    %cst_205 = arith.constant dense<0.000000e+00> : vector<80xf32>
    %217 = vector.multi_reduction <add>, %216, %cst_205 [1] : vector<80x10xf32> to vector<80xf32>
    %218 = vector.shape_cast %217 : vector<80xf32> to vector<80x1xf32>
    %cst_206 = arith.constant dense<0.000000e+00> : vector<16x1xf32>
    %219 = tpu.matmul %77, %218, %cst_206 {dimension_numbers = #tpu.dot_dimension_numbers<[1], [0], [0], [1], [0, 0, 1, 1], [], []>} : vector<16x80xf32>, vector<80x1xf32>, vector<16x1xf32> -> vector<16x1xf32>
    %cst_207 = arith.constant 2.000000e-02 : f32
    %220 = vector.broadcast %cst_207 : f32 to vector<16x1xf32>
    %221 = arith.mulf %219, %220 : vector<16x1xf32>
    %222 = arith.mulf %215, %215 : vector<16x1xf32>
    %223 = arith.subf %221, %222 : vector<16x1xf32>
    %cst_208 = arith.constant 9.99999974E-6 : f32
    %224 = vector.broadcast %cst_208 : f32 to vector<16x1xf32>
    %225 = arith.addf %223, %224 : vector<16x1xf32>
    %226 = math.rsqrt %225 : vector<16x1xf32>
    %c0_209 = arith.constant 0 : index
    %c0_210 = arith.constant 0 : index
    %227 = vector.load %arg18[%c0_209, %c0_210] : memref<16x1xf32, #tpu.memory_space<vmem>>, vector<16x1xf32>
    %228 = arith.mulf %227, %226 : vector<16x1xf32>
    %c0_211 = arith.constant 0 : index
    %c0_212 = arith.constant 0 : index
    %229 = vector.load %arg19[%c0_211, %c0_212] : memref<16x1xf32, #tpu.memory_space<vmem>>, vector<16x1xf32>
    %230 = arith.mulf %215, %228 : vector<16x1xf32>
    %231 = arith.subf %229, %230 : vector<16x1xf32>
    %cst_213 = arith.constant dense<0.000000e+00> : vector<80x1xf32>
    %232 = tpu.matmul %78, %228, %cst_213 {dimension_numbers = #tpu.dot_dimension_numbers<[1], [0], [0], [1], [0, 0, 1, 1], [], []>} : vector<80x16xf32>, vector<16x1xf32>, vector<80x1xf32> -> vector<80x1xf32>
    %233 = vector.broadcast %232 : vector<80x1xf32> to vector<80x10xf32>
    %234 = arith.mulf %210, %233 : vector<80x10xf32>
    %cst_214 = arith.constant dense<0.000000e+00> : vector<80x1xf32>
    %235 = tpu.matmul %78, %231, %cst_214 {dimension_numbers = #tpu.dot_dimension_numbers<[1], [0], [0], [1], [0, 0, 1, 1], [], []>} : vector<80x16xf32>, vector<16x1xf32>, vector<80x1xf32> -> vector<80x1xf32>
    %236 = vector.broadcast %235 : vector<80x1xf32> to vector<80x10xf32>
    %237 = arith.addf %234, %236 : vector<80x10xf32>
    %c0_215 = arith.constant 0 : index
    %c0_216 = arith.constant 0 : index
    %c0_217 = arith.constant 0 : index
    %238 = vector.load %arg20[%c0_215, %c0_216, %c0_217] : memref<5x114x80xf32, #tpu.memory_space<vmem>>, vector<1x114x80xf32>
    %239 = vector.shape_cast %238 : vector<1x114x80xf32> to vector<114x80xf32>
    %cst_218 = arith.constant dense<0.000000e+00> : vector<114x10xf32>
    %240 = tpu.matmul %239, %237, %cst_218 {dimension_numbers = #tpu.dot_dimension_numbers<[1], [0], [0], [1], [0, 0, 1, 1], [], []>} : vector<114x80xf32>, vector<80x10xf32>, vector<114x10xf32> -> vector<114x10xf32>
    %c0_219 = arith.constant 0 : index
    %c0_220 = arith.constant 0 : index
    %c0_221 = arith.constant 0 : index
    %241 = vector.load %arg21[%c0_219, %c0_220, %c0_221] : memref<5x10x38xf32, #tpu.memory_space<vmem>>, vector<1x10x38xf32>
    %242 = vector.shape_cast %241 : vector<1x10x38xf32> to vector<10x38xf32>
    %cst_222 = arith.constant dense<0.000000e+00> : vector<114x38xf32>
    %243 = tpu.matmul %240, %242, %cst_222 {dimension_numbers = #tpu.dot_dimension_numbers<[1], [0], [0], [1], [0, 0, 1, 1], [], []>} : vector<114x10xf32>, vector<10x38xf32>, vector<114x38xf32> -> vector<114x38xf32>
    %c1_223 = arith.constant 1 : index
    %c0_224 = arith.constant 0 : index
    %c0_225 = arith.constant 0 : index
    %244 = vector.load %arg20[%c1_223, %c0_224, %c0_225] : memref<5x114x80xf32, #tpu.memory_space<vmem>>, vector<1x114x80xf32>
    %245 = vector.shape_cast %244 : vector<1x114x80xf32> to vector<114x80xf32>
    %cst_226 = arith.constant dense<0.000000e+00> : vector<114x10xf32>
    %246 = tpu.matmul %245, %237, %cst_226 {dimension_numbers = #tpu.dot_dimension_numbers<[1], [0], [0], [1], [0, 0, 1, 1], [], []>} : vector<114x80xf32>, vector<80x10xf32>, vector<114x10xf32> -> vector<114x10xf32>
    %c1_227 = arith.constant 1 : index
    %c0_228 = arith.constant 0 : index
    %c0_229 = arith.constant 0 : index
    %247 = vector.load %arg21[%c1_227, %c0_228, %c0_229] : memref<5x10x38xf32, #tpu.memory_space<vmem>>, vector<1x10x38xf32>
    %248 = vector.shape_cast %247 : vector<1x10x38xf32> to vector<10x38xf32>
    %cst_230 = arith.constant dense<0.000000e+00> : vector<114x38xf32>
    %249 = tpu.matmul %246, %248, %cst_230 {dimension_numbers = #tpu.dot_dimension_numbers<[1], [0], [0], [1], [0, 0, 1, 1], [], []>} : vector<114x10xf32>, vector<10x38xf32>, vector<114x38xf32> -> vector<114x38xf32>
    %250 = arith.addf %243, %249 : vector<114x38xf32>
    %c2_231 = arith.constant 2 : index
    %c0_232 = arith.constant 0 : index
    %c0_233 = arith.constant 0 : index
    %251 = vector.load %arg20[%c2_231, %c0_232, %c0_233] : memref<5x114x80xf32, #tpu.memory_space<vmem>>, vector<1x114x80xf32>
    %252 = vector.shape_cast %251 : vector<1x114x80xf32> to vector<114x80xf32>
    %cst_234 = arith.constant dense<0.000000e+00> : vector<114x10xf32>
    %253 = tpu.matmul %252, %237, %cst_234 {dimension_numbers = #tpu.dot_dimension_numbers<[1], [0], [0], [1], [0, 0, 1, 1], [], []>} : vector<114x80xf32>, vector<80x10xf32>, vector<114x10xf32> -> vector<114x10xf32>
    %c2_235 = arith.constant 2 : index
    %c0_236 = arith.constant 0 : index
    %c0_237 = arith.constant 0 : index
    %254 = vector.load %arg21[%c2_235, %c0_236, %c0_237] : memref<5x10x38xf32, #tpu.memory_space<vmem>>, vector<1x10x38xf32>
    %255 = vector.shape_cast %254 : vector<1x10x38xf32> to vector<10x38xf32>
    %cst_238 = arith.constant dense<0.000000e+00> : vector<114x38xf32>
    %256 = tpu.matmul %253, %255, %cst_238 {dimension_numbers = #tpu.dot_dimension_numbers<[1], [0], [0], [1], [0, 0, 1, 1], [], []>} : vector<114x10xf32>, vector<10x38xf32>, vector<114x38xf32> -> vector<114x38xf32>
    %257 = arith.addf %250, %256 : vector<114x38xf32>
    %c3_239 = arith.constant 3 : index
    %c0_240 = arith.constant 0 : index
    %c0_241 = arith.constant 0 : index
    %258 = vector.load %arg20[%c3_239, %c0_240, %c0_241] : memref<5x114x80xf32, #tpu.memory_space<vmem>>, vector<1x114x80xf32>
    %259 = vector.shape_cast %258 : vector<1x114x80xf32> to vector<114x80xf32>
    %cst_242 = arith.constant dense<0.000000e+00> : vector<114x10xf32>
    %260 = tpu.matmul %259, %237, %cst_242 {dimension_numbers = #tpu.dot_dimension_numbers<[1], [0], [0], [1], [0, 0, 1, 1], [], []>} : vector<114x80xf32>, vector<80x10xf32>, vector<114x10xf32> -> vector<114x10xf32>
    %c3_243 = arith.constant 3 : index
    %c0_244 = arith.constant 0 : index
    %c0_245 = arith.constant 0 : index
    %261 = vector.load %arg21[%c3_243, %c0_244, %c0_245] : memref<5x10x38xf32, #tpu.memory_space<vmem>>, vector<1x10x38xf32>
    %262 = vector.shape_cast %261 : vector<1x10x38xf32> to vector<10x38xf32>
    %cst_246 = arith.constant dense<0.000000e+00> : vector<114x38xf32>
    %263 = tpu.matmul %260, %262, %cst_246 {dimension_numbers = #tpu.dot_dimension_numbers<[1], [0], [0], [1], [0, 0, 1, 1], [], []>} : vector<114x10xf32>, vector<10x38xf32>, vector<114x38xf32> -> vector<114x38xf32>
    %264 = arith.addf %257, %263 : vector<114x38xf32>
    %c4_247 = arith.constant 4 : index
    %c0_248 = arith.constant 0 : index
    %c0_249 = arith.constant 0 : index
    %265 = vector.load %arg20[%c4_247, %c0_248, %c0_249] : memref<5x114x80xf32, #tpu.memory_space<vmem>>, vector<1x114x80xf32>
    %266 = vector.shape_cast %265 : vector<1x114x80xf32> to vector<114x80xf32>
    %cst_250 = arith.constant dense<0.000000e+00> : vector<114x10xf32>
    %267 = tpu.matmul %266, %237, %cst_250 {dimension_numbers = #tpu.dot_dimension_numbers<[1], [0], [0], [1], [0, 0, 1, 1], [], []>} : vector<114x80xf32>, vector<80x10xf32>, vector<114x10xf32> -> vector<114x10xf32>
    %c4_251 = arith.constant 4 : index
    %c0_252 = arith.constant 0 : index
    %c0_253 = arith.constant 0 : index
    %268 = vector.load %arg21[%c4_251, %c0_252, %c0_253] : memref<5x10x38xf32, #tpu.memory_space<vmem>>, vector<1x10x38xf32>
    %269 = vector.shape_cast %268 : vector<1x10x38xf32> to vector<10x38xf32>
    %cst_254 = arith.constant dense<0.000000e+00> : vector<114x38xf32>
    %270 = tpu.matmul %267, %269, %cst_254 {dimension_numbers = #tpu.dot_dimension_numbers<[1], [0], [0], [1], [0, 0, 1, 1], [], []>} : vector<114x10xf32>, vector<10x38xf32>, vector<114x38xf32> -> vector<114x38xf32>
    %271 = arith.addf %264, %270 : vector<114x38xf32>
    %c0_255 = arith.constant 0 : index
    %c0_256 = arith.constant 0 : index
    %272 = vector.load %arg22[%c0_255, %c0_256] : memref<114x1xf32, #tpu.memory_space<vmem>>, vector<114x1xf32>
    %273 = vector.broadcast %272 : vector<114x1xf32> to vector<114x38xf32>
    %274 = arith.addf %271, %273 : vector<114x38xf32>
    %cst_257 = arith.constant 0.000000e+00 : f32
    %275 = vector.broadcast %cst_257 : f32 to vector<114x38xf32>
    %276 = arith.maximumf %274, %275 : vector<114x38xf32>
    %c0_258 = arith.constant 0 : index
    %c0_259 = arith.constant 0 : index
    %c0_260 = arith.constant 0 : index
    %277 = vector.load %arg23[%c0_258, %c0_259, %c0_260] : memref<5x75x114xf32, #tpu.memory_space<vmem>>, vector<1x75x114xf32>
    %278 = vector.shape_cast %277 : vector<1x75x114xf32> to vector<75x114xf32>
    %cst_261 = arith.constant dense<0.000000e+00> : vector<75x38xf32>
    %279 = tpu.matmul %278, %276, %cst_261 {dimension_numbers = #tpu.dot_dimension_numbers<[1], [0], [0], [1], [0, 0, 1, 1], [], []>} : vector<75x114xf32>, vector<114x38xf32>, vector<75x38xf32> -> vector<75x38xf32>
    %c0_262 = arith.constant 0 : index
    %c0_263 = arith.constant 0 : index
    %c0_264 = arith.constant 0 : index
    %280 = vector.load %arg24[%c0_262, %c0_263, %c0_264] : memref<5x38x150xf32, #tpu.memory_space<vmem>>, vector<1x38x150xf32>
    %281 = vector.shape_cast %280 : vector<1x38x150xf32> to vector<38x150xf32>
    %cst_265 = arith.constant dense<0.000000e+00> : vector<75x150xf32>
    %282 = tpu.matmul %279, %281, %cst_265 {dimension_numbers = #tpu.dot_dimension_numbers<[1], [0], [0], [1], [0, 0, 1, 1], [], []>} : vector<75x38xf32>, vector<38x150xf32>, vector<75x150xf32> -> vector<75x150xf32>
    %c1_266 = arith.constant 1 : index
    %c0_267 = arith.constant 0 : index
    %c0_268 = arith.constant 0 : index
    %283 = vector.load %arg23[%c1_266, %c0_267, %c0_268] : memref<5x75x114xf32, #tpu.memory_space<vmem>>, vector<1x75x114xf32>
    %284 = vector.shape_cast %283 : vector<1x75x114xf32> to vector<75x114xf32>
    %cst_269 = arith.constant dense<0.000000e+00> : vector<75x38xf32>
    %285 = tpu.matmul %284, %276, %cst_269 {dimension_numbers = #tpu.dot_dimension_numbers<[1], [0], [0], [1], [0, 0, 1, 1], [], []>} : vector<75x114xf32>, vector<114x38xf32>, vector<75x38xf32> -> vector<75x38xf32>
    %c1_270 = arith.constant 1 : index
    %c0_271 = arith.constant 0 : index
    %c0_272 = arith.constant 0 : index
    %286 = vector.load %arg24[%c1_270, %c0_271, %c0_272] : memref<5x38x150xf32, #tpu.memory_space<vmem>>, vector<1x38x150xf32>
    %287 = vector.shape_cast %286 : vector<1x38x150xf32> to vector<38x150xf32>
    %cst_273 = arith.constant dense<0.000000e+00> : vector<75x150xf32>
    %288 = tpu.matmul %285, %287, %cst_273 {dimension_numbers = #tpu.dot_dimension_numbers<[1], [0], [0], [1], [0, 0, 1, 1], [], []>} : vector<75x38xf32>, vector<38x150xf32>, vector<75x150xf32> -> vector<75x150xf32>
    %289 = arith.addf %282, %288 : vector<75x150xf32>
    %c2_274 = arith.constant 2 : index
    %c0_275 = arith.constant 0 : index
    %c0_276 = arith.constant 0 : index
    %290 = vector.load %arg23[%c2_274, %c0_275, %c0_276] : memref<5x75x114xf32, #tpu.memory_space<vmem>>, vector<1x75x114xf32>
    %291 = vector.shape_cast %290 : vector<1x75x114xf32> to vector<75x114xf32>
    %cst_277 = arith.constant dense<0.000000e+00> : vector<75x38xf32>
    %292 = tpu.matmul %291, %276, %cst_277 {dimension_numbers = #tpu.dot_dimension_numbers<[1], [0], [0], [1], [0, 0, 1, 1], [], []>} : vector<75x114xf32>, vector<114x38xf32>, vector<75x38xf32> -> vector<75x38xf32>
    %c2_278 = arith.constant 2 : index
    %c0_279 = arith.constant 0 : index
    %c0_280 = arith.constant 0 : index
    %293 = vector.load %arg24[%c2_278, %c0_279, %c0_280] : memref<5x38x150xf32, #tpu.memory_space<vmem>>, vector<1x38x150xf32>
    %294 = vector.shape_cast %293 : vector<1x38x150xf32> to vector<38x150xf32>
    %cst_281 = arith.constant dense<0.000000e+00> : vector<75x150xf32>
    %295 = tpu.matmul %292, %294, %cst_281 {dimension_numbers = #tpu.dot_dimension_numbers<[1], [0], [0], [1], [0, 0, 1, 1], [], []>} : vector<75x38xf32>, vector<38x150xf32>, vector<75x150xf32> -> vector<75x150xf32>
    %296 = arith.addf %289, %295 : vector<75x150xf32>
    %c3_282 = arith.constant 3 : index
    %c0_283 = arith.constant 0 : index
    %c0_284 = arith.constant 0 : index
    %297 = vector.load %arg23[%c3_282, %c0_283, %c0_284] : memref<5x75x114xf32, #tpu.memory_space<vmem>>, vector<1x75x114xf32>
    %298 = vector.shape_cast %297 : vector<1x75x114xf32> to vector<75x114xf32>
    %cst_285 = arith.constant dense<0.000000e+00> : vector<75x38xf32>
    %299 = tpu.matmul %298, %276, %cst_285 {dimension_numbers = #tpu.dot_dimension_numbers<[1], [0], [0], [1], [0, 0, 1, 1], [], []>} : vector<75x114xf32>, vector<114x38xf32>, vector<75x38xf32> -> vector<75x38xf32>
    %c3_286 = arith.constant 3 : index
    %c0_287 = arith.constant 0 : index
    %c0_288 = arith.constant 0 : index
    %300 = vector.load %arg24[%c3_286, %c0_287, %c0_288] : memref<5x38x150xf32, #tpu.memory_space<vmem>>, vector<1x38x150xf32>
    %301 = vector.shape_cast %300 : vector<1x38x150xf32> to vector<38x150xf32>
    %cst_289 = arith.constant dense<0.000000e+00> : vector<75x150xf32>
    %302 = tpu.matmul %299, %301, %cst_289 {dimension_numbers = #tpu.dot_dimension_numbers<[1], [0], [0], [1], [0, 0, 1, 1], [], []>} : vector<75x38xf32>, vector<38x150xf32>, vector<75x150xf32> -> vector<75x150xf32>
    %303 = arith.addf %296, %302 : vector<75x150xf32>
    %c4_290 = arith.constant 4 : index
    %c0_291 = arith.constant 0 : index
    %c0_292 = arith.constant 0 : index
    %304 = vector.load %arg23[%c4_290, %c0_291, %c0_292] : memref<5x75x114xf32, #tpu.memory_space<vmem>>, vector<1x75x114xf32>
    %305 = vector.shape_cast %304 : vector<1x75x114xf32> to vector<75x114xf32>
    %cst_293 = arith.constant dense<0.000000e+00> : vector<75x38xf32>
    %306 = tpu.matmul %305, %276, %cst_293 {dimension_numbers = #tpu.dot_dimension_numbers<[1], [0], [0], [1], [0, 0, 1, 1], [], []>} : vector<75x114xf32>, vector<114x38xf32>, vector<75x38xf32> -> vector<75x38xf32>
    %c4_294 = arith.constant 4 : index
    %c0_295 = arith.constant 0 : index
    %c0_296 = arith.constant 0 : index
    %307 = vector.load %arg24[%c4_294, %c0_295, %c0_296] : memref<5x38x150xf32, #tpu.memory_space<vmem>>, vector<1x38x150xf32>
    %308 = vector.shape_cast %307 : vector<1x38x150xf32> to vector<38x150xf32>
    %cst_297 = arith.constant dense<0.000000e+00> : vector<75x150xf32>
    %309 = tpu.matmul %306, %308, %cst_297 {dimension_numbers = #tpu.dot_dimension_numbers<[1], [0], [0], [1], [0, 0, 1, 1], [], []>} : vector<75x38xf32>, vector<38x150xf32>, vector<75x150xf32> -> vector<75x150xf32>
    %310 = arith.addf %303, %309 : vector<75x150xf32>
    %c0_298 = arith.constant 0 : index
    %c0_299 = arith.constant 0 : index
    %311 = vector.load %arg25[%c0_298, %c0_299] : memref<75x1xf32, #tpu.memory_space<vmem>>, vector<75x1xf32>
    %312 = vector.broadcast %311 : vector<75x1xf32> to vector<75x150xf32>
    %313 = arith.addf %310, %312 : vector<75x150xf32>
    %cst_300 = arith.constant 0.000000e+00 : f32
    %314 = vector.broadcast %cst_300 : f32 to vector<75x150xf32>
    %315 = arith.maximumf %313, %314 : vector<75x150xf32>
    %c0_301 = arith.constant 0 : index
    %c0_302 = arith.constant 0 : index
    %316 = vector.load %arg26[%c0_301, %c0_302] : memref<75x150xf32, #tpu.memory_space<vmem>>, vector<75x150xf32>
    tpu.vector_store %arg26[%c0_301, %c0_302], %315 {strides = array<i32>} : memref<75x150xf32, #tpu.memory_space<vmem>>, vector<75x150xf32>,
    return
  }
  func.func @transform_0(%arg0: i32) -> (i32, i32) {
    %c0_i32 = arith.constant 0 : i32
    %c0_i32_0 = arith.constant 0 : i32
    %c0_i32_1 = arith.constant 0 : i32
    return %c0_i32, %c0_i32_0 : i32, i32
  }
  func.func @transform_1(%arg0: i32) -> (i32, i32, i32) {
    %c0_i32 = arith.constant 0 : i32
    %c0_i32_0 = arith.constant 0 : i32
    %c0_i32_1 = arith.constant 0 : i32
    %c0_i32_2 = arith.constant 0 : i32
    return %c0_i32, %c0_i32_0, %c0_i32_1 : i32, i32, i32
  }
  func.func @transform_2(%arg0: i32) -> (i32, i32, i32) {
    %c0_i32 = arith.constant 0 : i32
    %c0_i32_0 = arith.constant 0 : i32
    %c0_i32_1 = arith.constant 0 : i32
    %c0_i32_2 = arith.constant 0 : i32
    return %c0_i32, %c0_i32_0, %c0_i32_1 : i32, i32, i32
  }
  func.func @transform_3(%arg0: i32) -> (i32, i32) {
    %c0_i32 = arith.constant 0 : i32
    %c0_i32_0 = arith.constant 0 : i32
    %c0_i32_1 = arith.constant 0 : i32
    return %c0_i32, %c0_i32_0 : i32, i32
  }
  func.func @transform_4(%arg0: i32) -> (i32, i32, i32) {
    %c0_i32 = arith.constant 0 : i32
    %c0_i32_0 = arith.constant 0 : i32
    %c0_i32_1 = arith.constant 0 : i32
    %c0_i32_2 = arith.constant 0 : i32
    return %c0_i32, %c0_i32_0, %c0_i32_1 : i32, i32, i32
  }
  func.func @transform_5(%arg0: i32) -> (i32, i32, i32) {
    %c0_i32 = arith.constant 0 : i32
    %c0_i32_0 = arith.constant 0 : i32
    %c0_i32_1 = arith.constant 0 : i32
    %c0_i32_2 = arith.constant 0 : i32
    return %c0_i32, %c0_i32_0, %c0_i32_1 : i32, i32, i32
  }
  func.func @transform_6(%arg0: i32) -> (i32, i32) {
    %c0_i32 = arith.constant 0 : i32
    %c0_i32_0 = arith.constant 0 : i32
    %c0_i32_1 = arith.constant 0 : i32
    return %c0_i32, %c0_i32_0 : i32, i32
  }
  func.func @transform_7(%arg0: i32) -> (i32, i32) {
    %c0_i32 = arith.constant 0 : i32
    %c0_i32_0 = arith.constant 0 : i32
    %c0_i32_1 = arith.constant 0 : i32
    return %c0_i32, %c0_i32_0 : i32, i32
  }
  func.func @transform_8(%arg0: i32) -> (i32, i32) {
    %c0_i32 = arith.constant 0 : i32
    %c0_i32_0 = arith.constant 0 : i32
    %c0_i32_1 = arith.constant 0 : i32
    return %c0_i32, %c0_i32_0 : i32, i32
  }
  func.func @transform_9(%arg0: i32) -> (i32, i32) {
    %c0_i32 = arith.constant 0 : i32
    %c0_i32_0 = arith.constant 0 : i32
    %c0_i32_1 = arith.constant 0 : i32
    return %c0_i32, %c0_i32_0 : i32, i32
  }
  func.func @transform_10(%arg0: i32) -> (i32, i32) {
    %c0_i32 = arith.constant 0 : i32
    %c0_i32_0 = arith.constant 0 : i32
    %c0_i32_1 = arith.constant 0 : i32
    return %c0_i32, %c0_i32_0 : i32, i32
  }
  func.func @transform_11(%arg0: i32) -> (i32, i32, i32) {
    %c0_i32 = arith.constant 0 : i32
    %c0_i32_0 = arith.constant 0 : i32
    %c0_i32_1 = arith.constant 0 : i32
    %c0_i32_2 = arith.constant 0 : i32
    return %c0_i32, %c0_i32_0, %c0_i32_1 : i32, i32, i32
  }
  func.func @transform_12(%arg0: i32) -> (i32, i32, i32) {
    %c0_i32 = arith.constant 0 : i32
    %c0_i32_0 = arith.constant 0 : i32
    %c0_i32_1 = arith.constant 0 : i32
    %c0_i32_2 = arith.constant 0 : i32
    return %c0_i32, %c0_i32_0, %c0_i32_1 : i32, i32, i32
  }
  func.func @transform_13(%arg0: i32) -> (i32, i32) {
    %c0_i32 = arith.constant 0 : i32
    %c0_i32_0 = arith.constant 0 : i32
    %c0_i32_1 = arith.constant 0 : i32
    return %c0_i32, %c0_i32_0 : i32, i32
  }
  func.func @transform_14(%arg0: i32) -> (i32, i32, i32) {
    %c0_i32 = arith.constant 0 : i32
    %c0_i32_0 = arith.constant 0 : i32
    %c0_i32_1 = arith.constant 0 : i32
    %c0_i32_2 = arith.constant 0 : i32
    return %c0_i32, %c0_i32_0, %c0_i32_1 : i32, i32, i32
  }
  func.func @transform_15(%arg0: i32) -> (i32, i32, i32) {
    %c0_i32 = arith.constant 0 : i32
    %c0_i32_0 = arith.constant 0 : i32
    %c0_i32_1 = arith.constant 0 : i32
    %c0_i32_2 = arith.constant 0 : i32
    return %c0_i32, %c0_i32_0, %c0_i32_1 : i32, i32, i32
  }
  func.func @transform_16(%arg0: i32) -> (i32, i32, i32) {
    %c0_i32 = arith.constant 0 : i32
    %c0_i32_0 = arith.constant 0 : i32
    %c0_i32_1 = arith.constant 0 : i32
    %c0_i32_2 = arith.constant 0 : i32
    return %c0_i32, %c0_i32_0, %c0_i32_1 : i32, i32, i32
  }
  func.func @transform_17(%arg0: i32) -> (i32, i32) {
    %c0_i32 = arith.constant 0 : i32
    %c0_i32_0 = arith.constant 0 : i32
    %c0_i32_1 = arith.constant 0 : i32
    return %c0_i32, %c0_i32_0 : i32, i32
  }
  func.func @transform_18(%arg0: i32) -> (i32, i32) {
    %c0_i32 = arith.constant 0 : i32
    %c0_i32_0 = arith.constant 0 : i32
    %c0_i32_1 = arith.constant 0 : i32
    return %c0_i32, %c0_i32_0 : i32, i32
  }
  func.func @transform_19(%arg0: i32) -> (i32, i32, i32) {
    %c0_i32 = arith.constant 0 : i32
    %c0_i32_0 = arith.constant 0 : i32
    %c0_i32_1 = arith.constant 0 : i32
    %c0_i32_2 = arith.constant 0 : i32
    return %c0_i32, %c0_i32_0, %c0_i32_1 : i32, i32, i32
  }
  func.func @transform_20(%arg0: i32) -> (i32, i32, i32) {
    %c0_i32 = arith.constant 0 : i32
    %c0_i32_0 = arith.constant 0 : i32
    %c0_i32_1 = arith.constant 0 : i32
    %c0_i32_2 = arith.constant 0 : i32
    return %c0_i32, %c0_i32_0, %c0_i32_1 : i32, i32, i32
  }
  func.func @transform_21(%arg0: i32) -> (i32, i32) {
    %c0_i32 = arith.constant 0 : i32
    %c0_i32_0 = arith.constant 0 : i32
    %c0_i32_1 = arith.constant 0 : i32
    return %c0_i32, %c0_i32_0 : i32, i32
  }
  func.func @transform_22(%arg0: i32) -> (i32, i32, i32) {
    %c0_i32 = arith.constant 0 : i32
    %c0_i32_0 = arith.constant 0 : i32
    %c0_i32_1 = arith.constant 0 : i32
    %c0_i32_2 = arith.constant 0 : i32
    return %c0_i32, %c0_i32_0, %c0_i32_1 : i32, i32, i32
  }
  func.func @transform_23(%arg0: i32) -> (i32, i32, i32) {
    %c0_i32 = arith.constant 0 : i32
    %c0_i32_0 = arith.constant 0 : i32
    %c0_i32_1 = arith.constant 0 : i32
    %c0_i32_2 = arith.constant 0 : i32
    return %c0_i32, %c0_i32_0, %c0_i32_1 : i32, i32, i32
  }
  func.func @transform_24(%arg0: i32) -> (i32, i32) {
    %c0_i32 = arith.constant 0 : i32
    %c0_i32_0 = arith.constant 0 : i32
    %c0_i32_1 = arith.constant 0 : i32
    return %c0_i32, %c0_i32_0 : i32, i32
  }
  func.func @transform_25(%arg0: i32) -> (i32, i32) {
    %c0_i32 = arith.constant 0 : i32
    %c0_i32_0 = arith.constant 0 : i32
    %c0_i32_1 = arith.constant 0 : i32
    return %c0_i32, %c0_i32_0 : i32, i32
  }
}

</mosaic_0001>

<bundles_post_ra>
// kernel: autoencoder_forward.1
= control target key start
LH: loop header
LB: loop body
LE: loop exit
PB: predicated region body
PF: predicated region fallthrough
CT: control target
= control target key end

     0   :  { %vm134_vm0 = vcmask 195584   ;;  %vm435_vm1 = vcmask 1043456   ;;  %vm389_vm2 = vcmask 621568   ;;  %vm1557_vm3 = vcmask 1045504   ;;  %s13425_s2 = inlined_call_operand.vmem [shape: f32[5,152,38], index: 2, kind: input, shape index: {}]   ;;  %s13426_s0 = inlined_call_operand.vmem [shape: f32[76,152], index: 0, kind: input, shape index: {}]   ;;  %s13427_s1 = inlined_call_operand.vmem [shape: f32[5,114,76], index: 1, kind: input, shape index: {}]   ;;  %s13428_s3 = inlined_call_operand.vmem [shape: f32[114,1], index: 3, kind: input, shape index: {}]   ;;  %s13429_s6 = inlined_call_operand.vmem [shape: f32[80,1], index: 6, kind: input, shape index: {}]   ;;  %s13430_s5 = inlined_call_operand.vmem [shape: f32[5,38,10], index: 5, kind: input, shape index: {}]   ;;  %s13431_s4 = inlined_call_operand.vmem [shape: f32[5,80,114], index: 4, kind: input, shape index: {}]   ;;  %s13432_s7 = inlined_call_operand.vmem [shape: f32[16,80], index: 7, kind: input, shape index: {}]   ;;  %s13433_s9 = inlined_call_operand.vmem [shape: f32[16,1], index: 9, kind: input, shape index: {}]   ;;  %s13434_s8 = inlined_call_operand.vmem [shape: f32[80,16], index: 8, kind: input, shape index: {}]   ;;  %s13435_s10 = inlined_call_operand.vmem [shape: f32[16,1], index: 10, kind: input, shape index: {}]   ;;  %s13436_s13 = inlined_call_operand.vmem [shape: f32[32,1], index: 13, kind: input, shape index: {}]   ;;  %s13437_s15 = inlined_call_operand.vmem [shape: f32[5,80,1], index: 15, kind: input, shape index: {}]   ;;  %s13438_s11 = inlined_call_operand.vmem [shape: f32[5,32,80], index: 11, kind: input, shape index: {}]   ;;  %s13439_s12 = inlined_call_operand.vmem [shape: f32[5,10,2], index: 12, kind: input, shape index: {}]   ;;  %s13440_s16 = inlined_call_operand.vmem [shape: f32[5,2,10], index: 16, kind: input, shape index: {}]   ;;  %s13441_s14 = inlined_call_operand.vmem [shape: f32[5,80,32], index: 14, kind: input, shape index: {}]   ;;  %s13442_s17 = inlined_call_operand.vmem [shape: f32[16,1], index: 17, kind: input, shape index: {}]   ;;  %s13443_s18 = inlined_call_operand.vmem [shape: f32[16,1], index: 18, kind: input, shape index: {}]   ;;  %s13444_s21 = inlined_call_operand.vmem [shape: f32[114,1], index: 21, kind: input, shape index: {}]   ;;  %s13445_s24 = inlined_call_operand.vmem [shape: f32[75,1], index: 24, kind: input, shape index: {}]   ;;  %s13446_s20 = inlined_call_operand.vmem [shape: f32[5,10,38], index: 20, kind: input, shape index: {}]   ;;  %s13447_s19 = inlined_call_operand.vmem [shape: f32[5,114,80], index: 19, kind: input, shape index: {}]   ;;  %s13448_s23 = inlined_call_operand.vmem [shape: f32[5,38,150], index: 23, kind: input, shape index: {}]   ;;  %s13449_s22 = inlined_call_operand.vmem [shape: f32[5,75,114], index: 22, kind: input, shape index: {}]   ;;  %s13450_s25 = inlined_call_operand.vmem [shape: f32[75,150], index: 25, kind: output, shape index: {}]  }
   0x1   :  { %13461 = sst [smem:[#allocation28_spill]] %s13425_s2  ;;  %vm1511_vm4 = vcmask 310272   ;;  %vm1736_vm5 = vcmask 1041408   ;;  %vm1705_vm6 = vcmask 932864   ;;  %vm2465_vm7 = vcmask 80896  }
   0x2   :  { %13462 = sst [smem:[#allocation29_spill]] %s13426_s0  ;;  %vm2496_vm8 = vcmask 654336   ;;  %vm2629_vm15 = vcmask 130048  }
   0x3   :  { %13463 = sst [smem:[#allocation30_spill]] %s13427_s1 }
   0x4   :  { %13464 = sst [smem:[#allocation31_spill]] %s13428_s3 }
   0x5   :  { %13465 = sst [smem:[#allocation32_spill]] %s13429_s6 }
   0x6   :  { %13466 = sst [smem:[#allocation33_spill]] %s13430_s5 }
   0x7   :  { %13467 = sst [smem:[#allocation34_spill]] %s13431_s4 }
   0x8   :  { %13468 = sst [smem:[#allocation35_spill]] %s13432_s7 }
   0x9   :  { %13469 = sst [smem:[#allocation36_spill]] %s13433_s9 }
   0xa   :  { %13470 = sst [smem:[#allocation37_spill]] %s13434_s8 }
   0xb   :  { %s13471_s4 = sld [smem:[#allocation28_spill]] }
   0xc   :  { %s13472_s29 = sld [smem:[#allocation29_spill]] }
   0xd   :  { %s13473_s27 = sld [smem:[#allocation30_spill]] }
   0xe   :  { %s13474_s5 = sld [smem:[#allocation31_spill]] }
   0xf   :  { %s13475_s26 = sld [smem:[#allocation32_spill]] }
  0x10   :  { %s13476_s6 = sld [smem:[#allocation33_spill]] }
  0x11   :  { %v130_v0 = vld [vmem:[%s13471_s4 + $0x78] sm:$0xff]  ;;  %v133_v1 = vld [vmem:[%s13471_s4 + $0x90] sm:$0xff]  ;;  %v132_v3 = vld [vmem:[%s13471_s4 + $0x88] sm:$0xff]  ;;  %s13477_s3 = sld [smem:[#allocation34_spill]] }
  0x12   :  { %v129_v2 = vld [vmem:[%s13471_s4 + $0x70] sm:$0xff]  ;;  %8905 = vmatpush.msra.mxu2 %v130_v0  ;;  %225 = vmatpush.msra.mxu1 %v133_v1  ;;  %v128_v4 = vld [vmem:[%s13471_s4 + $0x68] sm:$0xff]  ;;  %v131_v5 = vld [vmem:[%s13471_s4 + $0x80] sm:$0xff]  ;;  %s13478_s0 = sld [smem:[#allocation35_spill]] }
  0x13   :  { %165 = vmatpush.msra.mxu0 %v130_v0  ;;  %v9110_v6 = vld [vmem:[%s13472_s29 + $0x8] sm:$0xff]  ;;  %v127_v7 = vld [vmem:[%s13471_s4 + $0x60] sm:$0xff]  ;;  %v126_v8 = vld [vmem:[%s13471_s4 + $0x58] sm:$0xff]  ;;  %s13479_s28 = sld [smem:[#allocation36_spill]] }
  0x14   :  { %8906 = vmatpush.msra.mxu2 %v129_v2  ;;  %226 = vmatpush.msra.mxu1 %v132_v3  ;;  %v125_v9 = vld [vmem:[%s13471_s4 + $0x50] sm:$0xff]  ;;  %v124_v10 = vld [vmem:[%s13471_s4 + $0x48] sm:$0xff]  ;;  %v9129_v11 = vld [vmem:[%s13472_s29 + $0x18] sm:$0xff]  ;;  %s13480_s30 = sld [smem:[#allocation37_spill]] }
  0x15   :  { %166 = vmatpush.msra.mxu0 %v129_v2  ;;  %v123_v12 = vld [vmem:[%s13471_s4 + $0x40] sm:$0xff]  ;;  %v122_v13 = vld [vmem:[%s13471_s4 + $0x38] sm:$0xff]  ;;  %v121_v14 = vld [vmem:[%s13471_s4 + $0x30] sm:$0xff] }
  0x16   :  { %8907 = vmatpush.msra.mxu2 %v128_v4  ;;  %227 = vmatpush.msra.mxu1 %v131_v5  ;;  %v120_v15 = vld [vmem:[%s13471_s4 + $0x28] sm:$0xff]  ;;  %v119_v17 = vld [vmem:[%s13471_s4 + $0x20] sm:$0xff]  ;;  %v118_v18 = vld [vmem:[%s13471_s4 + $0x18] sm:$0xff] }
  0x17   :  { %7670 = vmatmul.msk.f32.vlgmr.msra.gmra.mxu1 %vm134_vm0, %v9110_v6  ;;  %167 = vmatpush.msra.mxu0 %v128_v4  ;;  %v9148_v16 = vld [vmem:[%s13472_s29 + $0x28] sm:$0xff]  ;;  %v117_v19 = vld [vmem:[%s13471_s4 + $0x10] sm:$0xff]  ;;  %v9167_v21 = vld [vmem:[%s13472_s29 + $0x38] sm:$0xff] }
  0x18   :  { %8908 = vmatpush.msra.mxu2 %v127_v7  ;;  %v116_v20 = vld [vmem:[%s13471_s4 + $0x8] sm:$0xff]  ;;  %v115_v22 = vld [vmem:[%s13471_s4] sm:$0xff]  ;;  %v7710_v24 = vld [vmem:[%s13471_s4 + $0x110] sm:$0xff] }
  0x19   :  { %168 = vmatpush.msra.mxu0 %v127_v7  ;;  %v9175_v23 = vld [vmem:[%s13472_s29 + $0x40] sm:$0xff]  ;;  %v7709_v25 = vld [vmem:[%s13471_s4 + $0x108] sm:$0xff]  ;;  %v7707_v28 = vld [vmem:[%s13471_s4 + $0xf8] sm:$0xff] }
  0x1a   :  { %8909 = vmatpush.msra.mxu2 %v126_v8  ;;  %v7708_v26 = vld [vmem:[%s13471_s4 + $0x100] sm:$0xff]  ;;  %v9192_v27 = vld [vmem:[%s13472_s29 + $0x48] sm:$0xff]  ;;  %v9200_v29 = vld [vmem:[%s13472_s29 + $0x50] sm:$0xff] }
  0x1b   :  { %169 = vmatpush.msra.mxu0 %v126_v8  ;;  %v7706_v30 = vld [vmem:[%s13471_s4 + $0xf0] sm:$0xff]  ;;  %v7705_v31 = vld [vmem:[%s13471_s4 + $0xe8] sm:$0xff]  ;;  %v7712_v33 = vld [vmem:[%s13471_s4 + $0x120] sm:$0xff] }
  0x1c   :  { %8910 = vmatpush.msra.mxu2 %v125_v9  ;;  %v7713_v32 = vld [vmem:[%s13471_s4 + $0x128] sm:$0xff]  ;;  %v7704_v34 = vld [vmem:[%s13471_s4 + $0xe0] sm:$0xff]  ;;  %v9223_v35 = vld [vmem:[%s13472_s29 + $0x58] sm:$0xff] }
  0x1d   :  { %170 = vmatpush.msra.mxu0 %v125_v9  ;;  %355 = vmatpush.msra.mxu3 %v7713_v32  ;;  %v7703_v36 = vld [vmem:[%s13471_s4 + $0xd8] sm:$0xff]  ;;  %v9231_v37 = vld [vmem:[%s13472_s29 + $0x60] sm:$0xff]  ;;  %v7702_v38 = vld [vmem:[%s13471_s4 + $0xd0] sm:$0xff] }
  0x1e   :  { %8911 = vmatpush.msra.mxu2 %v124_v10  ;;  %v7711_v39 = vld [vmem:[%s13471_s4 + $0x118] sm:$0xff]  ;;  %v7701_v40 = vld [vmem:[%s13471_s4 + $0xc8] sm:$0xff]  ;;  %v9248_v41 = vld [vmem:[%s13472_s29] sm:$0xff] }
  0x1f   :  { %7671 = vmatmul.msk.f32.gmra.mxu1 %vm134_vm0, %v9129_v11  ;;  %171 = vmatpush.msra.mxu0 %v124_v10  ;;  %v7700_v42 = vld [vmem:[%s13471_s4 + $0xc0] sm:$0xff]  ;;  %v9259_v43 = vld [vmem:[%s13472_s29 + $0x68] sm:$0xff]  ;;  %v7699_v44 = vld [vmem:[%s13471_s4 + $0xb8] sm:$0xff] }
  0x20   :  { %8912 = vmatpush.msra.mxu2 %v123_v12  ;;  %356 = vmatpush.msra.mxu3 %v7712_v33  ;;  %v9267_v45 = vld [vmem:[%s13472_s29 + $0x70] sm:$0xff]  ;;  %v7697_v47 = vld [vmem:[%s13471_s4 + $0xa8] sm:$0xff]  ;;  %v7696_v49 = vld [vmem:[%s13471_s4 + $0xa0] sm:$0xff] }
  0x21   :  { %172 = vmatpush.msra.mxu0 %v123_v12  ;;  %v7698_v46 = vld [vmem:[%s13471_s4 + $0xb0] sm:$0xff]  ;;  %v9292_v50 = vld [vmem:[%s13472_s29 + $0x78] sm:$0xff]  ;;  %v9300_v52 = vld [vmem:[%s13472_s29 + $0x80] sm:$0xff] }
  0x22   :  { %8913 = vmatpush.msra.mxu2 %v122_v13  ;;  %357 = vmatpush.msra.mxu3 %v7711_v39  ;;  %v9281_v48 = vld [vmem:[%s13472_s29 + $0x10] sm:$0xff]  ;;  %v7695_v51 = vld [vmem:[%s13471_s4 + $0x98] sm:$0xff]  ;;  %v9308_v53 = vld [vmem:[%s13472_s29 + $0x20] sm:$0xff] }
  0x23   :  { %173 = vmatpush.msra.mxu0 %v122_v13  ;;  %7714 = vmatmul.msk.f32.vlgmr.msra.gmra.mxu3 %vm134_vm0, %v9110_v6  ;;  %v9316_v54 = vld [vmem:[%s13472_s29 + $0x88] sm:$0xff]  ;;  %v9321_v55 = vld [vmem:[%s13472_s29 + $0x90] sm:$0xf]  ;;  %v9337_v57 = vld [vmem:[%s13472_s29 + $0x98] sm:$0xf] }
  0x24   :  { %8914 = vmatpush.msra.mxu2 %v121_v14  ;;  %v9329_v56 = vld [vmem:[%s13472_s29 + $0x30] sm:$0xff]  ;;  %v7784_v33 = vld [vmem:[%s13471_s4 + $0x198] sm:$0xff]  ;;  %v7782_v39 = vld [vmem:[%s13471_s4 + $0x188] sm:$0xff] }
  0x25   :  { %174 = vmatpush.msra.mxu0 %v121_v14 }
  0x26   :  { %8915 = vmatpush.msra.mxu2 %v120_v15 }
  0x27   :  { %7672 = vmatmul.msk.f32.gmra.mxu1 %vm134_vm0, %v9148_v16  ;;  %175 = vmatpush.msra.mxu0 %v120_v15 }
  0x28   :  { %8916 = vmatpush.msra.mxu2 %v119_v17 }
  0x29   :  { %176 = vmatpush.msra.mxu0 %v119_v17 }
  0x2a   :  { %8917 = vmatpush.msra.mxu2 %v118_v18 }
  0x2b   :  { %177 = vmatpush.msra.mxu0 %v118_v18  ;;  %7715 = vmatmul.msk.f32.gmra.mxu3 %vm134_vm0, %v9129_v11 }
  0x2c   :  { %8918 = vmatpush.msra.mxu2 %v117_v19 }
  0x2d   :  { %178 = vmatpush.msra.mxu0 %v117_v19 }
  0x2e   :  { %8919 = vmatpush.msra.mxu2 %v116_v20 }
  0x2f   :  { %7673 = vmatmul.msk.f32.gmra.mxu1 %vm134_vm0, %v9167_v21  ;;  %179 = vmatpush.msra.mxu0 %v116_v20 }
  0x30   :  { %8920 = vmatpush.msra.mxu2 %v115_v22 }
  0x31   :  { %193 = vmatmul.f32.vlgmr.msra.gmra.mxu2 %v9175_v23  ;;  %180 = vmatpush.msra.mxu0 %v115_v22 }
  0x32   :  { %295 = vmatpush.msrb.mxu2 %v7710_v24  ;;  %181 = vmatmul.f32.vlgmr.msra.gmra.mxu0 %v9248_v41 }
  0x33   :  { %7716 = vmatmul.msk.f32.gmra.mxu3 %vm134_vm0, %v9148_v16 }
  0x34   :  { %296 = vmatpush.msrb.mxu2 %v7709_v25 }
  0x36   :  { %297 = vmatpush.msrb.mxu2 %v7708_v26 }
  0x37   :  { %7674 = vmatmul.msk.f32.gmra.mxu1 %vm134_vm0, %v9192_v27 }
  0x38   :  { %298 = vmatpush.msrb.mxu2 %v7707_v28 }
  0x39   :  { %196 = vmatmul.f32.gmra.mxu2 %v9200_v29 }
  0x3a   :  { %299 = vmatpush.msrb.mxu2 %v7706_v30  ;;  %184 = vmatmul.f32.gmra.mxu0 %v9281_v48  ;;  %v7786_v30 = vld [vmem:[%s13471_s4 + $0x1a8] sm:$0xff] }
  0x3b   :  { %7717 = vmatmul.msk.f32.gmra.mxu3 %vm134_vm0, %v9167_v21  ;;  %647 = vmatpush.msrb.mxu0 %v7786_v30 }
  0x3c   :  { %300 = vmatpush.msrb.mxu2 %v7705_v31  ;;  %v7785_v31 = vld [vmem:[%s13471_s4 + $0x1a0] sm:$0xff] }
  0x3d   :  { %648 = vmatpush.msrb.mxu0 %v7785_v31  ;;  %v101_v31 = vld [vmem:[%s13473_s27 + $0x8] sm:$0xff] }
  0x3e   :  { %301 = vmatpush.msrb.mxu2 %v7704_v34 }
  0x3f   :  { %7675 = vmatmul.msk.f32.gmra.mxu1 %vm134_vm0, %v9223_v35  ;;  %649 = vmatpush.msrb.mxu0 %v7784_v33 }
  0x40   :  { %302 = vmatpush.msrb.mxu2 %v7703_v36  ;;  %v7783_v36 = vld [vmem:[%s13471_s4 + $0x190] sm:$0xff] }
  0x41   :  { %199 = vmatmul.f32.gmra.mxu2 %v9231_v37  ;;  %650 = vmatpush.msrb.mxu0 %v7783_v36  ;;  %v102_v36 = vld [vmem:[%s13473_s27 + $0x10] sm:$0xff] }
  0x42   :  { %303 = vmatpush.msrb.mxu2 %v7702_v38  ;;  %187 = vmatmul.f32.gmra.mxu0 %v9308_v53 }
  0x43   :  { %7718 = vmatmul.msk.f32.gmra.mxu3 %vm134_vm0, %v9192_v27  ;;  %651 = vmatpush.msrb.mxu0 %v7782_v39 }
  0x44   :  { %304 = vmatpush.msrb.mxu2 %v7701_v40  ;;  %v7781_v40 = vld [vmem:[%s13471_s4 + $0x180] sm:$0xff] }
  0x45   :  { %652 = vmatpush.msrb.mxu0 %v7781_v40 }
  0x46   :  { %305 = vmatpush.msrb.mxu2 %v7700_v42 }
  0x47   :  { %7676 = vmatmul.msk.f32.gmra.mxu1 %vm134_vm0, %v9259_v43 }
  0x48   :  { %306 = vmatpush.msrb.mxu2 %v7699_v44  ;;  %v7780_v44 = vld [vmem:[%s13471_s4 + $0x178] sm:$0xff] }
  0x49   :  { %202 = vmatmul.f32.gmra.mxu2 %v9267_v45  ;;  %653 = vmatpush.msrb.mxu0 %v7780_v44 }
  0x4a   :  { %307 = vmatpush.msrb.mxu2 %v7698_v46  ;;  %190 = vmatmul.f32.gmra.mxu0 %v9329_v56  ;;  %v7779_v46 = vld [vmem:[%s13471_s4 + $0x170] sm:$0xff] }
  0x4b   :  { %7719 = vmatmul.msk.f32.gmra.mxu3 %vm134_vm0, %v9223_v35  ;;  %654 = vmatpush.msrb.mxu0 %v7779_v46  ;;  %v103_v46 = vld [vmem:[%s13473_s27 + $0x18] sm:$0xff] }
  0x4c   :  { %308 = vmatpush.msrb.mxu2 %v7697_v47 }
  0x4e   :  { %309 = vmatpush.msrb.mxu2 %v7696_v49 }
  0x4f   :  { %7677 = vmatmul.msk.f32.gmra.mxu1 %vm134_vm0, %v9292_v50 }
  0x50   :  { %310 = vmatpush.msrb.mxu2 %v7695_v51  ;;  %v7778_v51 = vld [vmem:[%s13471_s4 + $0x168] sm:$0xff] }
  0x51   :  { %205 = vmatmul.f32.gmra.mxu2 %v9300_v52  ;;  %655 = vmatpush.msrb.mxu0 %v7778_v51 }
  0x53   :  { %7720 = vmatmul.msk.f32.gmra.mxu3 %vm134_vm0, %v9259_v43 }
  0x57   :  { %7678 = vmatmul.msk.f32.gmra.mxu1 %vm134_vm0, %v9316_v54 }
  0x59   :  { %208 = vmatmul.f32.gmra.mxu2 %v9321_v55 }
  0x5b   :  { %7721 = vmatmul.msk.f32.gmra.mxu3 %vm134_vm0, %v9292_v50 }
  0x5f   :  { %7679 = vmatmul.msk.f32.gmra.mxu1 %vm134_vm0, %v9337_v57 }
  0x61   :  { %311 = vmatmul.f32.vlgmr.msrb.gmra.mxu2 %v9248_v41 }
  0x63   :  { %7722 = vmatmul.msk.f32.gmra.mxu3 %vm134_vm0, %v9316_v54 }
  0x69   :  { %314 = vmatmul.f32.gmra.mxu2 %v9281_v48 }
  0x6b   :  { %7723 = vmatmul.msk.f32.gmra.mxu3 %vm134_vm0, %v9337_v57 }
  0x71   :  { %317 = vmatmul.f32.gmra.mxu2 %v9308_v53 }
  0x79   :  { %320 = vmatmul.f32.gmra.mxu2 %v9329_v56 }
  0x81   :  { %323 = vmatmul.f32.gmra.mxu2 %v9175_v23 }
  0x89   :  { %326 = vmatmul.f32.gmra.mxu2 %v9200_v29 }
  0x91   :  { %329 = vmatmul.f32.gmra.mxu2 %v9231_v37 }
  0x94   :  { %v9360_v58 = vpop.f32.mrf.mxu1 }
  0x99   :  { %332 = vmatmul.f32.gmra.mxu2 %v9267_v45 }
  0x9c   :  { %v9363_v59 = vpop.f32.mrf.mxu1 }
  0xa1   :  { %335 = vmatmul.f32.gmra.mxu2 %v9300_v52 }
  0xa4   :  { %v9366_v60 = vpop.f32.mrf.mxu1 }
  0xa6   :  { %v9371_v7 = vpop.f32.mrf.mxu3 }
  0xa9   :  { %338 = vmatmul.f32.gmra.mxu2 %v9321_v55 }
  0xac   :  { %v9369_v61 = vpop.f32.mrf.mxu1 }
  0xae   :  { %v9373_v10 = vpop.f32.mrf.mxu3 }
  0xaf   :  { %v182_v32 = vpop.f32.mrf.mxu0 }
  0xb4   :  { %v194_v62 = vpop.f32.mrf.mxu2  ;;  %v241_v63 = vpop.f32.mrf.mxu1 }
  0xb5   :  { %v242_v24 = vadd.f32 %v241_v63, %v194_v62  ;;  %v7777_v62 = vld [vmem:[%s13471_s4 + $0x160] sm:$0xff]  ;;  %v7776_v63 = vld [vmem:[%s13471_s4 + $0x158] sm:$0xff] }
  0xb6   :  { %v9378_v20 = vpop.f32.mrf.mxu3  ;;  %656 = vmatpush.msrb.mxu0 %v7777_v62 }
  0xb7   :  { %v185_v42 = vpop.f32.mrf.mxu0 }
  0xb8   :  { %657 = vmatpush.msrb.mxu0 %v7776_v63 }
  0xbc   :  { %v197_v0 = vpop.f32.mrf.mxu2  ;;  %v244_v1 = vpop.f32.mrf.mxu1 }
  0xbd   :  { %v245_v22 = vadd.f32 %v244_v1, %v197_v0  ;;  %v7775_v1 = vld [vmem:[%s13471_s4 + $0x150] sm:$0xff] }
  0xbe   :  { %v9382_v26 = vpop.f32.mrf.mxu3  ;;  %658 = vmatpush.msrb.mxu0 %v7775_v1  ;;  %v104_v1 = vld [vmem:[%s13473_s27 + $0x20] sm:$0xff] }
  0xbf   :  { %v188_v0 = vpop.f32.mrf.mxu0 }
  0xc4   :  { %v200_v2 = vpop.f32.mrf.mxu2  ;;  %v247_v3 = vpop.f32.mrf.mxu1 }
  0xc5   :  { %v248_v18 = vadd.f32 %v247_v3, %v200_v2 }
  0xc6   :  { %v9395_v34 = vpop.f32.mrf.mxu3 }
  0xcc   :  { %v203_v4 = vpop.f32.mrf.mxu2  ;;  %v250_v5 = vpop.f32.mrf.mxu1 }
  0xcd   :  { %v251_v17 = vadd.f32 %v250_v5, %v203_v4  ;;  %v7774_v4 = vld [vmem:[%s13471_s4 + $0x148] sm:$0xff]  ;;  %v7773_v5 = vld [vmem:[%s13471_s4 + $0x140] sm:$0xff] }
  0xce   :  { %v9414_v47 = vpop.f32.mrf.mxu3  ;;  %659 = vmatpush.msrb.mxu0 %v7774_v4  ;;  %v7685_v4 = vld [vmem:[%s13473_s27 + $0xa0] sm:$0xff] }
  0xd0   :  { %660 = vmatpush.msrb.mxu0 %v7773_v5  ;;  %v110_v5 = vld [vmem:[%s13473_s27 + $0x50] sm:$0xff] }
  0xd4   :  { %v206_v8 = vpop.f32.mrf.mxu2  ;;  %v253_v9 = vpop.f32.mrf.mxu1 }
  0xd5   :  { %v254_v15 = vadd.f32 %v253_v9, %v206_v8  ;;  %v7772_v8 = vld [vmem:[%s13471_s4 + $0x138] sm:$0xff]  ;;  %v191_v9 = vpop.f32.mrf.mxu0 }
  0xd6   :  { %v377_v3 = vpop.f32.mrf.mxu3  ;;  %661 = vmatpush.msrb.mxu0 %v7772_v8  ;;  %v7686_v8 = vld [vmem:[%s13473_s27 + $0xa8] sm:$0xff] }
  0xdc   :  { %v209_v12 = vpop.f32.mrf.mxu2  ;;  %v256_v13 = vpop.f32.mrf.mxu1 }
  0xdd   :  { %v257_v14 = vadd.f32 %v256_v13, %v209_v12  ;;  %v7771_v12 = vld [vmem:[%s13471_s4 + $0x130] sm:$0xff]  ;;  %v239_v13 = vadd.f32 %v9369_v61, %v191_v9  ;;  %v7788_v61 = vld [vmem:[%s13471_s4 + $0x1b8] sm:$0xff] }
  0xde   :  { %662 = vmatpush.msrb.mxu0 %v7771_v12  ;;  %v111_v9 = vld [vmem:[%s13473_s27 + $0x58] sm:$0xff]  ;;  %v7687_v12 = vld [vmem:[%s13473_s27 + $0xb0] sm:$0xff] }
  0xdf   :  { %7740 = vmatpush.msk.msrb.mxu3 %vm435_vm1, %v257_v14  ;;  %663 = vmatmul.f32.vlgmr.msrb.gmra.mxu0 %v9248_v41 }
  0xe1   :  { %556 = vmatpush.msrb.mxu3 %v254_v15  ;;  %v236_v15 = vadd.f32 %v9366_v60, %v188_v0  ;;  %v100_v60 = vld [vmem:[%s13473_s27] sm:$0xff] }
  0xe3   :  { %557 = vmatpush.msrb.mxu3 %v251_v17  ;;  %v380_v17 = vpop.f32.mrf.mxu3 }
  0xe4   :  { %v9376_v19 = vpop.f32.mrf.mxu2 }
  0xe5   :  { %558 = vmatpush.msrb.mxu3 %v248_v18  ;;  %v233_v18 = vadd.f32 %v9363_v59, %v185_v42 }
  0xe7   :  { %559 = vmatpush.msrb.mxu3 %v245_v22  ;;  %v7789_v22 = vld [vmem:[%s13471_s4 + $0x1c0] sm:$0xff]  ;;  %666 = vmatmul.f32.gmra.mxu0 %v9281_v48 }
  0xe8   :  { %8921 = vmatpush.msra.mxu2 %v7789_v22 }
  0xe9   :  { %560 = vmatpush.msrb.mxu3 %v242_v24  ;;  %v230_v24 = vadd.f32 %v9360_v58, %v182_v32  ;;  %v7787_v58 = vld [vmem:[%s13471_s4 + $0x1b0] sm:$0xff] }
  0xea   :  { %8922 = vmatpush.msra.mxu2 %v7788_v61 }
  0xeb   :  { %561 = vmatpush.msrb.mxu3 %v239_v13  ;;  %v383_v30 = vpop.f32.mrf.mxu3  ;;  %v112_v13 = vld [vmem:[%s13473_s27 + $0x60] sm:$0xff] }
  0xec   :  { %v9380_v25 = vpop.f32.mrf.mxu2  ;;  %8923 = vmatpush.msra.mxu2 %v7787_v58 }
  0xed   :  { %562 = vmatpush.msrb.mxu3 %v236_v15  ;;  %7792 = vmatmul.msk.f32.vlgmr.msra.gmra.mxu2 %vm134_vm0, %v9148_v16  ;;  %v113_v15 = vld [vmem:[%s13473_s27 + $0x68] sm:$0xff] }
  0xef   :  { %563 = vmatpush.msrb.mxu3 %v233_v18  ;;  %669 = vmatmul.f32.gmra.mxu0 %v9308_v53  ;;  %v7845_v18 = vld [vmem:[%s13471_s4 + $0x238] sm:$0xff] }
  0xf1   :  { %564 = vmatpush.msrb.mxu3 %v230_v24  ;;  %v7689_v24 = vld [vmem:[%s13473_s27 + $0xc0] sm:$0xff] }
  0xf2   :  { %7741 = vmatmul.msk.f32.vlgmr.msrb.gmra.mxu3 %vm389_vm2, %v100_v60  ;;  %v114_v60 = vld [vmem:[%s13473_s27 + $0x70] sm:$0x3] }
  0xf3   :  { %v386_v33 = vpop.f32.mrf.mxu3 }
  0xf4   :  { %v9384_v28 = vpop.f32.mrf.mxu2 }
  0xf5   :  { %7793 = vmatmul.msk.f32.gmra.mxu2 %vm134_vm0, %v9167_v21 }
  0xf7   :  { %672 = vmatmul.f32.gmra.mxu0 %v9329_v56 }
  0xfa   :  { %7742 = vmatmul.msk.f32.gmra.mxu3 %vm389_vm2, %v101_v31  ;;  %v7690_v31 = vld [vmem:[%s13473_s27 + $0xc8] sm:$0xff] }
  0xfc   :  { %v9400_v38 = vpop.f32.mrf.mxu2 }
  0xfd   :  { %7794 = vmatmul.msk.f32.gmra.mxu2 %vm134_vm0, %v9192_v27  ;;  %v369_v0 = vadd.f32 %v9382_v26, %v9400_v38  ;;  %v360_v26 = vadd.f32 %v9371_v7, %v9376_v19  ;;  %v7680_v38 = vld [vmem:[%s13473_s27 + $0x78] sm:$0xff]  ;;  %v7681_v7 = vld [vmem:[%s13473_s27 + $0x80] sm:$0xff]  ;;  %v7682_v19 = vld [vmem:[%s13473_s27 + $0x88] sm:$0xff] }
  0xff   :  { %675 = vmatmul.f32.gmra.mxu0 %v9175_v23 }
 0x102   :  { %7743 = vmatmul.msk.f32.gmra.mxu3 %vm389_vm2, %v102_v36  ;;  %v7838_v36 = vld [vmem:[%s13471_s4 + $0x200] sm:$0xff] }
 0x104   :  { %v9416_v49 = vpop.f32.mrf.mxu2 }
 0x105   :  { %7795 = vmatmul.msk.f32.gmra.mxu2 %vm134_vm0, %v9223_v35  ;;  %v372_v63 = vadd.f32 %v9395_v34, %v9416_v49  ;;  %v363_v34 = vadd.f32 %v9373_v10, %v9380_v25  ;;  %v106_v10 = vld [vmem:[%s13473_s27 + $0x30] sm:$0xff]  ;;  %v107_v25 = vld [vmem:[%s13473_s27 + $0x38] sm:$0xff] }
 0x106   :  { %v7684_v49 = vld [vmem:[%s13473_s27 + $0x98] sm:$0xff] }
 0x107   :  { %678 = vmatmul.f32.gmra.mxu0 %v9200_v29 }
 0x10a   :  { %7744 = vmatmul.msk.f32.gmra.mxu3 %vm389_vm2, %v103_v46  ;;  %v7835_v46 = vld [vmem:[%s13471_s4 + $0x1e8] sm:$0xff] }
 0x10c   :  { %v327_v2 = vpop.f32.mrf.mxu2 }
 0x10d   :  { %v375_v62 = vadd.f32 %v9414_v47, %v327_v2  ;;  %7796 = vmatmul.msk.f32.gmra.mxu2 %vm134_vm0, %v9259_v43  ;;  %v108_v47 = vld [vmem:[%s13473_s27 + $0x40] sm:$0xff]  ;;  %v109_v2 = vld [vmem:[%s13473_s27 + $0x48] sm:$0xff] }
 0x10f   :  { %681 = vmatmul.f32.gmra.mxu0 %v9231_v37 }
 0x112   :  { %7745 = vmatmul.msk.f32.gmra.mxu3 %vm389_vm2, %v104_v1 }
 0x114   :  { %v330_v14 = vpop.f32.mrf.mxu2 }
 0x115   :  { %v378_v51 = vadd.f32 %v377_v3, %v330_v14  ;;  %v366_v3 = vadd.f32 %v9378_v20, %v9384_v28  ;;  %v105_v20 = vld [vmem:[%s13473_s27 + $0x28] sm:$0xff]  ;;  %7797 = vmatmul.msk.f32.gmra.mxu2 %vm134_vm0, %v9292_v50  ;;  %v7683_v28 = vld [vmem:[%s13473_s27 + $0x90] sm:$0xff]  ;;  %v7688_v14 = vld [vmem:[%s13473_s27 + $0xb8] sm:$0xff] }
 0x117   :  { %684 = vmatmul.f32.gmra.mxu0 %v9267_v45 }
 0x11a   :  { %7746 = vmatmul.msk.f32.gmra.mxu3 %vm389_vm2, %v105_v20  ;;  %v7693_v20 = vld [vmem:[%s13473_s27 + $0xe0] sm:$0xff] }
 0x11c   :  { %v333_v59 = vpop.f32.mrf.mxu2 }
 0x11d   :  { %v381_v44 = vadd.f32 %v380_v17, %v333_v59  ;;  %7798 = vmatmul.msk.f32.gmra.mxu2 %vm134_vm0, %v9316_v54  ;;  %v7846_v17 = vld [vmem:[%s13471_s4 + $0x240] sm:$0xff] }
 0x11e   :  { %902 = vmatpush.msrb.mxu2 %v7846_v17  ;;  %v7842_v59 = vld [vmem:[%s13471_s4 + $0x220] sm:$0xff] }
 0x11f   :  { %687 = vmatmul.f32.gmra.mxu0 %v9300_v52 }
 0x120   :  { %903 = vmatpush.msrb.mxu2 %v7845_v18  ;;  %v7906_v18 = vld [vmem:[%s13471_s4 + $0x2d8] sm:$0xff] }
 0x122   :  { %7747 = vmatmul.msk.f32.gmra.mxu3 %vm389_vm2, %v106_v10 }
 0x124   :  { %v336_v32 = vpop.f32.mrf.mxu2 }
 0x125   :  { %v384_v42 = vadd.f32 %v383_v30, %v336_v32  ;;  %7799 = vmatmul.msk.f32.gmra.mxu2 %vm134_vm0, %v9337_v57  ;;  %v7840_v30 = vld [vmem:[%s13471_s4 + $0x210] sm:$0xff] }
 0x127   :  { %690 = vmatmul.f32.gmra.mxu0 %v9321_v55 }
 0x12a   :  { %7748 = vmatmul.msk.f32.gmra.mxu3 %vm389_vm2, %v107_v25  ;;  %v7694_v25 = vld [vmem:[%s13473_s27 + $0xe8] sm:$0x3] }
 0x12c   :  { %v339_v39 = vpop.f32.mrf.mxu2 }
 0x12d   :  { %v387_v40 = vadd.f32 %v386_v33, %v339_v39  ;;  %v7839_v33 = vld [vmem:[%s13471_s4 + $0x208] sm:$0xff]  ;;  %v7837_v39 = vld [vmem:[%s13471_s4 + $0x1f8] sm:$0xff] }
 0x12f   :  { %7724 = vmatpush.msk.msrb.mxu1 %vm435_vm1, %v387_v40  ;;  %v7836_v40 = vld [vmem:[%s13471_s4 + $0x1f0] sm:$0xff] }
 0x131   :  { %446 = vmatpush.msrb.mxu1 %v384_v42  ;;  %v7691_v42 = vld [vmem:[%s13473_s27 + $0xd0] sm:$0xff] }
 0x132   :  { %7749 = vmatmul.msk.f32.gmra.mxu3 %vm389_vm2, %v108_v47 }
 0x133   :  { %447 = vmatpush.msrb.mxu1 %v381_v44 }
 0x135   :  { %448 = vmatpush.msrb.mxu1 %v378_v51  ;;  %v7834_v51 = vld [vmem:[%s13471_s4 + $0x1e0] sm:$0xff] }
 0x137   :  { %449 = vmatpush.msrb.mxu1 %v375_v62  ;;  %v7833_v62 = vld [vmem:[%s13471_s4 + $0x1d8] sm:$0xff] }
 0x139   :  { %450 = vmatpush.msrb.mxu1 %v372_v63  ;;  %v7692_v63 = vld [vmem:[%s13473_s27 + $0xd8] sm:$0xff] }
 0x13a   :  { %7750 = vmatmul.msk.f32.gmra.mxu3 %vm389_vm2, %v109_v2 }
 0x13b   :  { %451 = vmatpush.msrb.mxu1 %v369_v0  ;;  %v7832_v0 = vld [vmem:[%s13471_s4 + $0x1d0] sm:$0xff] }
 0x13d   :  { %452 = vmatpush.msrb.mxu1 %v366_v3 }
 0x13f   :  { %453 = vmatpush.msrb.mxu1 %v363_v34  ;;  %v7831_v34 = vld [vmem:[%s13471_s4 + $0x1c8] sm:$0xff] }
 0x141   :  { %454 = vmatpush.msrb.mxu1 %v360_v26  ;;  %v7849_v26 = vld [vmem:[%s13471_s4 + $0x258] sm:$0xff] }
 0x142   :  { %7725 = vmatmul.msk.f32.vlgmr.msrb.gmra.mxu1 %vm389_vm2, %v7680_v38  ;;  %7751 = vmatmul.msk.f32.gmra.mxu3 %vm389_vm2, %v110_v5  ;;  %v7848_v38 = vld [vmem:[%s13471_s4 + $0x250] sm:$0xff] }
 0x143   :  { %707 = vmatpush.msra.mxu1 %v7789_v22  ;;  %v7844_v22 = vld [vmem:[%s13471_s4 + $0x230] sm:$0xff] }
 0x144   :  { %904 = vmatpush.msrb.mxu2 %v7844_v22  ;;  %v7905_v22 = vld [vmem:[%s13471_s4 + $0x2d0] sm:$0xff] }
 0x145   :  { %708 = vmatpush.msra.mxu1 %v7788_v61  ;;  %v7843_v61 = vld [vmem:[%s13471_s4 + $0x228] sm:$0xff] }
 0x146   :  { %905 = vmatpush.msrb.mxu2 %v7843_v61  ;;  %v7904_v61 = vld [vmem:[%s13471_s4 + $0x2c8] sm:$0xff] }
 0x147   :  { %709 = vmatpush.msra.mxu1 %v7787_v58  ;;  %v7841_v58 = vld [vmem:[%s13471_s4 + $0x218] sm:$0xff] }
 0x148   :  { %906 = vmatpush.msrb.mxu2 %v7842_v59 }
 0x149   :  { %962 = vmatpush.msrb.mxu1 %v7849_v26 }
 0x14a   :  { %7726 = vmatmul.msk.f32.gmra.mxu1 %vm389_vm2, %v7681_v7  ;;  %7752 = vmatmul.msk.f32.gmra.mxu3 %vm389_vm2, %v111_v9  ;;  %v7847_v7 = vld [vmem:[%s13471_s4 + $0x248] sm:$0xff] }
 0x14b   :  { %907 = vmatpush.msrb.mxu2 %v7841_v58  ;;  %963 = vmatpush.msrb.mxu1 %v7848_v38  ;;  %v7897_v38 = vld [vmem:[%s13471_s4 + $0x290] sm:$0xff] }
 0x14d   :  { %908 = vmatpush.msrb.mxu2 %v7840_v30  ;;  %964 = vmatpush.msrb.mxu1 %v7847_v7  ;;  %v7896_v7 = vld [vmem:[%s13471_s4 + $0x288] sm:$0xff] }
 0x14f   :  { %909 = vmatpush.msrb.mxu2 %v7839_v33  ;;  %v7902_v33 = vld [vmem:[%s13471_s4 + $0x2b8] sm:$0xff] }
 0x151   :  { %910 = vmatpush.msrb.mxu2 %v7838_v36 }
 0x152   :  { %7727 = vmatmul.msk.f32.gmra.mxu1 %vm389_vm2, %v7682_v19  ;;  %7753 = vmatmul.msk.f32.gmra.mxu3 %vm389_vm2, %v112_v13 }
 0x153   :  { %911 = vmatpush.msrb.mxu2 %v7837_v39 }
 0x155   :  { %912 = vmatpush.msrb.mxu2 %v7836_v40  ;;  %v7901_v40 = vld [vmem:[%s13471_s4 + $0x2b0] sm:$0xff] }
 0x157   :  { %913 = vmatpush.msrb.mxu2 %v7835_v46 }
 0x159   :  { %914 = vmatpush.msrb.mxu2 %v7834_v51  ;;  %v7900_v51 = vld [vmem:[%s13471_s4 + $0x2a8] sm:$0xff] }
 0x15a   :  { %7728 = vmatmul.msk.f32.gmra.mxu1 %vm389_vm2, %v7683_v28  ;;  %7754 = vmatmul.msk.f32.gmra.mxu3 %vm389_vm2, %v113_v15 }
 0x15b   :  { %915 = vmatpush.msrb.mxu2 %v7833_v62 }
 0x15c   :  { %v9617_v32 = vpop.f32.mrf.mxu0 }
 0x15d   :  { %916 = vmatpush.msrb.mxu2 %v7832_v0  ;;  %v7898_v0 = vld [vmem:[%s13471_s4 + $0x298] sm:$0xff] }
 0x15f   :  { %917 = vmatpush.msrb.mxu2 %v7831_v34 }
 0x160   :  { %918 = vmatmul.f32.vlgmr.msrb.gmra.mxu2 %v9248_v41 }
 0x161   :  { %1157 = vmatpush.msra.mxu2 %v7906_v18 }
 0x162   :  { %7729 = vmatmul.msk.f32.gmra.mxu1 %vm389_vm2, %v7684_v49  ;;  %7755 = vmatmul.msk.f32.gmra.mxu3 %vm389_vm2, %v114_v60 }
 0x163   :  { %1158 = vmatpush.msra.mxu2 %v7905_v22 }
 0x164   :  { %v9635_v44 = vpop.f32.mrf.mxu0 }
 0x165   :  { %1159 = vmatpush.msra.mxu2 %v7904_v61 }
 0x168   :  { %921 = vmatmul.f32.gmra.mxu2 %v9281_v48 }
 0x16a   :  { %7730 = vmatmul.msk.f32.gmra.mxu1 %vm389_vm2, %v7685_v4 }
 0x16c   :  { %v9653_v1 = vpop.f32.mrf.mxu0 }
 0x170   :  { %v9655_v3 = vpop.f32.mrf.mxu2  ;;  %924 = vmatmul.f32.gmra.mxu2 %v9308_v53 }
 0x171   :  { %v718_v26 = vadd.f32 %v9655_v3, %v9653_v1  ;;  %v7895_v1 = vld [vmem:[%s13471_s4 + $0x280] sm:$0xff]  ;;  %v7894_v3 = vld [vmem:[%s13471_s4 + $0x278] sm:$0xff] }
 0x172   :  { %7731 = vmatmul.msk.f32.gmra.mxu1 %vm389_vm2, %v7686_v8 }
 0x174   :  { %v9674_v10 = vpop.f32.mrf.mxu0 }
 0x178   :  { %v720_v19 = vpop.f32.mrf.mxu2  ;;  %927 = vmatmul.f32.gmra.mxu2 %v9329_v56 }
 0x179   :  { %v721_v34 = vadd.f32 %v720_v19, %v9674_v10  ;;  %v7893_v10 = vld [vmem:[%s13471_s4 + $0x270] sm:$0xff] }
 0x17a   :  { %7732 = vmatmul.msk.f32.gmra.mxu1 %vm389_vm2, %v7687_v12 }
 0x17c   :  { %v676_v28 = vpop.f32.mrf.mxu0 }
 0x180   :  { %v723_v47 = vpop.f32.mrf.mxu2  ;;  %930 = vmatmul.f32.gmra.mxu2 %v9175_v23 }
 0x181   :  { %v724_v62 = vadd.f32 %v723_v47, %v676_v28  ;;  %v7891_v28 = vld [vmem:[%s13471_s4 + $0x260] sm:$0xff]  ;;  %v7909_v47 = vld [vmem:[%s13471_s4 + $0x2f0] sm:$0xff] }
 0x182   :  { %7733 = vmatmul.msk.f32.gmra.mxu1 %vm389_vm2, %v7688_v14 }
 0x184   :  { %v679_v49 = vpop.f32.mrf.mxu0 }
 0x188   :  { %v726_v2 = vpop.f32.mrf.mxu2  ;;  %933 = vmatmul.f32.gmra.mxu2 %v9200_v29 }
 0x189   :  { %v727_v46 = vadd.f32 %v726_v2, %v679_v49  ;;  %v7908_v49 = vld [vmem:[%s13471_s4 + $0x2e8] sm:$0xff] }
 0x18a   :  { %7734 = vmatmul.msk.f32.gmra.mxu1 %vm389_vm2, %v7689_v24 }
 0x18c   :  { %v682_v5 = vpop.f32.mrf.mxu0 }
 0x190   :  { %v729_v8 = vpop.f32.mrf.mxu2  ;;  %936 = vmatmul.f32.gmra.mxu2 %v9231_v37 }
 0x191   :  { %v730_v39 = vadd.f32 %v729_v8, %v682_v5  ;;  %v7907_v5 = vld [vmem:[%s13471_s4 + $0x2e0] sm:$0xff] }
 0x192   :  { %7735 = vmatmul.msk.f32.gmra.mxu1 %vm389_vm2, %v7690_v31  ;;  %v7903_v31 = vld [vmem:[%s13471_s4 + $0x2c0] sm:$0xff] }
 0x193   :  { %1160 = vmatpush.msra.mxu2 %v7903_v31 }
 0x194   :  { %v685_v12 = vpop.f32.mrf.mxu0 }
 0x195   :  { %1161 = vmatpush.msra.mxu2 %v7902_v33  ;;  %v7763_v33 = vld [vmem:[%s13473_s27 + $0x128] sm:$0xff] }
 0x197   :  { %1162 = vmatpush.msra.mxu2 %v7901_v40 }
 0x198   :  { %v732_v13 = vpop.f32.mrf.mxu2  ;;  %939 = vmatmul.f32.gmra.mxu2 %v9267_v45 }
 0x199   :  { %v733_v36 = vadd.f32 %v732_v13, %v685_v12  ;;  %1163 = vmatpush.msra.mxu2 %v7900_v51  ;;  %v7765_v51 = vld [vmem:[%s13473_s27 + $0x138] sm:$0xff] }
 0x19a   :  { %7736 = vmatmul.msk.f32.gmra.mxu1 %vm389_vm2, %v7691_v42 }
 0x19c   :  { %v688_v15 = vpop.f32.mrf.mxu0 }
 0x1a0   :  { %v735_v17 = vpop.f32.mrf.mxu2  ;;  %942 = vmatmul.f32.gmra.mxu2 %v9300_v52 }
 0x1a1   :  { %v736_v58 = vadd.f32 %v735_v17, %v688_v15 }
 0x1a2   :  { %7737 = vmatmul.msk.f32.gmra.mxu1 %vm389_vm2, %v7692_v63  ;;  %v7899_v63 = vld [vmem:[%s13471_s4 + $0x2a0] sm:$0xff] }
 0x1a3   :  { %1164 = vmatpush.msra.mxu2 %v7899_v63 }
 0x1a4   :  { %v691_v60 = vpop.f32.mrf.mxu0 }
 0x1a5   :  { %1165 = vmatpush.msra.mxu2 %v7898_v0 }
 0x1a7   :  { %1166 = vmatpush.msra.mxu2 %v7897_v38 }
 0x1a8   :  { %v738_v59 = vpop.f32.mrf.mxu2  ;;  %945 = vmatmul.f32.gmra.mxu2 %v9321_v55 }
 0x1a9   :  { %v739_v30 = vadd.f32 %v738_v59, %v691_v60  ;;  %1167 = vmatpush.msra.mxu2 %v7896_v7 }
 0x1aa   :  { %7738 = vmatmul.msk.f32.gmra.mxu1 %vm389_vm2, %v7693_v20 }
 0x1ab   :  { %7800 = vmatpush.msk.msra.mxu0 %vm435_vm1, %v739_v30  ;;  %1168 = vmatpush.msra.mxu2 %v7895_v1 }
 0x1ad   :  { %796 = vmatpush.msra.mxu0 %v736_v58  ;;  %1169 = vmatpush.msra.mxu2 %v7894_v3 }
 0x1af   :  { %797 = vmatpush.msra.mxu0 %v733_v36  ;;  %1170 = vmatpush.msra.mxu2 %v7893_v10 }
 0x1b1   :  { %798 = vmatpush.msra.mxu0 %v730_v39  ;;  %v7764_v39 = vld [vmem:[%s13473_s27 + $0x130] sm:$0xff] }
 0x1b2   :  { %7739 = vmatmul.msk.f32.gmra.mxu1 %vm389_vm2, %v7694_v25  ;;  %v7892_v25 = vld [vmem:[%s13471_s4 + $0x268] sm:$0xff] }
 0x1b3   :  { %799 = vmatpush.msra.mxu0 %v727_v46  ;;  %1171 = vmatpush.msra.mxu2 %v7892_v25 }
 0x1b5   :  { %800 = vmatpush.msra.mxu0 %v724_v62  ;;  %1172 = vmatpush.msra.mxu2 %v7891_v28  ;;  %v7767_v28 = vld [vmem:[%s13473_s27 + $0x148] sm:$0xff] }
 0x1b6   :  { %1173 = vmatmul.f32.vlgmr.msra.gmra.mxu2 %v9248_v41 }
 0x1b7   :  { %801 = vmatpush.msra.mxu0 %v721_v34 }
 0x1b9   :  { %802 = vmatpush.msra.mxu0 %v718_v26  ;;  %v7766_v26 = vld [vmem:[%s13473_s27 + $0x140] sm:$0xff] }
 0x1ba   :  { %7790 = vmatmul.msk.f32.vlgmr.msra.gmra.mxu1 %vm134_vm0, %v9110_v6 }
 0x1bb   :  { %1217 = vmatpush.msra.mxu1 %v7909_v47 }
 0x1bd   :  { %1218 = vmatpush.msra.mxu1 %v7908_v49 }
 0x1be   :  { %1176 = vmatmul.f32.gmra.mxu2 %v9281_v48 }
 0x1bf   :  { %v9686_v4 = vpop.f32.mrf.mxu1  ;;  %1219 = vmatpush.msra.mxu1 %v7907_v5 }
 0x1c2   :  { %7791 = vmatmul.msk.f32.gmra.mxu1 %vm134_vm0, %v9129_v11 }
 0x1c6   :  { %1179 = vmatmul.f32.gmra.mxu2 %v9308_v53 }
 0x1c7   :  { %v9691_v9 = vpop.f32.mrf.mxu1 }
 0x1ca   :  { %7850 = vmatmul.msk.f32.vlgmr.msrb.gmra.mxu1 %vm134_vm0, %v9110_v6 }
 0x1ce   :  { %1182 = vmatmul.f32.gmra.mxu2 %v9329_v56 }
 0x1cf   :  { %v9696_v14 = vpop.f32.mrf.mxu1 }
 0x1d2   :  { %7851 = vmatmul.msk.f32.gmra.mxu1 %vm134_vm0, %v9129_v11 }
 0x1d6   :  { %1185 = vmatmul.f32.gmra.mxu2 %v9175_v23 }
 0x1d7   :  { %v9707_v24 = vpop.f32.mrf.mxu1 }
 0x1da   :  { %7852 = vmatmul.msk.f32.gmra.mxu1 %vm134_vm0, %v9148_v16 }
 0x1de   :  { %1188 = vmatmul.f32.gmra.mxu2 %v9200_v29 }
 0x1df   :  { %v9725_v42 = vpop.f32.mrf.mxu1 }
 0x1e2   :  { %7853 = vmatmul.msk.f32.gmra.mxu1 %vm134_vm0, %v9167_v21 }
 0x1e3   :  { %v9814_v13 = vpop.f32.mrf.mxu2 }
 0x1e6   :  { %1191 = vmatmul.f32.gmra.mxu2 %v9231_v37 }
 0x1e7   :  { %v9745_v20 = vpop.f32.mrf.mxu1 }
 0x1ea   :  { %7854 = vmatmul.msk.f32.gmra.mxu1 %vm134_vm0, %v9192_v27 }
 0x1ee   :  { %1194 = vmatmul.f32.gmra.mxu2 %v9267_v45 }
 0x1ef   :  { %v9762_v19 = vpop.f32.mrf.mxu1 }
 0x1f2   :  { %7855 = vmatmul.msk.f32.gmra.mxu1 %vm134_vm0, %v9223_v35 }
 0x1f6   :  { %1197 = vmatmul.f32.gmra.mxu2 %v9300_v52 }
 0x1f7   :  { %v9779_v2 = vpop.f32.mrf.mxu1 }
 0x1fa   :  { %7856 = vmatmul.msk.f32.gmra.mxu1 %vm134_vm0, %v9259_v43 }
 0x1fe   :  { %1200 = vmatmul.f32.gmra.mxu2 %v9321_v55  ;;  %v7757_v55 = vld [vmem:[%s13473_s27 + $0xf8] sm:$0xff] }
 0x1ff   :  { %v9787_v8 = vpop.f32.mrf.mxu1 }
 0x202   :  { %7857 = vmatmul.msk.f32.gmra.mxu1 %vm134_vm0, %v9292_v50 }
 0x207   :  { %v9792_v41 = vpop.f32.mrf.mxu1 }
 0x20a   :  { %7858 = vmatmul.msk.f32.gmra.mxu1 %vm134_vm0, %v9316_v54 }
 0x20f   :  { %v9797_v12 = vpop.f32.mrf.mxu1 }
 0x212   :  { %7859 = vmatmul.msk.f32.gmra.mxu1 %vm134_vm0, %v9337_v57 }
 0x217   :  { %v9802_v48 = vpop.f32.mrf.mxu1 }
 0x21a   :  { %7910 = vmatmul.msk.f32.vlgmr.msra.gmra.mxu1 %vm134_vm0, %v9110_v6  ;;  %v9821_v6 = vpop.f32.mrf.mxu2 }
 0x21f   :  { %v9807_v53 = vpop.f32.mrf.mxu1 }
 0x222   :  { %7911 = vmatmul.msk.f32.gmra.mxu1 %vm134_vm0, %v9129_v11  ;;  %v9826_v29 = vpop.f32.mrf.mxu2 }
 0x227   :  { %v9812_v56 = vpop.f32.mrf.mxu1 }
 0x22a   :  { %7912 = vmatmul.msk.f32.gmra.mxu1 %vm134_vm0, %v9148_v16  ;;  %v9831_v37 = vpop.f32.mrf.mxu2 }
 0x22f   :  { %v9819_v23 = vpop.f32.mrf.mxu1 }
 0x232   :  { %7913 = vmatmul.msk.f32.gmra.mxu1 %vm134_vm0, %v9167_v21  ;;  %v7756_v21 = vld [vmem:[%s13473_s27 + $0xf0] sm:$0xff]  ;;  %v931_v52 = vpop.f32.mrf.mxu2 }
 0x237   :  { %v711_v11 = vpop.f32.mrf.mxu1 }
 0x238   :  { %v712_v15 = vadd.f32 %v711_v11, %v9617_v32 }
 0x23a   :  { %7914 = vmatmul.msk.f32.gmra.mxu1 %vm134_vm0, %v9192_v27  ;;  %v934_v32 = vpop.f32.mrf.mxu2 }
 0x23f   :  { %v714_v16 = vpop.f32.mrf.mxu1 }
 0x240   :  { %v715_v45 = vadd.f32 %v714_v16, %v9635_v44  ;;  %v7758_v44 = vld [vmem:[%s13473_s27 + $0x100] sm:$0xff] }
 0x242   :  { %803 = vmatpush.msra.mxu0 %v715_v45  ;;  %7915 = vmatmul.msk.f32.gmra.mxu1 %vm134_vm0, %v9223_v35  ;;  %v937_v18 = vpop.f32.mrf.mxu2  ;;  %v8958_v45 = vmov 0  }
 0x243   :  { %8935 = vset.pattern.permute.xlu0 %v8958_v45  ;;  %8936 = vset.pattern.permute.xlu1 %v8958_v45 }
 0x244   :  { %804 = vmatpush.msra.mxu0 %v712_v15  ;;  %v1376_v15 = vld [vmem:[%s13474_s5] sm:$0xff]  ;;  %8937 = vset.pattern.permute.xlu2 %v8958_v45 }
 0x245   :  { %7801 = vmatmul.msk.f32.vlgmr.msra.gmra.mxu0 %vm389_vm2, %v7756_v21  ;;  %1393 = vperm.xlu0 %8935, %v1376_v15  }
 0x247   :  { %v9841_v27 = vpop.f32.mrf.mxu1 }
 0x24a   :  { %7916 = vmatmul.msk.f32.gmra.mxu1 %vm134_vm0, %v9259_v43  ;;  %v7759_v43 = vld [vmem:[%s13473_s27 + $0x108] sm:$0xff]  ;;  %v940_v61 = vpop.f32.mrf.mxu2 }
 0x24d   :  { %7802 = vmatmul.msk.f32.gmra.mxu0 %vm389_vm2, %v7757_v55 }
 0x24f   :  { %v969_v35 = vpop.f32.mrf.mxu1 }
 0x250   :  { %v970_v11 = vadd.f32 %v969_v35, %v9821_v6  ;;  %v7816_v6 = vld [vmem:[%s13473_s27 + $0x168] sm:$0xff] }
 0x252   :  { %7917 = vmatmul.msk.f32.gmra.mxu1 %vm134_vm0, %v9292_v50  ;;  %v7760_v50 = vld [vmem:[%s13473_s27 + $0x110] sm:$0xff]  ;;  %v943_v58 = vpop.f32.mrf.mxu2 }
 0x255   :  { %7803 = vmatmul.msk.f32.gmra.mxu0 %vm389_vm2, %v7758_v44  ;;  %v7770_v44 = vld [vmem:[%s13473_s27 + $0x160] sm:$0x3] }
 0x257   :  { %v972_v17 = vpop.f32.mrf.mxu1 }
 0x258   :  { %v973_v49 = vadd.f32 %v972_v17, %v9826_v29  ;;  %v7768_v29 = vld [vmem:[%s13473_s27 + $0x150] sm:$0xff]  ;;  %v7818_v17 = vld [vmem:[%s13473_s27 + $0x178] sm:$0xff] }
 0x25a   :  { %7918 = vmatmul.msk.f32.gmra.mxu1 %vm134_vm0, %v9316_v54  ;;  %v7761_v54 = vld [vmem:[%s13473_s27 + $0x118] sm:$0xff]  ;;  %v946_v31 = vpop.f32.mrf.mxu2 }
 0x25d   :  { %7804 = vmatmul.msk.f32.gmra.mxu0 %vm389_vm2, %v7759_v43 }
 0x25f   :  { %v975_v22 = vpop.f32.mrf.mxu1 }
 0x260   :  { %v976_v47 = vadd.f32 %v975_v22, %v9831_v37  ;;  %v967_v37 = vadd.f32 %v9841_v27, %v9814_v13  ;;  %v1377_v13 = vld [vmem:[%s13474_s5 + $0x8] sm:$0xff]  ;;  %v7769_v27 = vld [vmem:[%s13473_s27 + $0x158] sm:$0xff]  ;;  %v1378_v22 = vld [vmem:[%s13474_s5 + $0x10] sm:$0xff] }
 0x261   :  { %1398 = vperm.xlu0 %8935, %v1377_v13   ;;  %1403 = vperm.xlu1 %8936, %v1378_v22   ;;  %v2383_v13 = vld [vmem:[%s13475_s26] sm:$0xff] }
 0x262   :  { %7919 = vmatmul.msk.f32.gmra.mxu1 %vm134_vm0, %v9337_v57  ;;  %v7762_v57 = vld [vmem:[%s13473_s27 + $0x120] sm:$0xff]  ;;  %v9882_v40 = vpop.f32.mrf.mxu2  ;;  %vm3461_vm0 = vcmask 261120  }
 0x265   :  { %7805 = vmatmul.msk.f32.gmra.mxu0 %vm389_vm2, %v7760_v50  ;;  %v1385_v50 = vld [vmem:[%s13474_s5 + $0x48] sm:$0xff] }
 0x267   :  { %v978_v60 = vpop.f32.mrf.mxu1 }
 0x268   :  { %v979_v25 = vadd.f32 %v978_v60, %v931_v52  ;;  %v7817_v52 = vld [vmem:[%s13473_s27 + $0x170] sm:$0xff]  ;;  %v9966_v60 = vpop.f32.mrf.mxu3 }
 0x26a   :  { %v9889_v62 = vpop.f32.mrf.mxu2 }
 0x26d   :  { %7806 = vmatmul.msk.f32.gmra.mxu0 %vm389_vm2, %v7761_v54 }
 0x26f   :  { %v981_v59 = vpop.f32.mrf.mxu1 }
 0x270   :  { %v982_v10 = vadd.f32 %v981_v59, %v934_v32  ;;  %v1382_v32 = vld [vmem:[%s13474_s5 + $0x30] sm:$0xff] }
 0x271   :  { %1423 = vperm.xlu0 %8935, %v1382_v32  }
 0x272   :  { %v9898_v3 = vpop.f32.mrf.mxu2 }
 0x275   :  { %7807 = vmatmul.msk.f32.gmra.mxu0 %vm389_vm2, %v7762_v57  ;;  %v1388_v57 = vld [vmem:[%s13474_s5 + $0x60] sm:$0xff] }
 0x277   :  { %v984_v30 = vpop.f32.mrf.mxu1 }
 0x278   :  { %v985_v7 = vadd.f32 %v984_v30, %v937_v18  ;;  %v7820_v30 = vld [vmem:[%s13473_s27 + $0x188] sm:$0xff] }
 0x279   :  { %1438 = vperm.xlu0 %8935, %v1385_v50  }
 0x27a   :  { %v9909_v16 = vpop.f32.mrf.mxu2 }
 0x27d   :  { %7808 = vmatmul.msk.f32.gmra.mxu0 %vm389_vm2, %v7763_v33  ;;  %v9978_v33 = vpop.f32.mrf.mxu3 }
 0x27f   :  { %v987_v36 = vpop.f32.mrf.mxu1 }
 0x280   :  { %v988_v38 = vadd.f32 %v987_v36, %v940_v61  ;;  %v7819_v61 = vld [vmem:[%s13473_s27 + $0x180] sm:$0xff] }
 0x281   :  { %1453 = vperm.xlu0 %8935, %v1388_v57  }
 0x282   :  { %v9935_v55 = vpop.f32.mrf.mxu2 }
 0x285   :  { %7809 = vmatmul.msk.f32.gmra.mxu0 %vm389_vm2, %v7764_v39  ;;  %v1383_v39 = vld [vmem:[%s13474_s5 + $0x38] sm:$0xff] }
 0x287   :  { %v990_v46 = vpop.f32.mrf.mxu1 }
 0x288   :  { %v991_v34 = vadd.f32 %v990_v46, %v943_v58  ;;  %v1379_v58 = vld [vmem:[%s13474_s5 + $0x18] sm:$0xff]  ;;  %v2392_v46 = vld [vmem:[%s13475_s26 + $0x48] sm:$0xff] }
 0x289   :  { %1408 = vperm.xlu1 %8936, %v1379_v58   ;;  %2440 = vperm.xlu0 %8935, %v2392_v46   ;;  %v2388_v58 = vld [vmem:[%s13475_s26 + $0x28] sm:$0xff] }
 0x28a   :  { %v9952_v43 = vpop.f32.mrf.mxu2  ;;  %v7828_v46 = vld [vmem:[%s13473_s27 + $0x1c8] sm:$0xff] }
 0x28d   :  { %7810 = vmatmul.msk.f32.gmra.mxu0 %vm389_vm2, %v7765_v51  ;;  %v7821_v51 = vld [vmem:[%s13473_s27 + $0x190] sm:$0xff] }
 0x28f   :  { %v993_v63 = vpop.f32.mrf.mxu1 }
 0x290   :  { %v994_v0 = vadd.f32 %v993_v63, %v946_v31 }
 0x291   :  { %1428 = vperm.xlu1 %8936, %v1383_v39   ;;  %v1390_v39 = vld [vmem:[%s13474_s5 + $0x70] sm:$0x3] }
 0x292   :  { %7860 = vmatpush.msk.msra.mxu3 %vm435_vm1, %v994_v0  ;;  %v1192_v59 = vpop.f32.mrf.mxu2  ;;  %v1386_v0 = vld [vmem:[%s13474_s5 + $0x50] sm:$0xff] }
 0x294   :  { %1051 = vmatpush.msra.mxu3 %v991_v34  ;;  %v2389_v34 = vld [vmem:[%s13475_s26 + $0x30] sm:$0xff] }
 0x295   :  { %7811 = vmatmul.msk.f32.gmra.mxu0 %vm389_vm2, %v7766_v26  ;;  %v9996_v26 = vpop.f32.mrf.mxu3  ;;  %2425 = vperm.xlu0 %8935, %v2389_v34   ;;  %v2390_v34 = vld [vmem:[%s13475_s26 + $0x38] sm:$0xff] }
 0x296   :  { %1052 = vmatpush.msra.mxu3 %v988_v38  ;;  %v7822_v38 = vld [vmem:[%s13473_s27 + $0x198] sm:$0xff] }
 0x297   :  { %v9896_v1 = vpop.f32.mrf.mxu1 }
 0x298   :  { %1053 = vmatpush.msra.mxu3 %v985_v7 }
 0x299   :  { %1443 = vperm.xlu1 %8936, %v1386_v0  }
 0x29a   :  { %1054 = vmatpush.msra.mxu3 %v982_v10  ;;  %v1195_v36 = vpop.f32.mrf.mxu2 }
 0x29c   :  { %1055 = vmatpush.msra.mxu3 %v979_v25  ;;  %v1389_v25 = vld [vmem:[%s13474_s5 + $0x68] sm:$0xff] }
 0x29d   :  { %7812 = vmatmul.msk.f32.gmra.mxu0 %vm389_vm2, %v7767_v28  ;;  %v2386_v28 = vld [vmem:[%s13475_s26 + $0x18] sm:$0xff] }
 0x29e   :  { %1056 = vmatpush.msra.mxu3 %v976_v47  ;;  %v7823_v47 = vld [vmem:[%s13473_s27 + $0x1a0] sm:$0xff]  ;;  %2410 = vperm.xlu0 %8935, %v2386_v28  }
 0x29f   :  { %v9906_v5 = vpop.f32.mrf.mxu1  ;;  %v2387_v28 = vld [vmem:[%s13475_s26 + $0x20] sm:$0xff] }
 0x2a0   :  { %1057 = vmatpush.msra.mxu3 %v973_v49  ;;  %v10011_v49 = vpop.f32.mrf.mxu3 }
 0x2a1   :  { %1458 = vperm.xlu1 %8936, %v1389_v25  }
 0x2a2   :  { %1058 = vmatpush.msra.mxu3 %v970_v11  ;;  %v1198_v7 = vpop.f32.mrf.mxu2 }
 0x2a4   :  { %1059 = vmatpush.msra.mxu3 %v967_v37 }
 0x2a5   :  { %7813 = vmatmul.msk.f32.gmra.mxu0 %vm389_vm2, %v7768_v29  ;;  %7861 = vmatmul.msk.f32.vlgmr.msra.gmra.mxu3 %vm389_vm2, %v7816_v6  ;;  %v1380_v29 = vld [vmem:[%s13474_s5 + $0x20] sm:$0xff] }
 0x2a6   :  { %v2391_v6 = vld [vmem:[%s13475_s26 + $0x40] sm:$0xff]  ;;  %1413 = vperm.xlu2 %8937, %v1380_v29   ;;  %2395 = vperm.xlu0 %8935, %v2383_v13  }
 0x2a7   :  { %v9924_v21 = vpop.f32.mrf.mxu1 }
 0x2a9   :  { %2435 = vperm.xlu1 %8936, %v2391_v6   ;;  %v7881_v6 = vld [vmem:[%s13473_s27 + $0x208] sm:$0xff] }
 0x2aa   :  { %v1201_v11 = vpop.f32.mrf.mxu2 }
 0x2ad   :  { %7814 = vmatmul.msk.f32.gmra.mxu0 %vm389_vm2, %v7769_v27  ;;  %7862 = vmatmul.msk.f32.gmra.mxu3 %vm389_vm2, %v7817_v52  ;;  %v7824_v52 = vld [vmem:[%s13473_s27 + $0x1a8] sm:$0xff] }
 0x2af   :  { %v9939_v35 = vpop.f32.mrf.mxu1 }
 0x2b1   :  { %2420 = vperm.xlu1 %8936, %v2388_v58  }
 0x2b5   :  { %7815 = vmatmul.msk.f32.gmra.mxu0 %vm389_vm2, %v7770_v44  ;;  %7863 = vmatmul.msk.f32.gmra.mxu3 %vm389_vm2, %v7818_v17  ;;  %v10030_v44 = vpop.f32.mrf.mxu3 }
 0x2b7   :  { %v9954_v18 = vpop.f32.mrf.mxu1 }
 0x2b8   :  { %v1234_v57 = vadd.f32 %v9954_v18, %v9935_v55  ;;  %v1225_v55 = vadd.f32 %v9906_v5, %v9889_v62  ;;  %v1384_v18 = vld [vmem:[%s13474_s5 + $0x40] sm:$0xff] }
 0x2b9   :  { %v7876_v62 = vld [vmem:[%s13473_s27 + $0x1e0] sm:$0xff] }
 0x2ba   :  { %v7827_v5 = vld [vmem:[%s13473_s27 + $0x1c0] sm:$0xff] }
 0x2bd   :  { %7864 = vmatmul.msk.f32.gmra.mxu3 %vm389_vm2, %v7819_v61  ;;  %v1381_v61 = vld [vmem:[%s13474_s5 + $0x28] sm:$0xff] }
 0x2be   :  { %1418 = vperm.xlu2 %8937, %v1381_v61   ;;  %v7884_v61 = vld [vmem:[%s13473_s27 + $0x220] sm:$0xff] }
 0x2bf   :  { %v1236_v54 = vpop.f32.mrf.mxu1 }
 0x2c0   :  { %v1237_v22 = vadd.f32 %v1236_v54, %v9952_v43  ;;  %v1231_v43 = vadd.f32 %v9939_v35, %v9909_v16  ;;  %v1228_v54 = vadd.f32 %v9924_v21, %v9898_v3  ;;  %v2385_v16 = vld [vmem:[%s13475_s26 + $0x10] sm:$0xff]  ;;  %v1222_v35 = vadd.f32 %v9896_v1, %v9882_v40  ;;  %v7826_v3 = vld [vmem:[%s13473_s27 + $0x1b8] sm:$0xff]  ;;  %v7877_v21 = vld [vmem:[%s13473_s27 + $0x1e8] sm:$0xff] }
 0x2c1   :  { %2405 = vperm.xlu1 %8936, %v2385_v16   ;;  %v1387_v40 = vld [vmem:[%s13474_s5 + $0x58] sm:$0xff] }
 0x2c2   :  { %v10014_v45 = vpop.f32.mrf.mxu0  ;;  %v7887_v16 = vld [vmem:[%s13473_s27 + $0x238] sm:$0xff] }
 0x2c5   :  { %7865 = vmatmul.msk.f32.gmra.mxu3 %vm389_vm2, %v7820_v30  ;;  %v10051_v30 = vpop.f32.mrf.mxu3 }
 0x2c6   :  { %1433 = vperm.xlu2 %8937, %v1384_v18  }
 0x2c7   :  { %v1239_v31 = vpop.f32.mrf.mxu1 }
 0x2c8   :  { %v1240_v17 = vadd.f32 %v1239_v31, %v1192_v59  ;;  %v7825_v59 = vld [vmem:[%s13473_s27 + $0x1b0] sm:$0xff] }
 0x2ca   :  { %v10033_v50 = vpop.f32.mrf.mxu0 }
 0x2cd   :  { %7866 = vmatmul.msk.f32.gmra.mxu3 %vm389_vm2, %v7821_v51  ;;  %v10076_v1 = vpop.f32.mrf.mxu3  ;;  %v7878_v51 = vld [vmem:[%s13473_s27 + $0x1f0] sm:$0xff] }
 0x2ce   :  { %1448 = vperm.xlu2 %8937, %v1387_v40   ;;  %v1509_v40 = vld [vmem:[%s13476_s6 + $0x18] sm:$0xff] }
 0x2cf   :  { %v1242_v63 = vpop.f32.mrf.mxu1 }
 0x2d0   :  { %v1243_v32 = vadd.f32 %v1242_v63, %v1195_v36 }
 0x2d2   :  { %v10063_v31 = vpop.f32.mrf.mxu0 }
 0x2d5   :  { %7867 = vmatmul.msk.f32.gmra.mxu3 %vm389_vm2, %v7822_v38  ;;  %v10097_v63 = vpop.f32.mrf.mxu3  ;;  %v7829_v38 = vld [vmem:[%s13473_s27 + $0x1d0] sm:$0xff] }
 0x2d6   :  { %1463 = vperm.xlu2 %8937, %v1390_v39   ;;  %v7888_v39 = vld [vmem:[%s13473_s27 + $0x240] sm:$0xff] }
 0x2d7   :  { %v1245_v10 = vpop.f32.mrf.mxu1 }
 0x2d8   :  { %v1246_v27 = vadd.f32 %v1245_v10, %v1198_v7  ;;  %v7879_v7 = vld [vmem:[%s13473_s27 + $0x1f8] sm:$0xff] }
 0x2da   :  { %v10084_v36 = vpop.f32.mrf.mxu0 }
 0x2dd   :  { %7868 = vmatmul.msk.f32.gmra.mxu3 %vm389_vm2, %v7823_v47  ;;  %v10114_v10 = vpop.f32.mrf.mxu3  ;;  %v7830_v47 = vld [vmem:[%s13473_s27 + $0x1d8] sm:$0x3] }
 0x2de   :  { %2430 = vperm.xlu2 %8937, %v2390_v34   ;;  %v1507_v34 = vld [vmem:[%s13476_s6 + $0x8] sm:$0xff] }
 0x2df   :  { %v1248_v15 = vpop.f32.mrf.mxu1 }
 0x2e0   :  { %v1249_v37 = vadd.f32 %v1248_v15, %v1201_v11  ;;  %v7880_v11 = vld [vmem:[%s13473_s27 + $0x200] sm:$0xff] }
 0x2e2   :  { %7920 = vmatpush.msk.msrb.mxu0 %vm435_vm1, %v1249_v37  ;;  %v10101_v0 = vpop.f32.mrf.mxu0  ;;  %v2384_v37 = vld [vmem:[%s13475_s26 + $0x8] sm:$0xff]  ;;  %vm3711_vm1 = vcmask 15360  }
 0x2e4   :  { %1306 = vmatpush.msrb.mxu0 %v1246_v27  ;;  %v7882_v27 = vld [vmem:[%s13473_s27 + $0x210] sm:$0xff] }
 0x2e5   :  { %7869 = vmatmul.msk.f32.gmra.mxu3 %vm389_vm2, %v7824_v52  ;;  %v10129_v15 = vpop.f32.mrf.mxu3 }
 0x2e6   :  { %1307 = vmatpush.msrb.mxu0 %v1243_v32  ;;  %2415 = vperm.xlu2 %8937, %v2387_v28   ;;  %v7883_v32 = vld [vmem:[%s13473_s27 + $0x218] sm:$0xff]  ;;  %v1506_v28 = vld [vmem:[%s13476_s6] sm:$0xff] }
 0x2e8   :  { %1308 = vmatpush.msrb.mxu0 %v1240_v17 }
 0x2ea   :  { %1309 = vmatpush.msrb.mxu0 %v1237_v22  ;;  %v10116_v25 = vpop.f32.mrf.mxu0 }
 0x2ec   :  { %1310 = vmatpush.msrb.mxu0 %v1234_v57 }
 0x2ed   :  { %7870 = vmatmul.msk.f32.gmra.mxu3 %vm389_vm2, %v7825_v59  ;;  %v10140_v13 = vpop.f32.mrf.mxu3  ;;  %v7885_v59 = vld [vmem:[%s13473_s27 + $0x228] sm:$0xff] }
 0x2ee   :  { %1311 = vmatpush.msrb.mxu0 %v1231_v43  ;;  %2400 = vperm.xlu2 %8937, %v2384_v37  }
 0x2f0   :  { %1312 = vmatpush.msrb.mxu0 %v1228_v54 }
 0x2f2   :  { %1313 = vmatpush.msrb.mxu0 %v1225_v55  ;;  %v10134_v29 = vpop.f32.mrf.mxu0  ;;  %v7886_v55 = vld [vmem:[%s13473_s27 + $0x230] sm:$0xff] }
 0x2f4   :  { %1314 = vmatpush.msrb.mxu0 %v1222_v35 }
 0x2f5   :  { %7871 = vmatmul.msk.f32.gmra.mxu3 %vm389_vm2, %v7826_v3  ;;  %7921 = vmatmul.msk.f32.vlgmr.msrb.gmra.mxu0 %vm389_vm2, %v7876_v62  ;;  %v10151_v17 = vpop.f32.mrf.mxu3  ;;  %v1510_v3 = vld [vmem:[%s13476_s6 + $0x20] sm:$0x3f]  ;;  %v7966_v62 = vld [vmem:[%s13476_s6 + $0x48] sm:$0x3f] }
 0x2f6   :  { %7936 = vmatpush.msk.msrb.mxu3 %vm1557_vm3, %v1510_v3  ;;  %7967 = vmatpush.msk.msrb.mxu2 %vm1557_vm3, %v7966_v62  ;;  %v1394_v62 = vpop.permute.xlu0 %1393 }
 0x2f8   :  { %1573 = vmatpush.msrb.mxu3 %v1509_v40 }
 0x2fa   :  { %v10145_v52 = vpop.f32.mrf.mxu0 }
 0x2fd   :  { %7872 = vmatmul.msk.f32.gmra.mxu3 %vm389_vm2, %v7827_v5  ;;  %7922 = vmatmul.msk.f32.gmra.mxu0 %vm389_vm2, %v7877_v21  ;;  %v10160_v58 = vpop.f32.mrf.mxu3  ;;  %v7965_v5 = vld [vmem:[%s13476_s6 + $0x40] sm:$0xff] }
 0x2fe   :  { %1655 = vmatpush.msrb.mxu2 %v7965_v5 }
 0x302   :  { %v10154_v22 = vpop.f32.mrf.mxu0 }
 0x305   :  { %7873 = vmatmul.msk.f32.gmra.mxu3 %vm389_vm2, %v7828_v46  ;;  %7923 = vmatmul.msk.f32.gmra.mxu0 %vm389_vm2, %v7878_v51  ;;  %v10168_v43 = vpop.f32.mrf.mxu3  ;;  %v1508_v46 = vld [vmem:[%s13476_s6 + $0x10] sm:$0xff]  ;;  %v7964_v51 = vld [vmem:[%s13476_s6 + $0x38] sm:$0xff] }
 0x306   :  { %1574 = vmatpush.msrb.mxu3 %v1508_v46  ;;  %1656 = vmatpush.msrb.mxu2 %v7964_v51 }
 0x308   :  { %1575 = vmatpush.msrb.mxu3 %v1507_v34 }
 0x30a   :  { %v10162_v57 = vpop.f32.mrf.mxu0  ;;  %1576 = vmatpush.msrb.mxu3 %v1506_v28 }
 0x30d   :  { %7874 = vmatmul.msk.f32.gmra.mxu3 %vm389_vm2, %v7829_v38  ;;  %7924 = vmatmul.msk.f32.gmra.mxu0 %vm389_vm2, %v7879_v7  ;;  %v10176_v18 = vpop.f32.mrf.mxu3  ;;  %v7963_v38 = vld [vmem:[%s13476_s6 + $0x30] sm:$0xff] }
 0x30e   :  { %1657 = vmatpush.msrb.mxu2 %v7963_v38 }
 0x312   :  { %v10170_v54 = vpop.f32.mrf.mxu0 }
 0x315   :  { %7875 = vmatmul.msk.f32.gmra.mxu3 %vm389_vm2, %v7830_v47  ;;  %7925 = vmatmul.msk.f32.gmra.mxu0 %vm389_vm2, %v7880_v11  ;;  %v7962_v47 = vld [vmem:[%s13476_s6 + $0x28] sm:$0xff] }
 0x316   :  { %1658 = vmatpush.msrb.mxu2 %v7962_v47  ;;  %v7889_v11 = vld [vmem:[%s13473_s27 + $0x248] sm:$0xff] }
 0x31a   :  { %v10181_v35 = vpop.f32.mrf.mxu0 }
 0x31d   :  { %7926 = vmatmul.msk.f32.gmra.mxu0 %vm389_vm2, %v7881_v6 }
 0x322   :  { %v10214_v7 = vpop.f32.mrf.mxu0 }
 0x325   :  { %7927 = vmatmul.msk.f32.gmra.mxu0 %vm389_vm2, %v7882_v27  ;;  %v7890_v27 = vld [vmem:[%s13473_s27 + $0x250] sm:$0x3] }
 0x328   :  { %v1061_v21 = vpop.f32.mrf.mxu3 }
 0x32a   :  { %v10226_v6 = vpop.f32.mrf.mxu0 }
 0x32d   :  { %7928 = vmatmul.msk.f32.gmra.mxu0 %vm389_vm2, %v7883_v32 }
 0x330   :  { %v1064_v37 = vpop.f32.mrf.mxu3 }
 0x335   :  { %7929 = vmatmul.msk.f32.gmra.mxu0 %vm389_vm2, %v7884_v61  ;;  %v10232_v61 = vpop.f32.mrf.mxu0 }
 0x338   :  { %v1067_v32 = vpop.f32.mrf.mxu3 }
 0x33d   :  { %7930 = vmatmul.msk.f32.gmra.mxu0 %vm389_vm2, %v7885_v59  ;;  %v567_v59 = vadd.f32 %v9966_v60, %v9686_v4 }
 0x345   :  { %7931 = vmatmul.msk.f32.gmra.mxu0 %vm389_vm2, %v7886_v55  ;;  %v851_v55 = vadd.f32 %v10014_v45, %v567_v59 }
 0x347   :  { %v1106_v3 = vadd.f32 %v1061_v21, %v851_v55  ;;  %v1399_v21 = vpop.permute.xlu0 %1398  ;;  %v576_v55 = vadd.f32 %v10011_v49, %v9707_v24 }
 0x34d   :  { %7932 = vmatmul.msk.f32.gmra.mxu0 %vm389_vm2, %v7887_v16  ;;  %v1070_v16 = vpop.f32.mrf.mxu3 }
 0x355   :  { %7933 = vmatmul.msk.f32.gmra.mxu0 %vm389_vm2, %v7888_v39  ;;  %v570_v39 = vadd.f32 %v9978_v33, %v9691_v9  ;;  %v1073_v4 = vpop.f32.mrf.mxu3  ;;  %v573_v9 = vadd.f32 %v9996_v26, %v9696_v14  ;;  %v854_v26 = vadd.f32 %v10084_v36, %v576_v55  ;;  %v588_v55 = vadd.f32 %v10097_v63, %v9779_v2 }
 0x357   :  { %v852_v51 = vadd.f32 %v10033_v50, %v570_v39  ;;  %v853_v28 = vadd.f32 %v10063_v31, %v573_v9 }
 0x359   :  { %v1107_v38 = vadd.f32 %v1064_v37, %v852_v51  ;;  %v1108_v47 = vadd.f32 %v1067_v32, %v853_v28  ;;  %v585_v28 = vadd.f32 %v10076_v1, %v9762_v19  ;;  %v858_v1 = vadd.f32 %v10145_v52, %v588_v55 }
 0x35d   :  { %7934 = vmatmul.msk.f32.gmra.mxu0 %vm389_vm2, %v7889_v11  ;;  %v1404_v11 = vpop.permute.xlu1 %1403  ;;  %v1076_v59 = vpop.f32.mrf.mxu3 }
 0x365   :  { %7935 = vmatmul.msk.f32.gmra.mxu0 %vm389_vm2, %v7890_v27  ;;  %v1079_v24 = vpop.f32.mrf.mxu3 }
 0x372   :  { %v1316_v40 = vpop.f32.mrf.mxu0 }
 0x373   :  { %v1361_v5 = vadd.f32 %v1316_v40, %v1106_v3  ;;  %v1109_v3 = vadd.f32 %v1070_v16, %v854_v26  ;;  %v1409_v40 = vpop.permute.xlu1 %1408  ;;  %v1414_v16 = vpop.permute.xlu2 %1413 }
 0x375   :  { %v1466_v46 = vadd.f32 %v1394_v62, %v1361_v5  ;;  %v579_v5 = vadd.f32 %v10030_v44, %v9725_v42 }
 0x377   :  { %v10240_v34 = vmax.f32 %v1466_v46, 0.0  ;;  %v855_v49 = vadd.f32 %v10101_v0, %v579_v5  ;;  %v1082_v0 = vpop.f32.mrf.mxu3 }
 0x379   :  { %7937 = vmatmul.msk.f32.vlgmr.msrb.gmra.mxu3 %vm1511_vm4, %v10240_v34  ;;  %7968 = vmatmul.msk.f32.vlgmr.msrb.gmra.mxu2 %vm1511_vm4, %v10240_v34  ;;  %v1110_v46 = vadd.f32 %v1073_v4, %v855_v49 }
 0x37a   :  { %v1319_v60 = vpop.f32.mrf.mxu0 }
 0x37b   :  { %v1362_v45 = vadd.f32 %v1319_v60, %v1107_v38  ;;  %v582_v60 = vadd.f32 %v10051_v30, %v9745_v20  ;;  %v857_v30 = vadd.f32 %v10134_v29, %v585_v28  ;;  %v600_v28 = vadd.f32 %v10151_v17, %v9802_v48  ;;  %v8060_v48 = vld [vmem:[%s13476_s6 + $0x90] sm:$0xff]  ;;  %v8059_v17 = vld [vmem:[%s13476_s6 + $0x88] sm:$0xff] }
 0x37d   :  { %v1467_v33 = vadd.f32 %v1399_v21, %v1362_v45  ;;  %v856_v44 = vadd.f32 %v10116_v25, %v582_v60 }
 0x37f   :  { %v10249_v50 = vmax.f32 %v1467_v33, 0.0  ;;  %v1111_v21 = vadd.f32 %v1076_v59, %v856_v44  ;;  %v1419_v33 = vpop.permute.xlu2 %1418  ;;  %v1424_v59 = vpop.permute.xlu0 %1423  ;;  %v597_v44 = vadd.f32 %v10140_v13, %v9797_v12  ;;  %v862_v13 = vadd.f32 %v10181_v35, %v600_v28 }
 0x381   :  { %7938 = vmatmul.msk.f32.gmra.mxu3 %vm1511_vm4, %v10249_v50  ;;  %7969 = vmatmul.msk.f32.gmra.mxu2 %vm1511_vm4, %v10249_v50 }
 0x382   :  { %v1322_v37 = vpop.f32.mrf.mxu0 }
 0x383   :  { %v1363_v27 = vadd.f32 %v1322_v37, %v1108_v47  ;;  %v1112_v47 = vadd.f32 %v1079_v24, %v857_v30 }
 0x385   :  { %v1468_v14 = vadd.f32 %v1404_v11, %v1363_v27  ;;  %v1085_v11 = vpop.f32.mrf.mxu3 }
 0x387   :  { %v10258_v31 = vmax.f32 %v1468_v14, 0.0  ;;  %v1113_v14 = vadd.f32 %v1082_v0, %v858_v1  ;;  %v1434_v49 = vpop.permute.xlu2 %1433 }
 0x389   :  { %7939 = vmatmul.msk.f32.gmra.mxu3 %vm1511_vm4, %v10258_v31  ;;  %7970 = vmatmul.msk.f32.gmra.mxu2 %vm1511_vm4, %v10258_v31 }
 0x38a   :  { %v1325_v32 = vpop.f32.mrf.mxu0 }
 0x38b   :  { %v1364_v62 = vadd.f32 %v1325_v32, %v1109_v3  ;;  %v1429_v32 = vpop.permute.xlu1 %1428 }
 0x38d   :  { %v1469_v39 = vadd.f32 %v1409_v40, %v1364_v62  ;;  %v1088_v62 = vpop.f32.mrf.mxu3  ;;  %v591_v40 = vadd.f32 %v10114_v10, %v9787_v8 }
 0x38f   :  { %v10267_v36 = vmax.f32 %v1469_v39, 0.0  ;;  %v859_v63 = vadd.f32 %v10154_v22, %v591_v40 }
 0x391   :  { %7940 = vmatmul.msk.f32.gmra.mxu3 %vm1511_vm4, %v10267_v36  ;;  %7971 = vmatmul.msk.f32.gmra.mxu2 %vm1511_vm4, %v10267_v36  ;;  %v1114_v5 = vadd.f32 %v1085_v11, %v859_v63 }
 0x392   :  { %v1328_v51 = vpop.f32.mrf.mxu0 }
 0x393   :  { %v1365_v38 = vadd.f32 %v1328_v51, %v1110_v46  ;;  %v594_v46 = vadd.f32 %v10129_v15, %v9792_v41  ;;  %v861_v15 = vadd.f32 %v10170_v54, %v597_v44 }
 0x395   :  { %v1470_v42 = vadd.f32 %v1414_v16, %v1365_v38  ;;  %v1091_v8 = vpop.f32.mrf.mxu3  ;;  %v860_v10 = vadd.f32 %v10162_v57, %v594_v46 }
 0x397   :  { %v10276_v45 = vmax.f32 %v1470_v42, 0.0  ;;  %v1115_v51 = vadd.f32 %v1088_v62, %v860_v10  ;;  %v1439_v42 = vpop.permute.xlu0 %1438  ;;  %v606_v62 = vadd.f32 %v10168_v43, %v9812_v56 }
 0x399   :  { %7941 = vmatmul.msk.f32.gmra.mxu3 %vm1511_vm4, %v10276_v45  ;;  %7972 = vmatmul.msk.f32.gmra.mxu2 %vm1511_vm4, %v10276_v45 }
 0x39a   :  { %v1331_v4 = vpop.f32.mrf.mxu0 }
 0x39b   :  { %v1366_v9 = vadd.f32 %v1331_v4, %v1111_v21  ;;  %v1116_v21 = vadd.f32 %v1091_v8, %v861_v15 }
 0x39d   :  { %v1471_v20 = vadd.f32 %v1419_v33, %v1366_v9  ;;  %v1094_v57 = vpop.f32.mrf.mxu3  ;;  %v1444_v33 = vpop.permute.xlu1 %1443 }
 0x39e   :  { %v1117_v30 = vadd.f32 %v1094_v57, %v862_v13 }
 0x39f   :  { %v10285_v25 = vmax.f32 %v1471_v20, 0.0  ;;  %v8061_v20 = vld [vmem:[%s13476_s6 + $0x98] sm:$0x3f] }
 0x3a0   :  { %8062 = vmatpush.msk.msra.mxu2 %vm1557_vm3, %v8061_v20 }
 0x3a1   :  { %7942 = vmatmul.msk.f32.gmra.mxu3 %vm1511_vm4, %v10285_v25  ;;  %7973 = vmatmul.msk.f32.gmra.mxu2 %vm1511_vm4, %v10285_v25 }
 0x3a2   :  { %v1334_v37 = vpop.f32.mrf.mxu0  ;;  %2071 = vmatpush.msra.mxu2 %v8060_v48 }
 0x3a3   :  { %v1367_v27 = vadd.f32 %v1334_v37, %v1112_v47  ;;  %v8058_v37 = vld [vmem:[%s13476_s6 + $0x80] sm:$0xff] }
 0x3a4   :  { %2072 = vmatpush.msra.mxu2 %v8059_v17 }
 0x3a5   :  { %v1472_v19 = vadd.f32 %v1424_v59, %v1367_v27  ;;  %v1097_v35 = vpop.f32.mrf.mxu3  ;;  %v1449_v27 = vpop.permute.xlu2 %1448  ;;  %v603_v59 = vadd.f32 %v10160_v58, %v9807_v53 }
 0x3a6   :  { %2073 = vmatpush.msra.mxu2 %v8058_v37  ;;  %v1454_v58 = vpop.permute.xlu0 %1453 }
 0x3a7   :  { %v10294_v29 = vmax.f32 %v1472_v19, 0.0  ;;  %v8057_v19 = vld [vmem:[%s13476_s6 + $0x78] sm:$0xff]  ;;  %v863_v1 = vadd.f32 %v10214_v7, %v603_v59  ;;  %v864_v7 = vadd.f32 %v10226_v6, %v606_v62  ;;  %v7952_v62 = vld [vmem:[%s13477_s3 + $0x50] sm:$0xff] }
 0x3a8   :  { %2074 = vmatpush.msra.mxu2 %v8057_v19 }
 0x3a9   :  { %7943 = vmatmul.msk.f32.gmra.mxu3 %vm1511_vm4, %v10294_v29  ;;  %7974 = vmatmul.msk.f32.gmra.mxu2 %vm1511_vm4, %v10294_v29 }
 0x3aa   :  { %v1337_v26 = vpop.f32.mrf.mxu0 }
 0x3ab   :  { %v1368_v3 = vadd.f32 %v1337_v26, %v1113_v14  ;;  %v1118_v26 = vadd.f32 %v1097_v35, %v863_v1 }
 0x3ad   :  { %v1473_v2 = vadd.f32 %v1429_v32, %v1368_v3  ;;  %v1100_v32 = vpop.f32.mrf.mxu3 }
 0x3ae   :  { %v1119_v63 = vadd.f32 %v1100_v32, %v864_v7 }
 0x3af   :  { %v10303_v52 = vmax.f32 %v1473_v2, 0.0 }
 0x3b1   :  { %7944 = vmatmul.msk.f32.gmra.mxu3 %vm1511_vm4, %v10303_v52  ;;  %7975 = vmatmul.msk.f32.gmra.mxu2 %vm1511_vm4, %v10303_v52 }
 0x3b2   :  { %v1340_v39 = vpop.f32.mrf.mxu0 }
 0x3b3   :  { %v1369_v24 = vadd.f32 %v1340_v39, %v1114_v5 }
 0x3b5   :  { %v1474_v16 = vadd.f32 %v1434_v49, %v1369_v24  ;;  %v1459_v24 = vpop.permute.xlu1 %1458  ;;  %v609_v49 = vadd.f32 %v10176_v18, %v9819_v23  ;;  %v1103_v56 = vpop.f32.mrf.mxu3 }
 0x3b7   :  { %v10312_v22 = vmax.f32 %v1474_v16, 0.0  ;;  %v865_v43 = vadd.f32 %v10232_v61, %v609_v49  ;;  %v1498_v49 = vld [vmem:[%s13477_s3 + $0x10] sm:$0xff] }
 0x3b9   :  { %7945 = vmatmul.msk.f32.gmra.mxu3 %vm1511_vm4, %v10312_v22  ;;  %7976 = vmatmul.msk.f32.gmra.mxu2 %vm1511_vm4, %v10312_v22  ;;  %v1120_v16 = vadd.f32 %v1103_v56, %v865_v43  ;;  %v7955_v56 = vld [vmem:[%s13477_s3 + $0x68] sm:$0xff]  ;;  %v1499_v43 = vld [vmem:[%s13477_s3 + $0x18] sm:$0xff] }
 0x3ba   :  { %v1343_v38 = vpop.f32.mrf.mxu0 }
 0x3bb   :  { %v1370_v60 = vadd.f32 %v1343_v38, %v1115_v51  ;;  %v1464_v51 = vpop.permute.xlu2 %1463 }
 0x3bd   :  { %v1475_v41 = vadd.f32 %v1439_v42, %v1370_v60 }
 0x3bf   :  { %v10321_v0 = vmax.f32 %v1475_v41, 0.0 }
 0x3c1   :  { %7946 = vmatmul.msk.f32.gmra.mxu3 %vm1511_vm4, %v10321_v0  ;;  %7977 = vmatmul.msk.f32.gmra.mxu2 %vm1511_vm4, %v10321_v0 }
 0x3c2   :  { %v1346_v4 = vpop.f32.mrf.mxu0 }
 0x3c3   :  { %v1371_v9 = vadd.f32 %v1346_v4, %v1116_v21 }
 0x3c5   :  { %v1476_v12 = vadd.f32 %v1444_v33, %v1371_v9 }
 0x3c7   :  { %v10330_v54 = vmax.f32 %v1476_v12, 0.0 }
 0x3c9   :  { %7947 = vmatmul.msk.f32.gmra.mxu3 %vm1511_vm4, %v10330_v54  ;;  %7978 = vmatmul.msk.f32.gmra.mxu2 %vm1511_vm4, %v10330_v54 }
 0x3ca   :  { %v1349_v47 = vpop.f32.mrf.mxu0 }
 0x3cb   :  { %v1372_v11 = vadd.f32 %v1349_v47, %v1117_v30 }
 0x3cd   :  { %v1477_v55 = vadd.f32 %v1449_v27, %v1372_v11 }
 0x3cf   :  { %v10355_v14 = vmax.f32 %v1477_v55, 0.0 }
 0x3d1   :  { %7948 = vmatmul.msk.f32.gmra.mxu3 %vm1511_vm4, %v10355_v14  ;;  %7979 = vmatmul.msk.f32.gmra.mxu2 %vm1511_vm4, %v10355_v14 }
 0x3d2   :  { %v1352_v3 = vpop.f32.mrf.mxu0 }
 0x3d3   :  { %v1373_v53 = vadd.f32 %v1352_v3, %v1118_v26 }
 0x3d5   :  { %v1478_v40 = vadd.f32 %v1454_v58, %v1373_v53 }
 0x3d7   :  { %v10364_v2 = vmax.f32 %v1478_v40, 0.0  ;;  %v1496_v40 = vld [vmem:[%s13477_s3] sm:$0xff] }
 0x3d9   :  { %7949 = vmatmul.msk.f32.gmra.mxu3 %vm1511_vm4, %v10364_v2  ;;  %7980 = vmatmul.msk.f32.gmra.mxu2 %vm1511_vm4, %v10364_v2 }
 0x3da   :  { %v1355_v5 = vpop.f32.mrf.mxu0 }
 0x3db   :  { %v1374_v39 = vadd.f32 %v1355_v5, %v1119_v63  ;;  %v7953_v63 = vld [vmem:[%s13477_s3 + $0x58] sm:$0xff]  ;;  %v1497_v5 = vld [vmem:[%s13477_s3 + $0x8] sm:$0xff] }
 0x3dd   :  { %v1479_v46 = vadd.f32 %v1459_v24, %v1374_v39  ;;  %v7954_v24 = vld [vmem:[%s13477_s3 + $0x60] sm:$0xff] }
 0x3df   :  { %v10373_v6 = vmax.f32 %v1479_v46, 0.0 }
 0x3e1   :  { %7950 = vmatmul.msk.f32.gmra.mxu3 %vm1511_vm4, %v10373_v6  ;;  %7981 = vmatmul.msk.f32.gmra.mxu2 %vm1511_vm4, %v10373_v6 }
 0x3e2   :  { %v1358_v8 = vpop.f32.mrf.mxu0 }
 0x3e3   :  { %v1375_v10 = vadd.f32 %v1358_v8, %v1120_v16  ;;  %v7956_v8 = vld [vmem:[%s13477_s3 + $0x70] sm:$0xff] }
 0x3e5   :  { %v1480_v38 = vadd.f32 %v1464_v51, %v1375_v10  ;;  %v1500_v10 = vld [vmem:[%s13477_s3 + $0x20] sm:$0xff] }
 0x3e7   :  { %v10379_v60 = vmax.f32 %v1480_v38, 0.0  ;;  %v8019_v38 = vld [vmem:[%s13476_s6 + $0x70] sm:$0x3f] }
 0x3e9   :  { %7951 = vmatmul.msk.f32.gmra.mxu3 %vm1511_vm4, %v10379_v60  ;;  %7982 = vmatmul.msk.f32.gmra.mxu2 %vm1511_vm4, %v10379_v60 }
 0x3f1   :  { %8063 = vmatmul.msk.f32.vlgmr.msra.gmra.mxu2 %vm1511_vm4, %v10240_v34 }
 0x3f9   :  { %8064 = vmatmul.msk.f32.gmra.mxu2 %vm1511_vm4, %v10249_v50 }
 0x3fc   :  { %v10389_v23 = vpop.f32.mrf.mxu3  ;;  %v10391_v18 = vpop.f32.mrf.mxu2 }
 0x401   :  { %8065 = vmatmul.msk.f32.gmra.mxu2 %vm1511_vm4, %v10258_v31 }
 0x404   :  { %v10395_v61 = vpop.f32.mrf.mxu3  ;;  %v10397_v42 = vpop.f32.mrf.mxu2 }
 0x409   :  { %8066 = vmatmul.msk.f32.gmra.mxu2 %vm1511_vm4, %v10267_v36 }
 0x40c   :  { %v10401_v44 = vpop.f32.mrf.mxu3  ;;  %v10403_v41 = vpop.f32.mrf.mxu2 }
 0x411   :  { %8067 = vmatmul.msk.f32.gmra.mxu2 %vm1511_vm4, %v10276_v45 }
 0x414   :  { %v1587_v15 = vpop.f32.mrf.mxu3  ;;  %v1669_v57 = vpop.f32.mrf.mxu2 }
 0x419   :  { %8068 = vmatmul.msk.f32.gmra.mxu2 %vm1511_vm4, %v10285_v25 }
 0x41c   :  { %v1590_v21 = vpop.f32.mrf.mxu3  ;;  %v1672_v4 = vpop.f32.mrf.mxu2 }
 0x421   :  { %8069 = vmatmul.msk.f32.gmra.mxu2 %vm1511_vm4, %v10294_v29 }
 0x424   :  { %v1593_v9 = vpop.f32.mrf.mxu3  ;;  %v1675_v33 = vpop.f32.mrf.mxu2 }
 0x429   :  { %8070 = vmatmul.msk.f32.gmra.mxu2 %vm1511_vm4, %v10303_v52 }
 0x42c   :  { %v1596_v28 = vpop.f32.mrf.mxu3  ;;  %v1678_v12 = vpop.f32.mrf.mxu2 }
 0x431   :  { %8071 = vmatmul.msk.f32.gmra.mxu2 %vm1511_vm4, %v10312_v22 }
 0x434   :  { %v1599_v13 = vpop.f32.mrf.mxu3  ;;  %v1681_v20 = vpop.f32.mrf.mxu2 }
 0x439   :  { %8072 = vmatmul.msk.f32.gmra.mxu2 %vm1511_vm4, %v10321_v0 }
 0x43c   :  { %v1602_v30 = vpop.f32.mrf.mxu3  ;;  %v1684_v48 = vpop.f32.mrf.mxu2 }
 0x441   :  { %8073 = vmatmul.msk.f32.gmra.mxu2 %vm1511_vm4, %v10330_v54 }
 0x444   :  { %v1605_v17 = vpop.f32.mrf.mxu3  ;;  %v1687_v35 = vpop.f32.mrf.mxu2 }
 0x449   :  { %8074 = vmatmul.msk.f32.gmra.mxu2 %vm1511_vm4, %v10355_v14 }
 0x44c   :  { %v1608_v47 = vpop.f32.mrf.mxu3  ;;  %v1690_v11 = vpop.f32.mrf.mxu2 }
 0x451   :  { %8075 = vmatmul.msk.f32.gmra.mxu2 %vm1511_vm4, %v10364_v2 }
 0x454   :  { %v1611_v37 = vpop.f32.mrf.mxu3  ;;  %v1693_v27 = vpop.f32.mrf.mxu2 }
 0x459   :  { %8076 = vmatmul.msk.f32.gmra.mxu2 %vm1511_vm4, %v10373_v6 }
 0x45c   :  { %v1614_v59 = vpop.f32.mrf.mxu3  ;;  %v1696_v55 = vpop.f32.mrf.mxu2 }
 0x461   :  { %8077 = vmatmul.msk.f32.gmra.mxu2 %vm1511_vm4, %v10379_v60 }
 0x464   :  { %v1617_v19 = vpop.f32.mrf.mxu3  ;;  %v1699_v1 = vpop.f32.mrf.mxu2 }
 0x46c   :  { %v1620_v26 = vpop.f32.mrf.mxu3  ;;  %v1702_v3 = vpop.f32.mrf.mxu2 }
 0x46d   :  { %7983 = vmatpush.msk.msrb.mxu1 %vm1736_vm5, %v1702_v3  ;;  %7994 = vmatpush.msk.msra.mxu0 %vm1736_vm5, %v1620_v26 }
 0x46f   :  { %1742 = vmatpush.msrb.mxu1 %v1699_v1  ;;  %1822 = vmatpush.msra.mxu0 %v1617_v19 }
 0x471   :  { %1743 = vmatpush.msrb.mxu1 %v1696_v55  ;;  %1823 = vmatpush.msra.mxu0 %v1614_v59 }
 0x473   :  { %1744 = vmatpush.msrb.mxu1 %v1693_v27  ;;  %1824 = vmatpush.msra.mxu0 %v1611_v37 }
 0x474   :  { %v10429_v53 = vpop.f32.mrf.mxu2 }
 0x475   :  { %1745 = vmatpush.msrb.mxu1 %v1690_v11  ;;  %1825 = vmatpush.msra.mxu0 %v1608_v47 }
 0x477   :  { %1746 = vmatpush.msrb.mxu1 %v1687_v35  ;;  %1826 = vmatpush.msra.mxu0 %v1605_v17 }
 0x479   :  { %1747 = vmatpush.msrb.mxu1 %v1684_v48  ;;  %1827 = vmatpush.msra.mxu0 %v1602_v30  ;;  %v7961_v30 = vld [vmem:[%s13477_s3 + $0x98] sm:$0xff]  ;;  %v1505_v48 = vld [vmem:[%s13477_s3 + $0x48] sm:$0xff] }
 0x47b   :  { %1748 = vmatpush.msrb.mxu1 %v1681_v20  ;;  %1828 = vmatpush.msra.mxu0 %v1599_v13  ;;  %v1504_v13 = vld [vmem:[%s13477_s3 + $0x40] sm:$0xff] }
 0x47c   :  { %v10431_v58 = vpop.f32.mrf.mxu2 }
 0x47d   :  { %1749 = vmatpush.msrb.mxu1 %v1678_v12  ;;  %1829 = vmatpush.msra.mxu0 %v1596_v28  ;;  %v7960_v12 = vld [vmem:[%s13477_s3 + $0x90] sm:$0xff] }
 0x47f   :  { %1750 = vmatpush.msrb.mxu1 %v1675_v33  ;;  %1830 = vmatpush.msra.mxu0 %v1593_v9  ;;  %v7959_v9 = vld [vmem:[%s13477_s3 + $0x88] sm:$0xff]  ;;  %v1503_v33 = vld [vmem:[%s13477_s3 + $0x38] sm:$0xff] }
 0x481   :  { %1751 = vmatpush.msrb.mxu1 %v1672_v4  ;;  %1831 = vmatpush.msra.mxu0 %v1590_v21  ;;  %v1502_v21 = vld [vmem:[%s13477_s3 + $0x30] sm:$0xff] }
 0x483   :  { %1752 = vmatpush.msrb.mxu1 %v1669_v57  ;;  %1832 = vmatpush.msra.mxu0 %v1587_v15  ;;  %v8015_v15 = vld [vmem:[%s13476_s6 + $0x50] sm:$0xff]  ;;  %v7958_v57 = vld [vmem:[%s13477_s3 + $0x80] sm:$0xff] }
 0x484   :  { %v10433_v32 = vpop.f32.mrf.mxu2 }
 0x485   :  { %1753 = vmatpush.msrb.mxu1 %v10403_v41  ;;  %1833 = vmatpush.msra.mxu0 %v10401_v44  ;;  %v8017_v44 = vld [vmem:[%s13476_s6 + $0x60] sm:$0xff]  ;;  %v8016_v41 = vld [vmem:[%s13476_s6 + $0x58] sm:$0xff] }
 0x487   :  { %1754 = vmatpush.msrb.mxu1 %v10397_v42  ;;  %1834 = vmatpush.msra.mxu0 %v10395_v61  ;;  %v8018_v61 = vld [vmem:[%s13476_s6 + $0x68] sm:$0xff] }
 0x489   :  { %1755 = vmatpush.msrb.mxu1 %v10391_v18  ;;  %1835 = vmatpush.msra.mxu0 %v10389_v23  ;;  %v7957_v23 = vld [vmem:[%s13477_s3 + $0x78] sm:$0xff]  ;;  %v1501_v18 = vld [vmem:[%s13477_s3 + $0x28] sm:$0xff] }
 0x48a   :  { %7984 = vmatmul.msk.f32.vlgmr.msrb.gmra.mxu1 %vm1705_vm6, %v7952_v62  ;;  %7995 = vmatmul.msk.f32.vlgmr.msra.gmra.mxu0 %vm1705_vm6, %v1496_v40 }
 0x48b   :  { %8020 = vmatpush.msk.msra.mxu1 %vm1557_vm3, %v8019_v38  ;;  %v8049_v38 = vld [vmem:[%s13477_s3 + $0x100] sm:$0xff] }
 0x48c   :  { %v10449_v7 = vpop.f32.mrf.mxu2 }
 0x48d   :  { %1899 = vmatpush.msra.mxu1 %v8018_v61  ;;  %v8006_v61 = vld [vmem:[%s13477_s3 + $0xa8] sm:$0xff] }
 0x48f   :  { %1900 = vmatpush.msra.mxu1 %v8017_v44  ;;  %v8007_v44 = vld [vmem:[%s13477_s3 + $0xb0] sm:$0xff] }
 0x491   :  { %1901 = vmatpush.msra.mxu1 %v8016_v41  ;;  %v8052_v41 = vld [vmem:[%s13477_s3 + $0x118] sm:$0xff] }
 0x492   :  { %7985 = vmatmul.msk.f32.gmra.mxu1 %vm1705_vm6, %v7953_v63  ;;  %7996 = vmatmul.msk.f32.gmra.mxu0 %vm1705_vm6, %v1497_v5 }
 0x493   :  { %1902 = vmatpush.msra.mxu1 %v8015_v15  ;;  %v8008_v15 = vld [vmem:[%s13477_s3 + $0xb8] sm:$0xff] }
 0x494   :  { %v10459_v39 = vpop.f32.mrf.mxu2 }
 0x49a   :  { %7986 = vmatmul.msk.f32.gmra.mxu1 %vm1705_vm6, %v7954_v24  ;;  %7997 = vmatmul.msk.f32.gmra.mxu0 %vm1705_vm6, %v1498_v49 }
 0x49c   :  { %v2091_v46 = vpop.f32.mrf.mxu2 }
 0x4a2   :  { %7987 = vmatmul.msk.f32.gmra.mxu1 %vm1705_vm6, %v7955_v56  ;;  %7998 = vmatmul.msk.f32.gmra.mxu0 %vm1705_vm6, %v1499_v43 }
 0x4a4   :  { %v2094_v16 = vpop.f32.mrf.mxu2 }
 0x4aa   :  { %7988 = vmatmul.msk.f32.gmra.mxu1 %vm1705_vm6, %v7956_v8  ;;  %7999 = vmatmul.msk.f32.gmra.mxu0 %vm1705_vm6, %v1500_v10  ;;  %v8047_v10 = vld [vmem:[%s13477_s3 + $0xf0] sm:$0xff] }
 0x4ac   :  { %v2097_v51 = vpop.f32.mrf.mxu2 }
 0x4b2   :  { %7989 = vmatmul.msk.f32.gmra.mxu1 %vm1705_vm6, %v7957_v23  ;;  %8000 = vmatmul.msk.f32.gmra.mxu0 %vm1705_vm6, %v1501_v18  ;;  %v8005_v23 = vld [vmem:[%s13477_s3 + $0xa0] sm:$0xff]  ;;  %v8050_v18 = vld [vmem:[%s13477_s3 + $0x108] sm:$0xff] }
 0x4b4   :  { %v2100_v42 = vpop.f32.mrf.mxu2 }
 0x4ba   :  { %7990 = vmatmul.msk.f32.gmra.mxu1 %vm1705_vm6, %v7958_v57  ;;  %8001 = vmatmul.msk.f32.gmra.mxu0 %vm1705_vm6, %v1502_v21  ;;  %v8053_v57 = vld [vmem:[%s13477_s3 + $0x120] sm:$0xff] }
 0x4bb   :  { %v8009_v21 = vld [vmem:[%s13477_s3 + $0xc0] sm:$0xff] }
 0x4bc   :  { %v2103_v4 = vpop.f32.mrf.mxu2 }
 0x4c2   :  { %7991 = vmatmul.msk.f32.gmra.mxu1 %vm1705_vm6, %v7959_v9  ;;  %8002 = vmatmul.msk.f32.gmra.mxu0 %vm1705_vm6, %v1503_v33  ;;  %v8103_v9 = vld [vmem:[%s13476_s6 + $0xc0] sm:$0x3f]  ;;  %v8010_v33 = vld [vmem:[%s13477_s3 + $0xc8] sm:$0xff] }
 0x4c4   :  { %v2106_v28 = vpop.f32.mrf.mxu2 }
 0x4ca   :  { %7992 = vmatmul.msk.f32.gmra.mxu1 %vm1705_vm6, %v7960_v12  ;;  %8003 = vmatmul.msk.f32.gmra.mxu0 %vm1705_vm6, %v1504_v13  ;;  %v8102_v12 = vld [vmem:[%s13476_s6 + $0xb8] sm:$0xff]  ;;  %v8101_v13 = vld [vmem:[%s13476_s6 + $0xb0] sm:$0xff] }
 0x4cc   :  { %v2109_v20 = vpop.f32.mrf.mxu2 }
 0x4d2   :  { %7993 = vmatmul.msk.f32.gmra.mxu1 %vm1705_vm6, %v7961_v30  ;;  %8004 = vmatmul.msk.f32.gmra.mxu0 %vm1705_vm6, %v1505_v48  ;;  %v8099_v30 = vld [vmem:[%s13476_s6 + $0xa0] sm:$0xff]  ;;  %v8011_v48 = vld [vmem:[%s13477_s3 + $0xd0] sm:$0xff] }
 0x4d4   :  { %v2112_v17 = vpop.f32.mrf.mxu2 }
 0x4da   :  { %8021 = vmatmul.msk.f32.vlgmr.msra.gmra.mxu1 %vm1511_vm4, %v10240_v34 }
 0x4dc   :  { %v2115_v35 = vpop.f32.mrf.mxu2 }
 0x4e2   :  { %8022 = vmatmul.msk.f32.gmra.mxu1 %vm1511_vm4, %v10249_v50 }
 0x4e4   :  { %v2118_v47 = vpop.f32.mrf.mxu2 }
 0x4e5   :  { %8078 = vmatpush.msk.msrb.mxu0 %vm1736_vm5, %v2118_v47  ;;  %v8013_v47 = vld [vmem:[%s13477_s3 + $0xe0] sm:$0xff] }
 0x4e7   :  { %2156 = vmatpush.msrb.mxu0 %v2115_v35  ;;  %v8012_v35 = vld [vmem:[%s13477_s3 + $0xd8] sm:$0xff] }
 0x4e9   :  { %2157 = vmatpush.msrb.mxu0 %v2112_v17  ;;  %v8056_v17 = vld [vmem:[%s13477_s3 + $0x138] sm:$0xff] }
 0x4ea   :  { %8023 = vmatmul.msk.f32.gmra.mxu1 %vm1511_vm4, %v10258_v31 }
 0x4eb   :  { %2158 = vmatpush.msrb.mxu0 %v2109_v20  ;;  %v8100_v20 = vld [vmem:[%s13476_s6 + $0xa8] sm:$0xff] }
 0x4ed   :  { %2159 = vmatpush.msrb.mxu0 %v2106_v28  ;;  %v8055_v28 = vld [vmem:[%s13477_s3 + $0x130] sm:$0xff] }
 0x4ef   :  { %2160 = vmatpush.msrb.mxu0 %v2103_v4  ;;  %v8054_v4 = vld [vmem:[%s13477_s3 + $0x128] sm:$0xff] }
 0x4f1   :  { %2161 = vmatpush.msrb.mxu0 %v2100_v42  ;;  %v8051_v42 = vld [vmem:[%s13477_s3 + $0x110] sm:$0xff] }
 0x4f2   :  { %8024 = vmatmul.msk.f32.gmra.mxu1 %vm1511_vm4, %v10267_v36 }
 0x4f3   :  { %2162 = vmatpush.msrb.mxu0 %v2097_v51  ;;  %v8048_v51 = vld [vmem:[%s13477_s3 + $0xf8] sm:$0xff] }
 0x4f5   :  { %2163 = vmatpush.msrb.mxu0 %v2094_v16 }
 0x4f7   :  { %2164 = vmatpush.msrb.mxu0 %v2091_v46 }
 0x4f9   :  { %2165 = vmatpush.msrb.mxu0 %v10459_v39 }
 0x4fa   :  { %8025 = vmatmul.msk.f32.gmra.mxu1 %vm1511_vm4, %v10276_v45 }
 0x4fb   :  { %2166 = vmatpush.msrb.mxu0 %v10449_v7 }
 0x4fd   :  { %2167 = vmatpush.msrb.mxu0 %v10433_v32 }
 0x4ff   :  { %2168 = vmatpush.msrb.mxu0 %v10431_v58 }
 0x501   :  { %2169 = vmatpush.msrb.mxu0 %v10429_v53 }
 0x502   :  { %8026 = vmatmul.msk.f32.gmra.mxu1 %vm1511_vm4, %v10285_v25  ;;  %8079 = vmatmul.msk.f32.vlgmr.msrb.gmra.mxu0 %vm1705_vm6, %v8047_v10 }
 0x507   :  { %v10559_v11 = vpop.f32.mrf.mxu1 }
 0x50a   :  { %8027 = vmatmul.msk.f32.gmra.mxu1 %vm1511_vm4, %v10294_v29  ;;  %8080 = vmatmul.msk.f32.gmra.mxu0 %vm1705_vm6, %v8048_v51  ;;  %v8092_v51 = vld [vmem:[%s13477_s3 + $0x158] sm:$0xff] }
 0x50f   :  { %v10563_v37 = vpop.f32.mrf.mxu1 }
 0x512   :  { %8028 = vmatmul.msk.f32.gmra.mxu1 %vm1511_vm4, %v10303_v52  ;;  %8081 = vmatmul.msk.f32.gmra.mxu0 %vm1705_vm6, %v8049_v38 }
 0x517   :  { %v10567_v27 = vpop.f32.mrf.mxu1 }
 0x51a   :  { %8029 = vmatmul.msk.f32.gmra.mxu1 %vm1511_vm4, %v10312_v22  ;;  %8082 = vmatmul.msk.f32.gmra.mxu0 %vm1705_vm6, %v8050_v18 }
 0x51f   :  { %v10571_v59 = vpop.f32.mrf.mxu1 }
 0x522   :  { %8030 = vmatmul.msk.f32.gmra.mxu1 %vm1511_vm4, %v10321_v0  ;;  %8083 = vmatmul.msk.f32.gmra.mxu0 %vm1705_vm6, %v8051_v42 }
 0x527   :  { %v10575_v55 = vpop.f32.mrf.mxu1 }
 0x52a   :  { %8031 = vmatmul.msk.f32.gmra.mxu1 %vm1511_vm4, %v10330_v54  ;;  %8084 = vmatmul.msk.f32.gmra.mxu0 %vm1705_vm6, %v8052_v41  ;;  %v8096_v41 = vld [vmem:[%s13477_s3 + $0x178] sm:$0xff] }
 0x52f   :  { %v10579_v19 = vpop.f32.mrf.mxu1 }
 0x532   :  { %8032 = vmatmul.msk.f32.gmra.mxu1 %vm1511_vm4, %v10355_v14  ;;  %8085 = vmatmul.msk.f32.gmra.mxu0 %vm1705_vm6, %v8053_v57  ;;  %v8097_v57 = vld [vmem:[%s13477_s3 + $0x180] sm:$0xff] }
 0x537   :  { %v10583_v1 = vpop.f32.mrf.mxu1 }
 0x53a   :  { %8033 = vmatmul.msk.f32.gmra.mxu1 %vm1511_vm4, %v10364_v2  ;;  %8086 = vmatmul.msk.f32.gmra.mxu0 %vm1705_vm6, %v8054_v4  ;;  %v8098_v4 = vld [vmem:[%s13477_s3 + $0x188] sm:$0xff] }
 0x53f   :  { %v10587_v26 = vpop.f32.mrf.mxu1 }
 0x542   :  { %8034 = vmatmul.msk.f32.gmra.mxu1 %vm1511_vm4, %v10373_v6  ;;  %8087 = vmatmul.msk.f32.gmra.mxu0 %vm1705_vm6, %v8055_v28 }
 0x547   :  { %v10591_v3 = vpop.f32.mrf.mxu1 }
 0x54a   :  { %8035 = vmatmul.msk.f32.gmra.mxu1 %vm1511_vm4, %v10379_v60  ;;  %8088 = vmatmul.msk.f32.gmra.mxu0 %vm1705_vm6, %v8056_v17 }
 0x54f   :  { %v10595_v53 = vpop.f32.mrf.mxu1 }
 0x557   :  { %v1904_v58 = vpop.f32.mrf.mxu1 }
 0x55f   :  { %v1907_v32 = vpop.f32.mrf.mxu1 }
 0x567   :  { %v1910_v62 = vpop.f32.mrf.mxu1 }
 0x56f   :  { %v1913_v40 = vpop.f32.mrf.mxu1 }
 0x577   :  { %v1916_v7 = vpop.f32.mrf.mxu1 }
 0x57f   :  { %v1919_v63 = vpop.f32.mrf.mxu1 }
 0x587   :  { %v1922_v5 = vpop.f32.mrf.mxu1 }
 0x58f   :  { %v1925_v39 = vpop.f32.mrf.mxu1 }
 0x597   :  { %v1928_v24 = vpop.f32.mrf.mxu1 }
 0x59f   :  { %v1931_v49 = vpop.f32.mrf.mxu1 }
 0x5a7   :  { %v1934_v46 = vpop.f32.mrf.mxu1 }
 0x5af   :  { %v1937_v56 = vpop.f32.mrf.mxu1 }
 0x5b7   :  { %v1940_v43 = vpop.f32.mrf.mxu1 }
 0x5bf   :  { %v1943_v16 = vpop.f32.mrf.mxu1 }
 0x5c7   :  { %v1946_v8 = vpop.f32.mrf.mxu1 }
 0x5c8   :  { %8036 = vmatpush.msk.msra.mxu3 %vm1736_vm5, %v1946_v8  ;;  %v8091_v8 = vld [vmem:[%s13477_s3 + $0x150] sm:$0xff] }
 0x5ca   :  { %1984 = vmatpush.msra.mxu3 %v1943_v16  ;;  %v8090_v16 = vld [vmem:[%s13477_s3 + $0x148] sm:$0xff] }
 0x5cc   :  { %1985 = vmatpush.msra.mxu3 %v1940_v43  ;;  %v10749_v43 = vpop.f32.mrf.mxu0 }
 0x5ce   :  { %1986 = vmatpush.msra.mxu3 %v1937_v56 }
 0x5d0   :  { %1987 = vmatpush.msra.mxu3 %v1934_v46 }
 0x5d2   :  { %1988 = vmatpush.msra.mxu3 %v1931_v49 }
 0x5d4   :  { %1989 = vmatpush.msra.mxu3 %v1928_v24  ;;  %v10758_v10 = vpop.f32.mrf.mxu0 }
 0x5d6   :  { %1990 = vmatpush.msra.mxu3 %v1925_v39 }
 0x5d8   :  { %1991 = vmatpush.msra.mxu3 %v1922_v5 }
 0x5da   :  { %1992 = vmatpush.msra.mxu3 %v1919_v63 }
 0x5dc   :  { %1993 = vmatpush.msra.mxu3 %v1916_v7  ;;  %v10765_v38 = vpop.f32.mrf.mxu0 }
 0x5de   :  { %1994 = vmatpush.msra.mxu3 %v1913_v40 }
 0x5e0   :  { %1995 = vmatpush.msra.mxu3 %v1910_v62 }
 0x5e2   :  { %1996 = vmatpush.msra.mxu3 %v1907_v32 }
 0x5e4   :  { %1997 = vmatpush.msra.mxu3 %v1904_v58  ;;  %v8014_v58 = vld [vmem:[%s13477_s3 + $0xe8] sm:$0xff]  ;;  %v1846_v18 = vpop.f32.mrf.mxu0 }
 0x5e5   :  { %8037 = vmatmul.msk.f32.vlgmr.msra.gmra.mxu3 %vm1705_vm6, %v8005_v23  ;;  %v8093_v23 = vld [vmem:[%s13477_s3 + $0x160] sm:$0xff] }
 0x5e6   :  { %8104 = vmatpush.msk.msrb.mxu3 %vm1557_vm3, %v8103_v9 }
 0x5e8   :  { %2243 = vmatpush.msrb.mxu3 %v8102_v12 }
 0x5ea   :  { %2244 = vmatpush.msrb.mxu3 %v8101_v13 }
 0x5ec   :  { %2245 = vmatpush.msrb.mxu3 %v8100_v20  ;;  %v1849_v42 = vpop.f32.mrf.mxu0 }
 0x5ed   :  { %8038 = vmatmul.msk.f32.gmra.mxu3 %vm1705_vm6, %v8006_v61  ;;  %v8094_v61 = vld [vmem:[%s13477_s3 + $0x168] sm:$0xff] }
 0x5ee   :  { %2246 = vmatpush.msrb.mxu3 %v8099_v30 }
 0x5f5   :  { %8039 = vmatmul.msk.f32.gmra.mxu3 %vm1705_vm6, %v8007_v44  ;;  %v8095_v44 = vld [vmem:[%s13477_s3 + $0x170] sm:$0xff] }
 0x5fd   :  { %8040 = vmatmul.msk.f32.gmra.mxu3 %vm1705_vm6, %v8008_v15  ;;  %v1852_v15 = vpop.f32.mrf.mxu0 }
 0x605   :  { %8041 = vmatmul.msk.f32.gmra.mxu3 %vm1705_vm6, %v8009_v21  ;;  %v1855_v21 = vpop.f32.mrf.mxu0 }
 0x60d   :  { %8042 = vmatmul.msk.f32.gmra.mxu3 %vm1705_vm6, %v8010_v33  ;;  %v1858_v9 = vpop.f32.mrf.mxu0 }
 0x615   :  { %8043 = vmatmul.msk.f32.gmra.mxu3 %vm1705_vm6, %v8011_v48  ;;  %v10791_v33 = vpop.f32.mrf.mxu0  ;;  %v10803_v48 = vpop.permute.xlu0 %2440 }
 0x61d   :  { %8044 = vmatmul.msk.f32.gmra.mxu3 %vm1705_vm6, %v8012_v35  ;;  %v10793_v28 = vpop.f32.mrf.mxu0 }
 0x625   :  { %8045 = vmatmul.msk.f32.gmra.mxu3 %vm1705_vm6, %v8013_v47  ;;  %v10795_v12 = vpop.f32.mrf.mxu0  ;;  %v2426_v47 = vpop.permute.xlu0 %2425 }
 0x62d   :  { %8046 = vmatmul.msk.f32.gmra.mxu3 %vm1705_vm6, %v8014_v58  ;;  %v10797_v13 = vpop.f32.mrf.mxu0 }
 0x635   :  { %8105 = vmatmul.msk.f32.vlgmr.msrb.gmra.mxu3 %vm1511_vm4, %v10240_v34  ;;  %v10799_v20 = vpop.f32.mrf.mxu0 }
 0x63d   :  { %8106 = vmatmul.msk.f32.gmra.mxu3 %vm1511_vm4, %v10249_v50  ;;  %v2180_v17 = vpop.f32.mrf.mxu0 }
 0x645   :  { %8107 = vmatmul.msk.f32.gmra.mxu3 %vm1511_vm4, %v10258_v31 }
 0x64d   :  { %8108 = vmatmul.msk.f32.gmra.mxu3 %vm1511_vm4, %v10267_v36 }
 0x655   :  { %8109 = vmatmul.msk.f32.gmra.mxu3 %vm1511_vm4, %v10276_v45 }
 0x65d   :  { %8110 = vmatmul.msk.f32.gmra.mxu3 %vm1511_vm4, %v10285_v25 }
 0x665   :  { %8111 = vmatmul.msk.f32.gmra.mxu3 %vm1511_vm4, %v10294_v29 }
 0x668   :  { %v10708_v32 = vpop.f32.mrf.mxu3 }
 0x66d   :  { %8112 = vmatmul.msk.f32.gmra.mxu3 %vm1511_vm4, %v10303_v52 }
 0x670   :  { %v10712_v34 = vpop.f32.mrf.mxu3 }
 0x675   :  { %8113 = vmatmul.msk.f32.gmra.mxu3 %vm1511_vm4, %v10312_v22 }
 0x678   :  { %v10716_v50 = vpop.f32.mrf.mxu3 }
 0x67d   :  { %8114 = vmatmul.msk.f32.gmra.mxu3 %vm1511_vm4, %v10321_v0 }
 0x680   :  { %v10720_v31 = vpop.f32.mrf.mxu3 }
 0x685   :  { %8115 = vmatmul.msk.f32.gmra.mxu3 %vm1511_vm4, %v10330_v54 }
 0x688   :  { %v10724_v36 = vpop.f32.mrf.mxu3 }
 0x68d   :  { %8116 = vmatmul.msk.f32.gmra.mxu3 %vm1511_vm4, %v10355_v14 }
 0x690   :  { %v10728_v45 = vpop.f32.mrf.mxu3 }
 0x695   :  { %8117 = vmatmul.msk.f32.gmra.mxu3 %vm1511_vm4, %v10364_v2 }
 0x698   :  { %v10732_v25 = vpop.f32.mrf.mxu3 }
 0x69d   :  { %8118 = vmatmul.msk.f32.gmra.mxu3 %vm1511_vm4, %v10373_v6 }
 0x6a0   :  { %v10736_v29 = vpop.f32.mrf.mxu3 }
 0x6a5   :  { %8119 = vmatmul.msk.f32.gmra.mxu3 %vm1511_vm4, %v10379_v60  ;;  %v8089_v60 = vld [vmem:[%s13477_s3 + $0x140] sm:$0xff] }
 0x6a8   :  { %v10740_v52 = vpop.f32.mrf.mxu3 }
 0x6b0   :  { %v10742_v22 = vpop.f32.mrf.mxu3 }
 0x6b8   :  { %v2248_v0 = vpop.f32.mrf.mxu3 }
 0x6c0   :  { %v2251_v54 = vpop.f32.mrf.mxu3 }
 0x6c8   :  { %v2254_v14 = vpop.f32.mrf.mxu3 }
 0x6d0   :  { %v2257_v62 = vpop.f32.mrf.mxu3 }
 0x6d8   :  { %v2260_v40 = vpop.f32.mrf.mxu3 }
 0x6e0   :  { %v2263_v2 = vpop.f32.mrf.mxu3 }
 0x6e8   :  { %v2266_v7 = vpop.f32.mrf.mxu3 }
 0x6f0   :  { %v2269_v63 = vpop.f32.mrf.mxu3 }
 0x6f8   :  { %v2272_v5 = vpop.f32.mrf.mxu3 }
 0x700   :  { %v2275_v39 = vpop.f32.mrf.mxu3 }
 0x708   :  { %v2278_v6 = vpop.f32.mrf.mxu3 }
 0x710   :  { %v2281_v24 = vpop.f32.mrf.mxu3 }
 0x718   :  { %v2284_v49 = vpop.f32.mrf.mxu3 }
 0x720   :  { %v2287_v46 = vpop.f32.mrf.mxu3 }
 0x728   :  { %v2290_v56 = vpop.f32.mrf.mxu3 }
 0x729   :  { %8120 = vmatpush.msk.msrb.mxu1 %vm1736_vm5, %v2290_v56 }
 0x72b   :  { %2328 = vmatpush.msrb.mxu1 %v2287_v46 }
 0x72d   :  { %2329 = vmatpush.msrb.mxu1 %v2284_v49 }
 0x72f   :  { %2330 = vmatpush.msrb.mxu1 %v2281_v24 }
 0x731   :  { %2331 = vmatpush.msrb.mxu1 %v2278_v6 }
 0x733   :  { %2332 = vmatpush.msrb.mxu1 %v2275_v39 }
 0x735   :  { %2333 = vmatpush.msrb.mxu1 %v2272_v5  ;;  %v2411_v5 = vpop.permute.xlu0 %2410 }
 0x737   :  { %2334 = vmatpush.msrb.mxu1 %v2269_v63 }
 0x739   :  { %2335 = vmatpush.msrb.mxu1 %v2266_v7  ;;  %v1850_v7 = vadd.f32 %v1849_v42, %v10575_v55  ;;  %v1856_v42 = vadd.f32 %v1855_v21, %v10583_v1  ;;  %v1859_v1 = vadd.f32 %v1858_v9, %v10587_v26  ;;  %v1862_v26 = vadd.f32 %v10791_v33, %v10591_v3 }
 0x73a   :  { %v1841_v3 = vadd.f32 %v10758_v10, %v10563_v37  ;;  %v1865_v33 = vadd.f32 %v10793_v28, %v10595_v53 }
 0x73b   :  { %2336 = vmatpush.msrb.mxu1 %v2263_v2  ;;  %v2033_v39 = vadd.f32 %v10724_v36, %v1850_v7 }
 0x73d   :  { %2337 = vmatpush.msrb.mxu1 %v2260_v40  ;;  %v2431_v40 = vpop.permute.xlu2 %2430 }
 0x73f   :  { %2338 = vmatpush.msrb.mxu1 %v2257_v62 }
 0x741   :  { %2339 = vmatpush.msrb.mxu1 %v2254_v14 }
 0x743   :  { %2340 = vmatpush.msrb.mxu1 %v2251_v54  ;;  %v2183_v54 = vpop.f32.mrf.mxu0 }
 0x745   :  { %2341 = vmatpush.msrb.mxu1 %v2248_v0  ;;  %v1847_v0 = vadd.f32 %v1846_v18, %v10571_v59  ;;  %v2205_v59 = vadd.f32 %v2183_v54, %v2033_v39 }
 0x746   :  { %8121 = vmatmul.msk.f32.vlgmr.msrb.gmra.mxu1 %vm1705_vm6, %v8089_v60  ;;  %v1853_v60 = vadd.f32 %v1852_v15, %v10579_v19  ;;  %v2035_v15 = vadd.f32 %v10732_v25, %v1856_v42  ;;  %v2036_v25 = vadd.f32 %v10736_v29, %v1859_v1  ;;  %v2037_v29 = vadd.f32 %v10740_v52, %v1862_v26 }
 0x747   :  { %v2032_v14 = vadd.f32 %v10720_v31, %v1847_v0  ;;  %v2436_v31 = vpop.permute.xlu1 %2435 }
 0x749   :  { %v2204_v62 = vadd.f32 %v2180_v17, %v2032_v14 }
 0x74b   :  { %v2186_v24 = vpop.f32.mrf.mxu0 }
 0x74e   :  { %8122 = vmatmul.msk.f32.gmra.mxu1 %vm1705_vm6, %v8090_v16  ;;  %v2416_v16 = vpop.permute.xlu2 %2415 }
 0x74f   :  { %v2421_v19 = vpop.permute.xlu1 %2420 }
 0x756   :  { %8123 = vmatmul.msk.f32.gmra.mxu1 %vm1705_vm6, %v8091_v8  ;;  %v2034_v8 = vadd.f32 %v10728_v45, %v1853_v60 }
 0x758   :  { %v2206_v18 = vadd.f32 %v2186_v24, %v2034_v8 }
 0x75e   :  { %8124 = vmatmul.msk.f32.gmra.mxu1 %vm1705_vm6, %v8092_v51 }
 0x766   :  { %8125 = vmatmul.msk.f32.gmra.mxu1 %vm1705_vm6, %v8093_v23  ;;  %v2189_v23 = vpop.f32.mrf.mxu0 }
 0x767   :  { %v2207_v17 = vadd.f32 %v2189_v23, %v2035_v15 }
 0x76e   :  { %8126 = vmatmul.msk.f32.gmra.mxu1 %vm1705_vm6, %v8094_v61  ;;  %v2192_v0 = vpop.f32.mrf.mxu0 }
 0x776   :  { %8127 = vmatmul.msk.f32.gmra.mxu1 %vm1705_vm6, %v8095_v44  ;;  %v2195_v24 = vpop.f32.mrf.mxu0 }
 0x77e   :  { %8128 = vmatmul.msk.f32.gmra.mxu1 %vm1705_vm6, %v8096_v41 }
 0x786   :  { %8129 = vmatmul.msk.f32.gmra.mxu1 %vm1705_vm6, %v8097_v57 }
 0x78e   :  { %8130 = vmatmul.msk.f32.gmra.mxu1 %vm1705_vm6, %v8098_v4 }
 0x7c3   :  { %v10801_v30 = vpop.f32.mrf.mxu1 }
 0x7cb   :  { %v10805_v35 = vpop.f32.mrf.mxu1 }
 0x7d3   :  { %v10807_v58 = vpop.f32.mrf.mxu1 }
 0x7db   :  { %v2352_v2 = vpop.f32.mrf.mxu1 }
 0x7dc   :  { %v2376_v63 = vadd.f32 %v2352_v2, %v2204_v62 }
 0x7de   :  { %v10813_v6 = vadd.f32 %v2411_v5, %v2376_v63  ;;  %v2208_v63 = vadd.f32 %v2192_v0, %v2036_v25 }
 0x7e0   :  { %v2531_v49 = vmul.f32 %v10813_v6, %v10813_v6 }
 0x7e2   :  { %v2547_v46 = vsel %vm2465_vm7, %v2531_v49, 0.0 }
 0x7e3   :  { %v2355_v56 = vpop.f32.mrf.mxu1  ;;  %2548 = vadd.xlane.f32.xlu2 %v2547_v46  ;;  %v2209_v46 = vadd.f32 %v2195_v24, %v2037_v29 }
 0x7e4   :  { %v2377_v55 = vadd.f32 %v2355_v56, %v2205_v59 }
 0x7e6   :  { %v10820_v36 = vadd.f32 %v2416_v16, %v2377_v55  ;;  %v2030_v55 = vadd.f32 %v10712_v34, %v1841_v3  ;;  %v2038_v16 = vadd.f32 %v10742_v22, %v1865_v33 }
 0x7e8   :  { %v2478_v51 = vsel %vm2465_vm7, %v10820_v36, 0.0  ;;  %v2532_v41 = vmul.f32 %v10820_v36, %v10820_v36  ;;  %v2202_v10 = vadd.f32 %v10797_v13, %v2030_v55  ;;  %v2401_v13 = vpop.permute.xlu2 %2400 }
 0x7e9   :  { %2479 = vadd.xlane.f32.xlu0 %v2478_v51  ;;  %v2198_v51 = vpop.f32.mrf.mxu0 }
 0x7ea   :  { %v2550_v4 = vsel %vm2465_vm7, %v2532_v41, 0.0  ;;  %v2210_v28 = vadd.f32 %v2198_v51, %v2038_v16  ;;  %v2454_v51 = vld [vmem:[%s13478_s0 + $0x8] sm:$0xff] }
 0x7eb   :  { %v2358_v61 = vpop.f32.mrf.mxu1 }
 0x7ec   :  { %v2378_v44 = vadd.f32 %v2358_v61, %v2206_v18 }
 0x7ee   :  { %v10828_v57 = vadd.f32 %v2421_v19, %v2378_v44 }
 0x7f0   :  { %v2481_v45 = vsel %vm2465_vm7, %v10828_v57, 0.0  ;;  %v2533_v14 = vmul.f32 %v10828_v57, %v10828_v57 }
 0x7f1   :  { %2482 = vadd.xlane.f32.xlu1 %v2481_v45  ;;  %2551 = vadd.xlane.f32.xlu0 %v2550_v4  ;;  %v2396_v45 = vpop.permute.xlu0 %2395 }
 0x7f2   :  { %v2553_v2 = vsel %vm2465_vm7, %v2533_v14, 0.0 }
 0x7f3   :  { %v2361_v54 = vpop.f32.mrf.mxu1 }
 0x7f4   :  { %v2379_v21 = vadd.f32 %v2361_v54, %v2207_v17  ;;  %v2475_v17 = vsel %vm2465_vm7, %v10813_v6, 0.0 }
 0x7f6   :  { %v10837_v62 = vadd.f32 %v2426_v47, %v2379_v21 }
 0x7f8   :  { %v2484_v7 = vsel %vm2465_vm7, %v10837_v62, 0.0  ;;  %v2534_v39 = vmul.f32 %v10837_v62, %v10837_v62 }
 0x7f9   :  { %2554 = vadd.xlane.f32.xlu1 %v2553_v2  ;;  %2485 = vadd.xlane.f32.xlu2 %v2484_v7 }
 0x7fa   :  { %v2556_v59 = vsel %vm2465_vm7, %v2534_v39, 0.0 }
 0x7fb   :  { %v2364_v5 = vpop.f32.mrf.mxu1 }
 0x7fc   :  { %v2380_v9 = vadd.f32 %v2364_v5, %v2208_v63 }
 0x7fe   :  { %v10847_v47 = vadd.f32 %v2431_v40, %v2380_v9  ;;  %v1844_v40 = vadd.f32 %v10765_v38, %v10567_v27  ;;  %v1838_v27 = vadd.f32 %v10749_v43, %v10559_v11  ;;  %v2374_v38 = vadd.f32 %v10805_v35, %v2202_v10  ;;  %v2406_v35 = vpop.permute.xlu1 %2405 }
 0x800   :  { %v2487_v49 = vsel %vm2465_vm7, %v10847_v47, 0.0  ;;  %v2535_v52 = vmul.f32 %v10847_v47, %v10847_v47  ;;  %v2031_v23 = vadd.f32 %v10716_v50, %v1844_v40  ;;  %v2029_v18 = vadd.f32 %v10708_v32, %v1838_v27 }
 0x801   :  { %2488 = vadd.xlane.f32.xlu0 %v2487_v49  ;;  %2557 = vadd.xlane.f32.xlu2 %v2556_v59  ;;  %v10880_v44 = vadd.f32 %v2401_v13, %v2374_v38 }
 0x802   :  { %v2559_v53 = vsel %vm2465_vm7, %v2535_v52, 0.0  ;;  %v2203_v22 = vadd.f32 %v10799_v20, %v2031_v23  ;;  %v2201_v32 = vadd.f32 %v10795_v12, %v2029_v18  ;;  %v2453_v52 = vld [vmem:[%s13478_s0] sm:$0xff] }
 0x803   :  { %v2367_v56 = vpop.f32.mrf.mxu1  ;;  %v2529_v19 = vmul.f32 %v10880_v44, %v10880_v44  ;;  %v2469_v54 = vsel %vm2465_vm7, %v10880_v44, 0.0 }
 0x804   :  { %v2381_v60 = vadd.f32 %v2367_v56, %v2209_v46  ;;  %v2375_v61 = vadd.f32 %v10807_v58, %v2203_v22  ;;  %v2373_v41 = vadd.f32 %v10801_v30, %v2201_v32 }
 0x805   :  { %v2541_v12 = vsel %vm2465_vm7, %v2529_v19, 0.0 }
 0x806   :  { %v10862_v8 = vadd.f32 %v2436_v31, %v2381_v60  ;;  %v10888_v58 = vadd.f32 %v2406_v35, %v2375_v61  ;;  %v10896_v4 = vadd.f32 %v2396_v45, %v2373_v41 }
 0x808   :  { %v2490_v37 = vsel %vm2465_vm7, %v10862_v8, 0.0  ;;  %v2536_v50 = vmul.f32 %v10862_v8, %v10862_v8  ;;  %v2530_v15 = vmul.f32 %v10888_v58, %v10888_v58  ;;  %v2528_v30 = vmul.f32 %v10896_v4, %v10896_v4 }
 0x809   :  { %2491 = vadd.xlane.f32.xlu1 %v2490_v37  ;;  %2560 = vadd.xlane.f32.xlu2 %v2559_v53  ;;  %v2472_v21 = vsel %vm2465_vm7, %v10888_v58, 0.0  ;;  %v2466_v14 = vsel %vm2465_vm7, %v10896_v4, 0.0 }
 0x80a   :  { %v2562_v43 = vsel %vm2465_vm7, %v2536_v50, 0.0  ;;  %v2544_v0 = vsel %vm2465_vm7, %v2530_v15, 0.0  ;;  %v2538_v1 = vsel %vm2465_vm7, %v2528_v30, 0.0 }
 0x80b   :  { %v2370_v34 = vpop.f32.mrf.mxu1 }
 0x80c   :  { %v2382_v31 = vadd.f32 %v2370_v34, %v2210_v28 }
 0x80e   :  { %v10878_v42 = vadd.f32 %v10803_v48, %v2382_v31 }
 0x810   :  { %v2493_v11 = vsel %vm2465_vm7, %v10878_v42, 0.0  ;;  %v2537_v20 = vmul.f32 %v10878_v42, %v10878_v42 }
 0x811   :  { %2494 = vadd.xlane.f32.xlu0 %v2493_v11  ;;  %2563 = vadd.xlane.f32.xlu2 %v2562_v43 }
 0x812   :  { %v2565_v48 = vsel %vm2465_vm7, %v2537_v20, 0.0 }
 0x813   :  { %2566 = vadd.xlane.f32.xlu1 %v2565_v48 }
 0x819   :  { %2476 = vadd.xlane.f32.xlu2 %v2475_v17  ;;  %2542 = vadd.xlane.f32.xlu0 %v2541_v12 }
 0x81b   :  { %2545 = vadd.xlane.f32.xlu1 %v2544_v0  ;;  %v2619_v0 = vld [vmem:[%s13479_s28] sm:$0xff] }
 0x821   :  { %2470 = vadd.xlane.f32.xlu0 %v2469_v54  ;;  %2539 = vadd.xlane.f32.xlu2 %v2538_v1  ;;  %v2620_v54 = vld [vmem:[%s13479_s28 + $0x8] sm:$0xff] }
 0x823   :  { %2473 = vadd.xlane.f32.xlu1 %v2472_v21 }
 0x82b   :  { %2467 = vadd.xlane.f32.xlu1 %v2466_v14 }
 0x856   :  { %v2549_v25 = vpop.xlane.xlu2 %2548 }
 0x85c   :  { %v2480_v2 = vpop.xlane.xlu0 %2479 }
 0x864   :  { %v2483_v7 = vpop.xlane.xlu1 %2482  ;;  %v2552_v5 = vpop.xlane.xlu0 %2551 }
 0x86c   :  { %v2486_v63 = vpop.xlane.xlu2 %2485  ;;  %v2555_v9 = vpop.xlane.xlu1 %2554 }
 0x874   :  { %v2558_v26 = vpop.xlane.xlu2 %2557  ;;  %v2489_v39 = vpop.xlane.xlu0 %2488 }
 0x87c   :  { %v2561_v24 = vpop.xlane.xlu2 %2560  ;;  %v2492_v29 = vpop.xlane.xlu1 %2491 }
 0x884   :  { %v2495_v49 = vpop.xlane.xlu0 %2494  ;;  %v2564_v59 = vpop.xlane.xlu2 %2563 }
 0x885   :  { %2509 = vmatpush.msra.mxu0 %v2495_v49  ;;  %v2459_v49 = vld [vmem:[%s13480_s30 + $0x20] sm:$0xff] }
 0x886   :  { %v2567_v46 = vpop.xlane.xlu1 %2566 }
 0x887   :  { %2510 = vmatpush.msra.mxu0 %v2492_v29  ;;  %2574 = vmatpush.msrb.mxu2 %v2567_v46  ;;  %v2458_v29 = vld [vmem:[%s13480_s30 + $0x18] sm:$0xff]  ;;  %v2461_v46 = vld [vmem:[%s13480_s30 + $0x30] sm:$0xff] }
 0x889   :  { %2511 = vmatpush.msra.mxu0 %v2489_v39  ;;  %2575 = vmatpush.msrb.mxu2 %v2564_v59  ;;  %v2456_v39 = vld [vmem:[%s13480_s30 + $0x8] sm:$0xff] }
 0x88a   :  { %v2460_v59 = vld [vmem:[%s13480_s30 + $0x28] sm:$0xff] }
 0x88b   :  { %2512 = vmatpush.msra.mxu0 %v2486_v63  ;;  %2576 = vmatpush.msrb.mxu2 %v2561_v24  ;;  %v2457_v24 = vld [vmem:[%s13480_s30 + $0x10] sm:$0xff] }
 0x88c   :  { %v2477_v56 = vpop.xlane.xlu2 %2476  ;;  %v2543_v3 = vpop.xlane.xlu0 %2542 }
 0x88d   :  { %2513 = vmatpush.msra.mxu0 %v2483_v7  ;;  %2577 = vmatpush.msrb.mxu2 %v2558_v26 }
 0x88e   :  { %v2546_v33 = vpop.xlane.xlu1 %2545 }
 0x88f   :  { %2514 = vmatpush.msra.mxu0 %v2480_v2  ;;  %2578 = vmatpush.msrb.mxu2 %v2555_v9  ;;  %v2455_v2 = vld [vmem:[%s13480_s30] sm:$0xff] }
 0x891   :  { %2515 = vmatpush.msra.mxu0 %v2477_v56  ;;  %2579 = vmatpush.msrb.mxu2 %v2552_v5  ;;  %v2623_v5 = vld [vmem:[%s13435_s10] sm:$0xff]  ;;  %v2462_v56 = vld [vmem:[%s13480_s30 + $0x38] sm:$0xff] }
 0x893   :  { %2580 = vmatpush.msrb.mxu2 %v2549_v25  ;;  %v2624_v25 = vld [vmem:[%s13435_s10 + $0x8] sm:$0xff] }
 0x894   :  { %v2471_v40 = vpop.xlane.xlu0 %2470  ;;  %v2540_v55 = vpop.xlane.xlu2 %2539 }
 0x895   :  { %2581 = vmatpush.msrb.mxu2 %v2546_v33  ;;  %v2464_v33 = vld [vmem:[%s13480_s30 + $0x48] sm:$0xff] }
 0x896   :  { %v2474_v60 = vpop.xlane.xlu1 %2473 }
 0x897   :  { %2516 = vmatpush.msra.mxu0 %v2474_v60  ;;  %2582 = vmatpush.msrb.mxu2 %v2543_v3  ;;  %v2463_v3 = vld [vmem:[%s13480_s30 + $0x40] sm:$0xff] }
 0x899   :  { %2517 = vmatpush.msra.mxu0 %v2471_v40  ;;  %2583 = vmatpush.msrb.mxu2 %v2540_v55 }
 0x89a   :  { %8133 = vmatmul.msk.f32.vlgmr.msrb.gmra.mxu2 %vm2496_vm8, %v2453_v52 }
 0x89e   :  { %v2468_v16 = vpop.xlane.xlu1 %2467 }
 0x89f   :  { %2518 = vmatpush.msra.mxu0 %v2468_v16 }
 0x8a0   :  { %8131 = vmatmul.msk.f32.vlgmr.msra.gmra.mxu0 %vm2496_vm8, %v2453_v52 }
 0x8a2   :  { %8134 = vmatmul.msk.f32.gmra.mxu2 %vm2496_vm8, %v2454_v51 }
 0x8a8   :  { %8132 = vmatmul.msk.f32.gmra.mxu0 %vm2496_vm8, %v2454_v51 }
 0x91d   :  { %v2520_v23 = vpop.f32.mrf.mxu0  ;;  %v2585_v37 = vpop.f32.mrf.mxu2 }
 0x91e   :  { %v2526_v53 = vmul.f32 0.02, %v2520_v23  ;;  %v2591_v10 = vmul.f32 0.02, %v2585_v37 }
 0x920   :  { %v2593_v28 = vmul.f32 %v2526_v53, %v2526_v53 }
 0x922   :  { %v2595_v27 = vsub.f32 %v2591_v10, %v2593_v28 }
 0x924   :  { %v2597_v34 = vadd.f32 1e-05, %v2595_v27 }
 0x925   :  { %v2523_v22 = vpop.f32.mrf.mxu0  ;;  %v2588_v38 = vpop.f32.mrf.mxu2 }
 0x926   :  { %8938 = vrsqrt.f32 %v2597_v34  ;;  %v2527_v31 = vmul.f32 0.02, %v2523_v22  ;;  %v2592_v50 = vmul.f32 0.02, %v2588_v38  ;;  %vm2605_vm10 = vweird.f32 %v2597_v34 }
 0x928   :  { %v2594_v18 = vmul.f32 %v2527_v31, %v2527_v31 }
 0x92a   :  { %v2596_v61 = vsub.f32 %v2592_v50, %v2594_v18 }
 0x92c   :  { %v8939_v13 = vpop.eup %8938  ;;  %v2598_v11 = vadd.f32 1e-05, %v2596_v61 }
 0x92d   :  { %v2600_v43 = vmul.f32 %v8939_v13, %v2597_v34  ;;  %vm2606_vm9 = vweird.f32 %v8939_v13 }
 0x92e   :  { %8940 = vrsqrt.f32 %v2598_v11  ;;  %vm2607_vm11 = vmor %vm2605_vm10, %vm2606_vm9  ;;  %vm2615_vm13 = vweird.f32 %v2598_v11 }
 0x92f   :  { %v2601_v20 = vmul.f32 %v8939_v13, %v2600_v43  ;;  %v8244_v43 = vld [vmem:[%s13437_s15 + $0x50] sm:$0xff] }
 0x931   :  { %v2602_v35 = vmul.f32 0.5, %v2601_v20  ;;  %v3360_v20 = vld [vmem:[%s13436_s13 + $0x8] sm:$0xff] }
 0x933   :  { %v2603_v32 = vsub.f32 1.5, %v2602_v35  ;;  %v3362_v35 = vld [vmem:[%s13436_s13 + $0x18] sm:$0xff] }
 0x934   :  { %v8941_v48 = vpop.eup %8940 }
 0x935   :  { %v2610_v41 = vmul.f32 %v8941_v48, %v2598_v11  ;;  %v2604_v15 = vmul.f32 %v8939_v13, %v2603_v32  ;;  %vm2616_vm12 = vweird.f32 %v8941_v48  ;;  %v3361_v11 = vld [vmem:[%s13436_s13 + $0x10] sm:$0xff]  ;;  %v8247_v32 = vld [vmem:[%s13437_s15 + $0x68] sm:$0xff] }
 0x936   :  { %vm2617_vm14 = vmor %vm2615_vm13, %vm2616_vm12 }
 0x937   :  { %v2611_v19 = vmul.f32 %v8941_v48, %v2610_v41  ;;  %v2608_v12 = vsel %vm2607_vm11, %v8939_v13, %v2604_v15  ;;  %v3359_v41 = vld [vmem:[%s13436_s13] sm:$0xff]  ;;  %v8248_v15 = vld [vmem:[%s13437_s15 + $0x70] sm:$0xff] }
 0x938   :  { %v2621_v1 = vmul.f32 %v2619_v0, %v2608_v12  ;;  %v8251_v12 = vld [vmem:[%s13437_s15 + $0x88] sm:$0xff]  ;;  %v8249_v0 = vld [vmem:[%s13437_s15 + $0x78] sm:$0xff] }
 0x939   :  { %v2612_v45 = vmul.f32 0.5, %v2611_v19  ;;  %v8250_v19 = vld [vmem:[%s13437_s15 + $0x80] sm:$0xff] }
 0x93a   :  { %v2625_v63 = vmul.f32 %v2621_v1, %v2526_v53 }
 0x93b   :  { %v2613_v17 = vsub.f32 1.5, %v2612_v45  ;;  %v8246_v45 = vld [vmem:[%s13437_s15 + $0x60] sm:$0xff] }
 0x93c   :  { %v2627_v9 = vsub.f32 %v2623_v5, %v2625_v63  ;;  %v3403_v63 = vld [vmem:[%s13437_s15 + $0x10] sm:$0xff] }
 0x93d   :  { %v2614_v30 = vmul.f32 %v8941_v48, %v2613_v17  ;;  %v8253_v17 = vld [vmem:[%s13437_s15 + $0x98] sm:$0xff] }
 0x93f   :  { %v2618_v21 = vsel %vm2617_vm14, %v8941_v48, %v2614_v30  ;;  %v8245_v48 = vld [vmem:[%s13437_s15 + $0x58] sm:$0xff]  ;;  %v3402_v30 = vld [vmem:[%s13437_s15 + $0x8] sm:$0xff] }
 0x940   :  { %v2622_v14 = vmul.f32 %v2620_v54, %v2618_v21  ;;  %v3401_v54 = vld [vmem:[%s13437_s15] sm:$0xff]  ;;  %v8299_v21 = vld [vmem:[%s13437_s15 + $0xb0] sm:$0xff] }
 0x942   :  { %2674 = vmatpush.msrb.mxu0 %v2622_v14  ;;  %v2626_v7 = vmul.f32 %v2622_v14, %v2527_v31  ;;  %v8298_v14 = vld [vmem:[%s13437_s15 + $0xa8] sm:$0xff] }
 0x944   :  { %2675 = vmatpush.msrb.mxu0 %v2621_v1  ;;  %v2628_v26 = vsub.f32 %v2624_v25, %v2626_v7  ;;  %v8252_v1 = vld [vmem:[%s13437_s15 + $0x90] sm:$0xff]  ;;  %v8297_v25 = vld [vmem:[%s13437_s15 + $0xa0] sm:$0xff]  ;;  %v3404_v7 = vld [vmem:[%s13437_s15 + $0x18] sm:$0xff] }
 0x945   :  { %8135 = vmatmul.msk.f32.vlgmr.msrb.gmra.mxu0 %vm2629_vm15, %v2455_v2 }
 0x946   :  { %2781 = vmatpush.msra.mxu2 %v2628_v26  ;;  %v8302_v26 = vld [vmem:[%s13437_s15 + $0xc8] sm:$0xff] }
 0x948   :  { %2782 = vmatpush.msra.mxu2 %v2627_v9  ;;  %v8301_v9 = vld [vmem:[%s13437_s15 + $0xc0] sm:$0xff] }
 0x949   :  { %8145 = vmatmul.msk.f32.vlgmr.msra.gmra.mxu2 %vm2629_vm15, %v2455_v2  ;;  %v3405_v2 = vld [vmem:[%s13437_s15 + $0x20] sm:$0xff] }
 0x94d   :  { %8136 = vmatmul.msk.f32.gmra.mxu0 %vm2629_vm15, %v2456_v39 }
 0x951   :  { %8146 = vmatmul.msk.f32.gmra.mxu2 %vm2629_vm15, %v2456_v39  ;;  %v8300_v39 = vld [vmem:[%s13437_s15 + $0xb8] sm:$0xff] }
 0x955   :  { %8137 = vmatmul.msk.f32.gmra.mxu0 %vm2629_vm15, %v2457_v24 }
 0x959   :  { %8147 = vmatmul.msk.f32.gmra.mxu2 %vm2629_vm15, %v2457_v24 }
 0x95d   :  { %8138 = vmatmul.msk.f32.gmra.mxu0 %vm2629_vm15, %v2458_v29 }
 0x961   :  { %8148 = vmatmul.msk.f32.gmra.mxu2 %vm2629_vm15, %v2458_v29 }
 0x965   :  { %8139 = vmatmul.msk.f32.gmra.mxu0 %vm2629_vm15, %v2459_v49 }
 0x969   :  { %8149 = vmatmul.msk.f32.gmra.mxu2 %vm2629_vm15, %v2459_v49  ;;  %v3408_v49 = vld [vmem:[%s13437_s15 + $0x38] sm:$0xff] }
 0x96d   :  { %8140 = vmatmul.msk.f32.gmra.mxu0 %vm2629_vm15, %v2460_v59 }
 0x971   :  { %8150 = vmatmul.msk.f32.gmra.mxu2 %vm2629_vm15, %v2460_v59  ;;  %v3407_v59 = vld [vmem:[%s13437_s15 + $0x30] sm:$0xff] }
 0x975   :  { %8141 = vmatmul.msk.f32.gmra.mxu0 %vm2629_vm15, %v2461_v46 }
 0x979   :  { %8151 = vmatmul.msk.f32.gmra.mxu2 %vm2629_vm15, %v2461_v46  ;;  %v3406_v46 = vld [vmem:[%s13437_s15 + $0x28] sm:$0xff] }
 0x97d   :  { %8142 = vmatmul.msk.f32.gmra.mxu0 %vm2629_vm15, %v2462_v56 }
 0x981   :  { %8152 = vmatmul.msk.f32.gmra.mxu2 %vm2629_vm15, %v2462_v56 }
 0x985   :  { %8143 = vmatmul.msk.f32.gmra.mxu0 %vm2629_vm15, %v2463_v3 }
 0x989   :  { %8153 = vmatmul.msk.f32.gmra.mxu2 %vm2629_vm15, %v2463_v3 }
 0x98d   :  { %8144 = vmatmul.msk.f32.gmra.mxu0 %vm2629_vm15, %v2464_v33 }
 0x991   :  { %8154 = vmatmul.msk.f32.gmra.mxu2 %vm2629_vm15, %v2464_v33 }
 0x9c2   :  { %v2677_v60 = vpop.f32.mrf.mxu0 }
 0x9ca   :  { %v2680_v52 = vpop.f32.mrf.mxu0 }
 0x9cc   :  { %v2784_v40 = vpop.f32.mrf.mxu2 }
 0x9d2   :  { %v2683_v55 = vpop.f32.mrf.mxu0 }
 0x9d3   :  { %2719 = vperm.xlu2 %8937, %v2683_v55  }
 0x9d4   :  { %v2787_v16 = vpop.f32.mrf.mxu2 }
 0x9da   :  { %v2686_v51 = vpop.f32.mrf.mxu0 }
 0x9db   :  { %2724 = vperm.xlu1 %8936, %v2686_v51  }
 0x9dc   :  { %v2790_v23 = vpop.f32.mrf.mxu2 }
 0x9e2   :  { %v2689_v37 = vpop.f32.mrf.mxu0 }
 0x9e3   :  { %2729 = vperm.xlu0 %8935, %v2689_v37   ;;  %v3410_v37 = vld [vmem:[%s13437_s15 + $0x48] sm:$0xff] }
 0x9e4   :  { %v2793_v53 = vpop.f32.mrf.mxu2 }
 0x9ea   :  { %v2692_v10 = vpop.f32.mrf.mxu0 }
 0x9eb   :  { %2734 = vperm.xlu2 %8937, %v2692_v10  }
 0x9ec   :  { %v2796_v28 = vpop.f32.mrf.mxu2 }
 0x9ed   :  { %2836 = vperm.xlu0 %8935, %v2796_v28  }
 0x9f2   :  { %v2695_v27 = vpop.f32.mrf.mxu0 }
 0x9f3   :  { %2739 = vperm.xlu1 %8936, %v2695_v27  }
 0x9f4   :  { %v2799_v34 = vpop.f32.mrf.mxu2 }
 0x9f5   :  { %2841 = vperm.xlu2 %8937, %v2799_v34   ;;  %v8382_v34 = vld [vmem:[%s13437_s15 + $0x148] sm:$0xff] }
 0x9fa   :  { %v2698_v22 = vpop.f32.mrf.mxu0 }
 0x9fb   :  { %2744 = vperm.xlu0 %8935, %v2698_v22   ;;  %v8381_v22 = vld [vmem:[%s13437_s15 + $0x140] sm:$0xff] }
 0x9fc   :  { %v2802_v38 = vpop.f32.mrf.mxu2 }
 0x9fd   :  { %2846 = vperm.xlu1 %8936, %v2802_v38   ;;  %v8306_v38 = vld [vmem:[%s13437_s15 + $0xe8] sm:$0xff] }
 0xa02   :  { %v2701_v31 = vpop.f32.mrf.mxu0 }
 0xa03   :  { %2749 = vperm.xlu0 %8935, %v2701_v31  }
 0xa04   :  { %v2805_v50 = vpop.f32.mrf.mxu2 }
 0xa0a   :  { %v2704_v18 = vpop.f32.mrf.mxu0 }
 0xa0b   :  { %2754 = vperm.xlu2 %8937, %v2704_v18   ;;  %2851 = vperm.xlu0 %8935, %v2805_v50  }
 0xa0c   :  { %v2808_v61 = vpop.f32.mrf.mxu2 }
 0xa13   :  { %2714 = vperm.xlu0 %8935, %v2680_v52   ;;  %2856 = vperm.xlu2 %8937, %v2808_v61   ;;  %v8304_v52 = vld [vmem:[%s13437_s15 + $0xd8] sm:$0xff] }
 0xa14   :  { %v2811_v13 = vpop.f32.mrf.mxu2 }
 0xa15   :  { %2861 = vperm.xlu1 %8936, %v2811_v13  }
 0xa1b   :  { %2821 = vperm.xlu0 %8935, %v2787_v16   ;;  %2826 = vperm.xlu2 %8937, %v2790_v23   ;;  %v8339_v23 = vld [vmem:[%s13437_s15 + $0xf0] sm:$0xff] }
 0xa1d   :  { %2831 = vperm.xlu1 %8936, %v2793_v53   ;;  %v3409_v53 = vld [vmem:[%s13437_s15 + $0x40] sm:$0xff] }
 0xa23   :  { %3375 = vperm.xlu0 %8935, %v3361_v11   ;;  %2816 = vperm.xlu2 %8937, %v2784_v40   ;;  %v8303_v40 = vld [vmem:[%s13437_s15 + $0xd0] sm:$0xff] }
 0xa25   :  { %2709 = vperm.xlu1 %8936, %v2677_v60   ;;  %v8305_v60 = vld [vmem:[%s13437_s15 + $0xe0] sm:$0xff] }
 0xa2b   :  { %3574 = vperm.xlu0 %8935, %v8244_v43   ;;  %3370 = vperm.xlu2 %8937, %v3360_v20   ;;  %v8342_v20 = vld [vmem:[%s13437_s15 + $0x108] sm:$0xff] }
 0xa2d   :  { %3380 = vperm.xlu1 %8936, %v3362_v35   ;;  %v11060_v24 = vpop.permute.xlu2 %2719  ;;  %v8341_v35 = vld [vmem:[%s13437_s15 + $0x100] sm:$0xff] }
 0xa33   :  { %3589 = vperm.xlu0 %8935, %v8247_v32   ;;  %3579 = vperm.xlu2 %8937, %v8245_v48  }
 0xa35   :  { %3365 = vperm.xlu1 %8936, %v3359_v41  }
 0xa3b   :  { %3604 = vperm.xlu0 %8935, %v8250_v19   ;;  %3594 = vperm.xlu2 %8937, %v8248_v15  }
 0xa3d   :  { %3584 = vperm.xlu1 %8936, %v8246_v45  }
 0xa43   :  { %3619 = vperm.xlu0 %8935, %v8253_v17   ;;  %3609 = vperm.xlu2 %8937, %v8251_v12  }
 0xa45   :  { %3599 = vperm.xlu1 %8936, %v8249_v0   ;;  %v2735_v56 = vpop.permute.xlu2 %2734 }
 0xa4b   :  { %3418 = vperm.xlu0 %8935, %v3402_v30   ;;  %3413 = vperm.xlu2 %8937, %v3401_v54  }
 0xa4d   :  { %3614 = vperm.xlu1 %8936, %v8252_v1   ;;  %v2725_v33 = vpop.permute.xlu1 %2724  ;;  %v8384_v1 = vld [vmem:[%s13437_s15 + $0x158] sm:$0xff] }
 0xa4e   :  { %v2760_v0 = vmul.f32 %v2725_v33, %v10813_v6  ;;  %v2759_v6 = vmul.f32 %v11060_v24, %v10888_v58  ;;  %v8159_v33 = vld [vmem:[%s13438_s11 + $0x20] sm:$0xff] }
 0xa4f   :  { %v2842_v55 = vpop.permute.xlu2 %2841 }
 0xa53   :  { %3906 = vperm.xlu0 %8935, %v8299_v21   ;;  %3901 = vperm.xlu2 %8937, %v8298_v14  }
 0xa55   :  { %3896 = vperm.xlu1 %8936, %v8297_v25   ;;  %v11049_v5 = vpop.permute.xlu0 %2729  ;;  %v8383_v25 = vld [vmem:[%s13437_s15 + $0x150] sm:$0xff] }
 0xa56   :  { %v2761_v45 = vmul.f32 %v11049_v5, %v10820_v36  ;;  %v8385_v36 = vld [vmem:[%s13437_s15 + $0x160] sm:$0xff] }
 0xa5b   :  { %3433 = vperm.xlu0 %8935, %v3405_v2   ;;  %3428 = vperm.xlu2 %8937, %v3404_v7  }
 0xa5d   :  { %3423 = vperm.xlu1 %8936, %v3403_v63  }
 0xa5f   :  { %v11062_v29 = vpop.permute.xlu0 %2836 }
 0xa60   :  { %v2868_v30 = vadd.f32 %v11062_v29, %v2761_v45  ;;  %v8345_v29 = vld [vmem:[%s13437_s15 + $0x120] sm:$0xff] }
 0xa62   :  { %v11151_v2 = vmax.f32 %v2868_v30, 0.0  ;;  %v8194_v30 = vld [vmem:[%s13438_s11 + $0x60] sm:$0xff] }
 0xa63   :  { %3921 = vperm.xlu0 %8935, %v8302_v26   ;;  %3916 = vperm.xlu2 %8937, %v8301_v9  }
 0xa65   :  { %3911 = vperm.xlu1 %8936, %v8300_v39   ;;  %v2740_v51 = vpop.permute.xlu1 %2739  ;;  %v2755_v10 = vpop.permute.xlu2 %2754 }
 0xa66   :  { %v2766_v18 = vmul.f32 %v2755_v10, %v10878_v42  ;;  %v2763_v32 = vmul.f32 %v2740_v51, %v10837_v62  ;;  %v2762_v42 = vmul.f32 %v2735_v56, %v10828_v57  ;;  %v8388_v51 = vld [vmem:[%s13437_s15 + $0x178] sm:$0xff]  ;;  %v2885_v10 = vld [vmem:[%s13438_s11 + $0x8] sm:$0xff] }
 0xa68   :  { %v2869_v62 = vadd.f32 %v2842_v55, %v2762_v42  ;;  %v8179_v55 = vld [vmem:[%s13438_s11 + $0x40] sm:$0xff] }
 0xa6a   :  { %v11143_v21 = vmax.f32 %v2869_v62, 0.0  ;;  %v8210_v62 = vld [vmem:[%s13438_s11 + $0x88] sm:$0xff] }
 0xa6b   :  { %3448 = vperm.xlu0 %8935, %v3408_v49   ;;  %3443 = vperm.xlu2 %8937, %v3407_v59   ;;  %v8344_v49 = vld [vmem:[%s13437_s15 + $0x118] sm:$0xff] }
 0xa6d   :  { %v2745_v3 = vpop.permute.xlu0 %2744  ;;  %3438 = vperm.xlu1 %8936, %v3406_v46   ;;  %v2857_v50 = vpop.permute.xlu2 %2856 }
 0xa6e   :  { %v2764_v13 = vmul.f32 %v2745_v3, %v10847_v47  ;;  %v8340_v47 = vld [vmem:[%s13437_s15 + $0xf8] sm:$0xff]  ;;  %v2884_v3 = vld [vmem:[%s13438_s11] sm:$0xff] }
 0xa6f   :  { %v2847_v28 = vpop.permute.xlu1 %2846 }
 0xa70   :  { %v2870_v19 = vadd.f32 %v2847_v28, %v2763_v32  ;;  %v8348_v28 = vld [vmem:[%s13437_s15 + $0x138] sm:$0xff] }
 0xa72   :  { %v11130_v54 = vmax.f32 %v2870_v19, 0.0 }
 0xa73   :  { %3936 = vperm.xlu0 %8935, %v8305_v60   ;;  %3931 = vperm.xlu2 %8937, %v8304_v52   ;;  %v8168_v60 = vld [vmem:[%s13439_s12 + $0x18] sm:$0x3]  ;;  %v2930_v52 = vld [vmem:[%s13439_s12 + $0x8] sm:$0x3] }
 0xa75   :  { %3926 = vperm.xlu1 %8936, %v8303_v40   ;;  %v2750_v16 = vpop.permute.xlu0 %2749  ;;  %v2827_v57 = vpop.permute.xlu2 %2826  ;;  %v8167_v40 = vld [vmem:[%s13439_s12 + $0x10] sm:$0xff] }
 0xa76   :  { %v2765_v31 = vmul.f32 %v2750_v16, %v10862_v8  ;;  %v2866_v7 = vadd.f32 %v2827_v57, %v2759_v6  ;;  %v2929_v16 = vld [vmem:[%s13439_s12] sm:$0xff]  ;;  %v8197_v6 = vld [vmem:[%s13438_s11 + $0x78] sm:$0xff] }
 0xa78   :  { %v2872_v11 = vadd.f32 %v2857_v50, %v2765_v31  ;;  %v11162_v39 = vmax.f32 %v2866_v7, 0.0  ;;  %v8390_v31 = vld [vmem:[%s13437_s15 + $0x188] sm:$0xff] }
 0xa79   :  { %v8180_v50 = vld [vmem:[%s13438_s11 + $0x48] sm:$0xff] }
 0xa7a   :  { %v11116_v15 = vmax.f32 %v2872_v11, 0.0  ;;  %v8181_v11 = vld [vmem:[%s13438_s11 + $0x50] sm:$0xff]  ;;  %v8218_v7 = vld [vmem:[%s13439_s12 + $0x48] sm:$0x3] }
 0xa7b   :  { %4147 = vperm.xlu0 %8935, %v8339_v23   ;;  %3458 = vperm.xlu2 %8937, %v3410_v37   ;;  %v8387_v23 = vld [vmem:[%s13437_s15 + $0x170] sm:$0xff]  ;;  %v8386_v37 = vld [vmem:[%s13437_s15 + $0x168] sm:$0xff] }
 0xa7d   :  { %3453 = vperm.xlu1 %8936, %v3409_v53   ;;  %v2852_v27 = vpop.permute.xlu0 %2851  ;;  %v8160_v53 = vld [vmem:[%s13438_s11 + $0x28] sm:$0xff] }
 0xa7e   :  { %v2871_v8 = vadd.f32 %v2852_v27, %v2764_v13  ;;  %v8347_v27 = vld [vmem:[%s13437_s15 + $0x130] sm:$0xff]  ;;  %v2887_v13 = vld [vmem:[%s13438_s11 + $0x18] sm:$0xff] }
 0xa80   :  { %v11123_v17 = vmax.f32 %v2871_v8, 0.0 }
 0xa83   :  { %4403 = vperm.xlu0 %8935, %v8382_v34   ;;  %4398 = vperm.xlu2 %8937, %v8381_v22   ;;  %v8346_v34 = vld [vmem:[%s13437_s15 + $0x128] sm:$0xff]  ;;  %v8161_v22 = vld [vmem:[%s13438_s11 + $0x30] sm:$0xff] }
 0xa85   :  { %3941 = vperm.xlu1 %8936, %v8306_v38   ;;  %v2715_v48 = vpop.permute.xlu0 %2714  ;;  %v2886_v38 = vld [vmem:[%s13438_s11 + $0x10] sm:$0xff] }
 0xa86   :  { %v2758_v58 = vmul.f32 %v2715_v48, %v10880_v44  ;;  %v2817_v44 = vpop.permute.xlu2 %2816 }
 0xa87   :  { %v2862_v61 = vpop.permute.xlu1 %2861 }
 0xa88   :  { %v2873_v43 = vadd.f32 %v2862_v61, %v2766_v18  ;;  %v8389_v18 = vld [vmem:[%s13437_s15 + $0x180] sm:$0xff]  ;;  %v8162_v61 = vld [vmem:[%s13438_s11 + $0x38] sm:$0xff] }
 0xa8a   :  { %v11110_v41 = vmax.f32 %v2873_v43, 0.0  ;;  %v8188_v43 = vld [vmem:[%s13439_s12 + $0x28] sm:$0x3] }
 0xa8b   :  { %4162 = vperm.xlu0 %8935, %v8342_v20   ;;  %4157 = vperm.xlu2 %8937, %v8341_v35   ;;  %v8187_v20 = vld [vmem:[%s13439_s12 + $0x20] sm:$0xff] }
 0xa8c   :  { %2906 = vmatpush.msra.mxu1 %v11110_v41  ;;  %2954 = vmatpush.msra.mxu3 %v11110_v41 }
 0xa8d   :  { %3091 = vmatpush.msra.mxu0 %v11110_v41  ;;  %4152 = vperm.xlu1 %8936, %v8340_v47   ;;  %v2822_v63 = vpop.permute.xlu0 %2821  ;;  %v8209_v47 = vld [vmem:[%s13438_s11 + $0x80] sm:$0xff] }
 0xa8e   :  { %2907 = vmatpush.msra.mxu1 %v11116_v15  ;;  %2955 = vmatpush.msra.mxu3 %v11116_v15  ;;  %v2865_v26 = vadd.f32 %v2822_v63, %v2758_v58 }
 0xa8f   :  { %3092 = vmatpush.msra.mxu0 %v11116_v15  ;;  %v2832_v12 = vpop.permute.xlu1 %2831  ;;  %8189 = vmatpush.msk.msrb.mxu2 %vm1736_vm5, %v8188_v43 }
 0xa90   :  { %2908 = vmatpush.msra.mxu1 %v11123_v17  ;;  %2956 = vmatpush.msra.mxu3 %v11123_v17  ;;  %v2867_v14 = vadd.f32 %v2832_v12, %v2760_v0  ;;  %v11175_v46 = vmax.f32 %v2865_v26, 0.0  ;;  %v8182_v12 = vld [vmem:[%s13438_s11 + $0x58] sm:$0xff]  ;;  %v8211_v0 = vld [vmem:[%s13438_s11 + $0x90] sm:$0xff] }
 0xa91   :  { %3093 = vmatpush.msra.mxu0 %v11123_v17  ;;  %3147 = vmatpush.msrb.mxu2 %v8187_v20 }
 0xa92   :  { %2909 = vmatpush.msra.mxu1 %v11130_v54  ;;  %2957 = vmatpush.msra.mxu3 %v11130_v54  ;;  %v11157_v5 = vmax.f32 %v2867_v14, 0.0 }
 0xa93   :  { %3094 = vmatpush.msra.mxu0 %v11130_v54  ;;  %4418 = vperm.xlu0 %8935, %v8385_v36   ;;  %v8195_v36 = vld [vmem:[%s13438_s11 + $0x68] sm:$0xff] }
 0xa94   :  { %4413 = vperm.xlu2 %8937, %v8384_v1   ;;  %2910 = vmatpush.msra.mxu1 %v11143_v21  ;;  %v8196_v1 = vld [vmem:[%s13438_s11 + $0x70] sm:$0xff] }
 0xa95   :  { %2958 = vmatpush.msra.mxu3 %v11143_v21  ;;  %3095 = vmatpush.msra.mxu0 %v11143_v21 }
 0xa96   :  { %4408 = vperm.xlu1 %8936, %v8383_v25   ;;  %2911 = vmatpush.msra.mxu1 %v11151_v2  ;;  %v8203_v25 = vld [vmem:[%s13439_s12 + $0x38] sm:$0x3] }
 0xa97   :  { %2959 = vmatpush.msra.mxu3 %v11151_v2  ;;  %3096 = vmatpush.msra.mxu0 %v11151_v2  ;;  %v2710_v9 = vpop.permute.xlu1 %2709 }
 0xa98   :  { %v2757_v24 = vmul.f32 %v2710_v9, %v10896_v4  ;;  %2912 = vmatpush.msra.mxu1 %v11157_v5  ;;  %v8343_v4 = vld [vmem:[%s13437_s15 + $0x110] sm:$0xff]  ;;  %8219 = vmatpush.msk.msra.mxu2 %vm1736_vm5, %v8218_v7  ;;  %v3394_v7 = vld [vmem:[%s13441_s14 + $0x18] sm:$0xff] }
 0xa99   :  { %2960 = vmatpush.msra.mxu3 %v11157_v5  ;;  %3097 = vmatpush.msra.mxu0 %v11157_v5 }
 0xa9a   :  { %v2864_v59 = vadd.f32 %v2817_v44, %v2757_v24  ;;  %2913 = vmatpush.msra.mxu1 %v11162_v39 }
 0xa9b   :  { %2961 = vmatpush.msra.mxu3 %v11162_v39  ;;  %3098 = vmatpush.msra.mxu0 %v11162_v39 }
 0xa9c   :  { %v11182_v56 = vmax.f32 %v2864_v59, 0.0  ;;  %4177 = vperm.xlu0 %8935, %v8345_v29   ;;  %4172 = vperm.xlu2 %8937, %v8344_v49  }
 0xa9d   :  { %2914 = vmatpush.msra.mxu1 %v11175_v46  ;;  %2962 = vmatpush.msra.mxu3 %v11175_v46 }
 0xa9e   :  { %3099 = vmatpush.msra.mxu0 %v11175_v46  ;;  %4167 = vperm.xlu1 %8936, %v8343_v4  }
 0xa9f   :  { %2915 = vmatpush.msra.mxu1 %v11182_v56  ;;  %2963 = vmatpush.msra.mxu3 %v11182_v56 }
 0xaa0   :  { %3100 = vmatpush.msra.mxu0 %v11182_v56  ;;  %8155 = vmatmul.msk.f32.vlgmr.msra.gmra.mxu1 %vm2496_vm8, %v2884_v3 }
 0xaa1   :  { %8163 = vmatmul.msk.f32.vlgmr.msra.gmra.mxu3 %vm2496_vm8, %v8159_v33  ;;  %8169 = vmatpush.msk.msrb.mxu1 %vm1736_vm5, %v8168_v60 }
 0xaa2   :  { %8174 = vmatpush.msk.msrb.mxu3 %vm1736_vm5, %v2930_v52  ;;  %3285 = vmatpush.msrb.mxu0 %v11110_v41 }
 0xaa3   :  { %3010 = vmatpush.msrb.mxu1 %v8167_v40  ;;  %8183 = vmatmul.msk.f32.vlgmr.msra.gmra.mxu0 %vm2496_vm8, %v8179_v55 }
 0xaa4   :  { %3054 = vmatpush.msrb.mxu3 %v2929_v16  ;;  %3286 = vmatpush.msrb.mxu0 %v11116_v15 }
 0xaa5   :  { %3188 = vmatpush.msra.mxu1 %v11110_v41  ;;  %4433 = vperm.xlu0 %8935, %v8388_v51   ;;  %v8264_v51 = vld [vmem:[%s13440_s16 + $0x2] sm:$0x3] }
 0xaa6   :  { %8924 = vmatpush.msra.mxu3 %v11110_v41  ;;  %4428 = vperm.xlu2 %8937, %v8387_v23  }
 0xaa7   :  { %3287 = vmatpush.msrb.mxu0 %v11123_v17  ;;  %3189 = vmatpush.msra.mxu1 %v11116_v15 }
 0xaa8   :  { %8925 = vmatpush.msra.mxu3 %v11116_v15  ;;  %4423 = vperm.xlu1 %8936, %v8386_v37  }
 0xaa9   :  { %3288 = vmatpush.msrb.mxu0 %v11130_v54  ;;  %3190 = vmatpush.msra.mxu1 %v11123_v17 }
 0xaaa   :  { %8926 = vmatpush.msra.mxu3 %v11123_v17  ;;  %8156 = vmatmul.msk.f32.gmra.mxu1 %vm2496_vm8, %v2885_v10 }
 0xaab   :  { %8164 = vmatmul.msk.f32.gmra.mxu3 %vm2496_vm8, %v8160_v53  ;;  %3289 = vmatpush.msrb.mxu0 %v11143_v21 }
 0xaac   :  { %8927 = vmatpush.msra.mxu3 %v11130_v54  ;;  %3191 = vmatpush.msra.mxu1 %v11130_v54  ;;  %v8212_v54 = vld [vmem:[%s13438_s11 + $0x98] sm:$0xff] }
 0xaad   :  { %3290 = vmatpush.msrb.mxu0 %v11151_v2  ;;  %4192 = vperm.xlu0 %8935, %v8348_v28  }
 0xaae   :  { %8928 = vmatpush.msra.mxu3 %v11143_v21  ;;  %3192 = vmatpush.msra.mxu1 %v11143_v21 }
 0xaaf   :  { %4187 = vperm.xlu2 %8937, %v8347_v27   ;;  %3291 = vmatpush.msrb.mxu0 %v11157_v5 }
 0xab0   :  { %8929 = vmatpush.msra.mxu3 %v11151_v2  ;;  %3193 = vmatpush.msra.mxu1 %v11151_v2  ;;  %v8202_v2 = vld [vmem:[%s13439_s12 + $0x30] sm:$0xff] }
 0xab1   :  { %4182 = vperm.xlu1 %8936, %v8346_v34   ;;  %3292 = vmatpush.msrb.mxu0 %v11162_v39 }
 0xab2   :  { %8930 = vmatpush.msra.mxu3 %v11157_v5  ;;  %3194 = vmatpush.msra.mxu1 %v11157_v5  ;;  %v8217_v5 = vld [vmem:[%s13439_s12 + $0x40] sm:$0xff] }
 0xab3   :  { %8165 = vmatmul.msk.f32.gmra.mxu3 %vm2496_vm8, %v8161_v22  ;;  %8157 = vmatmul.msk.f32.gmra.mxu1 %vm2496_vm8, %v2886_v38 }
 0xab4   :  { %3293 = vmatpush.msrb.mxu0 %v11175_v46  ;;  %8931 = vmatpush.msra.mxu3 %v11162_v39 }
 0xab5   :  { %3195 = vmatpush.msra.mxu1 %v11162_v39  ;;  %8184 = vmatmul.msk.f32.gmra.mxu0 %vm2496_vm8, %v8180_v50  ;;  %v3381_v50 = vpop.permute.xlu1 %3380 }
 0xab6   :  { %3294 = vmatpush.msrb.mxu0 %v11182_v56  ;;  %8932 = vmatpush.msra.mxu3 %v11175_v46 }
 0xab7   :  { %3196 = vmatpush.msra.mxu1 %v11175_v46  ;;  %4443 = vperm.xlu2 %8937, %v8390_v31  }
 0xab8   :  { %8933 = vmatpush.msra.mxu3 %v11182_v56  ;;  %3341 = vmatpush.msra.mxu2 %v8217_v5  ;;  %v8238_v5 = vld [vmem:[%s13441_s14 + $0x70] sm:$0xff] }
 0xab9   :  { %3197 = vmatpush.msra.mxu1 %v11182_v56  ;;  %4438 = vperm.xlu1 %8936, %v8389_v18  }
 0xaba   :  { %8265 = vmatpush.msk.msra.mxu0 %vm1736_vm5, %v8264_v51 }
 0xabb   :  { %8166 = vmatmul.msk.f32.gmra.mxu3 %vm2496_vm8, %v8162_v61  ;;  %8158 = vmatmul.msk.f32.gmra.mxu1 %vm2496_vm8, %v2887_v13 }
 0xabd   :  { %8185 = vmatmul.msk.f32.gmra.mxu0 %vm2496_vm8, %v8181_v11 }
 0xac5   :  { %8213 = vmatmul.msk.f32.vlgmr.msrb.gmra.mxu0 %vm2496_vm8, %v8209_v47 }
 0xacd   :  { %8214 = vmatmul.msk.f32.gmra.mxu0 %vm2496_vm8, %v8210_v62 }
 0xad5   :  { %8215 = vmatmul.msk.f32.gmra.mxu0 %vm2496_vm8, %v8211_v0 }
 0xadd   :  { %8216 = vmatmul.msk.f32.gmra.mxu0 %vm2496_vm8, %v8212_v54 }
 0xb1d   :  { %v2917_v35 = vpop.f32.mrf.mxu1 }
 0xb1e   :  { %8175 = vmatmul.msk.f32.vlgmr.msrb.gmra.mxu3 %vm2465_vm7, %v2917_v35 }
 0xb1f   :  { %8204 = vmatpush.msk.msrb.mxu3 %vm1736_vm5, %v8203_v25  ;;  %v3393_v25 = vld [vmem:[%s13441_s14 + $0x10] sm:$0xff] }
 0xb20   :  { %v3102_v32 = vpop.f32.mrf.mxu0 }
 0xb21   :  { %8190 = vmatmul.msk.f32.vlgmr.msrb.gmra.mxu2 %vm2465_vm7, %v3102_v32  ;;  %3244 = vmatpush.msrb.mxu3 %v8202_v2  ;;  %v8236_v2 = vld [vmem:[%s13441_s14 + $0x60] sm:$0xff] }
 0xb24   :  { %v2965_v8 = vpop.f32.mrf.mxu3 }
 0xb25   :  { %8170 = vmatmul.msk.f32.vlgmr.msrb.gmra.mxu1 %vm2465_vm7, %v2965_v8 }
 0xb27   :  { %v2920_v48 = vpop.f32.mrf.mxu1 }
 0xb28   :  { %8176 = vmatmul.msk.f32.gmra.mxu3 %vm2465_vm7, %v2920_v48 }
 0xb2e   :  { %v2968_v41 = vpop.f32.mrf.mxu3 }
 0xb2f   :  { %8171 = vmatmul.msk.f32.gmra.mxu1 %vm2465_vm7, %v2968_v41 }
 0xb30   :  { %v2923_v42 = vpop.f32.mrf.mxu1 }
 0xb31   :  { %8177 = vmatmul.msk.f32.gmra.mxu3 %vm2465_vm7, %v2923_v42  ;;  %v3376_v42 = vpop.permute.xlu0 %3375 }
 0xb32   :  { %v3105_v19 = vpop.f32.mrf.mxu0 }
 0xb33   :  { %8191 = vmatmul.msk.f32.gmra.mxu2 %vm2465_vm7, %v3105_v19 }
 0xb36   :  { %v2971_v15 = vpop.f32.mrf.mxu3 }
 0xb37   :  { %8172 = vmatmul.msk.f32.gmra.mxu1 %vm2465_vm7, %v2971_v15 }
 0xb38   :  { %v2926_v45 = vpop.f32.mrf.mxu1 }
 0xb39   :  { %8178 = vmatmul.msk.f32.gmra.mxu3 %vm2465_vm7, %v2926_v45  ;;  %v3371_v45 = vpop.permute.xlu2 %3370 }
 0xb3a   :  { %v3108_v17 = vpop.f32.mrf.mxu0 }
 0xb3b   :  { %8192 = vmatmul.msk.f32.gmra.mxu2 %vm2465_vm7, %v3108_v17 }
 0xb3e   :  { %v2974_v57 = vpop.f32.mrf.mxu3 }
 0xb3f   :  { %8173 = vmatmul.msk.f32.gmra.mxu1 %vm2465_vm7, %v2974_v57 }
 0xb41   :  { %8186 = vmatmul.msk.f32.vlgmr.msra.gmra.mxu3 %vm2496_vm8, %v8182_v12  ;;  %v3366_v12 = vpop.permute.xlu1 %3365 }
 0xb42   :  { %v3296_v49 = vpop.f32.mrf.mxu0 }
 0xb47   :  { %8198 = vmatmul.msk.f32.vlgmr.msra.gmra.mxu1 %vm2496_vm8, %v8194_v30 }
 0xb4a   :  { %v3299_v46 = vpop.f32.mrf.mxu0 }
 0xb4f   :  { %8199 = vmatmul.msk.f32.gmra.mxu1 %vm2496_vm8, %v8195_v36 }
 0xb52   :  { %v3302_v56 = vpop.f32.mrf.mxu0 }
 0xb57   :  { %8200 = vmatmul.msk.f32.gmra.mxu1 %vm2496_vm8, %v8196_v1  ;;  %v3391_v1 = vld [vmem:[%s13441_s14] sm:$0xff] }
 0xb5a   :  { %v3305_v33 = vpop.f32.mrf.mxu0 }
 0xb5f   :  { %8201 = vmatmul.msk.f32.gmra.mxu1 %vm2496_vm8, %v8197_v6  ;;  %v8234_v6 = vld [vmem:[%s13441_s14 + $0x50] sm:$0xff] }
 0xba1   :  { %v3056_v14 = vpop.f32.mrf.mxu3 }
 0xba2   :  { %v3012_v21 = vpop.f32.mrf.mxu1 }
 0xba3   :  { %v3057_v22 = vadd.f32 %v3056_v14, %v3012_v21  ;;  %v3392_v21 = vld [vmem:[%s13441_s14 + $0x8] sm:$0xff]  ;;  %v8235_v14 = vld [vmem:[%s13441_s14 + $0x58] sm:$0xff] }
 0xba4   :  { %v3149_v60 = vpop.f32.mrf.mxu2 }
 0xba5   :  { %v3161_v43 = vadd.f32 %v3149_v60, %v3057_v22  ;;  %v8289_v60 = vld [vmem:[%s13441_s14 + $0xb0] sm:$0xff] }
 0xbab   :  { %v3059_v58 = vpop.f32.mrf.mxu3 }
 0xbac   :  { %v3015_v63 = vpop.f32.mrf.mxu1 }
 0xbad   :  { %v3060_v34 = vadd.f32 %v3059_v58, %v3015_v63  ;;  %v8237_v63 = vld [vmem:[%s13441_s14 + $0x68] sm:$0xff]  ;;  %v3395_v58 = vld [vmem:[%s13441_s14 + $0x20] sm:$0xff] }
 0xbb4   :  { %v3018_v26 = vpop.f32.mrf.mxu1  ;;  %v3062_v9 = vpop.f32.mrf.mxu3 }
 0xbb5   :  { %v3063_v28 = vadd.f32 %v3062_v9, %v3018_v26  ;;  %v3396_v26 = vld [vmem:[%s13441_s14 + $0x28] sm:$0xff]  ;;  %v8239_v9 = vld [vmem:[%s13441_s14 + $0x78] sm:$0xff] }
 0xbb6   :  { %v3152_v52 = vpop.f32.mrf.mxu2 }
 0xbb7   :  { %v3162_v61 = vadd.f32 %v3152_v52, %v3060_v34  ;;  %v3580_v52 = vpop.permute.xlu2 %3579 }
 0xbbc   :  { %v3021_v39 = vpop.f32.mrf.mxu1  ;;  %v3065_v24 = vpop.f32.mrf.mxu3 }
 0xbbd   :  { %v3066_v38 = vadd.f32 %v3065_v24, %v3021_v39  ;;  %v3397_v39 = vld [vmem:[%s13441_s14 + $0x30] sm:$0xff]  ;;  %v8240_v24 = vld [vmem:[%s13441_s14 + $0x80] sm:$0xff] }
 0xbbe   :  { %v3155_v40 = vpop.f32.mrf.mxu2 }
 0xbbf   :  { %v3163_v31 = vadd.f32 %v3155_v40, %v3063_v28  ;;  %v3549_v40 = vld [vmem:[%s13440_s16] sm:$0x3] }
 0xbc0   :  { %8276 = vmatpush.msk.msrb.mxu2 %vm1736_vm5, %v3549_v40 }
 0xbc4   :  { %v3199_v44 = vpop.f32.mrf.mxu1  ;;  %v3111_v29 = vpop.f32.mrf.mxu3 }
 0xbc5   :  { %8205 = vmatmul.msk.f32.vlgmr.msrb.gmra.mxu3 %vm2465_vm7, %v3199_v44  ;;  %8193 = vmatmul.msk.f32.gmra.mxu2 %vm2465_vm7, %v3111_v29  ;;  %v3398_v44 = vld [vmem:[%s13441_s14 + $0x38] sm:$0xff]  ;;  %v8241_v29 = vld [vmem:[%s13441_s14 + $0x88] sm:$0xff] }
 0xbcc   :  { %v3202_v59 = vpop.f32.mrf.mxu1 }
 0xbcd   :  { %8206 = vmatmul.msk.f32.gmra.mxu3 %vm2465_vm7, %v3202_v59  ;;  %8220 = vmatmul.msk.f32.vlgmr.msra.gmra.mxu2 %vm2465_vm7, %v3296_v49  ;;  %v3399_v49 = vld [vmem:[%s13441_s14 + $0x40] sm:$0xff]  ;;  %v8242_v59 = vld [vmem:[%s13441_s14 + $0x90] sm:$0xff] }
 0xbd4   :  { %v3205_v4 = vpop.f32.mrf.mxu1 }
 0xbd5   :  { %8207 = vmatmul.msk.f32.gmra.mxu3 %vm2465_vm7, %v3205_v4  ;;  %8221 = vmatmul.msk.f32.gmra.mxu2 %vm2465_vm7, %v3299_v46  ;;  %v3400_v46 = vld [vmem:[%s13441_s14 + $0x48] sm:$0xff]  ;;  %v8243_v4 = vld [vmem:[%s13441_s14 + $0x98] sm:$0xff] }
 0xbdc   :  { %v3208_v3 = vpop.f32.mrf.mxu1 }
 0xbdd   :  { %8208 = vmatmul.msk.f32.gmra.mxu3 %vm2465_vm7, %v3208_v3  ;;  %8222 = vmatmul.msk.f32.gmra.mxu2 %vm2465_vm7, %v3302_v56  ;;  %v8287_v56 = vld [vmem:[%s13441_s14 + $0xa0] sm:$0xff]  ;;  %v8288_v3 = vld [vmem:[%s13441_s14 + $0xa8] sm:$0xff] }
 0xbe5   :  { %8223 = vmatmul.msk.f32.gmra.mxu2 %vm2465_vm7, %v3305_v33  ;;  %v3575_v33 = vpop.permute.xlu0 %3574 }
 0xbed   :  { %v3590_v51 = vpop.permute.xlu0 %3589 }
 0xc48   :  { %v3246_v55 = vpop.f32.mrf.mxu3  ;;  %v3158_v16 = vpop.f32.mrf.mxu2 }
 0xc49   :  { %v3164_v13 = vadd.f32 %v3158_v16, %v3066_v38  ;;  %v3258_v48 = vadd.f32 %v3246_v55, %v3161_v43  ;;  %v3585_v55 = vpop.permute.xlu1 %3584  ;;  %v8290_v16 = vld [vmem:[%s13441_s14 + $0xb8] sm:$0xff] }
 0xc50   :  { %v3249_v23 = vpop.f32.mrf.mxu3  ;;  %v3343_v37 = vpop.f32.mrf.mxu2 }
 0xc51   :  { %v3259_v20 = vadd.f32 %v3249_v23, %v3162_v61  ;;  %v3355_v19 = vadd.f32 %v3343_v37, %v3258_v48  ;;  %v11482_v23 = vpop.permute.xlu2 %3594  ;;  %v8291_v37 = vld [vmem:[%s13441_s14 + $0xc0] sm:$0xff] }
 0xc53   :  { %v3383_v0 = vadd.f32 %v3366_v12, %v3355_v19 }
 0xc55   :  { %v3387_v36 = vmax.f32 %v3383_v0, 0.0 }
 0xc58   :  { %v3346_v53 = vpop.f32.mrf.mxu2  ;;  %v3252_v10 = vpop.f32.mrf.mxu3 }
 0xc59   :  { %v3260_v11 = vadd.f32 %v3252_v10, %v3163_v31  ;;  %v3356_v41 = vadd.f32 %v3346_v53, %v3259_v20  ;;  %v11488_v53 = vpop.permute.xlu1 %3599  ;;  %v11491_v10 = vpop.permute.xlu0 %3604 }
 0xc5a   :  { %v11493_v28 = vpop.permute.xlu2 %3609 }
 0xc5b   :  { %v3384_v17 = vadd.f32 %v3371_v45, %v3356_v41  ;;  %v8295_v45 = vld [vmem:[%s13441_s14 + $0xe0] sm:$0xff] }
 0xc5d   :  { %v3388_v54 = vmax.f32 %v3384_v17, 0.0 }
 0xc60   :  { %v3349_v27 = vpop.f32.mrf.mxu2  ;;  %v3255_v18 = vpop.f32.mrf.mxu3 }
 0xc61   :  { %v3261_v35 = vadd.f32 %v3255_v18, %v3164_v13  ;;  %v3357_v32 = vadd.f32 %v3349_v27, %v3260_v11  ;;  %v8292_v27 = vld [vmem:[%s13441_s14 + $0xc8] sm:$0xff]  ;;  %v11499_v34 = vpop.permute.xlu1 %3614  ;;  %v11501_v22 = vpop.permute.xlu0 %3619  ;;  %v8293_v18 = vld [vmem:[%s13441_s14 + $0xd0] sm:$0xff] }
 0xc62   :  { %v3414_v38 = vpop.permute.xlu2 %3413 }
 0xc63   :  { %v3385_v15 = vadd.f32 %v3376_v42, %v3357_v32  ;;  %v8294_v32 = vld [vmem:[%s13441_s14 + $0xd8] sm:$0xff] }
 0xc65   :  { %v3389_v30 = vmax.f32 %v3385_v15, 0.0 }
 0xc68   :  { %v3352_v8 = vpop.f32.mrf.mxu2 }
 0xc69   :  { %v3358_v47 = vadd.f32 %v3352_v8, %v3261_v35  ;;  %v11508_v13 = vpop.permute.xlu1 %3896  ;;  %v3419_v20 = vpop.permute.xlu0 %3418 }
 0xc6b   :  { %v3386_v62 = vadd.f32 %v3381_v50, %v3358_v47  ;;  %v11516_v47 = vpop.permute.xlu2 %3901 }
 0xc6d   :  { %v3390_v57 = vmax.f32 %v3386_v62, 0.0 }
 0xc6f   :  { %3504 = vmatpush.msrb.mxu1 %v3390_v57  ;;  %3664 = vmatpush.msra.mxu3 %v3390_v57 }
 0xc70   :  { %4237 = vmatpush.msrb.mxu0 %v3390_v57 }
 0xc71   :  { %3505 = vmatpush.msrb.mxu1 %v3389_v30  ;;  %3665 = vmatpush.msra.mxu3 %v3389_v30  ;;  %v3424_v15 = vpop.permute.xlu1 %3423  ;;  %v11524_v0 = vpop.permute.xlu0 %3906 }
 0xc72   :  { %4238 = vmatpush.msrb.mxu0 %v3389_v30 }
 0xc73   :  { %3506 = vmatpush.msrb.mxu1 %v3388_v54  ;;  %3666 = vmatpush.msra.mxu3 %v3388_v54 }
 0xc74   :  { %4239 = vmatpush.msrb.mxu0 %v3388_v54 }
 0xc75   :  { %3507 = vmatpush.msrb.mxu1 %v3387_v36  ;;  %3667 = vmatpush.msra.mxu3 %v3387_v36 }
 0xc76   :  { %4240 = vmatpush.msrb.mxu0 %v3387_v36  ;;  %8224 = vmatmul.msk.f32.vlgmr.msrb.gmra.mxu1 %vm3461_vm0, %v3391_v1 }
 0xc77   :  { %8254 = vmatmul.msk.f32.vlgmr.msra.gmra.mxu3 %vm3461_vm0, %v8234_v6  ;;  %3986 = vmatpush.msra.mxu1 %v3390_v57  ;;  %v8296_v6 = vld [vmem:[%s13441_s14 + $0xe8] sm:$0xff] }
 0xc79   :  { %3987 = vmatpush.msra.mxu1 %v3389_v30 }
 0xc7b   :  { %3988 = vmatpush.msra.mxu1 %v3388_v54 }
 0xc7d   :  { %3989 = vmatpush.msra.mxu1 %v3387_v36 }
 0xc7e   :  { %8225 = vmatmul.msk.f32.gmra.mxu1 %vm3461_vm0, %v3392_v21 }
 0xc7f   :  { %4488 = vmatpush.msrb.mxu1 %v3390_v57  ;;  %8255 = vmatmul.msk.f32.gmra.mxu3 %vm3461_vm0, %v8235_v14 }
 0xc81   :  { %4489 = vmatpush.msrb.mxu1 %v3389_v30 }
 0xc83   :  { %4490 = vmatpush.msrb.mxu1 %v3388_v54 }
 0xc85   :  { %4491 = vmatpush.msrb.mxu1 %v3387_v36  ;;  %v3429_v36 = vpop.permute.xlu2 %3428 }
 0xc86   :  { %8226 = vmatmul.msk.f32.gmra.mxu1 %vm3461_vm0, %v3393_v25 }
 0xc87   :  { %8256 = vmatmul.msk.f32.gmra.mxu3 %vm3461_vm0, %v8236_v2  ;;  %v11532_v2 = vpop.permute.xlu1 %3911 }
 0xc8e   :  { %8227 = vmatmul.msk.f32.gmra.mxu1 %vm3461_vm0, %v3394_v7 }
 0xc8f   :  { %8257 = vmatmul.msk.f32.gmra.mxu3 %vm3461_vm0, %v8237_v63 }
 0xc96   :  { %8228 = vmatmul.msk.f32.gmra.mxu1 %vm3461_vm0, %v3395_v58  ;;  %v3434_v58 = vpop.permute.xlu0 %3433 }
 0xc97   :  { %8258 = vmatmul.msk.f32.gmra.mxu3 %vm3461_vm0, %v8238_v5 }
 0xc9e   :  { %8229 = vmatmul.msk.f32.gmra.mxu1 %vm3461_vm0, %v3396_v26  ;;  %v8371_v26 = vld [vmem:[%s13441_s14 + $0x140] sm:$0xff] }
 0xc9f   :  { %8259 = vmatmul.msk.f32.gmra.mxu3 %vm3461_vm0, %v8239_v9 }
 0xca6   :  { %8230 = vmatmul.msk.f32.gmra.mxu1 %vm3461_vm0, %v3397_v39 }
 0xca7   :  { %8260 = vmatmul.msk.f32.gmra.mxu3 %vm3461_vm0, %v8240_v24 }
 0xcae   :  { %8231 = vmatmul.msk.f32.gmra.mxu1 %vm3461_vm0, %v3398_v44  ;;  %v11540_v44 = vpop.permute.xlu2 %3916 }
 0xcaf   :  { %8261 = vmatmul.msk.f32.gmra.mxu3 %vm3461_vm0, %v8241_v29 }
 0xcb6   :  { %8232 = vmatmul.msk.f32.gmra.mxu1 %vm3461_vm0, %v3399_v49 }
 0xcb7   :  { %8262 = vmatmul.msk.f32.gmra.mxu3 %vm3461_vm0, %v8242_v59  ;;  %v3439_v59 = vpop.permute.xlu1 %3438 }
 0xcbe   :  { %8233 = vmatmul.msk.f32.gmra.mxu1 %vm3461_vm0, %v3400_v46 }
 0xcbf   :  { %8263 = vmatmul.msk.f32.gmra.mxu3 %vm3461_vm0, %v8243_v4  ;;  %v8372_v4 = vld [vmem:[%s13441_s14 + $0x148] sm:$0xff] }
 0xcc6   :  { %8307 = vmatmul.msk.f32.vlgmr.msra.gmra.mxu1 %vm3461_vm0, %v8287_v56 }
 0xcce   :  { %8308 = vmatmul.msk.f32.gmra.mxu1 %vm3461_vm0, %v8288_v3 }
 0xcd6   :  { %8309 = vmatmul.msk.f32.gmra.mxu1 %vm3461_vm0, %v8289_v60  ;;  %v11549_v60 = vpop.permute.xlu0 %3921 }
 0xcde   :  { %8310 = vmatmul.msk.f32.gmra.mxu1 %vm3461_vm0, %v8290_v16 }
 0xce6   :  { %8311 = vmatmul.msk.f32.gmra.mxu1 %vm3461_vm0, %v8291_v37 }
 0xcee   :  { %8312 = vmatmul.msk.f32.gmra.mxu1 %vm3461_vm0, %v8292_v27 }
 0xcf3   :  { %v3509_v31 = vpop.f32.mrf.mxu1 }
 0xcf4   :  { %v3510_v50 = vadd.f32 %v3509_v31, %v3414_v38  ;;  %v8317_v38 = vld [vmem:[%s13440_s16 + $0x4] sm:$0x3] }
 0xcf5   :  { %8318 = vmatpush.msk.msrb.mxu3 %vm1736_vm5, %v8317_v38  ;;  %v8335_v38 = vld [vmem:[%s13441_s14 + $0x120] sm:$0xff] }
 0xcf6   :  { %v3539_v61 = vmax.f32 %v3510_v50, 0.0  ;;  %8313 = vmatmul.msk.f32.gmra.mxu1 %vm3461_vm0, %v8293_v18  ;;  %v3449_v18 = vpop.permute.xlu0 %3448 }
 0xcf8   :  { %8277 = vmatmul.msk.f32.vlgmr.msrb.gmra.mxu2 %vm3711_vm1, %v3539_v61 }
 0xcfa   :  { %v3669_v11 = vpop.f32.mrf.mxu3 }
 0xcfb   :  { %v3670_v43 = vadd.f32 %v3669_v11, %v3575_v33  ;;  %v3512_v35 = vpop.f32.mrf.mxu1  ;;  %v8374_v11 = vld [vmem:[%s13441_s14 + $0x158] sm:$0xff] }
 0xcfc   :  { %v3513_v48 = vadd.f32 %v3512_v35, %v3419_v20 }
 0xcfd   :  { %v3699_v8 = vmax.f32 %v3670_v43, 0.0 }
 0xcfe   :  { %v3540_v41 = vmax.f32 %v3513_v48, 0.0  ;;  %8314 = vmatmul.msk.f32.gmra.mxu1 %vm3461_vm0, %v8294_v32 }
 0xcff   :  { %8266 = vmatmul.msk.f32.vlgmr.msra.gmra.mxu0 %vm3711_vm1, %v3699_v8 }
 0xd00   :  { %8278 = vmatmul.msk.f32.gmra.mxu2 %vm3711_vm1, %v3540_v41 }
 0xd02   :  { %v3672_v42 = vpop.f32.mrf.mxu3 }
 0xd03   :  { %v3673_v19 = vadd.f32 %v3672_v42, %v3580_v52  ;;  %v3515_v62 = vpop.f32.mrf.mxu1  ;;  %v8375_v42 = vld [vmem:[%s13441_s14 + $0x160] sm:$0xff] }
 0xd04   :  { %v3516_v57 = vadd.f32 %v3515_v62, %v3424_v15 }
 0xd05   :  { %v3700_v17 = vmax.f32 %v3673_v19, 0.0 }
 0xd06   :  { %v3541_v12 = vmax.f32 %v3516_v57, 0.0  ;;  %8315 = vmatmul.msk.f32.gmra.mxu1 %vm3461_vm0, %v8295_v45 }
 0xd07   :  { %8267 = vmatmul.msk.f32.gmra.mxu0 %vm3711_vm1, %v3700_v17 }
 0xd08   :  { %8279 = vmatmul.msk.f32.gmra.mxu2 %vm3711_vm1, %v3541_v12  ;;  %v8376_v12 = vld [vmem:[%s13441_s14 + $0x168] sm:$0xff] }
 0xd0a   :  { %v3675_v30 = vpop.f32.mrf.mxu3 }
 0xd0b   :  { %v3676_v54 = vadd.f32 %v3675_v30, %v3585_v55  ;;  %v3518_v1 = vpop.f32.mrf.mxu1  ;;  %v3444_v55 = vpop.permute.xlu2 %3443 }
 0xd0c   :  { %v3519_v14 = vadd.f32 %v3518_v1, %v3429_v36 }
 0xd0d   :  { %v3701_v21 = vmax.f32 %v3676_v54, 0.0 }
 0xd0e   :  { %v3542_v25 = vmax.f32 %v3519_v14, 0.0  ;;  %8316 = vmatmul.msk.f32.gmra.mxu1 %vm3461_vm0, %v8296_v6 }
 0xd0f   :  { %8268 = vmatmul.msk.f32.gmra.mxu0 %vm3711_vm1, %v3701_v21 }
 0xd10   :  { %8280 = vmatmul.msk.f32.gmra.mxu2 %vm3711_vm1, %v3542_v25 }
 0xd12   :  { %v3678_v7 = vpop.f32.mrf.mxu3 }
 0xd13   :  { %v3679_v63 = vadd.f32 %v3678_v7, %v3590_v51  ;;  %v3521_v5 = vpop.f32.mrf.mxu1  ;;  %v8373_v51 = vld [vmem:[%s13441_s14 + $0x150] sm:$0xff]  ;;  %v11571_v32 = vpop.permute.xlu2 %3931 }
 0xd14   :  { %v3522_v39 = vadd.f32 %v3521_v5, %v3434_v58  ;;  %v8378_v58 = vld [vmem:[%s13441_s14 + $0x178] sm:$0xff] }
 0xd15   :  { %v3702_v9 = vmax.f32 %v3679_v63, 0.0 }
 0xd16   :  { %v3543_v24 = vmax.f32 %v3522_v39, 0.0  ;;  %8391 = vmatmul.msk.f32.vlgmr.msrb.gmra.mxu1 %vm3461_vm0, %v8371_v26  ;;  %v8379_v39 = vld [vmem:[%s13441_s14 + $0x180] sm:$0xff] }
 0xd17   :  { %8269 = vmatmul.msk.f32.gmra.mxu0 %vm3711_vm1, %v3702_v9  ;;  %v8330_v9 = vld [vmem:[%s13441_s14 + $0xf8] sm:$0xff] }
 0xd18   :  { %8281 = vmatmul.msk.f32.gmra.mxu2 %vm3711_vm1, %v3543_v24 }
 0xd1a   :  { %v3681_v29 = vpop.f32.mrf.mxu3 }
 0xd1b   :  { %v3682_v49 = vadd.f32 %v3681_v29, %v11482_v23  ;;  %v3524_v46 = vpop.f32.mrf.mxu1  ;;  %v3459_v57 = vpop.permute.xlu2 %3458 }
 0xd1c   :  { %v3525_v3 = vadd.f32 %v3524_v46, %v3439_v59  ;;  %v8380_v59 = vld [vmem:[%s13441_s14 + $0x188] sm:$0xff] }
 0xd1d   :  { %v3703_v56 = vmax.f32 %v3682_v49, 0.0  ;;  %v8331_v49 = vld [vmem:[%s13441_s14 + $0x100] sm:$0xff] }
 0xd1e   :  { %v3544_v33 = vmax.f32 %v3525_v3, 0.0  ;;  %8392 = vmatmul.msk.f32.gmra.mxu1 %vm3461_vm0, %v8372_v4 }
 0xd1f   :  { %8270 = vmatmul.msk.f32.gmra.mxu0 %vm3711_vm1, %v3703_v56  ;;  %v8332_v56 = vld [vmem:[%s13441_s14 + $0x108] sm:$0xff] }
 0xd20   :  { %8282 = vmatmul.msk.f32.gmra.mxu2 %vm3711_vm1, %v3544_v33 }
 0xd22   :  { %v3684_v52 = vpop.f32.mrf.mxu3 }
 0xd23   :  { %v3685_v40 = vadd.f32 %v3684_v52, %v11488_v53  ;;  %v3527_v16 = vpop.f32.mrf.mxu1  ;;  %v11562_v53 = vpop.permute.xlu1 %3926  ;;  %v8333_v52 = vld [vmem:[%s13441_s14 + $0x110] sm:$0xff] }
 0xd24   :  { %v3528_v37 = vadd.f32 %v3527_v16, %v3444_v55 }
 0xd25   :  { %v3704_v23 = vmax.f32 %v3685_v40, 0.0 }
 0xd26   :  { %v3545_v27 = vmax.f32 %v3528_v37, 0.0  ;;  %8393 = vmatmul.msk.f32.gmra.mxu1 %vm3461_vm0, %v8373_v51  ;;  %v8401_v37 = vld [vmem:[%s13440_s16 + $0x8] sm:$0x3] }
 0xd27   :  { %8271 = vmatmul.msk.f32.gmra.mxu0 %vm3711_vm1, %v3704_v23  ;;  %8402 = vmatpush.msk.msra.mxu3 %vm1736_vm5, %v8401_v37 }
 0xd28   :  { %8283 = vmatmul.msk.f32.gmra.mxu2 %vm3711_vm1, %v3545_v27 }
 0xd2a   :  { %v3687_v31 = vpop.f32.mrf.mxu3 }
 0xd2b   :  { %v3688_v50 = vadd.f32 %v3687_v31, %v11491_v10  ;;  %v3530_v61 = vpop.f32.mrf.mxu1  ;;  %v3454_v48 = vpop.permute.xlu1 %3453 }
 0xd2c   :  { %v3531_v20 = vadd.f32 %v3530_v61, %v3449_v18  ;;  %v8336_v18 = vld [vmem:[%s13441_s14 + $0x128] sm:$0xff]  ;;  %v3937_v61 = vpop.permute.xlu0 %3936 }
 0xd2d   :  { %v3705_v43 = vmax.f32 %v3688_v50, 0.0 }
 0xd2e   :  { %v3546_v35 = vmax.f32 %v3531_v20, 0.0  ;;  %8394 = vmatmul.msk.f32.gmra.mxu1 %vm3461_vm0, %v8374_v11 }
 0xd2f   :  { %8272 = vmatmul.msk.f32.gmra.mxu0 %vm3711_vm1, %v3705_v43 }
 0xd30   :  { %8284 = vmatmul.msk.f32.gmra.mxu2 %vm3711_vm1, %v3546_v35 }
 0xd32   :  { %v3690_v8 = vpop.f32.mrf.mxu3 }
 0xd33   :  { %v3691_v10 = vadd.f32 %v3690_v8, %v11493_v28  ;;  %v3533_v41 = vpop.f32.mrf.mxu1  ;;  %v3942_v8 = vpop.permute.xlu1 %3941 }
 0xd34   :  { %v3534_v15 = vadd.f32 %v3533_v41, %v3454_v48 }
 0xd35   :  { %v3706_v19 = vmax.f32 %v3691_v10, 0.0 }
 0xd36   :  { %v3547_v62 = vmax.f32 %v3534_v15, 0.0  ;;  %8395 = vmatmul.msk.f32.gmra.mxu1 %vm3461_vm0, %v8375_v42  ;;  %v4148_v42 = vpop.permute.xlu0 %4147  ;;  %v8338_v15 = vld [vmem:[%s13441_s14 + $0x138] sm:$0xff] }
 0xd37   :  { %8273 = vmatmul.msk.f32.gmra.mxu0 %vm3711_vm1, %v3706_v19 }
 0xd38   :  { %8285 = vmatmul.msk.f32.gmra.mxu2 %vm3711_vm1, %v3547_v62  ;;  %v4399_v62 = vpop.permute.xlu2 %4398 }
 0xd3a   :  { %v3693_v45 = vpop.f32.mrf.mxu3 }
 0xd3b   :  { %v3694_v17 = vadd.f32 %v3693_v45, %v11499_v34  ;;  %v3536_v28 = vpop.f32.mrf.mxu1  ;;  %v8377_v34 = vld [vmem:[%s13441_s14 + $0x170] sm:$0xff] }
 0xd3c   :  { %v3537_v54 = vadd.f32 %v3536_v28, %v3459_v57  ;;  %v4153_v28 = vpop.permute.xlu1 %4152 }
 0xd3d   :  { %v3707_v30 = vmax.f32 %v3694_v17, 0.0 }
 0xd3e   :  { %v3548_v36 = vmax.f32 %v3537_v54, 0.0  ;;  %8396 = vmatmul.msk.f32.gmra.mxu1 %vm3461_vm0, %v8376_v12 }
 0xd3f   :  { %8274 = vmatmul.msk.f32.gmra.mxu0 %vm3711_vm1, %v3707_v30  ;;  %v4404_v30 = vpop.permute.xlu0 %4403 }
 0xd40   :  { %8286 = vmatmul.msk.f32.gmra.mxu2 %vm3711_vm1, %v3548_v36 }
 0xd42   :  { %v3696_v1 = vpop.f32.mrf.mxu3 }
 0xd43   :  { %v3697_v6 = vadd.f32 %v3696_v1, %v11501_v22  ;;  %v3991_v21 = vpop.f32.mrf.mxu1  ;;  %v8329_v22 = vld [vmem:[%s13441_s14 + $0xf0] sm:$0xff] }
 0xd44   :  { %v3992_v25 = vadd.f32 %v3991_v21, %v11508_v13 }
 0xd45   :  { %v3708_v14 = vmax.f32 %v3697_v6, 0.0  ;;  %v4158_v6 = vpop.permute.xlu2 %4157 }
 0xd46   :  { %v4021_v7 = vmax.f32 %v3992_v25, 0.0  ;;  %8397 = vmatmul.msk.f32.gmra.mxu1 %vm3461_vm0, %v8377_v34  ;;  %v4409_v34 = vpop.permute.xlu1 %4408 }
 0xd47   :  { %8275 = vmatmul.msk.f32.gmra.mxu0 %vm3711_vm1, %v3708_v14 }
 0xd48   :  { %8319 = vmatmul.msk.f32.vlgmr.msrb.gmra.mxu3 %vm3711_vm1, %v4021_v7 }
 0xd4b   :  { %v3994_v63 = vpop.f32.mrf.mxu1 }
 0xd4c   :  { %v3995_v5 = vadd.f32 %v3994_v63, %v11516_v47  ;;  %v4163_v63 = vpop.permute.xlu0 %4162 }
 0xd4e   :  { %v4022_v26 = vmax.f32 %v3995_v5, 0.0  ;;  %8398 = vmatmul.msk.f32.gmra.mxu1 %vm3461_vm0, %v8378_v58  ;;  %v4414_v58 = vpop.permute.xlu2 %4413 }
 0xd4f   :  { %8349 = vmatmul.msk.f32.vlgmr.msrb.gmra.mxu0 %vm3461_vm0, %v8329_v22 }
 0xd50   :  { %8320 = vmatmul.msk.f32.gmra.mxu3 %vm3711_vm1, %v4022_v26 }
 0xd53   :  { %v3997_v13 = vpop.f32.mrf.mxu1 }
 0xd54   :  { %v3998_v24 = vadd.f32 %v3997_v13, %v11524_v0 }
 0xd56   :  { %v4023_v29 = vmax.f32 %v3998_v24, 0.0  ;;  %8399 = vmatmul.msk.f32.gmra.mxu1 %vm3461_vm0, %v8379_v39  ;;  %v4168_v39 = vpop.permute.xlu1 %4167 }
 0xd57   :  { %8350 = vmatmul.msk.f32.gmra.mxu0 %vm3461_vm0, %v8330_v9  ;;  %v8359_v9 = vld [vmem:[%s13440_s16 + $0x6] sm:$0x3] }
 0xd58   :  { %8321 = vmatmul.msk.f32.gmra.mxu3 %vm3711_vm1, %v4023_v29  ;;  %8360 = vmatpush.msk.msra.mxu2 %vm1736_vm5, %v8359_v9  ;;  %v4419_v29 = vpop.permute.xlu0 %4418 }
 0xd5b   :  { %v4000_v47 = vpop.f32.mrf.mxu1 }
 0xd5c   :  { %v4001_v46 = vadd.f32 %v4000_v47, %v11532_v2 }
 0xd5e   :  { %v4024_v4 = vmax.f32 %v4001_v46, 0.0  ;;  %8400 = vmatmul.msk.f32.gmra.mxu1 %vm3461_vm0, %v8380_v59  ;;  %v4173_v46 = vpop.permute.xlu2 %4172 }
 0xd5f   :  { %8351 = vmatmul.msk.f32.gmra.mxu0 %vm3461_vm0, %v8331_v49 }
 0xd60   :  { %8322 = vmatmul.msk.f32.gmra.mxu3 %vm3711_vm1, %v4024_v4 }
 0xd63   :  { %v4003_v0 = vpop.f32.mrf.mxu1 }
 0xd64   :  { %v4004_v3 = vadd.f32 %v4003_v0, %v11540_v44  ;;  %v8334_v44 = vld [vmem:[%s13441_s14 + $0x118] sm:$0xff]  ;;  %v4424_v0 = vpop.permute.xlu1 %4423 }
 0xd66   :  { %v4025_v33 = vmax.f32 %v4004_v3, 0.0 }
 0xd67   :  { %8352 = vmatmul.msk.f32.gmra.mxu0 %vm3461_vm0, %v8332_v56 }
 0xd68   :  { %8323 = vmatmul.msk.f32.gmra.mxu3 %vm3711_vm1, %v4025_v33 }
 0xd6b   :  { %v4006_v2 = vpop.f32.mrf.mxu1 }
 0xd6c   :  { %v4007_v40 = vadd.f32 %v4006_v2, %v11549_v60  ;;  %v4178_v2 = vpop.permute.xlu0 %4177 }
 0xd6e   :  { %v4026_v55 = vmax.f32 %v4007_v40, 0.0  ;;  %v4429_v40 = vpop.permute.xlu2 %4428 }
 0xd6f   :  { %8353 = vmatmul.msk.f32.gmra.mxu0 %vm3461_vm0, %v8333_v52 }
 0xd70   :  { %8324 = vmatmul.msk.f32.gmra.mxu3 %vm3711_vm1, %v4026_v55 }
 0xd73   :  { %v4009_v16 = vpop.f32.mrf.mxu1 }
 0xd74   :  { %v4010_v51 = vadd.f32 %v4009_v16, %v11562_v53  ;;  %v4434_v37 = vpop.permute.xlu0 %4433 }
 0xd76   :  { %v4027_v23 = vmax.f32 %v4010_v51, 0.0  ;;  %v4183_v51 = vpop.permute.xlu1 %4182 }
 0xd77   :  { %8354 = vmatmul.msk.f32.gmra.mxu0 %vm3461_vm0, %v8334_v44 }
 0xd78   :  { %8325 = vmatmul.msk.f32.gmra.mxu3 %vm3711_vm1, %v4027_v23 }
 0xd7b   :  { %v4012_v27 = vpop.f32.mrf.mxu1 }
 0xd7c   :  { %v11647_v60 = vpop.f32.mrf.mxu0  ;;  %v4013_v53 = vadd.f32 %v4012_v27, %v11571_v32  ;;  %v8337_v32 = vld [vmem:[%s13441_s14 + $0x130] sm:$0xff] }
 0xd7e   :  { %v4028_v31 = vmax.f32 %v4013_v53, 0.0 }
 0xd7f   :  { %8355 = vmatmul.msk.f32.gmra.mxu0 %vm3461_vm0, %v8335_v38 }
 0xd80   :  { %8326 = vmatmul.msk.f32.gmra.mxu3 %vm3711_vm1, %v4028_v31 }
 0xd83   :  { %v4015_v11 = vpop.f32.mrf.mxu1 }
 0xd84   :  { %v11655_v50 = vpop.f32.mrf.mxu0  ;;  %v4016_v43 = vadd.f32 %v4015_v11, %v3937_v61  ;;  %v4188_v61 = vpop.permute.xlu2 %4187 }
 0xd86   :  { %v4029_v20 = vmax.f32 %v4016_v43, 0.0  ;;  %v4439_v43 = vpop.permute.xlu1 %4438 }
 0xd87   :  { %8356 = vmatmul.msk.f32.gmra.mxu0 %vm3461_vm0, %v8336_v18 }
 0xd88   :  { %8327 = vmatmul.msk.f32.gmra.mxu3 %vm3711_vm1, %v4029_v20 }
 0xd8b   :  { %v4018_v10 = vpop.f32.mrf.mxu1 }
 0xd8c   :  { %v11662_v35 = vpop.f32.mrf.mxu0  ;;  %v4019_v48 = vadd.f32 %v4018_v10, %v3942_v8 }
 0xd8e   :  { %v4030_v41 = vmax.f32 %v4019_v48, 0.0 }
 0xd8f   :  { %8357 = vmatmul.msk.f32.gmra.mxu0 %vm3461_vm0, %v8337_v32 }
 0xd90   :  { %8328 = vmatmul.msk.f32.gmra.mxu3 %vm3711_vm1, %v4030_v41 }
 0xd93   :  { %v4493_v45 = vpop.f32.mrf.mxu1 }
 0xd94   :  { %v11669_v19 = vpop.f32.mrf.mxu0  ;;  %v4494_v17 = vadd.f32 %v4493_v45, %v4399_v62 }
 0xd96   :  { %v4523_v57 = vmax.f32 %v4494_v17, 0.0 }
 0xd97   :  { %8358 = vmatmul.msk.f32.gmra.mxu0 %vm3461_vm0, %v8338_v15 }
 0xd98   :  { %8403 = vmatmul.msk.f32.vlgmr.msra.gmra.mxu3 %vm3711_vm1, %v4523_v57 }
 0xd9b   :  { %v4496_v54 = vpop.f32.mrf.mxu1 }
 0xd9c   :  { %v11676_v12 = vpop.f32.mrf.mxu0  ;;  %v4497_v36 = vadd.f32 %v4496_v54, %v4404_v30 }
 0xd9e   :  { %v4524_v1 = vmax.f32 %v4497_v36, 0.0 }
 0xda0   :  { %8404 = vmatmul.msk.f32.gmra.mxu3 %vm3711_vm1, %v4524_v1 }
 0xda3   :  { %v4499_v14 = vpop.f32.mrf.mxu1 }
 0xda4   :  { %v11679_v21 = vpop.f32.mrf.mxu0  ;;  %v4500_v25 = vadd.f32 %v4499_v14, %v4409_v34 }
 0xda6   :  { %v4525_v7 = vmax.f32 %v4500_v25, 0.0  ;;  %v11710_v25 = vpop.f32.mrf.mxu2 }
 0xda8   :  { %8405 = vmatmul.msk.f32.gmra.mxu3 %vm3711_vm1, %v4525_v7 }
 0xdab   :  { %v4502_v5 = vpop.f32.mrf.mxu1 }
 0xdac   :  { %v11682_v22 = vpop.f32.mrf.mxu0  ;;  %v4503_v26 = vadd.f32 %v4502_v5, %v4414_v58 }
 0xdae   :  { %v4526_v13 = vmax.f32 %v4503_v26, 0.0 }
 0xdb0   :  { %8406 = vmatmul.msk.f32.gmra.mxu3 %vm3711_vm1, %v4526_v13 }
 0xdb3   :  { %v4505_v47 = vpop.f32.mrf.mxu1 }
 0xdb4   :  { %v11689_v24 = vpop.f32.mrf.mxu0  ;;  %v4506_v49 = vadd.f32 %v4505_v47, %v4419_v29 }
 0xdb6   :  { %v4527_v59 = vmax.f32 %v4506_v49, 0.0 }
 0xdb8   :  { %8407 = vmatmul.msk.f32.gmra.mxu3 %vm3711_vm1, %v4527_v59 }
 0xdbb   :  { %v4508_v56 = vpop.f32.mrf.mxu1 }
 0xdbc   :  { %v11692_v4 = vpop.f32.mrf.mxu0  ;;  %v4509_v3 = vadd.f32 %v4508_v56, %v4424_v0 }
 0xdbe   :  { %v4528_v33 = vmax.f32 %v4509_v3, 0.0 }
 0xdc0   :  { %8408 = vmatmul.msk.f32.gmra.mxu3 %vm3711_vm1, %v4528_v33 }
 0xdc3   :  { %v4511_v55 = vpop.f32.mrf.mxu1 }
 0xdc4   :  { %v11695_v52 = vpop.f32.mrf.mxu0  ;;  %v4512_v16 = vadd.f32 %v4511_v55, %v4429_v40 }
 0xdc6   :  { %v4529_v44 = vmax.f32 %v4512_v16, 0.0 }
 0xdc8   :  { %8409 = vmatmul.msk.f32.gmra.mxu3 %vm3711_vm1, %v4529_v44 }
 0xdcb   :  { %v4514_v38 = vpop.f32.mrf.mxu1  ;;  %v11702_v57 = vpop.f32.mrf.mxu3 }
 0xdcc   :  { %v4242_v23 = vpop.f32.mrf.mxu0  ;;  %v4515_v53 = vadd.f32 %v4514_v38, %v4434_v37 }
 0xdcd   :  { %v4243_v27 = vadd.f32 %v4242_v23, %v4148_v42  ;;  %v4444_v42 = vpop.permute.xlu2 %4443 }
 0xdce   :  { %v4530_v18 = vmax.f32 %v4515_v53, 0.0 }
 0xdcf   :  { %v4272_v31 = vmax.f32 %v4243_v27, 0.0 }
 0xdd0   :  { %8410 = vmatmul.msk.f32.gmra.mxu3 %vm3711_vm1, %v4530_v18 }
 0xdd1   :  { %8361 = vmatmul.msk.f32.vlgmr.msra.gmra.mxu2 %vm3711_vm1, %v4272_v31 }
 0xdd3   :  { %v4517_v32 = vpop.f32.mrf.mxu1  ;;  %v11707_v1 = vpop.f32.mrf.mxu3 }
 0xdd4   :  { %v4245_v11 = vpop.f32.mrf.mxu0  ;;  %v4518_v8 = vadd.f32 %v4517_v32, %v4439_v43 }
 0xdd5   :  { %v4246_v20 = vadd.f32 %v4245_v11, %v4153_v28 }
 0xdd6   :  { %v4531_v48 = vmax.f32 %v4518_v8, 0.0 }
 0xdd7   :  { %v4273_v10 = vmax.f32 %v4246_v20, 0.0 }
 0xdd8   :  { %8411 = vmatmul.msk.f32.gmra.mxu3 %vm3711_vm1, %v4531_v48 }
 0xdd9   :  { %8362 = vmatmul.msk.f32.gmra.mxu2 %vm3711_vm1, %v4273_v10 }
 0xddb   :  { %v4520_v62 = vpop.f32.mrf.mxu1  ;;  %v11712_v7 = vpop.f32.mrf.mxu3 }
 0xddc   :  { %v4248_v41 = vpop.f32.mrf.mxu0  ;;  %v4521_v45 = vadd.f32 %v4520_v62, %v4444_v42 }
 0xddd   :  { %v4249_v15 = vadd.f32 %v4248_v41, %v4158_v6 }
 0xdde   :  { %v4532_v30 = vmax.f32 %v4521_v45, 0.0 }
 0xddf   :  { %v4274_v17 = vmax.f32 %v4249_v15, 0.0 }
 0xde0   :  { %8412 = vmatmul.msk.f32.gmra.mxu3 %vm3711_vm1, %v4532_v30 }
 0xde1   :  { %8363 = vmatmul.msk.f32.gmra.mxu2 %vm3711_vm1, %v4274_v17 }
 0xde3   :  { %v4092_v29 = vpop.f32.mrf.mxu3 }
 0xde4   :  { %v4251_v28 = vpop.f32.mrf.mxu0 }
 0xde5   :  { %v4252_v54 = vadd.f32 %v4251_v28, %v4163_v63  ;;  %v11715_v63 = vpop.f32.mrf.mxu2 }
 0xde7   :  { %v4275_v36 = vmax.f32 %v4252_v54, 0.0 }
 0xde9   :  { %8364 = vmatmul.msk.f32.gmra.mxu2 %vm3711_vm1, %v4275_v36 }
 0xdeb   :  { %v4095_v56 = vpop.f32.mrf.mxu3 }
 0xdec   :  { %v4254_v34 = vpop.f32.mrf.mxu0 }
 0xded   :  { %v4255_v14 = vadd.f32 %v4254_v34, %v4168_v39  ;;  %v11718_v59 = vpop.f32.mrf.mxu2 }
 0xdef   :  { %v4276_v6 = vmax.f32 %v4255_v14, 0.0 }
 0xdf1   :  { %8365 = vmatmul.msk.f32.gmra.mxu2 %vm3711_vm1, %v4276_v6 }
 0xdf3   :  { %v4098_v55 = vpop.f32.mrf.mxu3 }
 0xdf4   :  { %v4257_v58 = vpop.f32.mrf.mxu0 }
 0xdf5   :  { %v4258_v5 = vadd.f32 %v4257_v58, %v4173_v46  ;;  %v3851_v40 = vpop.f32.mrf.mxu2 }
 0xdf6   :  { %v3852_v15 = vadd.f32 %v3851_v40, %v11669_v19 }
 0xdf7   :  { %v4277_v26 = vmax.f32 %v4258_v5, 0.0 }
 0xdf8   :  { %v4116_v62 = vadd.f32 %v4092_v29, %v3852_v15 }
 0xdf9   :  { %8366 = vmatmul.msk.f32.gmra.mxu2 %vm3711_vm1, %v4277_v26 }
 0xdfb   :  { %v4101_v37 = vpop.f32.mrf.mxu3 }
 0xdfc   :  { %v4260_v13 = vpop.f32.mrf.mxu0 }
 0xdfd   :  { %v4261_v9 = vadd.f32 %v4260_v13, %v4178_v2  ;;  %v4193_v2 = vpop.permute.xlu0 %4192 }
 0xdff   :  { %v4278_v47 = vmax.f32 %v4261_v9, 0.0 }
 0xe01   :  { %8367 = vmatmul.msk.f32.gmra.mxu2 %vm3711_vm1, %v4278_v47 }
 0xe03   :  { %v4104_v38 = vpop.f32.mrf.mxu3 }
 0xe04   :  { %v4263_v39 = vpop.f32.mrf.mxu0 }
 0xe05   :  { %v4264_v49 = vadd.f32 %v4263_v39, %v4183_v51  ;;  %v3854_v51 = vpop.f32.mrf.mxu2 }
 0xe06   :  { %v3855_v54 = vadd.f32 %v3854_v51, %v11676_v12 }
 0xe07   :  { %v4279_v0 = vmax.f32 %v4264_v49, 0.0 }
 0xe08   :  { %v4117_v34 = vadd.f32 %v4095_v56, %v3855_v54 }
 0xe09   :  { %8368 = vmatmul.msk.f32.gmra.mxu2 %vm3711_vm1, %v4279_v0 }
 0xe0b   :  { %v4107_v31 = vpop.f32.mrf.mxu3 }
 0xe0c   :  { %v4266_v46 = vpop.f32.mrf.mxu0 }
 0xe0d   :  { %v4267_v3 = vadd.f32 %v4266_v46, %v4188_v61  ;;  %v3857_v27 = vpop.f32.mrf.mxu2 }
 0xe0e   :  { %v3858_v19 = vadd.f32 %v3857_v27, %v11679_v21 }
 0xe0f   :  { %v4280_v33 = vmax.f32 %v4267_v3, 0.0 }
 0xe10   :  { %v4118_v9 = vadd.f32 %v4098_v55, %v3858_v19 }
 0xe11   :  { %8369 = vmatmul.msk.f32.gmra.mxu2 %vm3711_vm1, %v4280_v33 }
 0xe13   :  { %v11723_v11 = vpop.f32.mrf.mxu3 }
 0xe14   :  { %v4269_v16 = vpop.f32.mrf.mxu0 }
 0xe15   :  { %v4270_v44 = vadd.f32 %v4269_v16, %v4193_v2  ;;  %v3860_v53 = vpop.f32.mrf.mxu2 }
 0xe16   :  { %v3861_v0 = vadd.f32 %v3860_v53, %v11682_v22 }
 0xe17   :  { %v4281_v23 = vmax.f32 %v4270_v44, 0.0 }
 0xe18   :  { %v4119_v46 = vadd.f32 %v4101_v37, %v3861_v0 }
 0xe19   :  { %8370 = vmatmul.msk.f32.gmra.mxu2 %vm3711_vm1, %v4281_v23 }
 0xe1b   :  { %v11725_v43 = vpop.f32.mrf.mxu3 }
 0xe1d   :  { %v3863_v18 = vpop.f32.mrf.mxu2 }
 0xe1e   :  { %v3864_v55 = vadd.f32 %v3863_v18, %v11689_v24 }
 0xe20   :  { %v4120_v44 = vadd.f32 %v4104_v38, %v3864_v55 }
 0xe23   :  { %v11727_v32 = vpop.f32.mrf.mxu3 }
 0xe25   :  { %v3866_v61 = vpop.f32.mrf.mxu2 }
 0xe26   :  { %v3867_v53 = vadd.f32 %v3866_v61, %v11692_v4 }
 0xe2b   :  { %v11731_v10 = vpop.f32.mrf.mxu3 }
 0xe2d   :  { %v3869_v20 = vpop.f32.mrf.mxu2 }
 0xe2e   :  { %v3870_v4 = vadd.f32 %v3869_v20, %v11695_v52  ;;  %v3843_v20 = vadd.f32 %v11710_v25, %v11647_v60 }
 0xe30   :  { %v4113_v19 = vadd.f32 %v11702_v57, %v3843_v20 }
 0xe33   :  { %v4594_v41 = vpop.f32.mrf.mxu3 }
 0xe3b   :  { %v4597_v45 = vpop.f32.mrf.mxu3 }
 0xe43   :  { %v4600_v5 = vpop.f32.mrf.mxu3 }
 0xe4b   :  { %v4603_v49 = vpop.f32.mrf.mxu3 }
 0xe53   :  { %v4606_v22 = vpop.f32.mrf.mxu3 }
 0xe54   :  { %v11729_v8 = vpop.f32.mrf.mxu2 }
 0xe5b   :  { %v4609_v15 = vpop.f32.mrf.mxu3 }
 0xe5c   :  { %v11733_v48 = vpop.f32.mrf.mxu2 }
 0xe64   :  { %v11735_v42 = vpop.f32.mrf.mxu2 }
 0xe6c   :  { %v4343_v17 = vpop.f32.mrf.mxu2 }
 0xe6d   :  { %v4367_v30 = vadd.f32 %v4343_v17, %v4116_v62 }
 0xe6f   :  { %v11738_v28 = vadd.f32 %v4594_v41, %v4367_v30  ;;  %v4121_v41 = vadd.f32 %v4107_v31, %v3867_v53  ;;  %v3849_v30 = vadd.f32 %v11718_v59, %v11662_v35  ;;  %v4612_v59 = vpop.f32.mrf.mxu3 }
 0xe71   :  { %v4683_v36 = vmul.f32 %v11738_v28, %v11738_v28  ;;  %v4115_v31 = vadd.f32 %v11712_v7, %v3849_v30 }
 0xe73   :  { %v4699_v14 = vsel %vm2465_vm7, %v4683_v36, 0.0  ;;  %v4122_v36 = vadd.f32 %v11723_v11, %v3870_v4 }
 0xe74   :  { %4700 = vadd.xlane.f32.xlu2 %v4699_v14  ;;  %v4346_v6 = vpop.f32.mrf.mxu2  ;;  %v4366_v14 = vadd.f32 %v11735_v42, %v4115_v31 }
 0xe75   :  { %v4368_v58 = vadd.f32 %v4346_v6, %v4117_v34 }
 0xe77   :  { %v11744_v26 = vadd.f32 %v4597_v45, %v4368_v58  ;;  %v11791_v58 = vadd.f32 %v11731_v10, %v4366_v14  ;;  %v4364_v10 = vadd.f32 %v11729_v8, %v4113_v19 }
 0xe79   :  { %v4684_v13 = vmul.f32 %v11744_v26, %v11744_v26  ;;  %v4631_v8 = vsel %vm2465_vm7, %v11791_v58, 0.0 }
 0xe7b   :  { %v4702_v12 = vsel %vm2465_vm7, %v4684_v13, 0.0  ;;  %v4682_v13 = vmul.f32 %v11791_v58, %v11791_v58 }
 0xe7c   :  { %4703 = vadd.xlane.f32.xlu1 %v4702_v12  ;;  %v4349_v29 = vpop.f32.mrf.mxu2  ;;  %v11808_v12 = vadd.f32 %v11725_v43, %v4364_v10 }
 0xe7d   :  { %v4369_v47 = vadd.f32 %v4349_v29, %v4118_v9  ;;  %v4696_v29 = vsel %vm2465_vm7, %v4682_v13, 0.0 }
 0xe7f   :  { %v11750_v39 = vadd.f32 %v4600_v5, %v4369_v47  ;;  %v3846_v5 = vadd.f32 %v11715_v63, %v11655_v50  ;;  %v4634_v50 = vsel %vm2465_vm7, %v11738_v28, 0.0  ;;  %v4680_v63 = vmul.f32 %v11808_v12, %v11808_v12 }
 0xe80   :  { %v4625_v47 = vsel %vm2465_vm7, %v11808_v12, 0.0 }
 0xe81   :  { %v4640_v56 = vsel %vm2465_vm7, %v11750_v39, 0.0  ;;  %v4685_v33 = vmul.f32 %v11750_v39, %v11750_v39  ;;  %v4114_v25 = vadd.f32 %v11707_v1, %v3846_v5  ;;  %v4637_v1 = vsel %vm2465_vm7, %v11744_v26, 0.0 }
 0xe82   :  { %4641 = vadd.xlane.f32.xlu0 %v4640_v56 }
 0xe83   :  { %v4705_v2 = vsel %vm2465_vm7, %v4685_v33, 0.0  ;;  %v4365_v9 = vadd.f32 %v11733_v48, %v4114_v25  ;;  %v4690_v48 = vsel %vm2465_vm7, %v4680_v63, 0.0 }
 0xe84   :  { %v4352_v21 = vpop.f32.mrf.mxu2 }
 0xe85   :  { %v4370_v3 = vadd.f32 %v4352_v21, %v4119_v46  ;;  %v11814_v57 = vadd.f32 %v11727_v32, %v4365_v9 }
 0xe87   :  { %v11757_v40 = vadd.f32 %v4603_v49, %v4370_v3  ;;  %v4681_v43 = vmul.f32 %v11814_v57, %v11814_v57  ;;  %v4628_v49 = vsel %vm2465_vm7, %v11814_v57, 0.0 }
 0xe89   :  { %v4643_v16 = vsel %vm2465_vm7, %v11757_v40, 0.0  ;;  %v4686_v37 = vmul.f32 %v11757_v40, %v11757_v40  ;;  %v4693_v32 = vsel %vm2465_vm7, %v4681_v43, 0.0  ;;  %v4771_v43 = vld [vmem:[%s13442_s17] sm:$0xff] }
 0xe8a   :  { %4706 = vadd.xlane.f32.xlu0 %v4705_v2  ;;  %4644 = vadd.xlane.f32.xlu2 %v4643_v16 }
 0xe8b   :  { %v4708_v24 = vsel %vm2465_vm7, %v4686_v37, 0.0 }
 0xe8c   :  { %v4355_v23 = vpop.f32.mrf.mxu2 }
 0xe8d   :  { %v4371_v51 = vadd.f32 %v4355_v23, %v4120_v44 }
 0xe8f   :  { %v11765_v27 = vadd.f32 %v4606_v22, %v4371_v51 }
 0xe91   :  { %v4646_v18 = vsel %vm2465_vm7, %v11765_v27, 0.0  ;;  %v4687_v45 = vmul.f32 %v11765_v27, %v11765_v27 }
 0xe92   :  { %4709 = vadd.xlane.f32.xlu2 %v4708_v24  ;;  %4647 = vadd.xlane.f32.xlu1 %v4646_v18 }
 0xe93   :  { %v4711_v61 = vsel %vm2465_vm7, %v4687_v45, 0.0  ;;  %v8947_v45 = vld [vmem:[%s13478_s0 + $0x8] sm:$0xff] }
 0xe94   :  { %v4358_v62 = vpop.f32.mrf.mxu2 }
 0xe95   :  { %v4372_v38 = vadd.f32 %v4358_v62, %v4121_v41 }
 0xe97   :  { %v11773_v17 = vadd.f32 %v4609_v15, %v4372_v38  ;;  %v8946_v15 = vld [vmem:[%s13478_s0] sm:$0xff] }
 0xe99   :  { %v4649_v54 = vsel %vm2465_vm7, %v11773_v17, 0.0  ;;  %v4688_v35 = vmul.f32 %v11773_v17, %v11773_v17 }
 0xe9a   :  { %4712 = vadd.xlane.f32.xlu1 %v4711_v61  ;;  %4650 = vadd.xlane.f32.xlu0 %v4649_v54 }
 0xe9b   :  { %v4714_v7 = vsel %vm2465_vm7, %v4688_v35, 0.0 }
 0xe9c   :  { %v4361_v34 = vpop.f32.mrf.mxu2 }
 0xe9d   :  { %v4373_v6 = vadd.f32 %v4361_v34, %v4122_v36 }
 0xe9f   :  { %v11786_v52 = vadd.f32 %v4612_v59, %v4373_v6 }
 0xea1   :  { %v4652_v11 = vsel %vm2465_vm7, %v11786_v52, 0.0  ;;  %v4689_v42 = vmul.f32 %v11786_v52, %v11786_v52 }
 0xea2   :  { %4715 = vadd.xlane.f32.xlu0 %v4714_v7  ;;  %4653 = vadd.xlane.f32.xlu2 %v4652_v11 }
 0xea3   :  { %v4717_v60 = vsel %vm2465_vm7, %v4689_v42, 0.0 }
 0xea4   :  { %4718 = vadd.xlane.f32.xlu1 %v4717_v60 }
 0xeaa   :  { %4697 = vadd.xlane.f32.xlu0 %v4696_v29  ;;  %4635 = vadd.xlane.f32.xlu2 %v4634_v50 }
 0xeac   :  { %4638 = vadd.xlane.f32.xlu1 %v4637_v1 }
 0xeb2   :  { %4632 = vadd.xlane.f32.xlu0 %v4631_v8  ;;  %4691 = vadd.xlane.f32.xlu2 %v4690_v48  ;;  %v4772_v48 = vld [vmem:[%s13442_s17 + $0x8] sm:$0xff] }
 0xeb4   :  { %4694 = vadd.xlane.f32.xlu1 %v4693_v32 }
 0xeba   :  { %4626 = vadd.xlane.f32.xlu0 %v4625_v47 }
 0xebc   :  { %4629 = vadd.xlane.f32.xlu1 %v4628_v49 }
 0xee7   :  { %v4701_v0 = vpop.xlane.xlu2 %4700 }
 0xeef   :  { %v4704_v46 = vpop.xlane.xlu1 %4703 }
 0xef5   :  { %v4642_v56 = vpop.xlane.xlu0 %4641 }
 0xefd   :  { %v4645_v21 = vpop.xlane.xlu2 %4644  ;;  %v4707_v3 = vpop.xlane.xlu0 %4706 }
 0xf05   :  { %v4648_v33 = vpop.xlane.xlu1 %4647  ;;  %v4710_v55 = vpop.xlane.xlu2 %4709 }
 0xf0d   :  { %v4651_v2 = vpop.xlane.xlu0 %4650  ;;  %v4713_v16 = vpop.xlane.xlu1 %4712 }
 0xf15   :  { %v4716_v22 = vpop.xlane.xlu0 %4715  ;;  %v4654_v44 = vpop.xlane.xlu2 %4653 }
 0xf16   :  { %4661 = vmatpush.msra.mxu0 %v4654_v44  ;;  %v8952_v44 = vld [vmem:[%s13480_s30 + $0x20] sm:$0xff] }
 0xf17   :  { %v4719_v23 = vpop.xlane.xlu1 %4718 }
 0xf18   :  { %4662 = vmatpush.msra.mxu0 %v4651_v2  ;;  %4726 = vmatpush.msrb.mxu2 %v4719_v23  ;;  %v8949_v2 = vld [vmem:[%s13480_s30 + $0x8] sm:$0xff] }
 0xf19   :  { %v8953_v23 = vld [vmem:[%s13480_s30 + $0x28] sm:$0xff] }
 0xf1a   :  { %4663 = vmatpush.msra.mxu0 %v4648_v33  ;;  %4727 = vmatpush.msrb.mxu2 %v4716_v22  ;;  %v8948_v33 = vld [vmem:[%s13480_s30] sm:$0xff]  ;;  %v8951_v22 = vld [vmem:[%s13480_s30 + $0x18] sm:$0xff] }
 0xf1c   :  { %4664 = vmatpush.msra.mxu0 %v4645_v21  ;;  %4728 = vmatpush.msrb.mxu2 %v4713_v16  ;;  %v4775_v21 = vld [vmem:[%s13443_s18] sm:$0xff]  ;;  %v8950_v16 = vld [vmem:[%s13480_s30 + $0x10] sm:$0xff] }
 0xf1d   :  { %v4698_v51 = vpop.xlane.xlu0 %4697  ;;  %v4636_v37 = vpop.xlane.xlu2 %4635 }
 0xf1e   :  { %4665 = vmatpush.msra.mxu0 %v4642_v56  ;;  %4729 = vmatpush.msrb.mxu2 %v4710_v55 }
 0xf1f   :  { %v4639_v53 = vpop.xlane.xlu1 %4638 }
 0xf20   :  { %4666 = vmatpush.msra.mxu0 %v4639_v53  ;;  %4730 = vmatpush.msrb.mxu2 %v4707_v3  ;;  %v8956_v53 = vld [vmem:[%s13480_s30 + $0x40] sm:$0xff] }
 0xf22   :  { %4667 = vmatpush.msra.mxu0 %v4636_v37  ;;  %4731 = vmatpush.msrb.mxu2 %v4704_v46  ;;  %v8955_v37 = vld [vmem:[%s13480_s30 + $0x38] sm:$0xff] }
 0xf24   :  { %4732 = vmatpush.msrb.mxu2 %v4701_v0  ;;  %v4776_v0 = vld [vmem:[%s13443_s18 + $0x8] sm:$0xff] }
 0xf25   :  { %v4633_v24 = vpop.xlane.xlu0 %4632  ;;  %v4692_v41 = vpop.xlane.xlu2 %4691 }
 0xf26   :  { %4668 = vmatpush.msra.mxu0 %v4633_v24  ;;  %4733 = vmatpush.msrb.mxu2 %v4698_v51  ;;  %v8954_v51 = vld [vmem:[%s13480_s30 + $0x30] sm:$0xff]  ;;  %v8957_v24 = vld [vmem:[%s13480_s30 + $0x48] sm:$0xff] }
 0xf27   :  { %v4695_v18 = vpop.xlane.xlu1 %4694 }
 0xf28   :  { %4734 = vmatpush.msrb.mxu2 %v4695_v18 }
 0xf2a   :  { %4735 = vmatpush.msrb.mxu2 %v4692_v41 }
 0xf2b   :  { %8415 = vmatmul.msk.f32.vlgmr.msrb.gmra.mxu2 %vm2496_vm8, %v8946_v15 }
 0xf2d   :  { %v4627_v38 = vpop.xlane.xlu0 %4626 }
 0xf2f   :  { %v4630_v62 = vpop.xlane.xlu1 %4629 }
 0xf30   :  { %4669 = vmatpush.msra.mxu0 %v4630_v62 }
 0xf32   :  { %4670 = vmatpush.msra.mxu0 %v4627_v38 }
 0xf33   :  { %8413 = vmatmul.msk.f32.vlgmr.msra.gmra.mxu0 %vm2496_vm8, %v8946_v15  ;;  %8416 = vmatmul.msk.f32.gmra.mxu2 %vm2496_vm8, %v8947_v45 }
 0xf3b   :  { %8414 = vmatmul.msk.f32.gmra.mxu0 %vm2496_vm8, %v8947_v45 }
 0xfae   :  { %v4737_v30 = vpop.f32.mrf.mxu2 }
 0xfaf   :  { %v4743_v54 = vmul.f32 0.02, %v4737_v30 }
 0xfb0   :  { %v4672_v4 = vpop.f32.mrf.mxu0 }
 0xfb1   :  { %v4678_v61 = vmul.f32 0.02, %v4672_v4 }
 0xfb3   :  { %v4745_v31 = vmul.f32 %v4678_v61, %v4678_v61 }
 0xfb5   :  { %v4747_v36 = vsub.f32 %v4743_v54, %v4745_v31 }
 0xfb6   :  { %v4740_v34 = vpop.f32.mrf.mxu2 }
 0xfb7   :  { %v4749_v14 = vadd.f32 1e-05, %v4747_v36  ;;  %v4744_v59 = vmul.f32 0.02, %v4740_v34 }
 0xfb8   :  { %v4675_v6 = vpop.f32.mrf.mxu0 }
 0xfb9   :  { %8942 = vrsqrt.f32 %v4749_v14  ;;  %v4679_v35 = vmul.f32 0.02, %v4675_v6  ;;  %vm4757_vm9 = vweird.f32 %v4749_v14 }
 0xfbb   :  { %v4746_v20 = vmul.f32 %v4679_v35, %v4679_v35 }
 0xfbd   :  { %v4748_v7 = vsub.f32 %v4744_v59, %v4746_v20 }
 0xfbf   :  { %v8943_v11 = vpop.eup %8942  ;;  %v4750_v42 = vadd.f32 1e-05, %v4748_v7 }
 0xfc0   :  { %v4752_v5 = vmul.f32 %v8943_v11, %v4749_v14  ;;  %vm4758_vm2 = vweird.f32 %v8943_v11 }
 0xfc1   :  { %8944 = vrsqrt.f32 %v4750_v42  ;;  %vm4759_vm10 = vmor %vm4757_vm9, %vm4758_vm2  ;;  %vm4767_vm12 = vweird.f32 %v4750_v42 }
 0xfc2   :  { %v4753_v19 = vmul.f32 %v8943_v11, %v4752_v5  ;;  %v6229_v5 = vld [vmem:[%s13444_s21 + $0x58] sm:$0xff] }
 0xfc4   :  { %v4754_v60 = vmul.f32 0.5, %v4753_v19  ;;  %v6226_v19 = vld [vmem:[%s13444_s21 + $0x40] sm:$0xff] }
 0xfc6   :  { %v4755_v25 = vsub.f32 1.5, %v4754_v60  ;;  %v6231_v60 = vld [vmem:[%s13444_s21 + $0x68] sm:$0xff] }
 0xfc7   :  { %v8945_v10 = vpop.eup %8944 }
 0xfc8   :  { %v4762_v13 = vmul.f32 %v8945_v10, %v4750_v42  ;;  %v4756_v29 = vmul.f32 %v8943_v11, %v4755_v25  ;;  %vm4768_vm11 = vweird.f32 %v8945_v10  ;;  %v6232_v42 = vld [vmem:[%s13444_s21 + $0x70] sm:$0x3]  ;;  %v6223_v25 = vld [vmem:[%s13444_s21 + $0x28] sm:$0xff] }
 0xfc9   :  { %vm4769_vm13 = vmor %vm4767_vm12, %vm4768_vm11 }
 0xfca   :  { %v4763_v9 = vmul.f32 %v8945_v10, %v4762_v13  ;;  %v4760_v63 = vsel %vm4759_vm10, %v8943_v11, %v4756_v29  ;;  %v6230_v13 = vld [vmem:[%s13444_s21 + $0x60] sm:$0xff]  ;;  %v6225_v29 = vld [vmem:[%s13444_s21 + $0x38] sm:$0xff] }
 0xfcb   :  { %v4773_v32 = vmul.f32 %v4771_v43, %v4760_v63  ;;  %v6222_v63 = vld [vmem:[%s13444_s21 + $0x20] sm:$0xff]  ;;  %v6224_v43 = vld [vmem:[%s13444_s21 + $0x30] sm:$0xff] }
 0xfcc   :  { %v4764_v50 = vmul.f32 0.5, %v4763_v9  ;;  %v6220_v9 = vld [vmem:[%s13444_s21 + $0x10] sm:$0xff] }
 0xfcd   :  { %v4777_v46 = vmul.f32 %v4773_v32, %v4678_v61 }
 0xfce   :  { %v4765_v1 = vsub.f32 1.5, %v4764_v50  ;;  %v6227_v50 = vld [vmem:[%s13444_s21 + $0x48] sm:$0xff] }
 0xfcf   :  { %v4779_v55 = vsub.f32 %v4775_v21, %v4777_v46  ;;  %v7548_v46 = vld [vmem:[%s13445_s24 + $0x20] sm:$0xff]  ;;  %v7546_v21 = vld [vmem:[%s13445_s24 + $0x10] sm:$0xff] }
 0xfd0   :  { %v4766_v8 = vmul.f32 %v8945_v10, %v4765_v1  ;;  %v7544_v1 = vld [vmem:[%s13445_s24] sm:$0xff] }
 0xfd2   :  { %v4770_v47 = vsel %vm4769_vm13, %v8945_v10, %v4766_v8  ;;  %v6228_v10 = vld [vmem:[%s13444_s21 + $0x50] sm:$0xff]  ;;  %v7547_v8 = vld [vmem:[%s13445_s24 + $0x18] sm:$0xff] }
 0xfd3   :  { %v4774_v49 = vmul.f32 %v4772_v48, %v4770_v47  ;;  %v6219_v48 = vld [vmem:[%s13444_s21 + $0x8] sm:$0xff]  ;;  %v7550_v47 = vld [vmem:[%s13445_s24 + $0x30] sm:$0xff] }
 0xfd5   :  { %4795 = vmatpush.msrb.mxu0 %v4774_v49  ;;  %v4778_v56 = vmul.f32 %v4774_v49, %v4679_v35  ;;  %v7545_v49 = vld [vmem:[%s13445_s24 + $0x8] sm:$0xff] }
 0xfd7   :  { %4796 = vmatpush.msrb.mxu0 %v4773_v32  ;;  %v4780_v3 = vsub.f32 %v4776_v0, %v4778_v56  ;;  %v6221_v32 = vld [vmem:[%s13444_s21 + $0x18] sm:$0xff]  ;;  %v6218_v0 = vld [vmem:[%s13444_s21] sm:$0xff]  ;;  %v7553_v56 = vld [vmem:[%s13445_s24 + $0x48] sm:$0x7] }
 0xfd8   :  { %8417 = vmatmul.msk.f32.vlgmr.msrb.gmra.mxu0 %vm2629_vm15, %v8948_v33 }
 0xfd9   :  { %4902 = vmatpush.msra.mxu2 %v4780_v3 }
 0xfdb   :  { %4903 = vmatpush.msra.mxu2 %v4779_v55  ;;  %v7551_v55 = vld [vmem:[%s13445_s24 + $0x38] sm:$0xff] }
 0xfdc   :  { %8427 = vmatmul.msk.f32.vlgmr.msra.gmra.mxu2 %vm2629_vm15, %v8948_v33  ;;  %v8483_v33 = vld [vmem:[%s13446_s20 + $0x18] sm:$0x3] }
 0xfdd   :  { %8484 = vmatpush.msk.msra.mxu0 %vm1736_vm5, %v8483_v33  ;;  %v5005_v33 = vld [vmem:[%s13447_s19 + $0x50] sm:$0xff] }
 0xfe0   :  { %8418 = vmatmul.msk.f32.gmra.mxu0 %vm2629_vm15, %v8949_v2 }
 0xfe4   :  { %8428 = vmatmul.msk.f32.gmra.mxu2 %vm2629_vm15, %v8949_v2  ;;  %v7549_v2 = vld [vmem:[%s13445_s24 + $0x28] sm:$0xff] }
 0xfe8   :  { %8419 = vmatmul.msk.f32.gmra.mxu0 %vm2629_vm15, %v8950_v16 }
 0xfec   :  { %8429 = vmatmul.msk.f32.gmra.mxu2 %vm2629_vm15, %v8950_v16 }
 0xff0   :  { %8420 = vmatmul.msk.f32.gmra.mxu0 %vm2629_vm15, %v8951_v22 }
 0xff4   :  { %8430 = vmatmul.msk.f32.gmra.mxu2 %vm2629_vm15, %v8951_v22  ;;  %v8482_v22 = vld [vmem:[%s13446_s20 + $0x10] sm:$0xff] }
 0xff5   :  { %5308 = vmatpush.msra.mxu0 %v8482_v22  ;;  %v5007_v22 = vld [vmem:[%s13447_s19 + $0x60] sm:$0xff] }
 0xff8   :  { %8421 = vmatmul.msk.f32.gmra.mxu0 %vm2629_vm15, %v8952_v44 }
 0xffc   :  { %8431 = vmatmul.msk.f32.gmra.mxu2 %vm2629_vm15, %v8952_v44  ;;  %v7552_v44 = vld [vmem:[%s13445_s24 + $0x40] sm:$0xff] }
0x1000   :  { %8422 = vmatmul.msk.f32.gmra.mxu0 %vm2629_vm15, %v8953_v23 }
0x1004   :  { %8432 = vmatmul.msk.f32.gmra.mxu2 %vm2629_vm15, %v8953_v23 }
0x1008   :  { %8423 = vmatmul.msk.f32.gmra.mxu0 %vm2629_vm15, %v8954_v51 }
0x100c   :  { %8433 = vmatmul.msk.f32.gmra.mxu2 %vm2629_vm15, %v8954_v51 }
0x1010   :  { %8424 = vmatmul.msk.f32.gmra.mxu0 %vm2629_vm15, %v8955_v37 }
0x1014   :  { %8434 = vmatmul.msk.f32.gmra.mxu2 %vm2629_vm15, %v8955_v37 }
0x1018   :  { %8425 = vmatmul.msk.f32.gmra.mxu0 %vm2629_vm15, %v8956_v53 }
0x101c   :  { %8435 = vmatmul.msk.f32.gmra.mxu2 %vm2629_vm15, %v8956_v53 }
0x1020   :  { %8426 = vmatmul.msk.f32.gmra.mxu0 %vm2629_vm15, %v8957_v24 }
0x1024   :  { %8436 = vmatmul.msk.f32.gmra.mxu2 %vm2629_vm15, %v8957_v24 }
0x1055   :  { %v4798_v18 = vpop.f32.mrf.mxu0 }
0x105d   :  { %v4801_v41 = vpop.f32.mrf.mxu0 }
0x105f   :  { %v4905_v15 = vpop.f32.mrf.mxu2 }
0x1065   :  { %v4804_v62 = vpop.f32.mrf.mxu0 }
0x1067   :  { %v4908_v38 = vpop.f32.mrf.mxu2 }
0x106d   :  { %v4807_v45 = vpop.f32.mrf.mxu0 }
0x106e   :  { %4845 = vperm.xlu1 %8936, %v4807_v45  }
0x106f   :  { %v4911_v30 = vpop.f32.mrf.mxu2 }
0x1075   :  { %v4810_v4 = vpop.f32.mrf.mxu0 }
0x1076   :  { %4850 = vperm.xlu2 %8937, %v4810_v4  }
0x1077   :  { %v4914_v61 = vpop.f32.mrf.mxu2 }
0x107d   :  { %v4813_v54 = vpop.f32.mrf.mxu0 }
0x107e   :  { %4855 = vperm.xlu0 %8935, %v4813_v54  }
0x107f   :  { %v4917_v31 = vpop.f32.mrf.mxu2 }
0x1085   :  { %v4816_v36 = vpop.f32.mrf.mxu0 }
0x1086   :  { %4860 = vperm.xlu1 %8936, %v4816_v36  }
0x1087   :  { %v4920_v34 = vpop.f32.mrf.mxu2 }
0x1088   :  { %4962 = vperm.xlu0 %8935, %v4920_v34  }
0x108d   :  { %v4819_v14 = vpop.f32.mrf.mxu0 }
0x108e   :  { %4865 = vperm.xlu2 %8937, %v4819_v14  }
0x108f   :  { %v4923_v6 = vpop.f32.mrf.mxu2 }
0x1090   :  { %4967 = vperm.xlu1 %8936, %v4923_v6  }
0x1095   :  { %v4822_v35 = vpop.f32.mrf.mxu0 }
0x1097   :  { %v4926_v59 = vpop.f32.mrf.mxu2 }
0x1098   :  { %4870 = vperm.xlu1 %8936, %v4822_v35   ;;  %4972 = vperm.xlu2 %8937, %v4926_v59  }
0x109d   :  { %v4825_v20 = vpop.f32.mrf.mxu0 }
0x109f   :  { %v4929_v7 = vpop.f32.mrf.mxu2 }
0x10a0   :  { %4952 = vperm.xlu1 %8936, %v4914_v61   ;;  %4875 = vperm.xlu2 %8937, %v4825_v20  }
0x10a1   :  { %4977 = vperm.xlu0 %8935, %v4929_v7  }
0x10a7   :  { %v4932_v11 = vpop.f32.mrf.mxu2 }
0x10a8   :  { %4830 = vperm.xlu1 %8936, %v4798_v18   ;;  %4957 = vperm.xlu2 %8937, %v4917_v31  }
0x10a9   :  { %4982 = vperm.xlu0 %8935, %v4932_v11  }
0x10b0   :  { %6305 = vperm.xlu1 %8936, %v6232_v42   ;;  %4835 = vperm.xlu2 %8937, %v4801_v41  }
0x10b1   :  { %4840 = vperm.xlu0 %8935, %v4804_v62  }
0x10b8   :  { %6290 = vperm.xlu1 %8936, %v6229_v5   ;;  %4942 = vperm.xlu2 %8937, %v4908_v38  }
0x10b9   :  { %4947 = vperm.xlu0 %8935, %v4911_v30  }
0x10c0   :  { %6275 = vperm.xlu1 %8936, %v6226_v19   ;;  %6300 = vperm.xlu2 %8937, %v6231_v60  }
0x10c1   :  { %4937 = vperm.xlu0 %8935, %v4905_v15  }
0x10c8   :  { %6260 = vperm.xlu1 %8936, %v6223_v25   ;;  %6285 = vperm.xlu2 %8937, %v6228_v10   ;;  %v4995_v10 = vld [vmem:[%s13447_s19] sm:$0xff] }
0x10c9   :  { %6295 = vperm.xlu0 %8935, %v6230_v13   ;;  %v8453_v13 = vld [vmem:[%s13447_s19 + $0x80] sm:$0xff] }
0x10d0   :  { %6245 = vperm.xlu1 %8936, %v6220_v9   ;;  %6270 = vperm.xlu2 %8937, %v6225_v29   ;;  %v4851_v3 = vpop.permute.xlu2 %4850  ;;  %v4997_v9 = vld [vmem:[%s13447_s19 + $0x10] sm:$0xff]  ;;  %v8454_v29 = vld [vmem:[%s13447_s19 + $0x88] sm:$0xff] }
0x10d1   :  { %6280 = vperm.xlu0 %8935, %v6227_v50   ;;  %v4998_v50 = vld [vmem:[%s13447_s19 + $0x18] sm:$0xff] }
0x10d8   :  { %7556 = vperm.xlu1 %8936, %v7544_v1   ;;  %6255 = vperm.xlu2 %8937, %v6222_v63   ;;  %v8455_v1 = vld [vmem:[%s13447_s19 + $0x90] sm:$0xff]  ;;  %v4999_v63 = vld [vmem:[%s13447_s19 + $0x20] sm:$0xff] }
0x10d9   :  { %6265 = vperm.xlu0 %8935, %v6224_v43   ;;  %v8456_v43 = vld [vmem:[%s13447_s19 + $0x98] sm:$0xff] }
0x10e0   :  { %7571 = vperm.xlu1 %8936, %v7547_v8   ;;  %6240 = vperm.xlu2 %8937, %v6219_v48   ;;  %v4846_v23 = vpop.permute.xlu1 %4845  ;;  %v5000_v8 = vld [vmem:[%s13447_s19 + $0x28] sm:$0xff]  ;;  %v8457_v48 = vld [vmem:[%s13447_s19 + $0xa0] sm:$0xff] }
0x10e1   :  { %6250 = vperm.xlu0 %8935, %v6221_v32   ;;  %v5001_v32 = vld [vmem:[%s13447_s19 + $0x30] sm:$0xff] }
0x10e8   :  { %7586 = vperm.xlu1 %8936, %v7550_v47   ;;  %7561 = vperm.xlu2 %8937, %v7545_v49   ;;  %v4866_v16 = vpop.permute.xlu2 %4865  ;;  %v8458_v47 = vld [vmem:[%s13447_s19 + $0xa8] sm:$0xff]  ;;  %v5002_v49 = vld [vmem:[%s13447_s19 + $0x38] sm:$0xff] }
0x10e9   :  { %6235 = vperm.xlu0 %8935, %v6218_v0   ;;  %v4885_v54 = vmul.f32 %v4866_v16, %v11765_v27  ;;  %v8459_v0 = vld [vmem:[%s13447_s19 + $0xb0] sm:$0xff] }
0x10ea   :  { %v8463_v16 = vld [vmem:[%s13447_s19 + $0xd0] sm:$0xff] }
0x10f0   :  { %7601 = vperm.xlu1 %8936, %v7553_v56   ;;  %7576 = vperm.xlu2 %8937, %v7548_v46   ;;  %v4856_v51 = vpop.permute.xlu0 %4855  ;;  %v5003_v56 = vld [vmem:[%s13447_s19 + $0x40] sm:$0xff]  ;;  %v8460_v46 = vld [vmem:[%s13447_s19 + $0xb8] sm:$0xff] }
0x10f1   :  { %7566 = vperm.xlu0 %8935, %v7546_v21   ;;  %v4883_v27 = vmul.f32 %v4856_v51, %v11750_v39  ;;  %v4881_v39 = vmul.f32 %v4846_v23, %v11738_v28  ;;  %v5004_v21 = vld [vmem:[%s13447_s19 + $0x48] sm:$0xff]  ;;  %v5117_v51 = vld [vmem:[%s13446_s20] sm:$0xff] }
0x10f2   :  { %v4973_v37 = vpop.permute.xlu2 %4972  ;;  %v5118_v23 = vld [vmem:[%s13446_s20 + $0x8] sm:$0x3] }
0x10f3   :  { %v11994_v36 = vadd.f32 %v4973_v37, %v4885_v54  ;;  %8500 = vmatpush.msk.msrb.mxu2 %vm1736_vm5, %v5118_v23  ;;  %v5008_v37 = vld [vmem:[%s13447_s19 + $0x68] sm:$0xff]  ;;  %v8566_v23 = vld [vmem:[%s13447_s19 + $0x178] sm:$0xff] }
0x10f4   :  { %v8519_v54 = vld [vmem:[%s13447_s19 + $0x108] sm:$0xff] }
0x10f5   :  { %5418 = vmatpush.msrb.mxu2 %v5117_v51 }
0x10f8   :  { %7591 = vperm.xlu2 %8937, %v7551_v55   ;;  %v4861_v53 = vpop.permute.xlu1 %4860  ;;  %v8462_v55 = vld [vmem:[%s13447_s19 + $0xc8] sm:$0xff] }
0x10f9   :  { %7581 = vperm.xlu0 %8935, %v7549_v2   ;;  %v4884_v34 = vmul.f32 %v4861_v53, %v11757_v40  ;;  %v4882_v40 = vmul.f32 %v4851_v3, %v11744_v26  ;;  %v8461_v3 = vld [vmem:[%s13447_s19 + $0xc0] sm:$0xff]  ;;  %v5006_v2 = vld [vmem:[%s13447_s19 + $0x58] sm:$0xff] }
0x10fa   :  { %v4963_v24 = vpop.permute.xlu0 %4962  ;;  %v4876_v18 = vpop.permute.xlu2 %4875  ;;  %v8465_v53 = vld [vmem:[%s13447_s19 + $0xe0] sm:$0xff] }
0x10fb   :  { %v4887_v45 = vmul.f32 %v4876_v18, %v11786_v52  ;;  %v12007_v6 = vadd.f32 %v4963_v24, %v4883_v27  ;;  %v5009_v24 = vld [vmem:[%s13447_s19 + $0x70] sm:$0x3]  ;;  %v8466_v18 = vld [vmem:[%s13447_s19 + $0xe8] sm:$0x3] }
0x1101   :  { %7596 = vperm.xlu0 %8935, %v7552_v44   ;;  %v8464_v44 = vld [vmem:[%s13447_s19 + $0xd8] sm:$0xff] }
0x1102   :  { %v4968_v41 = vpop.permute.xlu1 %4967  ;;  %v4958_v62 = vpop.permute.xlu2 %4957 }
0x1103   :  { %v12001_v52 = vadd.f32 %v4968_v41, %v4884_v34  ;;  %v4989_v59 = vadd.f32 %v4958_v62, %v4882_v40  ;;  %v8516_v41 = vld [vmem:[%s13447_s19 + $0xf0] sm:$0xff]  ;;  %v8517_v62 = vld [vmem:[%s13447_s19 + $0xf8] sm:$0xff] }
0x1104   :  { %v8520_v34 = vld [vmem:[%s13447_s19 + $0x110] sm:$0xff] }
0x110a   :  { %v4871_v38 = vpop.permute.xlu1 %4870 }
0x110b   :  { %v4886_v4 = vmul.f32 %v4871_v38, %v11773_v17  ;;  %v4836_v17 = vpop.permute.xlu2 %4835 }
0x110c   :  { %v4879_v28 = vmul.f32 %v4836_v17, %v11814_v57  ;;  %v8452_v57 = vld [vmem:[%s13447_s19 + $0x78] sm:$0xff] }
0x1112   :  { %v4953_v35 = vpop.permute.xlu1 %4952 }
0x1113   :  { %v4978_v15 = vpop.permute.xlu0 %4977  ;;  %v4988_v20 = vadd.f32 %v4953_v35, %v4881_v39  ;;  %v4943_v7 = vpop.permute.xlu2 %4942 }
0x1114   :  { %v11989_v31 = vadd.f32 %v4978_v15, %v4886_v4  ;;  %v4986_v5 = vadd.f32 %v4943_v7, %v4879_v28  ;;  %v8524_v7 = vld [vmem:[%s13447_s19 + $0x130] sm:$0xff] }
0x111a   :  { %v4831_v19 = vpop.permute.xlu1 %4830 }
0x111b   :  { %v4983_v30 = vpop.permute.xlu0 %4982  ;;  %v4878_v60 = vmul.f32 %v4831_v19, %v11808_v12  ;;  %v4996_v12 = vld [vmem:[%s13447_s19 + $0x8] sm:$0xff] }
0x111c   :  { %v11986_v61 = vadd.f32 %v4983_v30, %v4887_v45  ;;  %v8518_v30 = vld [vmem:[%s13447_s19 + $0x100] sm:$0xff] }
0x111e   :  { %5061 = vmatpush.msra.mxu1 %v11986_v61  ;;  %5186 = vmatpush.msrb.mxu3 %v11986_v61 }
0x111f   :  { %5783 = vmatpush.msrb.mxu0 %v11986_v61 }
0x1120   :  { %5062 = vmatpush.msra.mxu1 %v11989_v31  ;;  %5187 = vmatpush.msrb.mxu3 %v11989_v31 }
0x1121   :  { %5784 = vmatpush.msrb.mxu0 %v11989_v31 }
0x1122   :  { %5063 = vmatpush.msra.mxu1 %v11994_v36  ;;  %5188 = vmatpush.msrb.mxu3 %v11994_v36 }
0x1123   :  { %5785 = vmatpush.msrb.mxu0 %v11994_v36  ;;  %v4841_v14 = vpop.permute.xlu0 %4840 }
0x1124   :  { %5064 = vmatpush.msra.mxu1 %v12001_v52  ;;  %5189 = vmatpush.msrb.mxu3 %v12001_v52  ;;  %v4880_v26 = vmul.f32 %v4841_v14, %v11791_v58 }
0x1125   :  { %5786 = vmatpush.msrb.mxu0 %v12001_v52 }
0x1126   :  { %5065 = vmatpush.msra.mxu1 %v12007_v6  ;;  %5190 = vmatpush.msrb.mxu3 %v12007_v6 }
0x1127   :  { %5787 = vmatpush.msrb.mxu0 %v12007_v6 }
0x1128   :  { %5066 = vmatpush.msra.mxu1 %v4989_v59  ;;  %5191 = vmatpush.msrb.mxu3 %v4989_v59 }
0x1129   :  { %5788 = vmatpush.msrb.mxu0 %v4989_v59 }
0x112a   :  { %5067 = vmatpush.msra.mxu1 %v4988_v20  ;;  %5192 = vmatpush.msrb.mxu3 %v4988_v20 }
0x112b   :  { %5789 = vmatpush.msrb.mxu0 %v4988_v20  ;;  %v4948_v11 = vpop.permute.xlu0 %4947 }
0x112c   :  { %v4987_v42 = vadd.f32 %v4948_v11, %v4880_v26 }
0x112e   :  { %5068 = vmatpush.msra.mxu1 %v4987_v42  ;;  %5193 = vmatpush.msrb.mxu3 %v4987_v42 }
0x112f   :  { %5790 = vmatpush.msrb.mxu0 %v4987_v42 }
0x1130   :  { %5069 = vmatpush.msra.mxu1 %v4986_v5  ;;  %5194 = vmatpush.msrb.mxu3 %v4986_v5 }
0x1131   :  { %5791 = vmatpush.msrb.mxu0 %v4986_v5 }
0x1133   :  { %v4938_v25 = vpop.permute.xlu0 %4937 }
0x1134   :  { %v4985_v58 = vadd.f32 %v4938_v25, %v4878_v60  ;;  %v8526_v60 = vld [vmem:[%s13447_s19 + $0x140] sm:$0xff] }
0x1136   :  { %5070 = vmatpush.msra.mxu1 %v4985_v58  ;;  %5195 = vmatpush.msrb.mxu3 %v4985_v58 }
0x1137   :  { %5792 = vmatpush.msrb.mxu0 %v4985_v58  ;;  %8437 = vmatmul.msk.f32.vlgmr.msra.gmra.mxu1 %vm2496_vm8, %v4995_v10  ;;  %v8527_v10 = vld [vmem:[%s13447_s19 + $0x148] sm:$0xff] }
0x1138   :  { %8467 = vmatmul.msk.f32.vlgmr.msrb.gmra.mxu3 %vm2496_vm8, %v8452_v57  ;;  %5532 = vmatpush.msrb.mxu1 %v11986_v61  ;;  %v8547_v57 = vld [vmem:[%s13446_s20 + $0x28] sm:$0x3] }
0x1139   :  { %8548 = vmatpush.msk.msra.mxu3 %vm1736_vm5, %v8547_v57 }
0x113a   :  { %5533 = vmatpush.msrb.mxu1 %v11989_v31 }
0x113c   :  { %5534 = vmatpush.msrb.mxu1 %v11994_v36 }
0x113e   :  { %5535 = vmatpush.msrb.mxu1 %v12001_v52 }
0x113f   :  { %8438 = vmatmul.msk.f32.gmra.mxu1 %vm2496_vm8, %v4996_v12 }
0x1140   :  { %8468 = vmatmul.msk.f32.gmra.mxu3 %vm2496_vm8, %v8453_v13  ;;  %5536 = vmatpush.msrb.mxu1 %v12007_v6 }
0x1142   :  { %5537 = vmatpush.msrb.mxu1 %v4989_v59 }
0x1144   :  { %5538 = vmatpush.msrb.mxu1 %v4988_v20 }
0x1146   :  { %5539 = vmatpush.msrb.mxu1 %v4987_v42 }
0x1147   :  { %8439 = vmatmul.msk.f32.gmra.mxu1 %vm2496_vm8, %v4997_v9  ;;  %v8528_v9 = vld [vmem:[%s13447_s19 + $0x150] sm:$0xff] }
0x1148   :  { %8469 = vmatmul.msk.f32.gmra.mxu3 %vm2496_vm8, %v8454_v29  ;;  %5540 = vmatpush.msrb.mxu1 %v4986_v5  ;;  %v8546_v29 = vld [vmem:[%s13446_s20 + $0x20] sm:$0xff] }
0x1149   :  { %5654 = vmatpush.msra.mxu3 %v8546_v29  ;;  %v8594_v29 = vld [vmem:[%s13446_s20 + $0x30] sm:$0xff] }
0x114a   :  { %5541 = vmatpush.msrb.mxu1 %v4985_v58 }
0x114c   :  { %6034 = vmatpush.msra.mxu1 %v11986_v61 }
0x114e   :  { %6035 = vmatpush.msra.mxu1 %v11989_v31 }
0x114f   :  { %8440 = vmatmul.msk.f32.gmra.mxu1 %vm2496_vm8, %v4998_v50 }
0x1150   :  { %6036 = vmatpush.msra.mxu1 %v11994_v36  ;;  %8470 = vmatmul.msk.f32.gmra.mxu3 %vm2496_vm8, %v8455_v1 }
0x1152   :  { %6037 = vmatpush.msra.mxu1 %v12001_v52  ;;  %v8521_v52 = vld [vmem:[%s13447_s19 + $0x118] sm:$0xff] }
0x1154   :  { %6038 = vmatpush.msra.mxu1 %v12007_v6  ;;  %v8522_v6 = vld [vmem:[%s13447_s19 + $0x120] sm:$0xff] }
0x1156   :  { %6039 = vmatpush.msra.mxu1 %v4989_v59  ;;  %v8523_v59 = vld [vmem:[%s13447_s19 + $0x128] sm:$0xff] }
0x1157   :  { %8441 = vmatmul.msk.f32.gmra.mxu1 %vm2496_vm8, %v4999_v63  ;;  %v8529_v63 = vld [vmem:[%s13447_s19 + $0x158] sm:$0xff] }
0x1158   :  { %6040 = vmatpush.msra.mxu1 %v4988_v20  ;;  %8471 = vmatmul.msk.f32.gmra.mxu3 %vm2496_vm8, %v8456_v43 }
0x115a   :  { %6041 = vmatpush.msra.mxu1 %v4987_v42  ;;  %v8525_v42 = vld [vmem:[%s13447_s19 + $0x138] sm:$0xff] }
0x115c   :  { %6042 = vmatpush.msra.mxu1 %v4986_v5 }
0x115e   :  { %6043 = vmatpush.msra.mxu1 %v4985_v58 }
0x115f   :  { %8442 = vmatmul.msk.f32.gmra.mxu1 %vm2496_vm8, %v5000_v8 }
0x1160   :  { %8472 = vmatmul.msk.f32.gmra.mxu3 %vm2496_vm8, %v8457_v48  ;;  %v8530_v48 = vld [vmem:[%s13447_s19 + $0x160] sm:$0x3] }
0x1167   :  { %8443 = vmatmul.msk.f32.gmra.mxu1 %vm2496_vm8, %v5001_v32 }
0x1168   :  { %8473 = vmatmul.msk.f32.gmra.mxu3 %vm2496_vm8, %v8458_v47 }
0x116f   :  { %8444 = vmatmul.msk.f32.gmra.mxu1 %vm2496_vm8, %v5002_v49  ;;  %v8612_v49 = vld [vmem:[%s13447_s19 + $0x1e0] sm:$0xff] }
0x1170   :  { %8474 = vmatmul.msk.f32.gmra.mxu3 %vm2496_vm8, %v8459_v0 }
0x1177   :  { %8445 = vmatmul.msk.f32.gmra.mxu1 %vm2496_vm8, %v5003_v56 }
0x1178   :  { %8475 = vmatmul.msk.f32.gmra.mxu3 %vm2496_vm8, %v8460_v46  ;;  %v8613_v46 = vld [vmem:[%s13447_s19 + $0x1e8] sm:$0xff] }
0x117f   :  { %8446 = vmatmul.msk.f32.gmra.mxu1 %vm2496_vm8, %v5004_v21  ;;  %v8564_v21 = vld [vmem:[%s13447_s19 + $0x168] sm:$0xff] }
0x1180   :  { %8476 = vmatmul.msk.f32.gmra.mxu3 %vm2496_vm8, %v8461_v3 }
0x1187   :  { %8447 = vmatmul.msk.f32.gmra.mxu1 %vm2496_vm8, %v5005_v33  ;;  %v8614_v33 = vld [vmem:[%s13447_s19 + $0x1f0] sm:$0xff] }
0x1188   :  { %8477 = vmatmul.msk.f32.gmra.mxu3 %vm2496_vm8, %v8462_v55 }
0x118f   :  { %8448 = vmatmul.msk.f32.gmra.mxu1 %vm2496_vm8, %v5006_v2  ;;  %v8565_v2 = vld [vmem:[%s13447_s19 + $0x170] sm:$0xff] }
0x1190   :  { %8478 = vmatmul.msk.f32.gmra.mxu3 %vm2496_vm8, %v8463_v16 }
0x1197   :  { %8449 = vmatmul.msk.f32.gmra.mxu1 %vm2496_vm8, %v5007_v22  ;;  %v8615_v22 = vld [vmem:[%s13447_s19 + $0x1f8] sm:$0xff] }
0x1198   :  { %8479 = vmatmul.msk.f32.gmra.mxu3 %vm2496_vm8, %v8464_v44 }
0x119f   :  { %8450 = vmatmul.msk.f32.gmra.mxu1 %vm2496_vm8, %v5008_v37  ;;  %v8616_v37 = vld [vmem:[%s13447_s19 + $0x200] sm:$0xff] }
0x11a0   :  { %8480 = vmatmul.msk.f32.gmra.mxu3 %vm2496_vm8, %v8465_v53 }
0x11a7   :  { %8451 = vmatmul.msk.f32.gmra.mxu1 %vm2496_vm8, %v5009_v24  ;;  %v8567_v24 = vld [vmem:[%s13447_s19 + $0x180] sm:$0xff] }
0x11a8   :  { %8481 = vmatmul.msk.f32.gmra.mxu3 %vm2496_vm8, %v8466_v18 }
0x11af   :  { %8531 = vmatmul.msk.f32.vlgmr.msrb.gmra.mxu1 %vm2496_vm8, %v8516_v41  ;;  %v8617_v41 = vld [vmem:[%s13447_s19 + $0x208] sm:$0xff] }
0x11b4   :  { %v5072_v15 = vpop.f32.mrf.mxu1 }
0x11b5   :  { %8501 = vmatmul.msk.f32.vlgmr.msrb.gmra.mxu2 %vm2465_vm7, %v5072_v15 }
0x11b7   :  { %8532 = vmatmul.msk.f32.gmra.mxu1 %vm2496_vm8, %v8517_v62  ;;  %v8568_v62 = vld [vmem:[%s13447_s19 + $0x188] sm:$0xff] }
0x11bb   :  { %v5197_v38 = vpop.f32.mrf.mxu3 }
0x11bc   :  { %8485 = vmatmul.msk.f32.vlgmr.msra.gmra.mxu0 %vm2465_vm7, %v5197_v38  ;;  %v5075_v45 = vpop.f32.mrf.mxu1 }
0x11bd   :  { %8502 = vmatmul.msk.f32.gmra.mxu2 %vm2465_vm7, %v5075_v45  ;;  %v8618_v45 = vld [vmem:[%s13447_s19 + $0x210] sm:$0xff] }
0x11bf   :  { %8533 = vmatmul.msk.f32.gmra.mxu1 %vm2496_vm8, %v8518_v30 }
0x11c3   :  { %v5200_v4 = vpop.f32.mrf.mxu3 }
0x11c4   :  { %8486 = vmatmul.msk.f32.gmra.mxu0 %vm2465_vm7, %v5200_v4  ;;  %v5078_v61 = vpop.f32.mrf.mxu1  ;;  %v8569_v4 = vld [vmem:[%s13447_s19 + $0x190] sm:$0xff] }
0x11c5   :  { %8503 = vmatmul.msk.f32.gmra.mxu2 %vm2465_vm7, %v5078_v61 }
0x11c7   :  { %8534 = vmatmul.msk.f32.gmra.mxu1 %vm2496_vm8, %v8519_v54  ;;  %v8619_v54 = vld [vmem:[%s13447_s19 + $0x218] sm:$0xff] }
0x11cb   :  { %v5203_v31 = vpop.f32.mrf.mxu3 }
0x11cc   :  { %8487 = vmatmul.msk.f32.gmra.mxu0 %vm2465_vm7, %v5203_v31  ;;  %v5081_v36 = vpop.f32.mrf.mxu1 }
0x11cd   :  { %8504 = vmatmul.msk.f32.gmra.mxu2 %vm2465_vm7, %v5081_v36  ;;  %v8570_v36 = vld [vmem:[%s13447_s19 + $0x198] sm:$0xff] }
0x11cf   :  { %8535 = vmatmul.msk.f32.gmra.mxu1 %vm2496_vm8, %v8520_v34 }
0x11d3   :  { %v5206_v17 = vpop.f32.mrf.mxu3 }
0x11d4   :  { %8488 = vmatmul.msk.f32.gmra.mxu0 %vm2465_vm7, %v5206_v17  ;;  %v5084_v27 = vpop.f32.mrf.mxu1  ;;  %v8620_v17 = vld [vmem:[%s13447_s19 + $0x220] sm:$0xff] }
0x11d5   :  { %8505 = vmatmul.msk.f32.gmra.mxu2 %vm2465_vm7, %v5084_v27 }
0x11d7   :  { %8536 = vmatmul.msk.f32.gmra.mxu1 %vm2496_vm8, %v8521_v52  ;;  %v8571_v52 = vld [vmem:[%s13447_s19 + $0x1a0] sm:$0xff] }
0x11db   :  { %v5209_v14 = vpop.f32.mrf.mxu3 }
0x11dc   :  { %8489 = vmatmul.msk.f32.gmra.mxu0 %vm2465_vm7, %v5209_v14  ;;  %v5087_v40 = vpop.f32.mrf.mxu1 }
0x11dd   :  { %8506 = vmatmul.msk.f32.gmra.mxu2 %vm2465_vm7, %v5087_v40  ;;  %v8621_v40 = vld [vmem:[%s13447_s19 + $0x228] sm:$0xff] }
0x11df   :  { %8537 = vmatmul.msk.f32.gmra.mxu1 %vm2496_vm8, %v8522_v6 }
0x11e3   :  { %v5212_v35 = vpop.f32.mrf.mxu3 }
0x11e4   :  { %8490 = vmatmul.msk.f32.gmra.mxu0 %vm2465_vm7, %v5212_v35  ;;  %v5090_v39 = vpop.f32.mrf.mxu1  ;;  %v8572_v35 = vld [vmem:[%s13447_s19 + $0x1a8] sm:$0xff] }
0x11e5   :  { %8507 = vmatmul.msk.f32.gmra.mxu2 %vm2465_vm7, %v5090_v39 }
0x11e7   :  { %8538 = vmatmul.msk.f32.gmra.mxu1 %vm2496_vm8, %v8523_v59  ;;  %v8622_v59 = vld [vmem:[%s13447_s19 + $0x230] sm:$0xff] }
0x11eb   :  { %v5215_v20 = vpop.f32.mrf.mxu3 }
0x11ec   :  { %8491 = vmatmul.msk.f32.gmra.mxu0 %vm2465_vm7, %v5215_v20  ;;  %v5093_v26 = vpop.f32.mrf.mxu1 }
0x11ed   :  { %8508 = vmatmul.msk.f32.gmra.mxu2 %vm2465_vm7, %v5093_v26  ;;  %v8573_v26 = vld [vmem:[%s13447_s19 + $0x1b0] sm:$0xff] }
0x11ef   :  { %8539 = vmatmul.msk.f32.gmra.mxu1 %vm2496_vm8, %v8524_v7 }
0x11f3   :  { %v5218_v11 = vpop.f32.mrf.mxu3 }
0x11f4   :  { %8492 = vmatmul.msk.f32.gmra.mxu0 %vm2465_vm7, %v5218_v11  ;;  %v5096_v28 = vpop.f32.mrf.mxu1  ;;  %v8623_v11 = vld [vmem:[%s13447_s19 + $0x238] sm:$0xff] }
0x11f5   :  { %8509 = vmatmul.msk.f32.gmra.mxu2 %vm2465_vm7, %v5096_v28  ;;  %v8595_v28 = vld [vmem:[%s13446_s20 + $0x38] sm:$0x3] }
0x11f6   :  { %8596 = vmatpush.msk.msra.mxu2 %vm1736_vm5, %v8595_v28 }
0x11f7   :  { %8540 = vmatmul.msk.f32.gmra.mxu1 %vm2496_vm8, %v8525_v42 }
0x11f8   :  { %5905 = vmatpush.msra.mxu2 %v8594_v29 }
0x11fb   :  { %v5221_v5 = vpop.f32.mrf.mxu3 }
0x11fc   :  { %8493 = vmatmul.msk.f32.gmra.mxu0 %vm2465_vm7, %v5221_v5  ;;  %v5099_v19 = vpop.f32.mrf.mxu1  ;;  %v8574_v5 = vld [vmem:[%s13447_s19 + $0x1b8] sm:$0xff] }
0x11fd   :  { %8510 = vmatmul.msk.f32.gmra.mxu2 %vm2465_vm7, %v5099_v19  ;;  %v8643_v19 = vld [vmem:[%s13446_s20 + $0x48] sm:$0x3] }
0x11fe   :  { %8644 = vmatpush.msk.msrb.mxu3 %vm1736_vm5, %v8643_v19 }
0x11ff   :  { %8541 = vmatmul.msk.f32.gmra.mxu1 %vm2496_vm8, %v8526_v60 }
0x1203   :  { %v5224_v25 = vpop.f32.mrf.mxu3 }
0x1204   :  { %8494 = vmatmul.msk.f32.gmra.mxu0 %vm2465_vm7, %v5224_v25  ;;  %v5102_v58 = vpop.f32.mrf.mxu1  ;;  %v8624_v25 = vld [vmem:[%s13447_s19 + $0x240] sm:$0xff] }
0x1205   :  { %8511 = vmatmul.msk.f32.gmra.mxu2 %vm2465_vm7, %v5102_v58 }
0x1207   :  { %8542 = vmatmul.msk.f32.gmra.mxu1 %vm2496_vm8, %v8527_v10  ;;  %v8575_v10 = vld [vmem:[%s13447_s19 + $0x1c0] sm:$0xff] }
0x120b   :  { %v5227_v12 = vpop.f32.mrf.mxu3 }
0x120c   :  { %8495 = vmatmul.msk.f32.gmra.mxu0 %vm2465_vm7, %v5227_v12  ;;  %v5105_v13 = vpop.f32.mrf.mxu1  ;;  %v8625_v12 = vld [vmem:[%s13447_s19 + $0x248] sm:$0xff] }
0x120d   :  { %8512 = vmatmul.msk.f32.gmra.mxu2 %vm2465_vm7, %v5105_v13 }
0x120f   :  { %8543 = vmatmul.msk.f32.gmra.mxu1 %vm2496_vm8, %v8528_v9  ;;  %v8576_v9 = vld [vmem:[%s13447_s19 + $0x1c8] sm:$0xff] }
0x1213   :  { %v5230_v50 = vpop.f32.mrf.mxu3 }
0x1214   :  { %8496 = vmatmul.msk.f32.gmra.mxu0 %vm2465_vm7, %v5230_v50  ;;  %v5108_v1 = vpop.f32.mrf.mxu1  ;;  %v8642_v50 = vld [vmem:[%s13446_s20 + $0x40] sm:$0xff] }
0x1215   :  { %8513 = vmatmul.msk.f32.gmra.mxu2 %vm2465_vm7, %v5108_v1  ;;  %6156 = vmatpush.msrb.mxu3 %v8642_v50 }
0x1217   :  { %8544 = vmatmul.msk.f32.gmra.mxu1 %vm2496_vm8, %v8529_v63  ;;  %v8626_v63 = vld [vmem:[%s13447_s19 + $0x250] sm:$0x3] }
0x121b   :  { %v5233_v43 = vpop.f32.mrf.mxu3 }
0x121c   :  { %8497 = vmatmul.msk.f32.gmra.mxu0 %vm2465_vm7, %v5233_v43  ;;  %v5111_v8 = vpop.f32.mrf.mxu1 }
0x121d   :  { %8514 = vmatmul.msk.f32.gmra.mxu2 %vm2465_vm7, %v5111_v8  ;;  %v8577_v8 = vld [vmem:[%s13447_s19 + $0x1d0] sm:$0xff] }
0x121f   :  { %8545 = vmatmul.msk.f32.gmra.mxu1 %vm2496_vm8, %v8530_v48 }
0x1223   :  { %v5236_v32 = vpop.f32.mrf.mxu3 }
0x1224   :  { %8498 = vmatmul.msk.f32.gmra.mxu0 %vm2465_vm7, %v5236_v32  ;;  %v5114_v47 = vpop.f32.mrf.mxu1 }
0x1225   :  { %8515 = vmatmul.msk.f32.gmra.mxu2 %vm2465_vm7, %v5114_v47 }
0x1227   :  { %8627 = vmatmul.msk.f32.vlgmr.msra.gmra.mxu1 %vm2496_vm8, %v8612_v49  ;;  %v8578_v49 = vld [vmem:[%s13447_s19 + $0x1d8] sm:$0x3] }
0x122b   :  { %v5239_v0 = vpop.f32.mrf.mxu3 }
0x122c   :  { %8499 = vmatmul.msk.f32.gmra.mxu0 %vm2465_vm7, %v5239_v0  ;;  %v5543_v56 = vpop.f32.mrf.mxu1 }
0x122d   :  { %8549 = vmatmul.msk.f32.vlgmr.msra.gmra.mxu3 %vm2465_vm7, %v5543_v56 }
0x122f   :  { %8628 = vmatmul.msk.f32.gmra.mxu1 %vm2496_vm8, %v8613_v46 }
0x1234   :  { %8579 = vmatmul.msk.f32.vlgmr.msrb.gmra.mxu0 %vm2496_vm8, %v8564_v21  ;;  %v5546_v3 = vpop.f32.mrf.mxu1 }
0x1235   :  { %8550 = vmatmul.msk.f32.gmra.mxu3 %vm2465_vm7, %v5546_v3 }
0x1237   :  { %8629 = vmatmul.msk.f32.gmra.mxu1 %vm2496_vm8, %v8614_v33 }
0x1238   :  { %v12424_v32 = vpop.f32.mrf.mxu2 }
0x1239   :  { %v12271_v55 = vpop.f32.mrf.mxu0  ;;  %13484 = vst [vmem:[#allocation5_spill] sm:$0xff] %v12424_v32 }
0x123a   :  { %13481 = vst [vmem:[#allocation2_spill] sm:$0xff] %v12271_v55  ;;  %v6306_v55 = vpop.permute.xlu1 %6305 }
0x123c   :  { %8580 = vmatmul.msk.f32.gmra.mxu0 %vm2496_vm8, %v8565_v2  ;;  %v5549_v16 = vpop.f32.mrf.mxu1 }
0x123d   :  { %8551 = vmatmul.msk.f32.gmra.mxu3 %vm2465_vm7, %v5549_v16 }
0x123f   :  { %8630 = vmatmul.msk.f32.gmra.mxu1 %vm2496_vm8, %v8615_v22 }
0x1240   :  { %v12435_v46 = vpop.f32.mrf.mxu2 }
0x1241   :  { %v12282_v44 = vpop.f32.mrf.mxu0  ;;  %13485 = vst [vmem:[#allocation6_spill] sm:$0xff] %v12435_v46 }
0x1242   :  { %13482 = vst [vmem:[#allocation3_spill] sm:$0xff] %v12282_v44 }
0x1244   :  { %8581 = vmatmul.msk.f32.gmra.mxu0 %vm2496_vm8, %v8566_v23  ;;  %v5552_v51 = vpop.f32.mrf.mxu1 }
0x1245   :  { %8552 = vmatmul.msk.f32.gmra.mxu3 %vm2465_vm7, %v5552_v51 }
0x1247   :  { %8631 = vmatmul.msk.f32.gmra.mxu1 %vm2496_vm8, %v8616_v37 }
0x1248   :  { %v12441_v2 = vpop.f32.mrf.mxu2 }
0x1249   :  { %v12293_v53 = vpop.f32.mrf.mxu0  ;;  %13487 = vst [vmem:[#allocation8_spill] sm:$0xff] %v12441_v2 }
0x124a   :  { %13483 = vst [vmem:[#allocation4_spill] sm:$0xff] %v12293_v53 }
0x124c   :  { %8582 = vmatmul.msk.f32.gmra.mxu0 %vm2496_vm8, %v8567_v24  ;;  %v5555_v18 = vpop.f32.mrf.mxu1 }
0x124d   :  { %8553 = vmatmul.msk.f32.gmra.mxu3 %vm2465_vm7, %v5555_v18 }
0x124f   :  { %8632 = vmatmul.msk.f32.gmra.mxu1 %vm2496_vm8, %v8617_v41 }
0x1250   :  { %v12447_v37 = vpop.f32.mrf.mxu2 }
0x1251   :  { %v12304_v15 = vpop.f32.mrf.mxu0  ;;  %13489 = vst [vmem:[#allocation10_spill] sm:$0xff] %v12447_v37 }
0x1254   :  { %8583 = vmatmul.msk.f32.gmra.mxu0 %vm2496_vm8, %v8568_v62  ;;  %v5558_v38 = vpop.f32.mrf.mxu1 }
0x1255   :  { %8554 = vmatmul.msk.f32.gmra.mxu3 %vm2465_vm7, %v5558_v38 }
0x1257   :  { %8633 = vmatmul.msk.f32.gmra.mxu1 %vm2496_vm8, %v8618_v45 }
0x1258   :  { %v12454_v62 = vpop.f32.mrf.mxu2 }
0x1259   :  { %v12315_v30 = vpop.f32.mrf.mxu0 }
0x125c   :  { %8584 = vmatmul.msk.f32.gmra.mxu0 %vm2496_vm8, %v8569_v4  ;;  %v5561_v61 = vpop.f32.mrf.mxu1 }
0x125d   :  { %8555 = vmatmul.msk.f32.gmra.mxu3 %vm2465_vm7, %v5561_v61 }
0x125f   :  { %8634 = vmatmul.msk.f32.gmra.mxu1 %vm2496_vm8, %v8619_v54 }
0x1261   :  { %v12326_v31 = vpop.f32.mrf.mxu0 }
0x1264   :  { %8585 = vmatmul.msk.f32.gmra.mxu0 %vm2496_vm8, %v8570_v36  ;;  %v5564_v34 = vpop.f32.mrf.mxu1  ;;  %v12462_v36 = vpop.f32.mrf.mxu2 }
0x1265   :  { %8556 = vmatmul.msk.f32.gmra.mxu3 %vm2465_vm7, %v5564_v34 }
0x1267   :  { %8635 = vmatmul.msk.f32.gmra.mxu1 %vm2496_vm8, %v8620_v17 }
0x1269   :  { %v12337_v27 = vpop.f32.mrf.mxu0 }
0x126c   :  { %8586 = vmatmul.msk.f32.gmra.mxu0 %vm2496_vm8, %v8571_v52  ;;  %v5567_v14 = vpop.f32.mrf.mxu1 }
0x126d   :  { %8557 = vmatmul.msk.f32.gmra.mxu3 %vm2465_vm7, %v5567_v14  ;;  %v12469_v14 = vpop.f32.mrf.mxu2 }
0x126f   :  { %8636 = vmatmul.msk.f32.gmra.mxu1 %vm2496_vm8, %v8621_v40 }
0x1271   :  { %v12348_v6 = vpop.f32.mrf.mxu0 }
0x1274   :  { %8587 = vmatmul.msk.f32.gmra.mxu0 %vm2496_vm8, %v8572_v35  ;;  %v5570_v39 = vpop.f32.mrf.mxu1 }
0x1275   :  { %8558 = vmatmul.msk.f32.gmra.mxu3 %vm2465_vm7, %v5570_v39 }
0x1277   :  { %8637 = vmatmul.msk.f32.gmra.mxu1 %vm2496_vm8, %v8622_v59 }
0x1279   :  { %v12359_v20 = vpop.f32.mrf.mxu0 }
0x127c   :  { %8588 = vmatmul.msk.f32.gmra.mxu0 %vm2496_vm8, %v8573_v26  ;;  %v5573_v7 = vpop.f32.mrf.mxu1  ;;  %v12475_v26 = vpop.f32.mrf.mxu2 }
0x127d   :  { %8559 = vmatmul.msk.f32.gmra.mxu3 %vm2465_vm7, %v5573_v7 }
0x127f   :  { %8638 = vmatmul.msk.f32.gmra.mxu1 %vm2496_vm8, %v8623_v11 }
0x1281   :  { %v12374_v42 = vpop.f32.mrf.mxu0 }
0x1284   :  { %8589 = vmatmul.msk.f32.gmra.mxu0 %vm2496_vm8, %v8574_v5  ;;  %v5576_v60 = vpop.f32.mrf.mxu1  ;;  %v12482_v5 = vpop.f32.mrf.mxu2 }
0x1285   :  { %8560 = vmatmul.msk.f32.gmra.mxu3 %vm2465_vm7, %v5576_v60 }
0x1287   :  { %8639 = vmatmul.msk.f32.gmra.mxu1 %vm2496_vm8, %v8624_v25 }
0x1289   :  { %v12389_v58 = vpop.f32.mrf.mxu0 }
0x128c   :  { %8590 = vmatmul.msk.f32.gmra.mxu0 %vm2496_vm8, %v8575_v10  ;;  %v5579_v57 = vpop.f32.mrf.mxu1 }
0x128d   :  { %8561 = vmatmul.msk.f32.gmra.mxu3 %vm2465_vm7, %v5579_v57 }
0x128f   :  { %8640 = vmatmul.msk.f32.gmra.mxu1 %vm2496_vm8, %v8625_v12  ;;  %v12490_v12 = vpop.f32.mrf.mxu2 }
0x1291   :  { %v12400_v13 = vpop.f32.mrf.mxu0 }
0x1294   :  { %8591 = vmatmul.msk.f32.gmra.mxu0 %vm2496_vm8, %v8576_v9  ;;  %v5582_v1 = vpop.f32.mrf.mxu1 }
0x1295   :  { %8562 = vmatmul.msk.f32.gmra.mxu3 %vm2465_vm7, %v5582_v1 }
0x1297   :  { %8641 = vmatmul.msk.f32.gmra.mxu1 %vm2496_vm8, %v8626_v63  ;;  %v12497_v1 = vpop.f32.mrf.mxu2 }
0x1299   :  { %v12417_v43 = vpop.f32.mrf.mxu0 }
0x129c   :  { %8592 = vmatmul.msk.f32.gmra.mxu0 %vm2496_vm8, %v8577_v8  ;;  %v5585_v48 = vpop.f32.mrf.mxu1 }
0x129d   :  { %8563 = vmatmul.msk.f32.gmra.mxu3 %vm2465_vm7, %v5585_v48 }
0x12a1   :  { %v12426_v47 = vpop.f32.mrf.mxu0 }
0x12a4   :  { %8593 = vmatmul.msk.f32.gmra.mxu0 %vm2496_vm8, %v8578_v49  ;;  %v6045_v0 = vpop.f32.mrf.mxu1 }
0x12a5   :  { %8645 = vmatmul.msk.f32.vlgmr.msrb.gmra.mxu3 %vm2465_vm7, %v6045_v0  ;;  %v5453_v0 = vpop.f32.mrf.mxu2 }
0x12a9   :  { %v12433_v56 = vpop.f32.mrf.mxu0 }
0x12ac   :  { %v6048_v21 = vpop.f32.mrf.mxu1 }
0x12ad   :  { %8646 = vmatmul.msk.f32.gmra.mxu3 %vm2465_vm7, %v6048_v21 }
0x12b0   :  { %v12438_v3 = vpop.f32.mrf.mxu3 }
0x12b1   :  { %13486 = vst [vmem:[#allocation7_spill] sm:$0xff] %v12438_v3  ;;  %v5794_v33 = vpop.f32.mrf.mxu0  ;;  %v6433_v3 = vld [vmem:[%s13448_s23 + $0x28] sm:$0xff] }
0x12b2   :  { %8597 = vmatmul.msk.f32.vlgmr.msra.gmra.mxu2 %vm2465_vm7, %v5794_v33 }
0x12b4   :  { %v6051_v16 = vpop.f32.mrf.mxu1 }
0x12b5   :  { %8647 = vmatmul.msk.f32.gmra.mxu3 %vm2465_vm7, %v6051_v16 }
0x12b8   :  { %v12444_v22 = vpop.f32.mrf.mxu3 }
0x12b9   :  { %13488 = vst [vmem:[#allocation9_spill] sm:$0xff] %v12444_v22  ;;  %v5797_v23 = vpop.f32.mrf.mxu0  ;;  %v6429_v22 = vld [vmem:[%s13448_s23 + $0x8] sm:$0xff] }
0x12ba   :  { %8598 = vmatmul.msk.f32.gmra.mxu2 %vm2465_vm7, %v5797_v23  ;;  %v5456_v23 = vpop.f32.mrf.mxu2 }
0x12bb   :  { %v5457_v44 = vadd.f32 %v5456_v23, %v12417_v43  ;;  %v5448_v43 = vadd.f32 %v12490_v12, %v12374_v42 }
0x12bc   :  { %v6054_v51 = vpop.f32.mrf.mxu1 }
0x12bd   :  { %8648 = vmatmul.msk.f32.gmra.mxu3 %vm2465_vm7, %v6054_v51 }
0x12c0   :  { %v12450_v24 = vpop.f32.mrf.mxu3 }
0x12c1   :  { %13490 = vst [vmem:[#allocation11_spill] sm:$0xff] %v12450_v24  ;;  %v5800_v18 = vpop.f32.mrf.mxu0 }
0x12c2   :  { %8599 = vmatmul.msk.f32.gmra.mxu2 %vm2465_vm7, %v5800_v18 }
0x12c4   :  { %v6057_v41 = vpop.f32.mrf.mxu1 }
0x12c5   :  { %8649 = vmatmul.msk.f32.gmra.mxu3 %vm2465_vm7, %v6057_v41 }
0x12c8   :  { %v12456_v38 = vpop.f32.mrf.mxu3 }
0x12c9   :  { %13491 = vst [vmem:[#allocation12_spill] sm:$0xff] %v12456_v38  ;;  %v5803_v45 = vpop.f32.mrf.mxu0 }
0x12ca   :  { %8600 = vmatmul.msk.f32.gmra.mxu2 %vm2465_vm7, %v5803_v45 }
0x12cc   :  { %v6060_v4 = vpop.f32.mrf.mxu1 }
0x12cd   :  { %8650 = vmatmul.msk.f32.gmra.mxu3 %vm2465_vm7, %v6060_v4  ;;  %v5459_v4 = vpop.f32.mrf.mxu2 }
0x12d0   :  { %v12460_v61 = vpop.f32.mrf.mxu3 }
0x12d1   :  { %13492 = vst [vmem:[#allocation13_spill] sm:$0xff] %v12460_v61  ;;  %v5806_v54 = vpop.f32.mrf.mxu0 }
0x12d2   :  { %8601 = vmatmul.msk.f32.gmra.mxu2 %vm2465_vm7, %v5806_v54 }
0x12d4   :  { %v6063_v34 = vpop.f32.mrf.mxu1 }
0x12d5   :  { %8651 = vmatmul.msk.f32.gmra.mxu3 %vm2465_vm7, %v6063_v34  ;;  %v5462_v34 = vpop.f32.mrf.mxu2 }
0x12d6   :  { %v5463_v38 = vadd.f32 %v5462_v34, %v12433_v56  ;;  %v13507_v34 = vld [vmem:[#allocation10_spill] sm:$0xff] }
0x12d8   :  { %v12466_v17 = vpop.f32.mrf.mxu3 }
0x12d9   :  { %v5809_v52 = vpop.f32.mrf.mxu0 }
0x12da   :  { %8602 = vmatmul.msk.f32.gmra.mxu2 %vm2465_vm7, %v5809_v52 }
0x12dc   :  { %v6066_v40 = vpop.f32.mrf.mxu1 }
0x12dd   :  { %8652 = vmatmul.msk.f32.gmra.mxu3 %vm2465_vm7, %v6066_v40 }
0x12e0   :  { %v12472_v35 = vpop.f32.mrf.mxu3 }
0x12e1   :  { %v5812_v39 = vpop.f32.mrf.mxu0 }
0x12e2   :  { %8603 = vmatmul.msk.f32.gmra.mxu2 %vm2465_vm7, %v5812_v39 }
0x12e4   :  { %v6069_v59 = vpop.f32.mrf.mxu1 }
0x12e5   :  { %8653 = vmatmul.msk.f32.gmra.mxu3 %vm2465_vm7, %v6069_v59 }
0x12e8   :  { %v12478_v7 = vpop.f32.mrf.mxu3 }
0x12e9   :  { %v5815_v11 = vpop.f32.mrf.mxu0 }
0x12ea   :  { %8604 = vmatmul.msk.f32.gmra.mxu2 %vm2465_vm7, %v5815_v11 }
0x12ec   :  { %v6072_v28 = vpop.f32.mrf.mxu1 }
0x12ed   :  { %8654 = vmatmul.msk.f32.gmra.mxu3 %vm2465_vm7, %v6072_v28 }
0x12f0   :  { %v12484_v19 = vpop.f32.mrf.mxu3 }
0x12f1   :  { %v5818_v60 = vpop.f32.mrf.mxu0 }
0x12f2   :  { %8605 = vmatmul.msk.f32.gmra.mxu2 %vm2465_vm7, %v5818_v60 }
0x12f4   :  { %v6075_v25 = vpop.f32.mrf.mxu1 }
0x12f5   :  { %8655 = vmatmul.msk.f32.gmra.mxu3 %vm2465_vm7, %v6075_v25 }
0x12f8   :  { %v12488_v10 = vpop.f32.mrf.mxu3 }
0x12f9   :  { %v5821_v57 = vpop.f32.mrf.mxu0 }
0x12fa   :  { %8606 = vmatmul.msk.f32.gmra.mxu2 %vm2465_vm7, %v5821_v57 }
0x12fc   :  { %v6078_v9 = vpop.f32.mrf.mxu1 }
0x12fd   :  { %8656 = vmatmul.msk.f32.gmra.mxu3 %vm2465_vm7, %v6078_v9 }
0x1300   :  { %v12494_v29 = vpop.f32.mrf.mxu3 }
0x1301   :  { %v5824_v50 = vpop.f32.mrf.mxu0 }
0x1302   :  { %8607 = vmatmul.msk.f32.gmra.mxu2 %vm2465_vm7, %v5824_v50 }
0x1304   :  { %v6081_v63 = vpop.f32.mrf.mxu1 }
0x1305   :  { %8657 = vmatmul.msk.f32.gmra.mxu3 %vm2465_vm7, %v6081_v63 }
0x1308   :  { %v12500_v8 = vpop.f32.mrf.mxu3 }
0x1309   :  { %v5827_v48 = vpop.f32.mrf.mxu0 }
0x130a   :  { %8608 = vmatmul.msk.f32.gmra.mxu2 %vm2465_vm7, %v5827_v48 }
0x130c   :  { %v6084_v49 = vpop.f32.mrf.mxu1 }
0x130d   :  { %8658 = vmatmul.msk.f32.gmra.mxu3 %vm2465_vm7, %v6084_v49 }
0x1310   :  { %v5692_v21 = vpop.f32.mrf.mxu3 }
0x1311   :  { %v5830_v33 = vpop.f32.mrf.mxu0  ;;  %v5713_v2 = vadd.f32 %v5692_v21, %v5457_v44  ;;  %v5710_v21 = vadd.f32 %v12488_v10, %v5448_v43  ;;  %v13518_v43 = vld [vmem:[#allocation11_spill] sm:$0xff] }
0x1312   :  { %8609 = vmatmul.msk.f32.gmra.mxu2 %vm2465_vm7, %v5830_v33 }
0x1314   :  { %v6087_v16 = vpop.f32.mrf.mxu1 }
0x1315   :  { %8659 = vmatmul.msk.f32.gmra.mxu3 %vm2465_vm7, %v6087_v16 }
0x1318   :  { %v5695_v51 = vpop.f32.mrf.mxu3 }
0x1319   :  { %v5833_v18 = vpop.f32.mrf.mxu0 }
0x131a   :  { %8610 = vmatmul.msk.f32.gmra.mxu2 %vm2465_vm7, %v5833_v18 }
0x1320   :  { %v5698_v41 = vpop.f32.mrf.mxu3 }
0x1321   :  { %v5836_v45 = vpop.f32.mrf.mxu0  ;;  %v5715_v61 = vadd.f32 %v5698_v41, %v5463_v38 }
0x1322   :  { %8611 = vmatmul.msk.f32.gmra.mxu2 %vm2465_vm7, %v5836_v45 }
0x1328   :  { %v12508_v54 = vpop.f32.mrf.mxu3 }
0x1329   :  { %13493 = vst [vmem:[#allocation14_spill] sm:$0xff] %v12508_v54 }
0x1330   :  { %v12510_v52 = vpop.f32.mrf.mxu3 }
0x1331   :  { %13494 = vst [vmem:[#allocation15_spill] sm:$0xff] %v12510_v52 }
0x1335   :  { %v12512_v40 = vpop.f32.mrf.mxu2 }
0x1336   :  { %13495 = vst [vmem:[#allocation16_spill] sm:$0xff] %v12512_v40  ;;  %v6437_v40 = vld [vmem:[%s13448_s23 + $0x48] sm:$0x3f] }
0x1337   :  { %8735 = vmatpush.msk.msra.mxu3 %vm1557_vm3, %v6437_v40 }
0x1338   :  { %v12514_v39 = vpop.f32.mrf.mxu3 }
0x1339   :  { %13496 = vst [vmem:[#allocation17_spill] sm:$0xff] %v12514_v39 }
0x133d   :  { %v12516_v59 = vpop.f32.mrf.mxu2 }
0x133e   :  { %13497 = vst [vmem:[#allocation18_spill] sm:$0xff] %v12516_v59  ;;  %v6435_v59 = vld [vmem:[%s13448_s23 + $0x38] sm:$0xff] }
0x133f   :  { %6762 = vmatpush.msra.mxu3 %v6435_v59  ;;  %v5460_v59 = vadd.f32 %v5459_v4, %v12426_v47 }
0x1340   :  { %v12518_v11 = vpop.f32.mrf.mxu3 }
0x1341   :  { %13498 = vst [vmem:[#allocation19_spill] sm:$0xff] %v12518_v11  ;;  %6763 = vmatpush.msra.mxu3 %v6433_v3  ;;  %v5454_v3 = vadd.f32 %v5453_v0, %v12400_v13 }
0x1345   :  { %v12520_v28 = vpop.f32.mrf.mxu2 }
0x1346   :  { %13499 = vst [vmem:[#allocation20_spill] sm:$0xff] %v12520_v28  ;;  %v6431_v28 = vld [vmem:[%s13448_s23 + $0x18] sm:$0xff] }
0x1347   :  { %6764 = vmatpush.msra.mxu3 %v6431_v28 }
0x1348   :  { %v12522_v60 = vpop.f32.mrf.mxu3 }
0x1349   :  { %13500 = vst [vmem:[#allocation21_spill] sm:$0xff] %v12522_v60  ;;  %6765 = vmatpush.msra.mxu3 %v6429_v22 }
0x134d   :  { %v12524_v25 = vpop.f32.mrf.mxu2 }
0x134e   :  { %13501 = vst [vmem:[#allocation22_spill] sm:$0xff] %v12524_v25  ;;  %v6296_v25 = vpop.permute.xlu0 %6295 }
0x1350   :  { %v12526_v57 = vpop.f32.mrf.mxu3 }
0x1351   :  { %13502 = vst [vmem:[#allocation23_spill] sm:$0xff] %v12526_v57  ;;  %v6301_v57 = vpop.permute.xlu2 %6300 }
0x1355   :  { %v12528_v9 = vpop.f32.mrf.mxu2 }
0x1356   :  { %13503 = vst [vmem:[#allocation24_spill] sm:$0xff] %v12528_v9  ;;  %v6291_v9 = vpop.permute.xlu1 %6290  ;;  %v6281_v22 = vpop.permute.xlu0 %6280 }
0x1358   :  { %v12530_v50 = vpop.f32.mrf.mxu3 }
0x1359   :  { %13504 = vst [vmem:[#allocation25_spill] sm:$0xff] %v12530_v50  ;;  %v5714_v50 = vadd.f32 %v5695_v51, %v5460_v59  ;;  %v6286_v28 = vpop.permute.xlu2 %6285 }
0x135d   :  { %v12532_v63 = vpop.f32.mrf.mxu2 }
0x135e   :  { %13505 = vst [vmem:[#allocation26_spill] sm:$0xff] %v12532_v63  ;;  %v5712_v63 = vadd.f32 %v12500_v8, %v5454_v3  ;;  %v6276_v51 = vpop.permute.xlu1 %6275  ;;  %v13516_v3 = vld [vmem:[#allocation3_spill] sm:$0xff] }
0x1360   :  { %v12534_v48 = vpop.f32.mrf.mxu3 }
0x1361   :  { %13506 = vst [vmem:[#allocation27_spill] sm:$0xff] %v12534_v48  ;;  %v5451_v48 = vadd.f32 %v12497_v1, %v12389_v58  ;;  %v6271_v10 = vpop.permute.xlu2 %6270 }
0x1363   :  { %v5711_v13 = vadd.f32 %v12494_v29, %v5451_v48  ;;  %v13513_v48 = vld [vmem:[#allocation12_spill] sm:$0xff] }
0x1365   :  { %v12536_v49 = vpop.f32.mrf.mxu2 }
0x1366   :  { %v6261_v59 = vpop.permute.xlu1 %6260 }
0x1368   :  { %v12538_v33 = vpop.f32.mrf.mxu3 }
0x136d   :  { %v12540_v16 = vpop.f32.mrf.mxu2 }
0x1370   :  { %v12542_v18 = vpop.f32.mrf.mxu3 }
0x1375   :  { %v5931_v45 = vpop.f32.mrf.mxu2 }
0x1378   :  { %v6188_v52 = vpop.f32.mrf.mxu3 }
0x137d   :  { %v5934_v54 = vpop.f32.mrf.mxu2 }
0x1380   :  { %v6191_v11 = vpop.f32.mrf.mxu3 }
0x1385   :  { %v5937_v39 = vpop.f32.mrf.mxu2 }
0x1386   :  { %v5962_v58 = vadd.f32 %v5937_v39, %v5711_v13 }
0x1388   :  { %v6194_v40 = vpop.f32.mrf.mxu3 }
0x138d   :  { %v5940_v60 = vpop.f32.mrf.mxu2 }
0x138e   :  { %v5963_v0 = vadd.f32 %v5940_v60, %v5712_v63 }
0x1390   :  { %v6197_v24 = vpop.f32.mrf.mxu3  ;;  %v6214_v38 = vadd.f32 %v6191_v11, %v5963_v0  ;;  %v13510_v11 = vld [vmem:[#allocation27_spill] sm:$0xff] }
0x1391   :  { %v13520_v0 = vld [vmem:[#allocation23_spill] sm:$0xff] }
0x1392   :  { %v6319_v41 = vadd.f32 %v6291_v9, %v6214_v38  ;;  %v13511_v9 = vld [vmem:[#allocation4_spill] sm:$0xff] }
0x1395   :  { %v5943_v32 = vpop.f32.mrf.mxu2 }
0x1396   :  { %v5964_v37 = vadd.f32 %v5943_v32, %v5713_v2  ;;  %v5442_v32 = vadd.f32 %v12475_v26, %v12348_v6  ;;  %v5961_v2 = vadd.f32 %v5934_v54, %v5710_v21  ;;  %v5436_v6 = vadd.f32 %v12462_v36, %v12326_v31  ;;  %v6256_v21 = vpop.permute.xlu2 %6255 }
0x1398   :  { %v6200_v23 = vpop.f32.mrf.mxu3  ;;  %v6215_v1 = vadd.f32 %v6194_v40, %v5964_v37  ;;  %v5706_v31 = vadd.f32 %v12466_v17, %v5436_v6  ;;  %v13509_v17 = vld [vmem:[#allocation26_spill] sm:$0xff]  ;;  %v13528_v6 = vld [vmem:[#allocation19_spill] sm:$0xff] }
0x139a   :  { %v5957_v39 = vadd.f32 %v13509_v17, %v5706_v31  ;;  %v13532_v17 = vld [vmem:[#allocation14_spill] sm:$0xff] }
0x139d   :  { %v5946_v46 = vpop.f32.mrf.mxu2 }
0x139e   :  { %v5965_v53 = vadd.f32 %v5946_v46, %v5714_v50  ;;  %v5445_v46 = vadd.f32 %v12482_v5, %v12359_v20  ;;  %v5708_v20 = vadd.f32 %v12478_v7, %v5442_v32  ;;  %v6320_v5 = vadd.f32 %v6296_v25, %v6215_v1  ;;  %v13512_v50 = vld [vmem:[#allocation8_spill] sm:$0xff]  ;;  %v13522_v1 = vld [vmem:[#allocation5_spill] sm:$0xff] }
0x139f   :  { %v5427_v63 = vadd.f32 %v13512_v50, %v13511_v9  ;;  %v13523_v32 = vld [vmem:[#allocation9_spill] sm:$0xff] }
0x13a0   :  { %v6216_v56 = vadd.f32 %v6197_v24, %v5965_v53  ;;  %v5709_v42 = vadd.f32 %v12484_v19, %v5445_v46  ;;  %v5439_v53 = vadd.f32 %v12469_v14, %v12337_v27  ;;  %v5959_v19 = vadd.f32 %v12540_v16, %v5708_v20  ;;  %v6266_v27 = vpop.permute.xlu0 %6265  ;;  %v13515_v16 = vld [vmem:[#allocation25_spill] sm:$0xff] }
0x13a1   :  { %v5433_v14 = vadd.f32 %v12454_v62, %v12315_v30  ;;  %v12599_v54 = vmax.f32 %v6320_v5, 0.0  ;;  %v13508_v30 = vld [vmem:[#allocation13_spill] sm:$0xff]  ;;  %v13527_v5 = vld [vmem:[#allocation18_spill] sm:$0xff] }
0x13a2   :  { %v6321_v12 = vadd.f32 %v6301_v57, %v6216_v56  ;;  %v5960_v24 = vadd.f32 %v5931_v45, %v5709_v42  ;;  %v5707_v26 = vadd.f32 %v12472_v35, %v5439_v53  ;;  %v6210_v60 = vadd.f32 %v13510_v11, %v5959_v19 }
0x13a3   :  { %v5705_v62 = vadd.f32 %v13508_v30, %v5433_v14  ;;  %v12609_v57 = vmax.f32 %v6319_v41, 0.0  ;;  %v6208_v56 = vadd.f32 %v13520_v0, %v5957_v39  ;;  %v13529_v41 = vld [vmem:[#allocation16_spill] sm:$0xff]  ;;  %v13530_v14 = vld [vmem:[#allocation17_spill] sm:$0xff]  ;;  %v8674_v0 = vld [vmem:[%s13449_s22 + $0x68] sm:$0xff] }
0x13a4   :  { %v12586_v4 = vmax.f32 %v6321_v12, 0.0  ;;  %v5958_v36 = vadd.f32 %v12536_v49, %v5707_v26  ;;  %v6211_v35 = vadd.f32 %v12538_v33, %v5960_v24  ;;  %v13514_v49 = vld [vmem:[#allocation24_spill] sm:$0xff]  ;;  %v13525_v12 = vld [vmem:[#allocation21_spill] sm:$0xff]  ;;  %v13526_v24 = vld [vmem:[#allocation7_spill] sm:$0xff] }
0x13a5   :  { %v5949_v47 = vpop.f32.mrf.mxu2  ;;  %v5956_v33 = vadd.f32 %v13514_v49, %v5705_v62  ;;  %v6313_v19 = vadd.f32 %v6261_v59, %v6208_v56  ;;  %v6246_v62 = vpop.permute.xlu1 %6245  ;;  %v8698_v59 = vld [vmem:[%s13448_s23 + $0x80] sm:$0xff]  ;;  %v6341_v56 = vld [vmem:[%s13449_s22 + $0x18] sm:$0xff] }
0x13a6   :  { %v5966_v44 = vadd.f32 %v5949_v47, %v5715_v61  ;;  %v6213_v61 = vadd.f32 %v6188_v52, %v5962_v58  ;;  %v5430_v52 = vadd.f32 %v13507_v34, %v12304_v15  ;;  %v6316_v45 = vadd.f32 %v6276_v51, %v6211_v35  ;;  %v13521_v58 = vld [vmem:[#allocation2_spill] sm:$0xff] }
0x13a7   :  { %v5703_v47 = vadd.f32 %v13518_v43, %v5427_v63  ;;  %v12660_v30 = vmax.f32 %v6313_v19, 0.0  ;;  %v8672_v43 = vld [vmem:[%s13449_s22 + $0x58] sm:$0xff] }
0x13a8   :  { %v6217_v8 = vadd.f32 %v6200_v23, %v5966_v44  ;;  %v6318_v7 = vadd.f32 %v6286_v28, %v6213_v61  ;;  %v5704_v15 = vadd.f32 %v13513_v48, %v5430_v52  ;;  %v13517_v28 = vld [vmem:[#allocation6_spill] sm:$0xff]  ;;  %v6315_v44 = vadd.f32 %v6271_v10, %v6210_v60  ;;  %v6251_v20 = vpop.permute.xlu0 %6250  ;;  %v8680_v19 = vld [vmem:[%s13449_s22 + $0x98] sm:$0x7] }
0x13a9   :  { %v13519_v23 = vld [vmem:[#allocation22_spill] sm:$0xff]  ;;  %v12639_v53 = vmax.f32 %v6316_v45, 0.0  ;;  %v8700_v45 = vld [vmem:[%s13448_s23 + $0x90] sm:$0x3f] }
0x13aa   :  { %v6322_v29 = vadd.f32 %v6306_v55, %v6217_v8  ;;  %v6212_v55 = vadd.f32 %v12542_v18, %v5961_v2  ;;  %v6209_v18 = vadd.f32 %v13515_v16, %v5958_v36  ;;  %v12619_v40 = vmax.f32 %v6318_v7, 0.0  ;;  %v13524_v2 = vld [vmem:[#allocation20_spill] sm:$0xff]  ;;  %v13531_v7 = vld [vmem:[#allocation15_spill] sm:$0xff]  ;;  %v6338_v16 = vld [vmem:[%s13449_s22] sm:$0xff] }
0x13ab   :  { %v5955_v13 = vadd.f32 %v13519_v23, %v5704_v15  ;;  %v5421_v8 = vadd.f32 %v13522_v1, %v13521_v58  ;;  %v5954_v38 = vadd.f32 %v13524_v2, %v5703_v47  ;;  %v8692_v47 = vld [vmem:[%s13448_s23 + $0x50] sm:$0xff]  ;;  %v8673_v23 = vld [vmem:[%s13449_s22 + $0x60] sm:$0xff]  ;;  %v8676_v58 = vld [vmem:[%s13449_s22 + $0x78] sm:$0xff] }
0x13ac   :  { %v12579_v37 = vmax.f32 %v6322_v29, 0.0  ;;  %v6317_v25 = vadd.f32 %v6281_v22, %v6212_v55  ;;  %v5424_v22 = vadd.f32 %v13517_v28, %v13516_v3  ;;  %v6207_v29 = vadd.f32 %v13525_v12, %v5956_v33  ;;  %v8696_v3 = vld [vmem:[%s13448_s23 + $0x70] sm:$0xff]  ;;  %v8694_v28 = vld [vmem:[%s13448_s23 + $0x60] sm:$0xff]  ;;  %v6343_v1 = vld [vmem:[%s13449_s22 + $0x28] sm:$0xff] }
0x13ad   :  { %v6314_v51 = vadd.f32 %v6266_v27, %v6209_v18  ;;  %v5701_v61 = vadd.f32 %v13526_v24, %v5421_v8  ;;  %v6206_v26 = vadd.f32 %v13528_v6, %v5955_v13  ;;  %v12647_v55 = vmax.f32 %v6315_v44, 0.0  ;;  %v8671_v18 = vld [vmem:[%s13449_s22 + $0x50] sm:$0xff]  ;;  %v6436_v8 = vld [vmem:[%s13448_s23 + $0x40] sm:$0x3f]  ;;  %v8772_v24 = vld [vmem:[%s13448_s23 + $0xc8] sm:$0xff] }
0x13ae   :  { %8660 = vmatpush.msk.msra.mxu0 %vm1736_vm5, %v12579_v37  ;;  %8681 = vmatpush.msk.msrb.mxu2 %vm1736_vm5, %v12579_v37  ;;  %v12629_v46 = vmax.f32 %v6317_v25, 0.0  ;;  %v5702_v42 = vadd.f32 %v13523_v32, %v5424_v22  ;;  %v6205_v31 = vadd.f32 %v13530_v14, %v5954_v38  ;;  %v6312_v36 = vadd.f32 %v6256_v21, %v6207_v29  ;;  %v6241_v25 = vpop.permute.xlu2 %6240  ;;  %v6339_v22 = vld [vmem:[%s13449_s22 + $0x8] sm:$0xff]  ;;  %v6340_v13 = vld [vmem:[%s13449_s22 + $0x10] sm:$0xff]  ;;  %v6342_v21 = vld [vmem:[%s13449_s22 + $0x20] sm:$0xff] }
0x13af   :  { %8809 = vmatpush.msk.msrb.mxu3 %vm1736_vm5, %v12579_v37  ;;  %v5952_v27 = vadd.f32 %v13529_v41, %v5701_v61  ;;  %v12654_v35 = vmax.f32 %v6314_v51, 0.0  ;;  %v6311_v52 = vadd.f32 %v6251_v20, %v6206_v26  ;;  %v8675_v44 = vld [vmem:[%s13449_s22 + $0x70] sm:$0xff]  ;;  %8724 = vmatpush.msk.msrb.mxu1 %vm1557_vm3, %v6436_v8  ;;  %v8677_v38 = vld [vmem:[%s13449_s22 + $0x80] sm:$0xff]  ;;  %v8776_v51 = vld [vmem:[%s13448_s23 + $0xe8] sm:$0x3f] }
0x13b0   :  { %6383 = vmatpush.msra.mxu0 %v12586_v4  ;;  %6481 = vmatpush.msrb.mxu2 %v12586_v4  ;;  %v5953_v10 = vadd.f32 %v13527_v5, %v5702_v42  ;;  %v6310_v11 = vadd.f32 %v6246_v62, %v6205_v31  ;;  %v12666_v60 = vmax.f32 %v6312_v36, 0.0  ;;  %v6236_v63 = vpop.permute.xlu0 %6235  ;;  %v6434_v32 = vld [vmem:[%s13448_s23 + $0x30] sm:$0xff]  ;;  %v6432_v42 = vld [vmem:[%s13448_s23 + $0x20] sm:$0xff]  ;;  %v8774_v20 = vld [vmem:[%s13448_s23 + $0xd8] sm:$0xff] }
0x13b1   :  { %7089 = vmatpush.msrb.mxu3 %v12586_v4  ;;  %v6203_v39 = vadd.f32 %v13532_v17, %v5952_v27  ;;  %v12671_v50 = vmax.f32 %v6311_v52, 0.0  ;;  %6715 = vmatpush.msrb.mxu1 %v6434_v32  ;;  %v6430_v2 = vld [vmem:[%s13448_s23 + $0x10] sm:$0xff]  ;;  %v6428_v29 = vld [vmem:[%s13448_s23] sm:$0xff]  ;;  %v8678_v61 = vld [vmem:[%s13449_s22 + $0x88] sm:$0xff] }
0x13b2   :  { %6384 = vmatpush.msra.mxu0 %v12599_v54  ;;  %6482 = vmatpush.msrb.mxu2 %v12599_v54  ;;  %v6204_v34 = vadd.f32 %v13531_v7, %v5953_v10  ;;  %v12676_v15 = vmax.f32 %v6310_v11, 0.0  ;;  %v6344_v12 = vld [vmem:[%s13449_s22 + $0x30] sm:$0xff]  ;;  %v6345_v5 = vld [vmem:[%s13449_s22 + $0x38] sm:$0xff]  ;;  %v6346_v26 = vld [vmem:[%s13449_s22 + $0x40] sm:$0xff] }
0x13b3   :  { %7090 = vmatpush.msrb.mxu3 %v12599_v54  ;;  %v6308_v48 = vadd.f32 %v6236_v63, %v6203_v39  ;;  %6716 = vmatpush.msrb.mxu1 %v6432_v42  ;;  %v8770_v10 = vld [vmem:[%s13448_s23 + $0xb8] sm:$0xff]  ;;  %v8679_v6 = vld [vmem:[%s13449_s22 + $0x90] sm:$0xff]  ;;  %v6347_v41 = vld [vmem:[%s13449_s22 + $0x48] sm:$0x7] }
0x13b4   :  { %6385 = vmatpush.msra.mxu0 %v12609_v57  ;;  %6483 = vmatpush.msrb.mxu2 %v12609_v57  ;;  %v6309_v9 = vadd.f32 %v6241_v25, %v6204_v34  ;;  %v8768_v27 = vld [vmem:[%s13448_s23 + $0xa8] sm:$0xff]  ;;  %v8701_v14 = vld [vmem:[%s13448_s23 + $0x98] sm:$0x3f]  ;;  %v8807_v8 = vld [vmem:[%s13449_s22 + $0x130] sm:$0xff] }
0x13b5   :  { %7091 = vmatpush.msrb.mxu3 %v12609_v57  ;;  %v12686_v33 = vmax.f32 %v6308_v48, 0.0  ;;  %6717 = vmatpush.msrb.mxu1 %v6430_v2  ;;  %v8699_v31 = vld [vmem:[%s13448_s23 + $0x88] sm:$0xff]  ;;  %v8697_v36 = vld [vmem:[%s13448_s23 + $0x78] sm:$0xff]  ;;  %v8799_v48 = vld [vmem:[%s13449_s22 + $0xf0] sm:$0xff] }
0x13b6   :  { %6386 = vmatpush.msra.mxu0 %v12619_v40  ;;  %6484 = vmatpush.msrb.mxu2 %v12619_v40  ;;  %v12681_v49 = vmax.f32 %v6309_v9, 0.0  ;;  %v8695_v7 = vld [vmem:[%s13448_s23 + $0x68] sm:$0xff]  ;;  %v8693_v34 = vld [vmem:[%s13448_s23 + $0x58] sm:$0xff]  ;;  %v8754_v2 = vld [vmem:[%s13449_s22 + $0xe0] sm:$0xff] }
0x13b7   :  { %7092 = vmatpush.msrb.mxu3 %v12619_v40  ;;  %6718 = vmatpush.msrb.mxu1 %v6428_v29 }
0x13b8   :  { %6387 = vmatpush.msra.mxu0 %v12629_v46  ;;  %6485 = vmatpush.msrb.mxu2 %v12629_v46 }
0x13b9   :  { %7093 = vmatpush.msrb.mxu3 %v12629_v46  ;;  %8788 = vmatpush.msk.msra.mxu1 %vm1557_vm3, %v8776_v51 }
0x13ba   :  { %6388 = vmatpush.msra.mxu0 %v12639_v53  ;;  %6486 = vmatpush.msrb.mxu2 %v12639_v53 }
0x13bb   :  { %7094 = vmatpush.msrb.mxu3 %v12639_v53  ;;  %6991 = vmatpush.msra.mxu1 %v8774_v20  ;;  %v8755_v20 = vld [vmem:[%s13449_s22 + $0xe8] sm:$0x7] }
0x13bc   :  { %6389 = vmatpush.msra.mxu0 %v12647_v55  ;;  %6487 = vmatpush.msrb.mxu2 %v12647_v55 }
0x13bd   :  { %7095 = vmatpush.msrb.mxu3 %v12647_v55  ;;  %6992 = vmatpush.msra.mxu1 %v8772_v24 }
0x13be   :  { %6390 = vmatpush.msra.mxu0 %v12654_v35  ;;  %6488 = vmatpush.msrb.mxu2 %v12654_v35 }
0x13bf   :  { %7096 = vmatpush.msrb.mxu3 %v12654_v35  ;;  %6993 = vmatpush.msra.mxu1 %v8770_v10 }
0x13c0   :  { %6391 = vmatpush.msra.mxu0 %v12660_v30  ;;  %6489 = vmatpush.msrb.mxu2 %v12660_v30 }
0x13c1   :  { %7097 = vmatpush.msrb.mxu3 %v12660_v30  ;;  %6994 = vmatpush.msra.mxu1 %v8768_v27  ;;  %v8773_v27 = vld [vmem:[%s13448_s23 + $0xd0] sm:$0xff] }
0x13c2   :  { %6392 = vmatpush.msra.mxu0 %v12666_v60  ;;  %6490 = vmatpush.msrb.mxu2 %v12666_v60 }
0x13c3   :  { %7098 = vmatpush.msrb.mxu3 %v12666_v60 }
0x13c4   :  { %6393 = vmatpush.msra.mxu0 %v12671_v50  ;;  %6491 = vmatpush.msrb.mxu2 %v12671_v50 }
0x13c5   :  { %7099 = vmatpush.msrb.mxu3 %v12671_v50 }
0x13c6   :  { %6394 = vmatpush.msra.mxu0 %v12676_v15  ;;  %6492 = vmatpush.msrb.mxu2 %v12676_v15 }
0x13c7   :  { %7100 = vmatpush.msrb.mxu3 %v12676_v15 }
0x13c8   :  { %6395 = vmatpush.msra.mxu0 %v12681_v49  ;;  %6493 = vmatpush.msrb.mxu2 %v12681_v49 }
0x13c9   :  { %7101 = vmatpush.msrb.mxu3 %v12681_v49 }
0x13ca   :  { %6396 = vmatpush.msra.mxu0 %v12686_v33  ;;  %6494 = vmatpush.msrb.mxu2 %v12686_v33 }
0x13cb   :  { %7102 = vmatpush.msrb.mxu3 %v12686_v33  ;;  %8661 = vmatmul.msk.f32.vlgmr.msra.gmra.mxu0 %vm1705_vm6, %v6338_v16  ;;  %v8801_v16 = vld [vmem:[%s13449_s22 + $0x100] sm:$0xff] }
0x13cc   :  { %8682 = vmatmul.msk.f32.vlgmr.msrb.gmra.mxu2 %vm1705_vm6, %v8671_v18  ;;  %8702 = vmatpush.msk.msrb.mxu0 %vm1557_vm3, %v8700_v45  ;;  %v8748_v18 = vld [vmem:[%s13449_s22 + $0xb0] sm:$0xff]  ;;  %v8802_v45 = vld [vmem:[%s13449_s22 + $0x108] sm:$0xff] }
0x13cd   :  { %8713 = vmatpush.msk.msra.mxu2 %vm1557_vm3, %v8701_v14  ;;  %v8771_v14 = vld [vmem:[%s13448_s23 + $0xc0] sm:$0xff] }
0x13ce   :  { %6585 = vmatpush.msrb.mxu0 %v8698_v59  ;;  %v8749_v59 = vld [vmem:[%s13449_s22 + $0xb8] sm:$0xff] }
0x13cf   :  { %6632 = vmatpush.msra.mxu2 %v8699_v31  ;;  %v8769_v31 = vld [vmem:[%s13448_s23 + $0xb0] sm:$0xff] }
0x13d0   :  { %6586 = vmatpush.msrb.mxu0 %v8696_v3  ;;  %v8803_v3 = vld [vmem:[%s13449_s22 + $0x110] sm:$0xff] }
0x13d1   :  { %6633 = vmatpush.msra.mxu2 %v8697_v36 }
0x13d2   :  { %6587 = vmatpush.msrb.mxu0 %v8694_v28  ;;  %v8750_v28 = vld [vmem:[%s13449_s22 + $0xc0] sm:$0xff] }
0x13d3   :  { %8662 = vmatmul.msk.f32.gmra.mxu0 %vm1705_vm6, %v6339_v22  ;;  %6634 = vmatpush.msra.mxu2 %v8695_v7  ;;  %v8804_v22 = vld [vmem:[%s13449_s22 + $0x118] sm:$0xff] }
0x13d4   :  { %8683 = vmatmul.msk.f32.gmra.mxu2 %vm1705_vm6, %v8672_v43  ;;  %6588 = vmatpush.msrb.mxu0 %v8692_v47  ;;  %v8751_v43 = vld [vmem:[%s13449_s22 + $0xc8] sm:$0xff]  ;;  %v8805_v47 = vld [vmem:[%s13449_s22 + $0x120] sm:$0xff] }
0x13d5   :  { %6635 = vmatpush.msra.mxu2 %v8693_v34 }
0x13d6   :  { %8756 = vmatpush.msk.msra.mxu0 %vm1736_vm5, %v12579_v37 }
0x13d8   :  { %6840 = vmatpush.msra.mxu0 %v12586_v4 }
0x13da   :  { %6841 = vmatpush.msra.mxu0 %v12599_v54 }
0x13db   :  { %8663 = vmatmul.msk.f32.gmra.mxu0 %vm1705_vm6, %v6340_v13 }
0x13dc   :  { %6842 = vmatpush.msra.mxu0 %v12609_v57  ;;  %8684 = vmatmul.msk.f32.gmra.mxu2 %vm1705_vm6, %v8673_v23 }
0x13de   :  { %6843 = vmatpush.msra.mxu0 %v12619_v40 }
0x13e0   :  { %6844 = vmatpush.msra.mxu0 %v12629_v46 }
0x13e2   :  { %6845 = vmatpush.msra.mxu0 %v12639_v53 }
0x13e3   :  { %8664 = vmatmul.msk.f32.gmra.mxu0 %vm1705_vm6, %v6341_v56  ;;  %v8806_v56 = vld [vmem:[%s13449_s22 + $0x128] sm:$0xff] }
0x13e4   :  { %6846 = vmatpush.msra.mxu0 %v12647_v55  ;;  %8685 = vmatmul.msk.f32.gmra.mxu2 %vm1705_vm6, %v8674_v0  ;;  %v8752_v0 = vld [vmem:[%s13449_s22 + $0xd0] sm:$0xff] }
0x13e6   :  { %6847 = vmatpush.msra.mxu0 %v12654_v35 }
0x13e8   :  { %6848 = vmatpush.msra.mxu0 %v12660_v30 }
0x13ea   :  { %6849 = vmatpush.msra.mxu0 %v12666_v60 }
0x13eb   :  { %8665 = vmatmul.msk.f32.gmra.mxu0 %vm1705_vm6, %v6342_v21 }
0x13ec   :  { %6850 = vmatpush.msra.mxu0 %v12671_v50  ;;  %8686 = vmatmul.msk.f32.gmra.mxu2 %vm1705_vm6, %v8675_v44 }
0x13ee   :  { %6851 = vmatpush.msra.mxu0 %v12676_v15 }
0x13f0   :  { %6852 = vmatpush.msra.mxu0 %v12681_v49 }
0x13f2   :  { %6853 = vmatpush.msra.mxu0 %v12686_v33 }
0x13f3   :  { %8666 = vmatmul.msk.f32.gmra.mxu0 %vm1705_vm6, %v6343_v1  ;;  %v8753_v1 = vld [vmem:[%s13449_s22 + $0xd8] sm:$0xff] }
0x13f4   :  { %8687 = vmatmul.msk.f32.gmra.mxu2 %vm1705_vm6, %v8676_v58 }
0x13fb   :  { %8667 = vmatmul.msk.f32.gmra.mxu0 %vm1705_vm6, %v6344_v12  ;;  %v8808_v12 = vld [vmem:[%s13449_s22 + $0x138] sm:$0x7] }
0x13fc   :  { %8688 = vmatmul.msk.f32.gmra.mxu2 %vm1705_vm6, %v8677_v38 }
0x1403   :  { %8668 = vmatmul.msk.f32.gmra.mxu0 %vm1705_vm6, %v6345_v5 }
0x1404   :  { %8689 = vmatmul.msk.f32.gmra.mxu2 %vm1705_vm6, %v8678_v61 }
0x140b   :  { %8669 = vmatmul.msk.f32.gmra.mxu0 %vm1705_vm6, %v6346_v26 }
0x140c   :  { %8690 = vmatmul.msk.f32.gmra.mxu2 %vm1705_vm6, %v8679_v6 }
0x1413   :  { %8670 = vmatmul.msk.f32.gmra.mxu0 %vm1705_vm6, %v6347_v41  ;;  %v8775_v41 = vld [vmem:[%s13448_s23 + $0xe0] sm:$0x3f] }
0x1414   :  { %8691 = vmatmul.msk.f32.gmra.mxu2 %vm1705_vm6, %v8680_v19 }
0x1415   :  { %8777 = vmatpush.msk.msrb.mxu2 %vm1557_vm3, %v8775_v41 }
0x1417   :  { %6944 = vmatpush.msrb.mxu2 %v8773_v27 }
0x1419   :  { %6945 = vmatpush.msrb.mxu2 %v8771_v14 }
0x141b   :  { %6946 = vmatpush.msrb.mxu2 %v8769_v31 }
0x1448   :  { %v6398_v52 = vpop.f32.mrf.mxu0 }
0x1449   :  { %8725 = vmatmul.msk.f32.vlgmr.msrb.gmra.mxu1 %vm1511_vm4, %v6398_v52  ;;  %8736 = vmatmul.msk.f32.vlgmr.msra.gmra.mxu3 %vm1511_vm4, %v6398_v52  ;;  %v8767_v52 = vld [vmem:[%s13448_s23 + $0xa0] sm:$0xff] }
0x144a   :  { %8862 = vmatpush.msk.msrb.mxu1 %vm1736_vm5, %v12579_v37  ;;  %6947 = vmatpush.msrb.mxu2 %v8767_v52 }
0x144c   :  { %7338 = vmatpush.msrb.mxu1 %v12586_v4 }
0x144e   :  { %7339 = vmatpush.msrb.mxu1 %v12599_v54 }
0x144f   :  { %v6496_v62 = vpop.f32.mrf.mxu2 }
0x1450   :  { %8703 = vmatmul.msk.f32.vlgmr.msrb.gmra.mxu0 %vm1511_vm4, %v6496_v62  ;;  %7340 = vmatpush.msrb.mxu1 %v12609_v57  ;;  %v6401_v17 = vpop.f32.mrf.mxu0 }
0x1451   :  { %8737 = vmatmul.msk.f32.gmra.mxu3 %vm1511_vm4, %v6401_v17  ;;  %8714 = vmatmul.msk.f32.vlgmr.msra.gmra.mxu2 %vm1511_vm4, %v6496_v62  ;;  %v8828_v62 = vld [vmem:[%s13448_s23 + $0x130] sm:$0x3f] }
0x1452   :  { %7341 = vmatpush.msrb.mxu1 %v12619_v40  ;;  %8830 = vmatpush.msk.msrb.mxu0 %vm1557_vm3, %v8828_v62 }
0x1453   :  { %8726 = vmatmul.msk.f32.gmra.mxu1 %vm1511_vm4, %v6401_v17  ;;  %v8826_v17 = vld [vmem:[%s13448_s23 + $0x120] sm:$0xff] }
0x1454   :  { %7342 = vmatpush.msrb.mxu1 %v12629_v46  ;;  %7193 = vmatpush.msrb.mxu0 %v8826_v17 }
0x1456   :  { %7343 = vmatpush.msrb.mxu1 %v12639_v53 }
0x1457   :  { %v6499_v37 = vpop.f32.mrf.mxu2 }
0x1458   :  { %8704 = vmatmul.msk.f32.gmra.mxu0 %vm1511_vm4, %v6499_v37  ;;  %7344 = vmatpush.msrb.mxu1 %v12647_v55  ;;  %v6404_v4 = vpop.f32.mrf.mxu0 }
0x1459   :  { %8715 = vmatmul.msk.f32.gmra.mxu2 %vm1511_vm4, %v6499_v37  ;;  %8738 = vmatmul.msk.f32.gmra.mxu3 %vm1511_vm4, %v6404_v4  ;;  %v8824_v37 = vld [vmem:[%s13448_s23 + $0x110] sm:$0xff] }
0x145a   :  { %7345 = vmatpush.msrb.mxu1 %v12654_v35  ;;  %7194 = vmatpush.msrb.mxu0 %v8824_v37 }
0x145b   :  { %8727 = vmatmul.msk.f32.gmra.mxu1 %vm1511_vm4, %v6404_v4  ;;  %v8822_v4 = vld [vmem:[%s13448_s23 + $0x100] sm:$0xff] }
0x145c   :  { %7346 = vmatpush.msrb.mxu1 %v12660_v30  ;;  %7195 = vmatpush.msrb.mxu0 %v8822_v4  ;;  %v8852_v4 = vld [vmem:[%s13449_s22 + $0x140] sm:$0xff] }
0x145e   :  { %7347 = vmatpush.msrb.mxu1 %v12666_v60 }
0x145f   :  { %v6502_v54 = vpop.f32.mrf.mxu2 }
0x1460   :  { %8705 = vmatmul.msk.f32.gmra.mxu0 %vm1511_vm4, %v6502_v54  ;;  %7348 = vmatpush.msrb.mxu1 %v12671_v50  ;;  %v6407_v57 = vpop.f32.mrf.mxu0 }
0x1461   :  { %8716 = vmatmul.msk.f32.gmra.mxu2 %vm1511_vm4, %v6502_v54  ;;  %8739 = vmatmul.msk.f32.gmra.mxu3 %vm1511_vm4, %v6407_v57 }
0x1462   :  { %7349 = vmatpush.msrb.mxu1 %v12676_v15  ;;  %v8746_v15 = vld [vmem:[%s13449_s22 + $0xa0] sm:$0xff] }
0x1463   :  { %8728 = vmatmul.msk.f32.gmra.mxu1 %vm1511_vm4, %v6407_v57 }
0x1464   :  { %7350 = vmatpush.msrb.mxu1 %v12681_v49  ;;  %v8800_v49 = vld [vmem:[%s13449_s22 + $0xf8] sm:$0xff] }
0x1466   :  { %7351 = vmatpush.msrb.mxu1 %v12686_v33  ;;  %v8747_v33 = vld [vmem:[%s13449_s22 + $0xa8] sm:$0xff] }
0x1467   :  { %v6505_v40 = vpop.f32.mrf.mxu2 }
0x1468   :  { %8706 = vmatmul.msk.f32.gmra.mxu0 %vm1511_vm4, %v6505_v40  ;;  %v6410_v46 = vpop.f32.mrf.mxu0 }
0x1469   :  { %8717 = vmatmul.msk.f32.gmra.mxu2 %vm1511_vm4, %v6505_v40  ;;  %8740 = vmatmul.msk.f32.gmra.mxu3 %vm1511_vm4, %v6410_v46 }
0x146b   :  { %8729 = vmatmul.msk.f32.gmra.mxu1 %vm1511_vm4, %v6410_v46  ;;  %v8820_v46 = vld [vmem:[%s13448_s23 + $0xf0] sm:$0xff] }
0x146c   :  { %7196 = vmatpush.msrb.mxu0 %v8820_v46  ;;  %v8854_v46 = vld [vmem:[%s13449_s22 + $0x150] sm:$0xff] }
0x146f   :  { %v6508_v53 = vpop.f32.mrf.mxu2 }
0x1470   :  { %8707 = vmatmul.msk.f32.gmra.mxu0 %vm1511_vm4, %v6508_v53  ;;  %v6413_v55 = vpop.f32.mrf.mxu0 }
0x1471   :  { %8718 = vmatmul.msk.f32.gmra.mxu2 %vm1511_vm4, %v6508_v53  ;;  %8741 = vmatmul.msk.f32.gmra.mxu3 %vm1511_vm4, %v6413_v55 }
0x1473   :  { %8730 = vmatmul.msk.f32.gmra.mxu1 %vm1511_vm4, %v6413_v55 }
0x1477   :  { %v6511_v35 = vpop.f32.mrf.mxu2 }
0x1478   :  { %8708 = vmatmul.msk.f32.gmra.mxu0 %vm1511_vm4, %v6511_v35  ;;  %v6416_v30 = vpop.f32.mrf.mxu0 }
0x1479   :  { %8719 = vmatmul.msk.f32.gmra.mxu2 %vm1511_vm4, %v6511_v35  ;;  %8742 = vmatmul.msk.f32.gmra.mxu3 %vm1511_vm4, %v6416_v30 }
0x147b   :  { %8731 = vmatmul.msk.f32.gmra.mxu1 %vm1511_vm4, %v6416_v30 }
0x147f   :  { %v6514_v39 = vpop.f32.mrf.mxu2 }
0x1480   :  { %8709 = vmatmul.msk.f32.gmra.mxu0 %vm1511_vm4, %v6514_v39  ;;  %v6419_v11 = vpop.f32.mrf.mxu0 }
0x1481   :  { %8720 = vmatmul.msk.f32.gmra.mxu2 %vm1511_vm4, %v6514_v39  ;;  %8743 = vmatmul.msk.f32.gmra.mxu3 %vm1511_vm4, %v6419_v11 }
0x1483   :  { %8732 = vmatmul.msk.f32.gmra.mxu1 %vm1511_vm4, %v6419_v11 }
0x1487   :  { %v6517_v60 = vpop.f32.mrf.mxu2 }
0x1488   :  { %8710 = vmatmul.msk.f32.gmra.mxu0 %vm1511_vm4, %v6517_v60  ;;  %v6422_v25 = vpop.f32.mrf.mxu0 }
0x1489   :  { %8721 = vmatmul.msk.f32.gmra.mxu2 %vm1511_vm4, %v6517_v60  ;;  %8744 = vmatmul.msk.f32.gmra.mxu3 %vm1511_vm4, %v6422_v25 }
0x148b   :  { %8733 = vmatmul.msk.f32.gmra.mxu1 %vm1511_vm4, %v6422_v25 }
0x148f   :  { %v6520_v9 = vpop.f32.mrf.mxu2 }
0x1490   :  { %8711 = vmatmul.msk.f32.gmra.mxu0 %vm1511_vm4, %v6520_v9  ;;  %v6425_v50 = vpop.f32.mrf.mxu0 }
0x1491   :  { %8722 = vmatmul.msk.f32.gmra.mxu2 %vm1511_vm4, %v6520_v9  ;;  %8745 = vmatmul.msk.f32.gmra.mxu3 %vm1511_vm4, %v6425_v50 }
0x1493   :  { %8734 = vmatmul.msk.f32.gmra.mxu1 %vm1511_vm4, %v6425_v50 }
0x1497   :  { %v6523_v63 = vpop.f32.mrf.mxu2 }
0x1498   :  { %8712 = vmatmul.msk.f32.gmra.mxu0 %vm1511_vm4, %v6523_v63 }
0x1499   :  { %8723 = vmatmul.msk.f32.gmra.mxu2 %vm1511_vm4, %v6523_v63  ;;  %8810 = vmatmul.msk.f32.vlgmr.msrb.gmra.mxu3 %vm1705_vm6, %v8799_v48 }
0x14a0   :  { %8757 = vmatmul.msk.f32.vlgmr.msra.gmra.mxu0 %vm1705_vm6, %v8746_v15 }
0x14a1   :  { %8811 = vmatmul.msk.f32.gmra.mxu3 %vm1705_vm6, %v8800_v49 }
0x14a8   :  { %8758 = vmatmul.msk.f32.gmra.mxu0 %vm1705_vm6, %v8747_v33 }
0x14a9   :  { %8812 = vmatmul.msk.f32.gmra.mxu3 %vm1705_vm6, %v8801_v16 }
0x14b0   :  { %8759 = vmatmul.msk.f32.gmra.mxu0 %vm1705_vm6, %v8748_v18 }
0x14b1   :  { %8813 = vmatmul.msk.f32.gmra.mxu3 %vm1705_vm6, %v8802_v45 }
0x14b8   :  { %8760 = vmatmul.msk.f32.gmra.mxu0 %vm1705_vm6, %v8749_v59 }
0x14b9   :  { %8814 = vmatmul.msk.f32.gmra.mxu3 %vm1705_vm6, %v8803_v3 }
0x14c0   :  { %8761 = vmatmul.msk.f32.gmra.mxu0 %vm1705_vm6, %v8750_v28 }
0x14c1   :  { %8815 = vmatmul.msk.f32.gmra.mxu3 %vm1705_vm6, %v8804_v22 }
0x14c6   :  { %v13095_v45 = vpop.f32.mrf.mxu1 }
0x14c8   :  { %8762 = vmatmul.msk.f32.gmra.mxu0 %vm1705_vm6, %v8751_v43 }
0x14c9   :  { %8816 = vmatmul.msk.f32.gmra.mxu3 %vm1705_vm6, %v8805_v47  ;;  %v8829_v47 = vld [vmem:[%s13448_s23 + $0x138] sm:$0x3f] }
0x14ca   :  { %8841 = vmatpush.msk.msra.mxu2 %vm1557_vm3, %v8829_v47 }
0x14cc   :  { %v12962_v23 = vpop.f32.mrf.mxu3 }
0x14cd   :  { %v12964_v13 = vpop.f32.mrf.mxu0 }
0x14d0   :  { %8763 = vmatmul.msk.f32.gmra.mxu0 %vm1705_vm6, %v8752_v0  ;;  %v13100_v28 = vpop.f32.mrf.mxu1  ;;  %v8827_v0 = vld [vmem:[%s13448_s23 + $0x128] sm:$0xff] }
0x14d1   :  { %8817 = vmatmul.msk.f32.gmra.mxu3 %vm1705_vm6, %v8806_v56  ;;  %v8825_v56 = vld [vmem:[%s13448_s23 + $0x118] sm:$0xff]  ;;  %7240 = vmatpush.msra.mxu2 %v8827_v0 }
0x14d3   :  { %7241 = vmatpush.msra.mxu2 %v8825_v56 }
0x14d4   :  { %v12974_v44 = vpop.f32.mrf.mxu3  ;;  %v12976_v21 = vpop.f32.mrf.mxu2 }
0x14d5   :  { %v12978_v58 = vpop.f32.mrf.mxu0 }
0x14d6   :  { %v6724_v56 = vadd.f32 %v13100_v28, %v12978_v58 }
0x14d8   :  { %8764 = vmatmul.msk.f32.gmra.mxu0 %vm1705_vm6, %v8753_v1  ;;  %v8823_v1 = vld [vmem:[%s13448_s23 + $0x108] sm:$0xff] }
0x14d9   :  { %8818 = vmatmul.msk.f32.gmra.mxu3 %vm1705_vm6, %v8807_v8  ;;  %v13118_v8 = vpop.f32.mrf.mxu1  ;;  %7242 = vmatpush.msra.mxu2 %v8823_v1 }
0x14dc   :  { %v12988_v32 = vpop.f32.mrf.mxu2  ;;  %v12995_v38 = vpop.f32.mrf.mxu3 }
0x14dd   :  { %v12990_v42 = vpop.f32.mrf.mxu0 }
0x14e0   :  { %8765 = vmatmul.msk.f32.gmra.mxu0 %vm1705_vm6, %v8754_v2  ;;  %v8821_v2 = vld [vmem:[%s13448_s23 + $0xf8] sm:$0xff] }
0x14e1   :  { %8819 = vmatmul.msk.f32.gmra.mxu3 %vm1705_vm6, %v8808_v12  ;;  %7243 = vmatpush.msra.mxu2 %v8821_v2  ;;  %v13128_v14 = vpop.f32.mrf.mxu1  ;;  %v8860_v2 = vld [vmem:[%s13449_s22 + $0x180] sm:$0xff] }
0x14e4   :  { %v13002_v29 = vpop.f32.mrf.mxu2  ;;  %v13009_v24 = vpop.f32.mrf.mxu3 }
0x14e5   :  { %v13004_v51 = vpop.f32.mrf.mxu0 }
0x14e8   :  { %8766 = vmatmul.msk.f32.gmra.mxu0 %vm1705_vm6, %v8755_v20 }
0x14e9   :  { %v13134_v52 = vpop.f32.mrf.mxu1 }
0x14ec   :  { %v13012_v61 = vpop.f32.mrf.mxu2  ;;  %v13016_v10 = vpop.f32.mrf.mxu3 }
0x14ed   :  { %v13014_v5 = vpop.f32.mrf.mxu0 }
0x14f1   :  { %v13139_v37 = vpop.f32.mrf.mxu1 }
0x14f4   :  { %v13018_v6 = vpop.f32.mrf.mxu2  ;;  %v13022_v19 = vpop.f32.mrf.mxu3 }
0x14f5   :  { %v13020_v26 = vpop.f32.mrf.mxu0 }
0x14fc   :  { %v13037_v36 = vpop.f32.mrf.mxu2  ;;  %v6785_v34 = vpop.f32.mrf.mxu3 }
0x14fd   :  { %v13039_v7 = vpop.f32.mrf.mxu0 }
0x1504   :  { %v6655_v54 = vpop.f32.mrf.mxu2  ;;  %v6788_v40 = vpop.f32.mrf.mxu3 }
0x1505   :  { %v13057_v57 = vpop.f32.mrf.mxu0  ;;  %v13062_v53 = vadd.f32 %v6785_v34, %v6655_v54  ;;  %v8853_v54 = vld [vmem:[%s13449_s22 + $0x148] sm:$0xff] }
0x150c   :  { %v6658_v55 = vpop.f32.mrf.mxu2  ;;  %v6791_v30 = vpop.f32.mrf.mxu3 }
0x150d   :  { %v13064_v35 = vpop.f32.mrf.mxu0  ;;  %v13066_v39 = vadd.f32 %v6788_v40, %v6658_v55  ;;  %v13150_v40 = vpop.f32.mrf.mxu1 }
0x1514   :  { %v6661_v11 = vpop.f32.mrf.mxu2  ;;  %v13070_v25 = vpop.f32.mrf.mxu3 }
0x1515   :  { %v13068_v60 = vpop.f32.mrf.mxu0  ;;  %v13072_v9 = vadd.f32 %v6791_v30, %v6661_v11  ;;  %v13161_v55 = vpop.f32.mrf.mxu1  ;;  %v8855_v30 = vld [vmem:[%s13449_s22 + $0x158] sm:$0xff] }
0x151c   :  { %v13074_v63 = vpop.f32.mrf.mxu3 }
0x151d   :  { %v6855_v50 = vpop.f32.mrf.mxu0  ;;  %8831 = vmatmul.msk.f32.vlgmr.msrb.gmra.mxu0 %vm1511_vm4, %v13074_v63  ;;  %v13168_v11 = vpop.f32.mrf.mxu1 }
0x151e   :  { %8778 = vmatmul.msk.f32.vlgmr.msrb.gmra.mxu2 %vm1511_vm4, %v6855_v50  ;;  %8789 = vmatmul.msk.f32.vlgmr.msra.gmra.mxu1 %vm1511_vm4, %v6855_v50  ;;  %v8856_v50 = vld [vmem:[%s13449_s22 + $0x160] sm:$0xff] }
0x1524   :  { %v13080_v15 = vpop.f32.mrf.mxu3 }
0x1525   :  { %v6858_v48 = vpop.f32.mrf.mxu0  ;;  %8832 = vmatmul.msk.f32.gmra.mxu0 %vm1511_vm4, %v13080_v15 }
0x1526   :  { %8779 = vmatmul.msk.f32.gmra.mxu2 %vm1511_vm4, %v6858_v48  ;;  %8790 = vmatmul.msk.f32.gmra.mxu1 %vm1511_vm4, %v6858_v48  ;;  %v8857_v48 = vld [vmem:[%s13449_s22 + $0x168] sm:$0xff] }
0x152c   :  { %v13086_v33 = vpop.f32.mrf.mxu3 }
0x152d   :  { %v6861_v49 = vpop.f32.mrf.mxu0  ;;  %8833 = vmatmul.msk.f32.gmra.mxu0 %vm1511_vm4, %v13086_v33 }
0x152e   :  { %8780 = vmatmul.msk.f32.gmra.mxu2 %vm1511_vm4, %v6861_v49  ;;  %8791 = vmatmul.msk.f32.gmra.mxu1 %vm1511_vm4, %v6861_v49 }
0x1534   :  { %v7113_v18 = vpop.f32.mrf.mxu3 }
0x1535   :  { %v6864_v16 = vpop.f32.mrf.mxu0  ;;  %8834 = vmatmul.msk.f32.gmra.mxu0 %vm1511_vm4, %v7113_v18 }
0x1536   :  { %8781 = vmatmul.msk.f32.gmra.mxu2 %vm1511_vm4, %v6864_v16  ;;  %8792 = vmatmul.msk.f32.gmra.mxu1 %vm1511_vm4, %v6864_v16 }
0x153c   :  { %v7116_v3 = vpop.f32.mrf.mxu3 }
0x153d   :  { %v6867_v59 = vpop.f32.mrf.mxu0  ;;  %8835 = vmatmul.msk.f32.gmra.mxu0 %vm1511_vm4, %v7116_v3 }
0x153e   :  { %8782 = vmatmul.msk.f32.gmra.mxu2 %vm1511_vm4, %v6867_v59  ;;  %8793 = vmatmul.msk.f32.gmra.mxu1 %vm1511_vm4, %v6867_v59 }
0x1544   :  { %v7119_v43 = vpop.f32.mrf.mxu3 }
0x1545   :  { %v6870_v22 = vpop.f32.mrf.mxu0  ;;  %8836 = vmatmul.msk.f32.gmra.mxu0 %vm1511_vm4, %v7119_v43 }
0x1546   :  { %8783 = vmatmul.msk.f32.gmra.mxu2 %vm1511_vm4, %v6870_v22  ;;  %8794 = vmatmul.msk.f32.gmra.mxu1 %vm1511_vm4, %v6870_v22 }
0x154c   :  { %v7122_v20 = vpop.f32.mrf.mxu3 }
0x154d   :  { %v6873_v12 = vpop.f32.mrf.mxu0  ;;  %8837 = vmatmul.msk.f32.gmra.mxu0 %vm1511_vm4, %v7122_v20 }
0x154e   :  { %8784 = vmatmul.msk.f32.gmra.mxu2 %vm1511_vm4, %v6873_v12  ;;  %8795 = vmatmul.msk.f32.gmra.mxu1 %vm1511_vm4, %v6873_v12 }
0x1554   :  { %v7125_v27 = vpop.f32.mrf.mxu3 }
0x1555   :  { %v6876_v41 = vpop.f32.mrf.mxu0  ;;  %8838 = vmatmul.msk.f32.gmra.mxu0 %vm1511_vm4, %v7125_v27 }
0x1556   :  { %8785 = vmatmul.msk.f32.gmra.mxu2 %vm1511_vm4, %v6876_v41  ;;  %8796 = vmatmul.msk.f32.gmra.mxu1 %vm1511_vm4, %v6876_v41  ;;  %v6727_v41 = vadd.f32 %v13118_v8, %v12990_v42 }
0x155c   :  { %v7128_v34 = vpop.f32.mrf.mxu3 }
0x155d   :  { %v6879_v31 = vpop.f32.mrf.mxu0  ;;  %8839 = vmatmul.msk.f32.gmra.mxu0 %vm1511_vm4, %v7128_v34 }
0x155e   :  { %8786 = vmatmul.msk.f32.gmra.mxu2 %vm1511_vm4, %v6879_v31  ;;  %8797 = vmatmul.msk.f32.gmra.mxu1 %vm1511_vm4, %v6879_v31  ;;  %v8861_v31 = vld [vmem:[%s13449_s22 + $0x188] sm:$0x7] }
0x1564   :  { %v7131_v17 = vpop.f32.mrf.mxu3 }
0x1565   :  { %v6882_v62 = vpop.f32.mrf.mxu0  ;;  %8840 = vmatmul.msk.f32.gmra.mxu0 %vm1511_vm4, %v7131_v17 }
0x1566   :  { %8787 = vmatmul.msk.f32.gmra.mxu2 %vm1511_vm4, %v6882_v62  ;;  %8798 = vmatmul.msk.f32.gmra.mxu1 %vm1511_vm4, %v6882_v62 }
0x156e   :  { %8842 = vmatmul.msk.f32.vlgmr.msra.gmra.mxu2 %vm1511_vm4, %v13074_v63  ;;  %8863 = vmatmul.msk.f32.vlgmr.msrb.gmra.mxu1 %vm1705_vm6, %v8852_v4  ;;  %v13175_v63 = vpop.f32.mrf.mxu1 }
0x1576   :  { %8843 = vmatmul.msk.f32.gmra.mxu2 %vm1511_vm4, %v13080_v15  ;;  %8864 = vmatmul.msk.f32.gmra.mxu1 %vm1705_vm6, %v8853_v54  ;;  %v13182_v15 = vpop.f32.mrf.mxu2 }
0x157e   :  { %8844 = vmatmul.msk.f32.gmra.mxu2 %vm1511_vm4, %v13086_v33  ;;  %8865 = vmatmul.msk.f32.gmra.mxu1 %vm1705_vm6, %v8854_v46  ;;  %v8858_v33 = vld [vmem:[%s13449_s22 + $0x170] sm:$0xff] }
0x1586   :  { %8845 = vmatmul.msk.f32.gmra.mxu2 %vm1511_vm4, %v7113_v18  ;;  %8866 = vmatmul.msk.f32.gmra.mxu1 %vm1705_vm6, %v8855_v30  ;;  %v6721_v18 = vadd.f32 %v13095_v45, %v12964_v13 }
0x158e   :  { %8846 = vmatmul.msk.f32.gmra.mxu2 %vm1511_vm4, %v7116_v3  ;;  %8867 = vmatmul.msk.f32.gmra.mxu1 %vm1705_vm6, %v8856_v50  ;;  %v6733_v50 = vadd.f32 %v13134_v52, %v13014_v5  ;;  %v8880_v5 = vld [vmem:[%s13448_s23 + $0x178] sm:$0xff]  ;;  %v8877_v52 = vld [vmem:[%s13448_s23 + $0x160] sm:$0xff] }
0x1596   :  { %8847 = vmatmul.msk.f32.gmra.mxu2 %vm1511_vm4, %v7119_v43  ;;  %8868 = vmatmul.msk.f32.gmra.mxu1 %vm1705_vm6, %v8857_v48  ;;  %v8859_v43 = vld [vmem:[%s13449_s22 + $0x178] sm:$0xff] }
0x159a   :  { %v7198_v16 = vpop.f32.mrf.mxu0 }
0x159b   :  { %v13184_v49 = vpop.f32.mrf.mxu1 }
0x159e   :  { %8848 = vmatmul.msk.f32.gmra.mxu2 %vm1511_vm4, %v7122_v20  ;;  %8869 = vmatmul.msk.f32.gmra.mxu1 %vm1705_vm6, %v8858_v33 }
0x15a1   :  { %v6949_v59 = vpop.f32.mrf.mxu2 }
0x15a2   :  { %v7026_v3 = vadd.f32 %v6949_v59, %v6721_v18  ;;  %v7201_v0 = vpop.f32.mrf.mxu0  ;;  %v8879_v59 = vld [vmem:[%s13448_s23 + $0x170] sm:$0xff] }
0x15a3   :  { %v13193_v22 = vpop.f32.mrf.mxu1 }
0x15a4   :  { %v13198_v47 = vadd.f32 %v7198_v16, %v7026_v3  ;;  %v8878_v3 = vld [vmem:[%s13448_s23 + $0x168] sm:$0xff] }
0x15a6   :  { %8849 = vmatmul.msk.f32.gmra.mxu2 %vm1511_vm4, %v7125_v27  ;;  %8870 = vmatmul.msk.f32.gmra.mxu1 %vm1705_vm6, %v8859_v43  ;;  %v6736_v43 = vadd.f32 %v13139_v37, %v13020_v26  ;;  %v8873_v26 = vld [vmem:[%s13448_s23 + $0x140] sm:$0xff]  ;;  %v8874_v37 = vld [vmem:[%s13448_s23 + $0x148] sm:$0xff] }
0x15a9   :  { %v6952_v1 = vpop.f32.mrf.mxu2 }
0x15aa   :  { %v7028_v13 = vadd.f32 %v6952_v1, %v6724_v56  ;;  %v7204_v20 = vpop.f32.mrf.mxu0  ;;  %v8875_v1 = vld [vmem:[%s13448_s23 + $0x150] sm:$0xff] }
0x15ab   :  { %v13204_v45 = vpop.f32.mrf.mxu1 }
0x15ac   :  { %v13209_v12 = vadd.f32 %v7201_v0, %v7028_v13  ;;  %v8876_v13 = vld [vmem:[%s13448_s23 + $0x158] sm:$0xff] }
0x15ae   :  { %8850 = vmatmul.msk.f32.gmra.mxu2 %vm1511_vm4, %v7128_v34  ;;  %8871 = vmatmul.msk.f32.gmra.mxu1 %vm1705_vm6, %v8860_v2  ;;  %v6730_v34 = vadd.f32 %v13128_v14, %v13004_v51  ;;  %v8881_v51 = vld [vmem:[%s13448_s23 + $0x180] sm:$0x3f]  ;;  %v8882_v14 = vld [vmem:[%s13448_s23 + $0x188] sm:$0x3f] }
0x15af   :  { %8883 = vmatpush.msk.msra.mxu3 %vm1557_vm3, %v8881_v51  ;;  %8894 = vmatpush.msk.msra.mxu0 %vm1557_vm3, %v8882_v14  ;;  %v6795_v14 = vadd.f32 %v13070_v25, %v13182_v15  ;;  %vm7645_vm3 = vcmask 179200  }
0x15b1   :  { %v6955_v27 = vpop.f32.mrf.mxu2  ;;  %7442 = vmatpush.msra.mxu3 %v8879_v59  ;;  %7489 = vmatpush.msra.mxu0 %v8880_v5 }
0x15b2   :  { %v7030_v58 = vadd.f32 %v6955_v27, %v6727_v41  ;;  %v7207_v4 = vpop.f32.mrf.mxu0 }
0x15b3   :  { %v13215_v28 = vpop.f32.mrf.mxu1  ;;  %7443 = vmatpush.msra.mxu3 %v8877_v52  ;;  %7490 = vmatpush.msra.mxu0 %v8878_v3 }
0x15b4   :  { %v13220_v62 = vadd.f32 %v7204_v20, %v7030_v58  ;;  %v6739_v58 = vadd.f32 %v13150_v40, %v13039_v7  ;;  %v6745_v7 = vadd.f32 %v13168_v11, %v13064_v35 }
0x15b5   :  { %7444 = vmatpush.msra.mxu3 %v8875_v1  ;;  %7491 = vmatpush.msra.mxu0 %v8876_v13 }
0x15b6   :  { %8851 = vmatmul.msk.f32.gmra.mxu2 %vm1511_vm4, %v7131_v17  ;;  %8872 = vmatmul.msk.f32.gmra.mxu1 %vm1705_vm6, %v8861_v31 }
0x15b7   :  { %7445 = vmatpush.msra.mxu3 %v8873_v26  ;;  %7492 = vmatpush.msra.mxu0 %v8874_v37  ;;  %v6768_v37 = vadd.f32 %v12962_v23, %v12976_v21 }
0x15b9   :  { %v6958_v54 = vpop.f32.mrf.mxu2 }
0x15ba   :  { %v7032_v42 = vadd.f32 %v6958_v54, %v6730_v34  ;;  %v7210_v30 = vpop.f32.mrf.mxu0 }
0x15bb   :  { %v13226_v8 = vpop.f32.mrf.mxu1 }
0x15bc   :  { %v13228_v46 = vadd.f32 %v7207_v4, %v7032_v42 }
0x15c1   :  { %v6961_v48 = vpop.f32.mrf.mxu2 }
0x15c2   :  { %v7034_v33 = vadd.f32 %v6961_v48, %v6733_v50  ;;  %v7213_v18 = vpop.f32.mrf.mxu0 }
0x15c3   :  { %v13232_v16 = vpop.f32.mrf.mxu1 }
0x15c4   :  { %v13234_v17 = vadd.f32 %v7210_v30, %v7034_v33  ;;  %v6742_v30 = vadd.f32 %v13161_v55, %v13057_v57 }
0x15c9   :  { %v6964_v0 = vpop.f32.mrf.mxu2 }
0x15ca   :  { %v7036_v56 = vadd.f32 %v6964_v0, %v6736_v43  ;;  %v7216_v27 = vpop.f32.mrf.mxu0 }
0x15cb   :  { %v7014_v2 = vpop.f32.mrf.mxu1 }
0x15cc   :  { %v13265_v20 = vadd.f32 %v7014_v2, %v13062_v53  ;;  %v13267_v41 = vadd.f32 %v7213_v18, %v7036_v56 }
0x15d1   :  { %v6967_v31 = vpop.f32.mrf.mxu2 }
0x15d2   :  { %v7038_v4 = vadd.f32 %v6967_v31, %v6739_v58  ;;  %v7219_v42 = vpop.f32.mrf.mxu0 }
0x15d3   :  { %v7017_v53 = vpop.f32.mrf.mxu1 }
0x15d4   :  { %v13278_v34 = vadd.f32 %v7017_v53, %v13066_v39  ;;  %v13280_v54 = vadd.f32 %v7216_v27, %v7038_v4  ;;  %v7027_v27 = vadd.f32 %v13184_v49, %v6768_v37 }
0x15d9   :  { %v6970_v50 = vpop.f32.mrf.mxu2 }
0x15da   :  { %v7040_v48 = vadd.f32 %v6970_v50, %v6742_v30  ;;  %v7222_v39 = vpop.f32.mrf.mxu0  ;;  %v6771_v30 = vadd.f32 %v12974_v44, %v12988_v32  ;;  %v6774_v44 = vadd.f32 %v12995_v38, %v13002_v29 }
0x15db   :  { %v7020_v33 = vpop.f32.mrf.mxu1 }
0x15dc   :  { %v13285_v18 = vadd.f32 %v7020_v33, %v13072_v9  ;;  %v13287_v51 = vadd.f32 %v7219_v42, %v7040_v48  ;;  %v7557_v42 = vpop.permute.xlu1 %7556  ;;  %v7029_v48 = vadd.f32 %v13193_v22, %v6771_v30 }
0x15e1   :  { %v6973_v40 = vpop.f32.mrf.mxu2 }
0x15e2   :  { %v7042_v59 = vadd.f32 %v6973_v40, %v6745_v7  ;;  %v13319_v26 = vpop.f32.mrf.mxu0 }
0x15e3   :  { %v7023_v5 = vpop.f32.mrf.mxu1 }
0x15e4   :  { %v13293_v52 = vadd.f32 %v7023_v5, %v6795_v14  ;;  %v13295_v57 = vadd.f32 %v7222_v39, %v7042_v59  ;;  %v7562_v59 = vpop.permute.xlu2 %7561  ;;  %v7031_v5 = vadd.f32 %v13204_v45, %v6774_v44  ;;  %v6777_v45 = vadd.f32 %v13009_v24, %v13012_v61 }
0x15e9   :  { %v13317_v1 = vpop.f32.mrf.mxu2 }
0x15eb   :  { %v7353_v55 = vpop.f32.mrf.mxu1 }
0x15ec   :  { %8884 = vmatmul.msk.f32.vlgmr.msra.gmra.mxu3 %vm1511_vm4, %v7353_v55  ;;  %8895 = vmatmul.msk.f32.vlgmr.msra.gmra.mxu0 %vm1511_vm4, %v7353_v55 }
0x15f1   :  { %v7245_v13 = vpop.f32.mrf.mxu2 }
0x15f2   :  { %v7276_v31 = vadd.f32 %v7245_v13, %v7027_v27  ;;  %v7572_v27 = vpop.permute.xlu1 %7571 }
0x15f3   :  { %v7356_v9 = vpop.f32.mrf.mxu1 }
0x15f4   :  { %8885 = vmatmul.msk.f32.gmra.mxu3 %vm1511_vm4, %v7356_v9  ;;  %8896 = vmatmul.msk.f32.gmra.mxu0 %vm1511_vm4, %v7356_v9 }
0x15f9   :  { %v7248_v2 = vpop.f32.mrf.mxu2 }
0x15fa   :  { %v7278_v40 = vadd.f32 %v7248_v2, %v7029_v48 }
0x15fb   :  { %v7359_v35 = vpop.f32.mrf.mxu1 }
0x15fc   :  { %8886 = vmatmul.msk.f32.gmra.mxu3 %vm1511_vm4, %v7359_v35  ;;  %8897 = vmatmul.msk.f32.gmra.mxu0 %vm1511_vm4, %v7359_v35 }
0x1601   :  { %v7251_v58 = vpop.f32.mrf.mxu2 }
0x1602   :  { %v7280_v35 = vadd.f32 %v7251_v58, %v7031_v5 }
0x1603   :  { %v7362_v25 = vpop.f32.mrf.mxu1 }
0x1604   :  { %8887 = vmatmul.msk.f32.gmra.mxu3 %vm1511_vm4, %v7362_v25  ;;  %8898 = vmatmul.msk.f32.gmra.mxu0 %vm1511_vm4, %v7362_v25 }
0x1609   :  { %v7254_v21 = vpop.f32.mrf.mxu2 }
0x160b   :  { %v7365_v11 = vpop.f32.mrf.mxu1 }
0x160c   :  { %8888 = vmatmul.msk.f32.gmra.mxu3 %vm1511_vm4, %v7365_v11  ;;  %8899 = vmatmul.msk.f32.gmra.mxu0 %vm1511_vm4, %v7365_v11  ;;  %v7567_v11 = vpop.permute.xlu0 %7566 }
0x1613   :  { %v7368_v15 = vpop.f32.mrf.mxu1 }
0x1614   :  { %8889 = vmatmul.msk.f32.gmra.mxu3 %vm1511_vm4, %v7368_v15  ;;  %8900 = vmatmul.msk.f32.gmra.mxu0 %vm1511_vm4, %v7368_v15  ;;  %v7257_v15 = vpop.f32.mrf.mxu2  ;;  %v7582_v44 = vpop.permute.xlu0 %7581 }
0x161b   :  { %v7371_v3 = vpop.f32.mrf.mxu1 }
0x161c   :  { %8890 = vmatmul.msk.f32.gmra.mxu3 %vm1511_vm4, %v7371_v3  ;;  %8901 = vmatmul.msk.f32.gmra.mxu0 %vm1511_vm4, %v7371_v3 }
0x1623   :  { %v7374_v43 = vpop.f32.mrf.mxu1 }
0x1624   :  { %8891 = vmatmul.msk.f32.gmra.mxu3 %vm1511_vm4, %v7374_v43  ;;  %8902 = vmatmul.msk.f32.gmra.mxu0 %vm1511_vm4, %v7374_v43 }
0x162b   :  { %v7377_v0 = vpop.f32.mrf.mxu1 }
0x162c   :  { %8892 = vmatmul.msk.f32.gmra.mxu3 %vm1511_vm4, %v7377_v0  ;;  %8903 = vmatmul.msk.f32.gmra.mxu0 %vm1511_vm4, %v7377_v0  ;;  %v7033_v0 = vadd.f32 %v13215_v28, %v6777_v45  ;;  %v6780_v28 = vadd.f32 %v13016_v10, %v13018_v6 }
0x162e   :  { %v7282_v2 = vadd.f32 %v7254_v21, %v7033_v0 }
0x1633   :  { %v7380_v56 = vpop.f32.mrf.mxu1 }
0x1634   :  { %8893 = vmatmul.msk.f32.gmra.mxu3 %vm1511_vm4, %v7380_v56  ;;  %8904 = vmatmul.msk.f32.gmra.mxu0 %vm1511_vm4, %v7380_v56  ;;  %vm7664_vm4 = vcmask 174080  }
0x1669   :  { %v7494_v4 = vpop.f32.mrf.mxu0 }
0x166a   :  { %v7525_v53 = vadd.f32 %v7494_v4, %v7276_v31  ;;  %v7260_v4 = vpop.f32.mrf.mxu2 }
0x166c   :  { %v7605_v50 = vadd.f32 %v7557_v42, %v7525_v53  ;;  %v7035_v53 = vadd.f32 %v13226_v8, %v6780_v28  ;;  %v6783_v8 = vadd.f32 %v13022_v19, %v13037_v36 }
0x166e   :  { %v7625_v33 = vmax.f32 %v7605_v50, 0.0  ;;  %v7284_v50 = vadd.f32 %v7257_v15, %v7035_v53 }
0x166f   :  { %v7447_v7 = vpop.f32.mrf.mxu3 }
0x1670   :  { %7646 = vst.msk [vmem:[%s13450_s25 + $0x8] sm:$0xff] %vm7645_vm3, %v7625_v33  ;;  %v7524_v23 = vadd.f32 %v7447_v7, %v13198_v47  ;;  %v7577_v33 = vpop.permute.xlu2 %7576 }
0x1671   :  { %v7497_v49 = vpop.f32.mrf.mxu0 }
0x1672   :  { %v7604_v39 = vadd.f32 %v7557_v42, %v7524_v23  ;;  %v7527_v14 = vadd.f32 %v7497_v49, %v7278_v40  ;;  %v7037_v23 = vadd.f32 %v13232_v16, %v6783_v8  ;;  %v7263_v49 = vpop.f32.mrf.mxu2 }
0x1674   :  { %v7624_v32 = vmax.f32 %v7604_v39, 0.0  ;;  %v7607_v22 = vadd.f32 %v7562_v59, %v7527_v14  ;;  %v7286_v14 = vadd.f32 %v7260_v4, %v7037_v23 }
0x1676   :  { %7644 = vst [vmem:[%s13450_s25] sm:$0xff] %v7624_v32  ;;  %v7627_v55 = vmax.f32 %v7607_v22, 0.0 }
0x1677   :  { %v7450_v9 = vpop.f32.mrf.mxu3 }
0x1678   :  { %7648 = vst.msk [vmem:[%s13450_s25 + $0x18] sm:$0xff] %vm7645_vm3, %v7627_v55  ;;  %v7526_v47 = vadd.f32 %v7450_v9, %v13209_v12  ;;  %v7288_v55 = vadd.f32 %v7263_v49, %v13265_v20 }
0x1679   :  { %v7500_v25 = vpop.f32.mrf.mxu0 }
0x167a   :  { %v7606_v38 = vadd.f32 %v7562_v59, %v7526_v47  ;;  %v7529_v29 = vadd.f32 %v7500_v25, %v7280_v35  ;;  %v7266_v9 = vpop.f32.mrf.mxu2 }
0x167b   :  { %v7290_v45 = vadd.f32 %v7266_v9, %v13278_v34 }
0x167c   :  { %v7626_v3 = vmax.f32 %v7606_v38, 0.0  ;;  %v7609_v43 = vadd.f32 %v7567_v11, %v7529_v29  ;;  %v7587_v38 = vpop.permute.xlu1 %7586 }
0x167e   :  { %7647 = vst [vmem:[%s13450_s25 + $0x10] sm:$0xff] %v7626_v3  ;;  %v7629_v56 = vmax.f32 %v7609_v43, 0.0 }
0x167f   :  { %v7453_v13 = vpop.f32.mrf.mxu3 }
0x1680   :  { %7650 = vst.msk [vmem:[%s13450_s25 + $0x28] sm:$0xff] %vm7645_vm3, %v7629_v56  ;;  %v7528_v12 = vadd.f32 %v7453_v13, %v13220_v62  ;;  %v7592_v56 = vpop.permute.xlu2 %7591 }
0x1681   :  { %v7503_v37 = vpop.f32.mrf.mxu0 }
0x1682   :  { %v7608_v24 = vadd.f32 %v7567_v11, %v7528_v12  ;;  %v7531_v61 = vadd.f32 %v7503_v37, %v7282_v2  ;;  %v7269_v13 = vpop.f32.mrf.mxu2 }
0x1684   :  { %v7628_v58 = vmax.f32 %v7608_v24, 0.0  ;;  %v7611_v31 = vadd.f32 %v7572_v27, %v7531_v61  ;;  %v7292_v24 = vadd.f32 %v7269_v13, %v13285_v18 }
0x1686   :  { %7649 = vst [vmem:[%s13450_s25 + $0x20] sm:$0xff] %v7628_v58  ;;  %v7631_v42 = vmax.f32 %v7611_v31, 0.0  ;;  %v7597_v58 = vpop.permute.xlu0 %7596 }
0x1687   :  { %v7456_v30 = vpop.f32.mrf.mxu3 }
0x1688   :  { %7652 = vst.msk [vmem:[%s13450_s25 + $0x38] sm:$0xff] %vm7645_vm3, %v7631_v42  ;;  %v7530_v62 = vadd.f32 %v7456_v30, %v13228_v46  ;;  %v6748_v30 = vadd.f32 %v13175_v63, %v13068_v60 }
0x1689   :  { %v7506_v10 = vpop.f32.mrf.mxu0 }
0x168a   :  { %v7610_v6 = vadd.f32 %v7572_v27, %v7530_v62  ;;  %v7533_v48 = vadd.f32 %v7506_v10, %v7284_v50  ;;  %v7272_v53 = vpop.f32.mrf.mxu2  ;;  %v7044_v10 = vadd.f32 %v13317_v1, %v6748_v30 }
0x168b   :  { %v7294_v50 = vadd.f32 %v7272_v53, %v13293_v52 }
0x168c   :  { %v7630_v7 = vmax.f32 %v7610_v6, 0.0  ;;  %v7613_v40 = vadd.f32 %v7577_v33, %v7533_v48  ;;  %v7293_v60 = vadd.f32 %v13319_v26, %v7044_v10 }
0x168e   :  { %7651 = vst [vmem:[%s13450_s25 + $0x30] sm:$0xff] %v7630_v7  ;;  %v7633_v21 = vmax.f32 %v7613_v40, 0.0 }
0x168f   :  { %v7459_v39 = vpop.f32.mrf.mxu3 }
0x1690   :  { %7654 = vst.msk [vmem:[%s13450_s25 + $0x48] sm:$0xff] %vm7645_vm3, %v7633_v21  ;;  %v7532_v46 = vadd.f32 %v7459_v39, %v13234_v17 }
0x1691   :  { %v7509_v19 = vpop.f32.mrf.mxu0 }
0x1692   :  { %v7612_v36 = vadd.f32 %v7577_v33, %v7532_v46  ;;  %v7535_v59 = vadd.f32 %v7509_v19, %v7286_v14  ;;  %v7602_v33 = vpop.permute.xlu1 %7601 }
0x1694   :  { %v7632_v16 = vmax.f32 %v7612_v36, 0.0  ;;  %v7615_v32 = vadd.f32 %v7582_v44, %v7535_v59 }
0x1696   :  { %7653 = vst [vmem:[%s13450_s25 + $0x40] sm:$0xff] %v7632_v16  ;;  %v7635_v22 = vmax.f32 %v7615_v32, 0.0 }
0x1697   :  { %v7462_v5 = vpop.f32.mrf.mxu3 }
0x1698   :  { %7656 = vst.msk [vmem:[%s13450_s25 + $0x58] sm:$0xff] %vm7645_vm3, %v7635_v22  ;;  %v7534_v17 = vadd.f32 %v7462_v5, %v13267_v41 }
0x1699   :  { %v7512_v35 = vpop.f32.mrf.mxu0 }
0x169a   :  { %v7614_v47 = vadd.f32 %v7582_v44, %v7534_v17  ;;  %v7537_v25 = vadd.f32 %v7512_v35, %v7288_v55 }
0x169c   :  { %v7634_v29 = vmax.f32 %v7614_v47, 0.0  ;;  %v7617_v11 = vadd.f32 %v7587_v38, %v7537_v25 }
0x169e   :  { %7655 = vst [vmem:[%s13450_s25 + $0x50] sm:$0xff] %v7634_v29  ;;  %v7637_v15 = vmax.f32 %v7617_v11, 0.0 }
0x169f   :  { %v7465_v20 = vpop.f32.mrf.mxu3 }
0x16a0   :  { %7658 = vst.msk [vmem:[%s13450_s25 + $0x68] sm:$0xff] %vm7645_vm3, %v7637_v15  ;;  %v7536_v41 = vadd.f32 %v7465_v20, %v13280_v54 }
0x16a1   :  { %v7515_v3 = vpop.f32.mrf.mxu0 }
0x16a2   :  { %v7616_v43 = vadd.f32 %v7587_v38, %v7536_v41  ;;  %v7539_v0 = vadd.f32 %v7515_v3, %v7290_v45 }
0x16a4   :  { %v7636_v2 = vmax.f32 %v7616_v43, 0.0  ;;  %v7619_v12 = vadd.f32 %v7592_v56, %v7539_v0 }
0x16a6   :  { %7657 = vst [vmem:[%s13450_s25 + $0x60] sm:$0xff] %v7636_v2  ;;  %v7639_v37 = vmax.f32 %v7619_v12, 0.0 }
0x16a7   :  { %v7468_v34 = vpop.f32.mrf.mxu3 }
0x16a8   :  { %7660 = vst.msk [vmem:[%s13450_s25 + $0x78] sm:$0xff] %vm7645_vm3, %v7639_v37  ;;  %v7538_v54 = vadd.f32 %v7468_v34, %v13287_v51 }
0x16a9   :  { %v7518_v61 = vpop.f32.mrf.mxu0 }
0x16aa   :  { %v7618_v27 = vadd.f32 %v7592_v56, %v7538_v54  ;;  %v7541_v28 = vadd.f32 %v7518_v61, %v7292_v24 }
0x16ac   :  { %v7638_v31 = vmax.f32 %v7618_v27, 0.0  ;;  %v7621_v4 = vadd.f32 %v7597_v58, %v7541_v28 }
0x16ae   :  { %7659 = vst [vmem:[%s13450_s25 + $0x70] sm:$0xff] %v7638_v31  ;;  %v7641_v42 = vmax.f32 %v7621_v4, 0.0 }
0x16af   :  { %v7471_v18 = vpop.f32.mrf.mxu3 }
0x16b0   :  { %7662 = vst.msk [vmem:[%s13450_s25 + $0x88] sm:$0xff] %vm7645_vm3, %v7641_v42  ;;  %v7540_v51 = vadd.f32 %v7471_v18, %v13295_v57 }
0x16b1   :  { %v7521_v62 = vpop.f32.mrf.mxu0 }
0x16b2   :  { %v7620_v6 = vadd.f32 %v7597_v58, %v7540_v51  ;;  %v7543_v48 = vadd.f32 %v7521_v62, %v7294_v50 }
0x16b4   :  { %v7640_v8 = vmax.f32 %v7620_v6, 0.0  ;;  %v7623_v7 = vadd.f32 %v7602_v33, %v7543_v48 }
0x16b6   :  { %7661 = vst [vmem:[%s13450_s25 + $0x80] sm:$0xff] %v7640_v8  ;;  %v7643_v63 = vmax.f32 %v7623_v7, 0.0 }
0x16b7   :  { %v7474_v52 = vpop.f32.mrf.mxu3 }
0x16b8   :  { %7665 = vst.msk [vmem:[%s13450_s25 + $0x98] sm:$0x7] %vm7664_vm4, %v7643_v63  ;;  %v7542_v57 = vadd.f32 %v7474_v52, %v7293_v60 }
0x16ba   :  { %v7622_v1 = vadd.f32 %v7602_v33, %v7542_v57 }
0x16bc   :  { %v7642_v40 = vmax.f32 %v7622_v1, 0.0 }
0x16be   :  { %7663 = vst [vmem:[%s13450_s25 + $0x90] sm:$0x7] %v7642_v40 }

</bundles_post_ra>
